<compile_context>
chip_gen: v6e
topology: v6e:2x2x1
jax: 0.10.0
libtpu: 0.0.40
codegen_flags: <defaults>
</compile_context>

<pallas_src>
import jax
import jax.numpy as jnp
from jax import lax
from jax.experimental import pallas as pl
from jax.experimental.pallas import tpu as pltpu

# ----- model dims (small synthetic, consistent with the module) -----
S   = 4        # num_agents == transformer sequence length
D   = 128      # d_model (MiniLM=384; small synthetic=128)
H   = 4        # nhead
DH  = D // H
DFF = 256      # dim_feedforward (PyTorch default 2048; small synthetic)
HID = 64       # classifier hidden_dim (module default 512; small synthetic)
C   = 4        # num_classes
L   = 2        # transformer encoder layers
EPS = 1e-5     # layer_norm_eps

DEFAULT_BB = 32    # ensemble problems per grid step (ROWS = BB*S = 128)

# packed per-layer 1-D parameter layout along lanes (all offsets multiples of 128)
OFF_BQKV = 0
OFF_BO   = 3 * D
OFF_G1   = 4 * D
OFF_BE1  = 5 * D
OFF_B1   = 6 * D
OFF_B2   = 6 * D + DFF
OFF_G2   = 7 * D + DFF
OFF_BE2  = 8 * D + DFF
VEC_W    = 9 * D + DFF     # 1408


def _layer_norm(v, g, b):
    mu = jnp.mean(v, axis=-1, keepdims=True)
    var = jnp.mean((v - mu) ** 2, axis=-1, keepdims=True)
    return (v - mu) * lax.rsqrt(var + EPS) * g + b


def _make_kernel(bb):
    assert bb % 8 == 0 and bb & (bb - 1) == 0, "bb must be a power of two >= 8"
    rows = bb * S

    def kernel(x_ref, wqkv_ref, wo_ref, w1_ref, w2_ref, vecs_ref,
               wc1_ref, wc2_ref, cbias_ref, out_ref):
        f32, bf16 = jnp.float32, jnp.bfloat16
        dn   = (((1,), (0,)), ((), ()))   # canonical (M,K)x(K,N)
        dn_t = (((1,), (1,)), ((), ()))   # contract last dims (rhs transposed)

        # row layout inside the block is AGENT-major: row = s*bb + b
        x = x_ref[...].astype(f32)                         # (rows, D)

        def vec(l, off, width):                            # packed per-layer vectors
            return vecs_ref[l:l + 1, off:off + width]      # (1, width), lane-aligned

        # tiny problem-id vectors; the (rows, rows) mask is never kept live as a
        # constant -- it is re-formed per head by a broadcasting compare.
        r_id = lax.broadcasted_iota(jnp.int32, (rows, 1), 0) & (bb - 1)
        c_id = lax.broadcasted_iota(jnp.int32, (1, rows), 1) & (bb - 1)

        for l in range(L):                                 # static unroll, 2 layers
            # -------- self-attention: per-head lane slices, Q scale pre-folded ----
            qkv = lax.dot_general(x.astype(bf16), wqkv_ref[l], dn,
                                  preferred_element_type=f32)
            qkv = qkv + vec(l, OFF_BQKV, 3 * D)            # (rows, 3D) f32

            proj = vec(l, OFF_BO, D)                       # start from out_proj bias
            for h in range(H):
                qh = qkv[:, h * DH:(h + 1) * DH].astype(bf16)
                kh = qkv[:, D + h * DH:D + (h + 1) * DH].astype(bf16)
                vh = qkv[:, 2 * D + h * DH:2 * D + (h + 1) * DH].astype(bf16)

                sc = lax.dot_general(qh, kh, dn_t, preferred_element_type=f32)
                sc = jnp.where(r_id == c_id, sc, -1e30)    # same-problem mask
                sc = sc - jnp.max(sc, axis=-1, keepdims=True)
                pw = jnp.exp(sc)
                pw = pw * pl.reciprocal(jnp.sum(pw, axis=-1, keepdims=True),
                                        approx=True)
                oh = lax.dot_general(pw.astype(bf16), vh, dn,
                                     preferred_element_type=f32)   # (rows, DH)
                proj = proj + lax.dot_general(
                    oh.astype(bf16), wo_ref[l, h * DH:(h + 1) * DH, :], dn,
                    preferred_element_type=f32)            # accumulate W_o slice

            x = _layer_norm(x + proj, vec(l, OFF_G1, D), vec(l, OFF_BE1, D))

            # ----------------------------- feed-forward ---------------------------
            ff = lax.dot_general(x.astype(bf16), w1_ref[l], dn,
                                 preferred_element_type=f32) + vec(l, OFF_B1, DFF)
            ff = jnp.maximum(ff, 0.0)
            ff = lax.dot_general(ff.astype(bf16), w2_ref[l], dn,
                                 preferred_element_type=f32) + vec(l, OFF_B2, D)
            x = _layer_norm(x + ff, vec(l, OFF_G2, D), vec(l, OFF_BE2, D))

        # ---- classifier on flat = [agent0 | agent1 | agent2 | agent3] features ----
        # agent-major rows => each agent slice is a contiguous vreg-aligned block.
        hid = cbias_ref[0:1, 0:HID]
        for s in range(S):
            hid = hid + lax.dot_general(
                x[s * bb:(s + 1) * bb, :].astype(bf16), wc1_ref[s], dn,
                preferred_element_type=f32)                # (bb, HID)
        hid = jnp.maximum(hid, 0.0)
        out = lax.dot_general(hid.astype(bf16), wc2_ref[...], dn,
                              preferred_element_type=f32) + cbias_ref[1:2, :]
        out_ref[...] = out.astype(out_ref.dtype)           # lane-dense (bb, 128) store

    return kernel


def verdict_forward(xb, p, bb=DEFAULT_BB):
    """xb: (B, S, D) per-agent CLS embeddings for B independent ensemble problems."""
    B = xb.shape[0]
    rows = bb * S
    nb = pl.cdiv(B, bb)
    b_pad = nb * bb
    if b_pad != B:                                         # pad partial final block
        xb = jnp.pad(xb, ((0, b_pad - B), (0, 0), (0, 0)))

    # host-side rearrangement: agent-major within each bb-problem block
    # (block row = s*bb + b). Pure layout plumbing, outside the kernel.
    xr = xb.reshape(nb, bb, S, D).transpose(0, 2, 1, 3).reshape(nb * rows, D)

    in_specs = [
        pl.BlockSpec((rows, D), lambda i: (i, 0)),          # x block: bb problems
        pl.BlockSpec((L, D, 3 * D), lambda i: (0, 0, 0)),   # weights stay resident
        pl.BlockSpec((L, D, D), lambda i: (0, 0, 0)),
        pl.BlockSpec((L, D, DFF), lambda i: (0, 0, 0)),
        pl.BlockSpec((L, DFF, D), lambda i: (0, 0, 0)),
        pl.BlockSpec((L, VEC_W), lambda i: (0, 0)),
        pl.BlockSpec((S, D, HID), lambda i: (0, 0, 0)),
        pl.BlockSpec((HID, 128), lambda i: (0, 0)),
        pl.BlockSpec((2, 128), lambda i: (0, 0)),
    ]
    out = pl.pallas_call(
        _make_kernel(bb),
        out_shape=jax.ShapeDtypeStruct((b_pad, 128), jnp.float32),
        grid=(nb,),
        in_specs=in_specs,
        out_specs=pl.BlockSpec((bb, 128), lambda i: (i, 0)),
        compiler_params=pltpu.CompilerParams(
            dimension_semantics=("parallel",)),             # megacore / v7x 2 TCs
    )(xr, p["wqkv_t"], p["wo_t"], p["w1_t"], p["w2_t"], p["vecs"],
      p["wc1r"], p["wc2p"], p["cbias"])
    return out[:B, :C]


def init_params(key):
    ks = jax.random.split(key, 12)

    def nrm(k, shape, scl=0.05):
        return (scl * jax.random.normal(k, shape)).astype(jnp.float32)

    # PyTorch-style parameters (out_features, in_features), then host-side
    # pre-transpose to (in, out), fold the 1/sqrt(DH) Q scale, cast MXU operands
    # to bf16, and pack the tiny per-layer vectors into one f32 array.
    wqkv = nrm(ks[0], (L, 3 * D, D))          # in_proj_weight per layer
    bqkv = nrm(ks[1], (L, 3 * D))
    wo   = nrm(ks[2], (L, D, D))              # out_proj
    bo   = nrm(ks[3], (L, D))
    g1   = jnp.ones((L, D), jnp.float32)
    be1  = jnp.zeros((L, D), jnp.float32)
    w1   = nrm(ks[4], (L, DFF, D))            # linear1
    b1   = nrm(ks[5], (L, DFF))
    w2   = nrm(ks[6], (L, D, DFF))            # linear2
    b2   = nrm(ks[7], (L, D))
    g2   = jnp.ones((L, D), jnp.float32)
    be2  = jnp.zeros((L, D), jnp.float32)
    wc1  = nrm(ks[8], (HID, S * D))           # classifier Linear(S*D, HID).weight
    bc1  = nrm(ks[9], (HID,))
    wc2  = nrm(ks[10], (C, HID))              # classifier Linear(HID, C).weight
    bc2  = nrm(ks[11], (C,))

    scale = 1.0 / (DH ** 0.5)
    wqkv_t = jnp.transpose(wqkv, (0, 2, 1))             # (L, D, 3D)
    wqkv_t = wqkv_t.at[:, :, :D].multiply(scale)        # fold Q scale into weights
    bqkv   = bqkv.at[:, :D].multiply(scale)             # ... and into the Q bias

    p = {}
    p["wqkv_t"] = wqkv_t.astype(jnp.bfloat16)
    p["wo_t"]   = jnp.transpose(wo, (0, 2, 1)).astype(jnp.bfloat16)   # (L, D, D)
    p["w1_t"]   = jnp.transpose(w1, (0, 2, 1)).astype(jnp.bfloat16)   # (L, D, DFF)
    p["w2_t"]   = jnp.transpose(w2, (0, 2, 1)).astype(jnp.bfloat16)   # (L, DFF, D)
    # packed per-layer vectors (f32): [bqkv | bo | g1 | be1 | b1 | b2 | g2 | be2]
    p["vecs"]   = jnp.concatenate([bqkv, bo, g1, be1, b1, b2, g2, be2], axis=1)
    # flat index j = s*D + d  =>  (S*D, HID) reshaped to (S, D, HID)
    p["wc1r"]   = wc1.T.reshape(S, D, HID).astype(jnp.bfloat16)
    # classifier output weight padded to 128 lanes for an unmasked lane-dense store
    wc2p = jnp.zeros((HID, 128), jnp.float32).at[:, :C].set(wc2.T)
    p["wc2p"]   = wc2p.astype(jnp.bfloat16)
    cb = jnp.zeros((2, 128), jnp.float32)
    cb = cb.at[0, :HID].set(bc1)
    cb = cb.at[1, :C].set(bc2)
    p["cbias"]  = cb
    return p


def reference_forward(xb, p):
    """Pure-JAX f32 reference: post-norm TransformerEncoder + classifier per problem.

    Uses the same (bf16-stored) weights as the kernel; the 1/sqrt(DH) scale is
    already folded into the Q projection, so no extra division here.
    """
    Bq = xb.shape[0]
    vecs = p["vecs"]
    wqkv = p["wqkv_t"].astype(jnp.float32)
    wo   = p["wo_t"].astype(jnp.float32)
    w1   = p["w1_t"].astype(jnp.float32)
    w2   = p["w2_t"].astype(jnp.float32)
    wc1  = p["wc1r"].astype(jnp.float32).reshape(S * D, HID)
    wc2  = p["wc2p"].astype(jnp.float32)[:, :C]

    def ln(v, g, b):
        mu = v.mean(-1, keepdims=True)
        var = ((v - mu) ** 2).mean(-1, keepdims=True)
        return (v - mu) / jnp.sqrt(var + EPS) * g + b

    x = xb.astype(jnp.float32)                          # (B, S, D)
    for l in range(L):
        qkv = x @ wqkv[l] + vecs[l, OFF_BQKV:OFF_BQKV + 3 * D]
        q, k, v = qkv[..., :D], qkv[..., D:2 * D], qkv[..., 2 * D:]
        qh = q.reshape(Bq, S, H, DH).transpose(0, 2, 1, 3)   # scale pre-folded
        kh = k.reshape(Bq, S, H, DH).transpose(0, 2, 1, 3)
        vh = v.reshape(Bq, S, H, DH).transpose(0, 2, 1, 3)
        pw = jax.nn.softmax(jnp.einsum("bhqe,bhke->bhqk", qh, kh), axis=-1)
        attn = jnp.einsum("bhqk,bhke->bhqe", pw, vh).transpose(0, 2, 1, 3).reshape(Bq, S, D)
        x = ln(x + attn @ wo[l] + vecs[l, OFF_BO:OFF_BO + D],
               vecs[l, OFF_G1:OFF_G1 + D], vecs[l, OFF_BE1:OFF_BE1 + D])
        ff = jnp.maximum(x @ w1[l] + vecs[l, OFF_B1:OFF_B1 + DFF], 0.0)
        ff = ff @ w2[l] + vecs[l, OFF_B2:OFF_B2 + D]
        x = ln(x + ff, vecs[l, OFF_G2:OFF_G2 + D], vecs[l, OFF_BE2:OFF_BE2 + D])
    flat = x.reshape(Bq, S * D)
    hid = jnp.maximum(flat @ wc1 + p["cbias"][0, :HID], 0.0)
    return hid @ wc2 + p["cbias"][1, :C]


if __name__ == "__main__":
    B = 48      # independent ensemble evaluations; not a multiple of BB -> pad path
    key = jax.random.PRNGKey(0)
    kx, kp = jax.random.split(key)
    # xb[b, s] stands in for encoder(**tok).last_hidden_state[:, 0, :] of problem b
    xb = jax.random.normal(kx, (B, S, D), dtype=jnp.float32)
    params = init_params(kp)

    out = verdict_forward(xb, params)
    out = jax.block_until_ready(out)
    assert out.shape == (B, C)

    ref = reference_forward(xb, params)
    if not jnp.allclose(out, ref, rtol=3e-2, atol=3e-2):
        err = float(jnp.max(jnp.abs(out - ref)))
        raise AssertionError(f"Pallas kernel does not match JAX reference (max |diff| = {err})")
    print("KERNEL_OK")
</pallas_src>

<mosaic_0001>
module attributes {stable_mosaic.version = 11 : i64} {
  func.func @kernel(%arg0: i32, %arg1: memref<128x128xf32, #tpu.memory_space<vmem>>, %arg2: memref<2x128x384xbf16, #tpu.memory_space<vmem>>, %arg3: memref<2x128x128xbf16, #tpu.memory_space<vmem>>, %arg4: memref<2x128x256xbf16, #tpu.memory_space<vmem>>, %arg5: memref<2x256x128xbf16, #tpu.memory_space<vmem>>, %arg6: memref<2x1408xf32, #tpu.memory_space<vmem>>, %arg7: memref<4x128x64xbf16, #tpu.memory_space<vmem>>, %arg8: memref<64x128xbf16, #tpu.memory_space<vmem>>, %arg9: memref<2x128xf32, #tpu.memory_space<vmem>>, %arg10: memref<32x128xf32, #tpu.memory_space<vmem>>) attributes {dimension_semantics = [#tpu.dimension_semantics<parallel>], iteration_bounds = array<i64: 2>, scalar_prefetch = 0 : i64, scratch_operands = 0 : i64, tpu.core_type = #tpu.core_type<tc>, window_params = [{transform_indices = @transform_0, window_bounds = array<i64: 128, 128>}, {pipeline_mode = #tpu.pipeline_mode<synchronous>, transform_indices = @transform_1, window_bounds = array<i64: 2, 128, 384>}, {pipeline_mode = #tpu.pipeline_mode<synchronous>, transform_indices = @transform_2, window_bounds = array<i64: 2, 128, 128>}, {pipeline_mode = #tpu.pipeline_mode<synchronous>, transform_indices = @transform_3, window_bounds = array<i64: 2, 128, 256>}, {pipeline_mode = #tpu.pipeline_mode<synchronous>, transform_indices = @transform_4, window_bounds = array<i64: 2, 256, 128>}, {pipeline_mode = #tpu.pipeline_mode<synchronous>, transform_indices = @transform_5, window_bounds = array<i64: 2, 1408>}, {pipeline_mode = #tpu.pipeline_mode<synchronous>, transform_indices = @transform_6, window_bounds = array<i64: 4, 128, 64>}, {pipeline_mode = #tpu.pipeline_mode<synchronous>, transform_indices = @transform_7, window_bounds = array<i64: 64, 128>}, {pipeline_mode = #tpu.pipeline_mode<synchronous>, transform_indices = @transform_8, window_bounds = array<i64: 2, 128>}, {transform_indices = @transform_9, window_bounds = array<i64: 32, 128>}]} {
    %c0 = arith.constant 0 : index
    %c0_0 = arith.constant 0 : index
    %0 = vector.load %arg1[%c0, %c0_0] : memref<128x128xf32, #tpu.memory_space<vmem>>, vector<128x128xf32>
    %1 = tpu.iota {dimensions = array<i32: 0>} : vector<128x1xi32>
    %c31_i32 = arith.constant 31 : i32
    %2 = vector.broadcast %c31_i32 : i32 to vector<128x1xi32>
    %3 = arith.andi %1, %2 : vector<128x1xi32>
    %4 = tpu.iota {dimensions = array<i32: 1>} : vector<1x128xi32>
    %c31_i32_1 = arith.constant 31 : i32
    %5 = vector.broadcast %c31_i32_1 : i32 to vector<1x128xi32>
    %6 = arith.andi %4, %5 : vector<1x128xi32>
    %7 = arith.truncf %0 : vector<128x128xf32> to vector<128x128xbf16>
    %c0_2 = arith.constant 0 : index
    %c0_3 = arith.constant 0 : index
    %c0_4 = arith.constant 0 : index
    %8 = vector.load %arg2[%c0_2, %c0_3, %c0_4] : memref<2x128x384xbf16, #tpu.memory_space<vmem>>, vector<1x128x384xbf16>
    %9 = vector.shape_cast %8 : vector<1x128x384xbf16> to vector<128x384xbf16>
    %cst = arith.constant dense<0.000000e+00> : vector<128x384xf32>
    %10 = tpu.matmul %7, %9, %cst {dimension_numbers = #tpu.dot_dimension_numbers<[1], [0], [0], [1], [0, 0, 1, 1], [], []>} : vector<128x128xbf16>, vector<128x384xbf16>, vector<128x384xf32> -> vector<128x384xf32>
    %c0_5 = arith.constant 0 : index
    %c0_6 = arith.constant 0 : index
    %11 = vector.load %arg6[%c0_5, %c0_6] : memref<2x1408xf32, #tpu.memory_space<vmem>>, vector<1x384xf32>
    %12 = vector.broadcast %11 : vector<1x384xf32> to vector<128x384xf32>
    %13 = arith.addf %10, %12 : vector<128x384xf32>
    %c0_7 = arith.constant 0 : index
    %c384 = arith.constant 384 : index
    %14 = vector.load %arg6[%c0_7, %c384] : memref<2x1408xf32, #tpu.memory_space<vmem>>, vector<1x128xf32>
    %15 = vector.extract_strided_slice %13 {offsets = [0, 0], sizes = [128, 32], strides = [1, 1]} : vector<128x384xf32> to vector<128x32xf32>
    %16 = arith.truncf %15 : vector<128x32xf32> to vector<128x32xbf16>
    %17 = vector.extract_strided_slice %13 {offsets = [0, 128], sizes = [128, 32], strides = [1, 1]} : vector<128x384xf32> to vector<128x32xf32>
    %18 = arith.truncf %17 : vector<128x32xf32> to vector<128x32xbf16>
    %19 = vector.extract_strided_slice %13 {offsets = [0, 256], sizes = [128, 32], strides = [1, 1]} : vector<128x384xf32> to vector<128x32xf32>
    %20 = arith.truncf %19 : vector<128x32xf32> to vector<128x32xbf16>
    %cst_8 = arith.constant dense<0.000000e+00> : vector<128x128xf32>
    %21 = tpu.matmul %16, %18, %cst_8 {dimension_numbers = #tpu.dot_dimension_numbers<[1], [1], [0], [0], [0, 0, 1, 0], [], []>} : vector<128x32xbf16>, vector<128x32xbf16>, vector<128x128xf32> -> vector<128x128xf32>
    %22 = vector.broadcast %3 : vector<128x1xi32> to vector<128x128xi32>
    %23 = vector.broadcast %6 : vector<1x128xi32> to vector<128x128xi32>
    %24 = arith.cmpi eq, %22, %23 : vector<128x128xi32>
    %cst_9 = arith.constant -1.000000e+30 : f32
    %25 = vector.broadcast %cst_9 : f32 to vector<128x128xf32>
    %26 = arith.select %24, %21, %25 : vector<128x128xi1>, vector<128x128xf32>
    %cst_10 = arith.constant dense<0xFF800000> : vector<128xf32>
    %27 = vector.multi_reduction <maximumf>, %26, %cst_10 [1] : vector<128x128xf32> to vector<128xf32>
    %28 = vector.shape_cast %27 : vector<128xf32> to vector<128x1xf32>
    %29 = vector.broadcast %28 : vector<128x1xf32> to vector<128x128xf32>
    %30 = arith.subf %26, %29 : vector<128x128xf32>
    %31 = math.exp %30 : vector<128x128xf32>
    %cst_11 = arith.constant dense<0.000000e+00> : vector<128xf32>
    %32 = vector.multi_reduction <add>, %31, %cst_11 [1] : vector<128x128xf32> to vector<128xf32>
    %33 = vector.shape_cast %32 : vector<128xf32> to vector<128x1xf32>
    %34 = tpu.reciprocal %33 {approx = true} : vector<128x1xf32> -> vector<128x1xf32>
    %35 = vector.broadcast %34 : vector<128x1xf32> to vector<128x128xf32>
    %36 = arith.mulf %31, %35 : vector<128x128xf32>
    %37 = arith.truncf %36 : vector<128x128xf32> to vector<128x128xbf16>
    %cst_12 = arith.constant dense<0.000000e+00> : vector<128x32xf32>
    %38 = tpu.matmul %37, %20, %cst_12 {dimension_numbers = #tpu.dot_dimension_numbers<[1], [0], [0], [1], [0, 0, 1, 1], [], []>} : vector<128x128xbf16>, vector<128x32xbf16>, vector<128x32xf32> -> vector<128x32xf32>
    %39 = arith.truncf %38 : vector<128x32xf32> to vector<128x32xbf16>
    %c0_13 = arith.constant 0 : index
    %c0_14 = arith.constant 0 : index
    %c0_15 = arith.constant 0 : index
    %40 = vector.load %arg3[%c0_13, %c0_14, %c0_15] : memref<2x128x128xbf16, #tpu.memory_space<vmem>>, vector<1x32x128xbf16>
    %41 = vector.shape_cast %40 : vector<1x32x128xbf16> to vector<32x128xbf16>
    %cst_16 = arith.constant dense<0.000000e+00> : vector<128x128xf32>
    %42 = tpu.matmul %39, %41, %cst_16 {dimension_numbers = #tpu.dot_dimension_numbers<[1], [0], [0], [1], [0, 0, 1, 1], [], []>} : vector<128x32xbf16>, vector<32x128xbf16>, vector<128x128xf32> -> vector<128x128xf32>
    %43 = vector.broadcast %14 : vector<1x128xf32> to vector<128x128xf32>
    %44 = arith.addf %43, %42 : vector<128x128xf32>
    %45 = vector.extract_strided_slice %13 {offsets = [0, 32], sizes = [128, 32], strides = [1, 1]} : vector<128x384xf32> to vector<128x32xf32>
    %46 = arith.truncf %45 : vector<128x32xf32> to vector<128x32xbf16>
    %47 = vector.extract_strided_slice %13 {offsets = [0, 160], sizes = [128, 32], strides = [1, 1]} : vector<128x384xf32> to vector<128x32xf32>
    %48 = arith.truncf %47 : vector<128x32xf32> to vector<128x32xbf16>
    %49 = vector.extract_strided_slice %13 {offsets = [0, 288], sizes = [128, 32], strides = [1, 1]} : vector<128x384xf32> to vector<128x32xf32>
    %50 = arith.truncf %49 : vector<128x32xf32> to vector<128x32xbf16>
    %cst_17 = arith.constant dense<0.000000e+00> : vector<128x128xf32>
    %51 = tpu.matmul %46, %48, %cst_17 {dimension_numbers = #tpu.dot_dimension_numbers<[1], [1], [0], [0], [0, 0, 1, 0], [], []>} : vector<128x32xbf16>, vector<128x32xbf16>, vector<128x128xf32> -> vector<128x128xf32>
    %52 = vector.broadcast %3 : vector<128x1xi32> to vector<128x128xi32>
    %53 = vector.broadcast %6 : vector<1x128xi32> to vector<128x128xi32>
    %54 = arith.cmpi eq, %52, %53 : vector<128x128xi32>
    %cst_18 = arith.constant -1.000000e+30 : f32
    %55 = vector.broadcast %cst_18 : f32 to vector<128x128xf32>
    %56 = arith.select %54, %51, %55 : vector<128x128xi1>, vector<128x128xf32>
    %cst_19 = arith.constant dense<0xFF800000> : vector<128xf32>
    %57 = vector.multi_reduction <maximumf>, %56, %cst_19 [1] : vector<128x128xf32> to vector<128xf32>
    %58 = vector.shape_cast %57 : vector<128xf32> to vector<128x1xf32>
    %59 = vector.broadcast %58 : vector<128x1xf32> to vector<128x128xf32>
    %60 = arith.subf %56, %59 : vector<128x128xf32>
    %61 = math.exp %60 : vector<128x128xf32>
    %cst_20 = arith.constant dense<0.000000e+00> : vector<128xf32>
    %62 = vector.multi_reduction <add>, %61, %cst_20 [1] : vector<128x128xf32> to vector<128xf32>
    %63 = vector.shape_cast %62 : vector<128xf32> to vector<128x1xf32>
    %64 = tpu.reciprocal %63 {approx = true} : vector<128x1xf32> -> vector<128x1xf32>
    %65 = vector.broadcast %64 : vector<128x1xf32> to vector<128x128xf32>
    %66 = arith.mulf %61, %65 : vector<128x128xf32>
    %67 = arith.truncf %66 : vector<128x128xf32> to vector<128x128xbf16>
    %cst_21 = arith.constant dense<0.000000e+00> : vector<128x32xf32>
    %68 = tpu.matmul %67, %50, %cst_21 {dimension_numbers = #tpu.dot_dimension_numbers<[1], [0], [0], [1], [0, 0, 1, 1], [], []>} : vector<128x128xbf16>, vector<128x32xbf16>, vector<128x32xf32> -> vector<128x32xf32>
    %69 = arith.truncf %68 : vector<128x32xf32> to vector<128x32xbf16>
    %c0_22 = arith.constant 0 : index
    %c32 = arith.constant 32 : index
    %c0_23 = arith.constant 0 : index
    %70 = vector.load %arg3[%c0_22, %c32, %c0_23] : memref<2x128x128xbf16, #tpu.memory_space<vmem>>, vector<1x32x128xbf16>
    %71 = vector.shape_cast %70 : vector<1x32x128xbf16> to vector<32x128xbf16>
    %cst_24 = arith.constant dense<0.000000e+00> : vector<128x128xf32>
    %72 = tpu.matmul %69, %71, %cst_24 {dimension_numbers = #tpu.dot_dimension_numbers<[1], [0], [0], [1], [0, 0, 1, 1], [], []>} : vector<128x32xbf16>, vector<32x128xbf16>, vector<128x128xf32> -> vector<128x128xf32>
    %73 = arith.addf %44, %72 : vector<128x128xf32>
    %74 = vector.extract_strided_slice %13 {offsets = [0, 64], sizes = [128, 32], strides = [1, 1]} : vector<128x384xf32> to vector<128x32xf32>
    %75 = arith.truncf %74 : vector<128x32xf32> to vector<128x32xbf16>
    %76 = vector.extract_strided_slice %13 {offsets = [0, 192], sizes = [128, 32], strides = [1, 1]} : vector<128x384xf32> to vector<128x32xf32>
    %77 = arith.truncf %76 : vector<128x32xf32> to vector<128x32xbf16>
    %78 = vector.extract_strided_slice %13 {offsets = [0, 320], sizes = [128, 32], strides = [1, 1]} : vector<128x384xf32> to vector<128x32xf32>
    %79 = arith.truncf %78 : vector<128x32xf32> to vector<128x32xbf16>
    %cst_25 = arith.constant dense<0.000000e+00> : vector<128x128xf32>
    %80 = tpu.matmul %75, %77, %cst_25 {dimension_numbers = #tpu.dot_dimension_numbers<[1], [1], [0], [0], [0, 0, 1, 0], [], []>} : vector<128x32xbf16>, vector<128x32xbf16>, vector<128x128xf32> -> vector<128x128xf32>
    %81 = vector.broadcast %3 : vector<128x1xi32> to vector<128x128xi32>
    %82 = vector.broadcast %6 : vector<1x128xi32> to vector<128x128xi32>
    %83 = arith.cmpi eq, %81, %82 : vector<128x128xi32>
    %cst_26 = arith.constant -1.000000e+30 : f32
    %84 = vector.broadcast %cst_26 : f32 to vector<128x128xf32>
    %85 = arith.select %83, %80, %84 : vector<128x128xi1>, vector<128x128xf32>
    %cst_27 = arith.constant dense<0xFF800000> : vector<128xf32>
    %86 = vector.multi_reduction <maximumf>, %85, %cst_27 [1] : vector<128x128xf32> to vector<128xf32>
    %87 = vector.shape_cast %86 : vector<128xf32> to vector<128x1xf32>
    %88 = vector.broadcast %87 : vector<128x1xf32> to vector<128x128xf32>
    %89 = arith.subf %85, %88 : vector<128x128xf32>
    %90 = math.exp %89 : vector<128x128xf32>
    %cst_28 = arith.constant dense<0.000000e+00> : vector<128xf32>
    %91 = vector.multi_reduction <add>, %90, %cst_28 [1] : vector<128x128xf32> to vector<128xf32>
    %92 = vector.shape_cast %91 : vector<128xf32> to vector<128x1xf32>
    %93 = tpu.reciprocal %92 {approx = true} : vector<128x1xf32> -> vector<128x1xf32>
    %94 = vector.broadcast %93 : vector<128x1xf32> to vector<128x128xf32>
    %95 = arith.mulf %90, %94 : vector<128x128xf32>
    %96 = arith.truncf %95 : vector<128x128xf32> to vector<128x128xbf16>
    %cst_29 = arith.constant dense<0.000000e+00> : vector<128x32xf32>
    %97 = tpu.matmul %96, %79, %cst_29 {dimension_numbers = #tpu.dot_dimension_numbers<[1], [0], [0], [1], [0, 0, 1, 1], [], []>} : vector<128x128xbf16>, vector<128x32xbf16>, vector<128x32xf32> -> vector<128x32xf32>
    %98 = arith.truncf %97 : vector<128x32xf32> to vector<128x32xbf16>
    %c0_30 = arith.constant 0 : index
    %c64 = arith.constant 64 : index
    %c0_31 = arith.constant 0 : index
    %99 = vector.load %arg3[%c0_30, %c64, %c0_31] : memref<2x128x128xbf16, #tpu.memory_space<vmem>>, vector<1x32x128xbf16>
    %100 = vector.shape_cast %99 : vector<1x32x128xbf16> to vector<32x128xbf16>
    %cst_32 = arith.constant dense<0.000000e+00> : vector<128x128xf32>
    %101 = tpu.matmul %98, %100, %cst_32 {dimension_numbers = #tpu.dot_dimension_numbers<[1], [0], [0], [1], [0, 0, 1, 1], [], []>} : vector<128x32xbf16>, vector<32x128xbf16>, vector<128x128xf32> -> vector<128x128xf32>
    %102 = arith.addf %73, %101 : vector<128x128xf32>
    %103 = vector.extract_strided_slice %13 {offsets = [0, 96], sizes = [128, 32], strides = [1, 1]} : vector<128x384xf32> to vector<128x32xf32>
    %104 = arith.truncf %103 : vector<128x32xf32> to vector<128x32xbf16>
    %105 = vector.extract_strided_slice %13 {offsets = [0, 224], sizes = [128, 32], strides = [1, 1]} : vector<128x384xf32> to vector<128x32xf32>
    %106 = arith.truncf %105 : vector<128x32xf32> to vector<128x32xbf16>
    %107 = vector.extract_strided_slice %13 {offsets = [0, 352], sizes = [128, 32], strides = [1, 1]} : vector<128x384xf32> to vector<128x32xf32>
    %108 = arith.truncf %107 : vector<128x32xf32> to vector<128x32xbf16>
    %cst_33 = arith.constant dense<0.000000e+00> : vector<128x128xf32>
    %109 = tpu.matmul %104, %106, %cst_33 {dimension_numbers = #tpu.dot_dimension_numbers<[1], [1], [0], [0], [0, 0, 1, 0], [], []>} : vector<128x32xbf16>, vector<128x32xbf16>, vector<128x128xf32> -> vector<128x128xf32>
    %110 = vector.broadcast %3 : vector<128x1xi32> to vector<128x128xi32>
    %111 = vector.broadcast %6 : vector<1x128xi32> to vector<128x128xi32>
    %112 = arith.cmpi eq, %110, %111 : vector<128x128xi32>
    %cst_34 = arith.constant -1.000000e+30 : f32
    %113 = vector.broadcast %cst_34 : f32 to vector<128x128xf32>
    %114 = arith.select %112, %109, %113 : vector<128x128xi1>, vector<128x128xf32>
    %cst_35 = arith.constant dense<0xFF800000> : vector<128xf32>
    %115 = vector.multi_reduction <maximumf>, %114, %cst_35 [1] : vector<128x128xf32> to vector<128xf32>
    %116 = vector.shape_cast %115 : vector<128xf32> to vector<128x1xf32>
    %117 = vector.broadcast %116 : vector<128x1xf32> to vector<128x128xf32>
    %118 = arith.subf %114, %117 : vector<128x128xf32>
    %119 = math.exp %118 : vector<128x128xf32>
    %cst_36 = arith.constant dense<0.000000e+00> : vector<128xf32>
    %120 = vector.multi_reduction <add>, %119, %cst_36 [1] : vector<128x128xf32> to vector<128xf32>
    %121 = vector.shape_cast %120 : vector<128xf32> to vector<128x1xf32>
    %122 = tpu.reciprocal %121 {approx = true} : vector<128x1xf32> -> vector<128x1xf32>
    %123 = vector.broadcast %122 : vector<128x1xf32> to vector<128x128xf32>
    %124 = arith.mulf %119, %123 : vector<128x128xf32>
    %125 = arith.truncf %124 : vector<128x128xf32> to vector<128x128xbf16>
    %cst_37 = arith.constant dense<0.000000e+00> : vector<128x32xf32>
    %126 = tpu.matmul %125, %108, %cst_37 {dimension_numbers = #tpu.dot_dimension_numbers<[1], [0], [0], [1], [0, 0, 1, 1], [], []>} : vector<128x128xbf16>, vector<128x32xbf16>, vector<128x32xf32> -> vector<128x32xf32>
    %127 = arith.truncf %126 : vector<128x32xf32> to vector<128x32xbf16>
    %c0_38 = arith.constant 0 : index
    %c96 = arith.constant 96 : index
    %c0_39 = arith.constant 0 : index
    %128 = vector.load %arg3[%c0_38, %c96, %c0_39] : memref<2x128x128xbf16, #tpu.memory_space<vmem>>, vector<1x32x128xbf16>
    %129 = vector.shape_cast %128 : vector<1x32x128xbf16> to vector<32x128xbf16>
    %cst_40 = arith.constant dense<0.000000e+00> : vector<128x128xf32>
    %130 = tpu.matmul %127, %129, %cst_40 {dimension_numbers = #tpu.dot_dimension_numbers<[1], [0], [0], [1], [0, 0, 1, 1], [], []>} : vector<128x32xbf16>, vector<32x128xbf16>, vector<128x128xf32> -> vector<128x128xf32>
    %131 = arith.addf %102, %130 : vector<128x128xf32>
    %132 = arith.addf %0, %131 : vector<128x128xf32>
    %c0_41 = arith.constant 0 : index
    %c512 = arith.constant 512 : index
    %133 = vector.load %arg6[%c0_41, %c512] : memref<2x1408xf32, #tpu.memory_space<vmem>>, vector<1x128xf32>
    %c0_42 = arith.constant 0 : index
    %c640 = arith.constant 640 : index
    %134 = vector.load %arg6[%c0_42, %c640] : memref<2x1408xf32, #tpu.memory_space<vmem>>, vector<1x128xf32>
    %cst_43 = arith.constant dense<0.000000e+00> : vector<128xf32>
    %135 = vector.multi_reduction <add>, %132, %cst_43 [1] : vector<128x128xf32> to vector<128xf32>
    %136 = vector.shape_cast %135 : vector<128xf32> to vector<128x1xf32>
    %cst_44 = arith.constant 1.280000e+02 : f32
    %137 = vector.broadcast %cst_44 : f32 to vector<128x1xf32>
    %138 = arith.divf %136, %137 : vector<128x1xf32>
    %139 = vector.broadcast %138 : vector<128x1xf32> to vector<128x128xf32>
    %140 = arith.subf %132, %139 : vector<128x128xf32>
    %141 = arith.mulf %140, %140 : vector<128x128xf32>
    %cst_45 = arith.constant dense<0.000000e+00> : vector<128xf32>
    %142 = vector.multi_reduction <add>, %141, %cst_45 [1] : vector<128x128xf32> to vector<128xf32>
    %143 = vector.shape_cast %142 : vector<128xf32> to vector<128x1xf32>
    %cst_46 = arith.constant 1.280000e+02 : f32
    %144 = vector.broadcast %cst_46 : f32 to vector<128x1xf32>
    %145 = arith.divf %143, %144 : vector<128x1xf32>
    %146 = vector.broadcast %138 : vector<128x1xf32> to vector<128x128xf32>
    %147 = arith.subf %132, %146 : vector<128x128xf32>
    %cst_47 = arith.constant 9.99999974E-6 : f32
    %148 = vector.broadcast %cst_47 : f32 to vector<128x1xf32>
    %149 = arith.addf %145, %148 : vector<128x1xf32>
    %150 = math.rsqrt %149 : vector<128x1xf32>
    %151 = vector.broadcast %150 : vector<128x1xf32> to vector<128x128xf32>
    %152 = arith.mulf %147, %151 : vector<128x128xf32>
    %153 = vector.broadcast %133 : vector<1x128xf32> to vector<128x128xf32>
    %154 = arith.mulf %152, %153 : vector<128x128xf32>
    %155 = vector.broadcast %134 : vector<1x128xf32> to vector<128x128xf32>
    %156 = arith.addf %154, %155 : vector<128x128xf32>
    %157 = arith.truncf %156 : vector<128x128xf32> to vector<128x128xbf16>
    %c0_48 = arith.constant 0 : index
    %c0_49 = arith.constant 0 : index
    %c0_50 = arith.constant 0 : index
    %158 = vector.load %arg4[%c0_48, %c0_49, %c0_50] : memref<2x128x256xbf16, #tpu.memory_space<vmem>>, vector<1x128x256xbf16>
    %159 = vector.shape_cast %158 : vector<1x128x256xbf16> to vector<128x256xbf16>
    %cst_51 = arith.constant dense<0.000000e+00> : vector<128x256xf32>
    %160 = tpu.matmul %157, %159, %cst_51 {dimension_numbers = #tpu.dot_dimension_numbers<[1], [0], [0], [1], [0, 0, 1, 1], [], []>} : vector<128x128xbf16>, vector<128x256xbf16>, vector<128x256xf32> -> vector<128x256xf32>
    %c0_52 = arith.constant 0 : index
    %c768 = arith.constant 768 : index
    %161 = vector.load %arg6[%c0_52, %c768] : memref<2x1408xf32, #tpu.memory_space<vmem>>, vector<1x256xf32>
    %162 = vector.broadcast %161 : vector<1x256xf32> to vector<128x256xf32>
    %163 = arith.addf %160, %162 : vector<128x256xf32>
    %cst_53 = arith.constant 0.000000e+00 : f32
    %164 = vector.broadcast %cst_53 : f32 to vector<128x256xf32>
    %165 = arith.maximumf %163, %164 : vector<128x256xf32>
    %166 = arith.truncf %165 : vector<128x256xf32> to vector<128x256xbf16>
    %c0_54 = arith.constant 0 : index
    %c0_55 = arith.constant 0 : index
    %c0_56 = arith.constant 0 : index
    %167 = vector.load %arg5[%c0_54, %c0_55, %c0_56] : memref<2x256x128xbf16, #tpu.memory_space<vmem>>, vector<1x256x128xbf16>
    %168 = vector.shape_cast %167 : vector<1x256x128xbf16> to vector<256x128xbf16>
    %cst_57 = arith.constant dense<0.000000e+00> : vector<128x128xf32>
    %169 = tpu.matmul %166, %168, %cst_57 {dimension_numbers = #tpu.dot_dimension_numbers<[1], [0], [0], [1], [0, 0, 1, 1], [], []>} : vector<128x256xbf16>, vector<256x128xbf16>, vector<128x128xf32> -> vector<128x128xf32>
    %c0_58 = arith.constant 0 : index
    %c1024 = arith.constant 1024 : index
    %170 = vector.load %arg6[%c0_58, %c1024] : memref<2x1408xf32, #tpu.memory_space<vmem>>, vector<1x128xf32>
    %171 = vector.broadcast %170 : vector<1x128xf32> to vector<128x128xf32>
    %172 = arith.addf %169, %171 : vector<128x128xf32>
    %173 = arith.addf %156, %172 : vector<128x128xf32>
    %c0_59 = arith.constant 0 : index
    %c1152 = arith.constant 1152 : index
    %174 = vector.load %arg6[%c0_59, %c1152] : memref<2x1408xf32, #tpu.memory_space<vmem>>, vector<1x128xf32>
    %c0_60 = arith.constant 0 : index
    %c1280 = arith.constant 1280 : index
    %175 = vector.load %arg6[%c0_60, %c1280] : memref<2x1408xf32, #tpu.memory_space<vmem>>, vector<1x128xf32>
    %cst_61 = arith.constant dense<0.000000e+00> : vector<128xf32>
    %176 = vector.multi_reduction <add>, %173, %cst_61 [1] : vector<128x128xf32> to vector<128xf32>
    %177 = vector.shape_cast %176 : vector<128xf32> to vector<128x1xf32>
    %cst_62 = arith.constant 1.280000e+02 : f32
    %178 = vector.broadcast %cst_62 : f32 to vector<128x1xf32>
    %179 = arith.divf %177, %178 : vector<128x1xf32>
    %180 = vector.broadcast %179 : vector<128x1xf32> to vector<128x128xf32>
    %181 = arith.subf %173, %180 : vector<128x128xf32>
    %182 = arith.mulf %181, %181 : vector<128x128xf32>
    %cst_63 = arith.constant dense<0.000000e+00> : vector<128xf32>
    %183 = vector.multi_reduction <add>, %182, %cst_63 [1] : vector<128x128xf32> to vector<128xf32>
    %184 = vector.shape_cast %183 : vector<128xf32> to vector<128x1xf32>
    %cst_64 = arith.constant 1.280000e+02 : f32
    %185 = vector.broadcast %cst_64 : f32 to vector<128x1xf32>
    %186 = arith.divf %184, %185 : vector<128x1xf32>
    %187 = vector.broadcast %179 : vector<128x1xf32> to vector<128x128xf32>
    %188 = arith.subf %173, %187 : vector<128x128xf32>
    %cst_65 = arith.constant 9.99999974E-6 : f32
    %189 = vector.broadcast %cst_65 : f32 to vector<128x1xf32>
    %190 = arith.addf %186, %189 : vector<128x1xf32>
    %191 = math.rsqrt %190 : vector<128x1xf32>
    %192 = vector.broadcast %191 : vector<128x1xf32> to vector<128x128xf32>
    %193 = arith.mulf %188, %192 : vector<128x128xf32>
    %194 = vector.broadcast %174 : vector<1x128xf32> to vector<128x128xf32>
    %195 = arith.mulf %193, %194 : vector<128x128xf32>
    %196 = vector.broadcast %175 : vector<1x128xf32> to vector<128x128xf32>
    %197 = arith.addf %195, %196 : vector<128x128xf32>
    %198 = arith.truncf %197 : vector<128x128xf32> to vector<128x128xbf16>
    %c1 = arith.constant 1 : index
    %c0_66 = arith.constant 0 : index
    %c0_67 = arith.constant 0 : index
    %199 = vector.load %arg2[%c1, %c0_66, %c0_67] : memref<2x128x384xbf16, #tpu.memory_space<vmem>>, vector<1x128x384xbf16>
    %200 = vector.shape_cast %199 : vector<1x128x384xbf16> to vector<128x384xbf16>
    %cst_68 = arith.constant dense<0.000000e+00> : vector<128x384xf32>
    %201 = tpu.matmul %198, %200, %cst_68 {dimension_numbers = #tpu.dot_dimension_numbers<[1], [0], [0], [1], [0, 0, 1, 1], [], []>} : vector<128x128xbf16>, vector<128x384xbf16>, vector<128x384xf32> -> vector<128x384xf32>
    %c1_69 = arith.constant 1 : index
    %c0_70 = arith.constant 0 : index
    %202 = vector.load %arg6[%c1_69, %c0_70] : memref<2x1408xf32, #tpu.memory_space<vmem>>, vector<1x384xf32>
    %203 = vector.broadcast %202 : vector<1x384xf32> to vector<128x384xf32>
    %204 = arith.addf %201, %203 : vector<128x384xf32>
    %c1_71 = arith.constant 1 : index
    %c384_72 = arith.constant 384 : index
    %205 = vector.load %arg6[%c1_71, %c384_72] : memref<2x1408xf32, #tpu.memory_space<vmem>>, vector<1x128xf32>
    %206 = vector.extract_strided_slice %204 {offsets = [0, 0], sizes = [128, 32], strides = [1, 1]} : vector<128x384xf32> to vector<128x32xf32>
    %207 = arith.truncf %206 : vector<128x32xf32> to vector<128x32xbf16>
    %208 = vector.extract_strided_slice %204 {offsets = [0, 128], sizes = [128, 32], strides = [1, 1]} : vector<128x384xf32> to vector<128x32xf32>
    %209 = arith.truncf %208 : vector<128x32xf32> to vector<128x32xbf16>
    %210 = vector.extract_strided_slice %204 {offsets = [0, 256], sizes = [128, 32], strides = [1, 1]} : vector<128x384xf32> to vector<128x32xf32>
    %211 = arith.truncf %210 : vector<128x32xf32> to vector<128x32xbf16>
    %cst_73 = arith.constant dense<0.000000e+00> : vector<128x128xf32>
    %212 = tpu.matmul %207, %209, %cst_73 {dimension_numbers = #tpu.dot_dimension_numbers<[1], [1], [0], [0], [0, 0, 1, 0], [], []>} : vector<128x32xbf16>, vector<128x32xbf16>, vector<128x128xf32> -> vector<128x128xf32>
    %213 = vector.broadcast %3 : vector<128x1xi32> to vector<128x128xi32>
    %214 = vector.broadcast %6 : vector<1x128xi32> to vector<128x128xi32>
    %215 = arith.cmpi eq, %213, %214 : vector<128x128xi32>
    %cst_74 = arith.constant -1.000000e+30 : f32
    %216 = vector.broadcast %cst_74 : f32 to vector<128x128xf32>
    %217 = arith.select %215, %212, %216 : vector<128x128xi1>, vector<128x128xf32>
    %cst_75 = arith.constant dense<0xFF800000> : vector<128xf32>
    %218 = vector.multi_reduction <maximumf>, %217, %cst_75 [1] : vector<128x128xf32> to vector<128xf32>
    %219 = vector.shape_cast %218 : vector<128xf32> to vector<128x1xf32>
    %220 = vector.broadcast %219 : vector<128x1xf32> to vector<128x128xf32>
    %221 = arith.subf %217, %220 : vector<128x128xf32>
    %222 = math.exp %221 : vector<128x128xf32>
    %cst_76 = arith.constant dense<0.000000e+00> : vector<128xf32>
    %223 = vector.multi_reduction <add>, %222, %cst_76 [1] : vector<128x128xf32> to vector<128xf32>
    %224 = vector.shape_cast %223 : vector<128xf32> to vector<128x1xf32>
    %225 = tpu.reciprocal %224 {approx = true} : vector<128x1xf32> -> vector<128x1xf32>
    %226 = vector.broadcast %225 : vector<128x1xf32> to vector<128x128xf32>
    %227 = arith.mulf %222, %226 : vector<128x128xf32>
    %228 = arith.truncf %227 : vector<128x128xf32> to vector<128x128xbf16>
    %cst_77 = arith.constant dense<0.000000e+00> : vector<128x32xf32>
    %229 = tpu.matmul %228, %211, %cst_77 {dimension_numbers = #tpu.dot_dimension_numbers<[1], [0], [0], [1], [0, 0, 1, 1], [], []>} : vector<128x128xbf16>, vector<128x32xbf16>, vector<128x32xf32> -> vector<128x32xf32>
    %230 = arith.truncf %229 : vector<128x32xf32> to vector<128x32xbf16>
    %c1_78 = arith.constant 1 : index
    %c0_79 = arith.constant 0 : index
    %c0_80 = arith.constant 0 : index
    %231 = vector.load %arg3[%c1_78, %c0_79, %c0_80] : memref<2x128x128xbf16, #tpu.memory_space<vmem>>, vector<1x32x128xbf16>
    %232 = vector.shape_cast %231 : vector<1x32x128xbf16> to vector<32x128xbf16>
    %cst_81 = arith.constant dense<0.000000e+00> : vector<128x128xf32>
    %233 = tpu.matmul %230, %232, %cst_81 {dimension_numbers = #tpu.dot_dimension_numbers<[1], [0], [0], [1], [0, 0, 1, 1], [], []>} : vector<128x32xbf16>, vector<32x128xbf16>, vector<128x128xf32> -> vector<128x128xf32>
    %234 = vector.broadcast %205 : vector<1x128xf32> to vector<128x128xf32>
    %235 = arith.addf %234, %233 : vector<128x128xf32>
    %236 = vector.extract_strided_slice %204 {offsets = [0, 32], sizes = [128, 32], strides = [1, 1]} : vector<128x384xf32> to vector<128x32xf32>
    %237 = arith.truncf %236 : vector<128x32xf32> to vector<128x32xbf16>
    %238 = vector.extract_strided_slice %204 {offsets = [0, 160], sizes = [128, 32], strides = [1, 1]} : vector<128x384xf32> to vector<128x32xf32>
    %239 = arith.truncf %238 : vector<128x32xf32> to vector<128x32xbf16>
    %240 = vector.extract_strided_slice %204 {offsets = [0, 288], sizes = [128, 32], strides = [1, 1]} : vector<128x384xf32> to vector<128x32xf32>
    %241 = arith.truncf %240 : vector<128x32xf32> to vector<128x32xbf16>
    %cst_82 = arith.constant dense<0.000000e+00> : vector<128x128xf32>
    %242 = tpu.matmul %237, %239, %cst_82 {dimension_numbers = #tpu.dot_dimension_numbers<[1], [1], [0], [0], [0, 0, 1, 0], [], []>} : vector<128x32xbf16>, vector<128x32xbf16>, vector<128x128xf32> -> vector<128x128xf32>
    %243 = vector.broadcast %3 : vector<128x1xi32> to vector<128x128xi32>
    %244 = vector.broadcast %6 : vector<1x128xi32> to vector<128x128xi32>
    %245 = arith.cmpi eq, %243, %244 : vector<128x128xi32>
    %cst_83 = arith.constant -1.000000e+30 : f32
    %246 = vector.broadcast %cst_83 : f32 to vector<128x128xf32>
    %247 = arith.select %245, %242, %246 : vector<128x128xi1>, vector<128x128xf32>
    %cst_84 = arith.constant dense<0xFF800000> : vector<128xf32>
    %248 = vector.multi_reduction <maximumf>, %247, %cst_84 [1] : vector<128x128xf32> to vector<128xf32>
    %249 = vector.shape_cast %248 : vector<128xf32> to vector<128x1xf32>
    %250 = vector.broadcast %249 : vector<128x1xf32> to vector<128x128xf32>
    %251 = arith.subf %247, %250 : vector<128x128xf32>
    %252 = math.exp %251 : vector<128x128xf32>
    %cst_85 = arith.constant dense<0.000000e+00> : vector<128xf32>
    %253 = vector.multi_reduction <add>, %252, %cst_85 [1] : vector<128x128xf32> to vector<128xf32>
    %254 = vector.shape_cast %253 : vector<128xf32> to vector<128x1xf32>
    %255 = tpu.reciprocal %254 {approx = true} : vector<128x1xf32> -> vector<128x1xf32>
    %256 = vector.broadcast %255 : vector<128x1xf32> to vector<128x128xf32>
    %257 = arith.mulf %252, %256 : vector<128x128xf32>
    %258 = arith.truncf %257 : vector<128x128xf32> to vector<128x128xbf16>
    %cst_86 = arith.constant dense<0.000000e+00> : vector<128x32xf32>
    %259 = tpu.matmul %258, %241, %cst_86 {dimension_numbers = #tpu.dot_dimension_numbers<[1], [0], [0], [1], [0, 0, 1, 1], [], []>} : vector<128x128xbf16>, vector<128x32xbf16>, vector<128x32xf32> -> vector<128x32xf32>
    %260 = arith.truncf %259 : vector<128x32xf32> to vector<128x32xbf16>
    %c1_87 = arith.constant 1 : index
    %c32_88 = arith.constant 32 : index
    %c0_89 = arith.constant 0 : index
    %261 = vector.load %arg3[%c1_87, %c32_88, %c0_89] : memref<2x128x128xbf16, #tpu.memory_space<vmem>>, vector<1x32x128xbf16>
    %262 = vector.shape_cast %261 : vector<1x32x128xbf16> to vector<32x128xbf16>
    %cst_90 = arith.constant dense<0.000000e+00> : vector<128x128xf32>
    %263 = tpu.matmul %260, %262, %cst_90 {dimension_numbers = #tpu.dot_dimension_numbers<[1], [0], [0], [1], [0, 0, 1, 1], [], []>} : vector<128x32xbf16>, vector<32x128xbf16>, vector<128x128xf32> -> vector<128x128xf32>
    %264 = arith.addf %235, %263 : vector<128x128xf32>
    %265 = vector.extract_strided_slice %204 {offsets = [0, 64], sizes = [128, 32], strides = [1, 1]} : vector<128x384xf32> to vector<128x32xf32>
    %266 = arith.truncf %265 : vector<128x32xf32> to vector<128x32xbf16>
    %267 = vector.extract_strided_slice %204 {offsets = [0, 192], sizes = [128, 32], strides = [1, 1]} : vector<128x384xf32> to vector<128x32xf32>
    %268 = arith.truncf %267 : vector<128x32xf32> to vector<128x32xbf16>
    %269 = vector.extract_strided_slice %204 {offsets = [0, 320], sizes = [128, 32], strides = [1, 1]} : vector<128x384xf32> to vector<128x32xf32>
    %270 = arith.truncf %269 : vector<128x32xf32> to vector<128x32xbf16>
    %cst_91 = arith.constant dense<0.000000e+00> : vector<128x128xf32>
    %271 = tpu.matmul %266, %268, %cst_91 {dimension_numbers = #tpu.dot_dimension_numbers<[1], [1], [0], [0], [0, 0, 1, 0], [], []>} : vector<128x32xbf16>, vector<128x32xbf16>, vector<128x128xf32> -> vector<128x128xf32>
    %272 = vector.broadcast %3 : vector<128x1xi32> to vector<128x128xi32>
    %273 = vector.broadcast %6 : vector<1x128xi32> to vector<128x128xi32>
    %274 = arith.cmpi eq, %272, %273 : vector<128x128xi32>
    %cst_92 = arith.constant -1.000000e+30 : f32
    %275 = vector.broadcast %cst_92 : f32 to vector<128x128xf32>
    %276 = arith.select %274, %271, %275 : vector<128x128xi1>, vector<128x128xf32>
    %cst_93 = arith.constant dense<0xFF800000> : vector<128xf32>
    %277 = vector.multi_reduction <maximumf>, %276, %cst_93 [1] : vector<128x128xf32> to vector<128xf32>
    %278 = vector.shape_cast %277 : vector<128xf32> to vector<128x1xf32>
    %279 = vector.broadcast %278 : vector<128x1xf32> to vector<128x128xf32>
    %280 = arith.subf %276, %279 : vector<128x128xf32>
    %281 = math.exp %280 : vector<128x128xf32>
    %cst_94 = arith.constant dense<0.000000e+00> : vector<128xf32>
    %282 = vector.multi_reduction <add>, %281, %cst_94 [1] : vector<128x128xf32> to vector<128xf32>
    %283 = vector.shape_cast %282 : vector<128xf32> to vector<128x1xf32>
    %284 = tpu.reciprocal %283 {approx = true} : vector<128x1xf32> -> vector<128x1xf32>
    %285 = vector.broadcast %284 : vector<128x1xf32> to vector<128x128xf32>
    %286 = arith.mulf %281, %285 : vector<128x128xf32>
    %287 = arith.truncf %286 : vector<128x128xf32> to vector<128x128xbf16>
    %cst_95 = arith.constant dense<0.000000e+00> : vector<128x32xf32>
    %288 = tpu.matmul %287, %270, %cst_95 {dimension_numbers = #tpu.dot_dimension_numbers<[1], [0], [0], [1], [0, 0, 1, 1], [], []>} : vector<128x128xbf16>, vector<128x32xbf16>, vector<128x32xf32> -> vector<128x32xf32>
    %289 = arith.truncf %288 : vector<128x32xf32> to vector<128x32xbf16>
    %c1_96 = arith.constant 1 : index
    %c64_97 = arith.constant 64 : index
    %c0_98 = arith.constant 0 : index
    %290 = vector.load %arg3[%c1_96, %c64_97, %c0_98] : memref<2x128x128xbf16, #tpu.memory_space<vmem>>, vector<1x32x128xbf16>
    %291 = vector.shape_cast %290 : vector<1x32x128xbf16> to vector<32x128xbf16>
    %cst_99 = arith.constant dense<0.000000e+00> : vector<128x128xf32>
    %292 = tpu.matmul %289, %291, %cst_99 {dimension_numbers = #tpu.dot_dimension_numbers<[1], [0], [0], [1], [0, 0, 1, 1], [], []>} : vector<128x32xbf16>, vector<32x128xbf16>, vector<128x128xf32> -> vector<128x128xf32>
    %293 = arith.addf %264, %292 : vector<128x128xf32>
    %294 = vector.extract_strided_slice %204 {offsets = [0, 96], sizes = [128, 32], strides = [1, 1]} : vector<128x384xf32> to vector<128x32xf32>
    %295 = arith.truncf %294 : vector<128x32xf32> to vector<128x32xbf16>
    %296 = vector.extract_strided_slice %204 {offsets = [0, 224], sizes = [128, 32], strides = [1, 1]} : vector<128x384xf32> to vector<128x32xf32>
    %297 = arith.truncf %296 : vector<128x32xf32> to vector<128x32xbf16>
    %298 = vector.extract_strided_slice %204 {offsets = [0, 352], sizes = [128, 32], strides = [1, 1]} : vector<128x384xf32> to vector<128x32xf32>
    %299 = arith.truncf %298 : vector<128x32xf32> to vector<128x32xbf16>
    %cst_100 = arith.constant dense<0.000000e+00> : vector<128x128xf32>
    %300 = tpu.matmul %295, %297, %cst_100 {dimension_numbers = #tpu.dot_dimension_numbers<[1], [1], [0], [0], [0, 0, 1, 0], [], []>} : vector<128x32xbf16>, vector<128x32xbf16>, vector<128x128xf32> -> vector<128x128xf32>
    %301 = vector.broadcast %3 : vector<128x1xi32> to vector<128x128xi32>
    %302 = vector.broadcast %6 : vector<1x128xi32> to vector<128x128xi32>
    %303 = arith.cmpi eq, %301, %302 : vector<128x128xi32>
    %cst_101 = arith.constant -1.000000e+30 : f32
    %304 = vector.broadcast %cst_101 : f32 to vector<128x128xf32>
    %305 = arith.select %303, %300, %304 : vector<128x128xi1>, vector<128x128xf32>
    %cst_102 = arith.constant dense<0xFF800000> : vector<128xf32>
    %306 = vector.multi_reduction <maximumf>, %305, %cst_102 [1] : vector<128x128xf32> to vector<128xf32>
    %307 = vector.shape_cast %306 : vector<128xf32> to vector<128x1xf32>
    %308 = vector.broadcast %307 : vector<128x1xf32> to vector<128x128xf32>
    %309 = arith.subf %305, %308 : vector<128x128xf32>
    %310 = math.exp %309 : vector<128x128xf32>
    %cst_103 = arith.constant dense<0.000000e+00> : vector<128xf32>
    %311 = vector.multi_reduction <add>, %310, %cst_103 [1] : vector<128x128xf32> to vector<128xf32>
    %312 = vector.shape_cast %311 : vector<128xf32> to vector<128x1xf32>
    %313 = tpu.reciprocal %312 {approx = true} : vector<128x1xf32> -> vector<128x1xf32>
    %314 = vector.broadcast %313 : vector<128x1xf32> to vector<128x128xf32>
    %315 = arith.mulf %310, %314 : vector<128x128xf32>
    %316 = arith.truncf %315 : vector<128x128xf32> to vector<128x128xbf16>
    %cst_104 = arith.constant dense<0.000000e+00> : vector<128x32xf32>
    %317 = tpu.matmul %316, %299, %cst_104 {dimension_numbers = #tpu.dot_dimension_numbers<[1], [0], [0], [1], [0, 0, 1, 1], [], []>} : vector<128x128xbf16>, vector<128x32xbf16>, vector<128x32xf32> -> vector<128x32xf32>
    %318 = arith.truncf %317 : vector<128x32xf32> to vector<128x32xbf16>
    %c1_105 = arith.constant 1 : index
    %c96_106 = arith.constant 96 : index
    %c0_107 = arith.constant 0 : index
    %319 = vector.load %arg3[%c1_105, %c96_106, %c0_107] : memref<2x128x128xbf16, #tpu.memory_space<vmem>>, vector<1x32x128xbf16>
    %320 = vector.shape_cast %319 : vector<1x32x128xbf16> to vector<32x128xbf16>
    %cst_108 = arith.constant dense<0.000000e+00> : vector<128x128xf32>
    %321 = tpu.matmul %318, %320, %cst_108 {dimension_numbers = #tpu.dot_dimension_numbers<[1], [0], [0], [1], [0, 0, 1, 1], [], []>} : vector<128x32xbf16>, vector<32x128xbf16>, vector<128x128xf32> -> vector<128x128xf32>
    %322 = arith.addf %293, %321 : vector<128x128xf32>
    %323 = arith.addf %197, %322 : vector<128x128xf32>
    %c1_109 = arith.constant 1 : index
    %c512_110 = arith.constant 512 : index
    %324 = vector.load %arg6[%c1_109, %c512_110] : memref<2x1408xf32, #tpu.memory_space<vmem>>, vector<1x128xf32>
    %c1_111 = arith.constant 1 : index
    %c640_112 = arith.constant 640 : index
    %325 = vector.load %arg6[%c1_111, %c640_112] : memref<2x1408xf32, #tpu.memory_space<vmem>>, vector<1x128xf32>
    %cst_113 = arith.constant dense<0.000000e+00> : vector<128xf32>
    %326 = vector.multi_reduction <add>, %323, %cst_113 [1] : vector<128x128xf32> to vector<128xf32>
    %327 = vector.shape_cast %326 : vector<128xf32> to vector<128x1xf32>
    %cst_114 = arith.constant 1.280000e+02 : f32
    %328 = vector.broadcast %cst_114 : f32 to vector<128x1xf32>
    %329 = arith.divf %327, %328 : vector<128x1xf32>
    %330 = vector.broadcast %329 : vector<128x1xf32> to vector<128x128xf32>
    %331 = arith.subf %323, %330 : vector<128x128xf32>
    %332 = arith.mulf %331, %331 : vector<128x128xf32>
    %cst_115 = arith.constant dense<0.000000e+00> : vector<128xf32>
    %333 = vector.multi_reduction <add>, %332, %cst_115 [1] : vector<128x128xf32> to vector<128xf32>
    %334 = vector.shape_cast %333 : vector<128xf32> to vector<128x1xf32>
    %cst_116 = arith.constant 1.280000e+02 : f32
    %335 = vector.broadcast %cst_116 : f32 to vector<128x1xf32>
    %336 = arith.divf %334, %335 : vector<128x1xf32>
    %337 = vector.broadcast %329 : vector<128x1xf32> to vector<128x128xf32>
    %338 = arith.subf %323, %337 : vector<128x128xf32>
    %cst_117 = arith.constant 9.99999974E-6 : f32
    %339 = vector.broadcast %cst_117 : f32 to vector<128x1xf32>
    %340 = arith.addf %336, %339 : vector<128x1xf32>
    %341 = math.rsqrt %340 : vector<128x1xf32>
    %342 = vector.broadcast %341 : vector<128x1xf32> to vector<128x128xf32>
    %343 = arith.mulf %338, %342 : vector<128x128xf32>
    %344 = vector.broadcast %324 : vector<1x128xf32> to vector<128x128xf32>
    %345 = arith.mulf %343, %344 : vector<128x128xf32>
    %346 = vector.broadcast %325 : vector<1x128xf32> to vector<128x128xf32>
    %347 = arith.addf %345, %346 : vector<128x128xf32>
    %348 = arith.truncf %347 : vector<128x128xf32> to vector<128x128xbf16>
    %c1_118 = arith.constant 1 : index
    %c0_119 = arith.constant 0 : index
    %c0_120 = arith.constant 0 : index
    %349 = vector.load %arg4[%c1_118, %c0_119, %c0_120] : memref<2x128x256xbf16, #tpu.memory_space<vmem>>, vector<1x128x256xbf16>
    %350 = vector.shape_cast %349 : vector<1x128x256xbf16> to vector<128x256xbf16>
    %cst_121 = arith.constant dense<0.000000e+00> : vector<128x256xf32>
    %351 = tpu.matmul %348, %350, %cst_121 {dimension_numbers = #tpu.dot_dimension_numbers<[1], [0], [0], [1], [0, 0, 1, 1], [], []>} : vector<128x128xbf16>, vector<128x256xbf16>, vector<128x256xf32> -> vector<128x256xf32>
    %c1_122 = arith.constant 1 : index
    %c768_123 = arith.constant 768 : index
    %352 = vector.load %arg6[%c1_122, %c768_123] : memref<2x1408xf32, #tpu.memory_space<vmem>>, vector<1x256xf32>
    %353 = vector.broadcast %352 : vector<1x256xf32> to vector<128x256xf32>
    %354 = arith.addf %351, %353 : vector<128x256xf32>
    %cst_124 = arith.constant 0.000000e+00 : f32
    %355 = vector.broadcast %cst_124 : f32 to vector<128x256xf32>
    %356 = arith.maximumf %354, %355 : vector<128x256xf32>
    %357 = arith.truncf %356 : vector<128x256xf32> to vector<128x256xbf16>
    %c1_125 = arith.constant 1 : index
    %c0_126 = arith.constant 0 : index
    %c0_127 = arith.constant 0 : index
    %358 = vector.load %arg5[%c1_125, %c0_126, %c0_127] : memref<2x256x128xbf16, #tpu.memory_space<vmem>>, vector<1x256x128xbf16>
    %359 = vector.shape_cast %358 : vector<1x256x128xbf16> to vector<256x128xbf16>
    %cst_128 = arith.constant dense<0.000000e+00> : vector<128x128xf32>
    %360 = tpu.matmul %357, %359, %cst_128 {dimension_numbers = #tpu.dot_dimension_numbers<[1], [0], [0], [1], [0, 0, 1, 1], [], []>} : vector<128x256xbf16>, vector<256x128xbf16>, vector<128x128xf32> -> vector<128x128xf32>
    %c1_129 = arith.constant 1 : index
    %c1024_130 = arith.constant 1024 : index
    %361 = vector.load %arg6[%c1_129, %c1024_130] : memref<2x1408xf32, #tpu.memory_space<vmem>>, vector<1x128xf32>
    %362 = vector.broadcast %361 : vector<1x128xf32> to vector<128x128xf32>
    %363 = arith.addf %360, %362 : vector<128x128xf32>
    %364 = arith.addf %347, %363 : vector<128x128xf32>
    %c1_131 = arith.constant 1 : index
    %c1152_132 = arith.constant 1152 : index
    %365 = vector.load %arg6[%c1_131, %c1152_132] : memref<2x1408xf32, #tpu.memory_space<vmem>>, vector<1x128xf32>
    %c1_133 = arith.constant 1 : index
    %c1280_134 = arith.constant 1280 : index
    %366 = vector.load %arg6[%c1_133, %c1280_134] : memref<2x1408xf32, #tpu.memory_space<vmem>>, vector<1x128xf32>
    %cst_135 = arith.constant dense<0.000000e+00> : vector<128xf32>
    %367 = vector.multi_reduction <add>, %364, %cst_135 [1] : vector<128x128xf32> to vector<128xf32>
    %368 = vector.shape_cast %367 : vector<128xf32> to vector<128x1xf32>
    %cst_136 = arith.constant 1.280000e+02 : f32
    %369 = vector.broadcast %cst_136 : f32 to vector<128x1xf32>
    %370 = arith.divf %368, %369 : vector<128x1xf32>
    %371 = vector.broadcast %370 : vector<128x1xf32> to vector<128x128xf32>
    %372 = arith.subf %364, %371 : vector<128x128xf32>
    %373 = arith.mulf %372, %372 : vector<128x128xf32>
    %cst_137 = arith.constant dense<0.000000e+00> : vector<128xf32>
    %374 = vector.multi_reduction <add>, %373, %cst_137 [1] : vector<128x128xf32> to vector<128xf32>
    %375 = vector.shape_cast %374 : vector<128xf32> to vector<128x1xf32>
    %cst_138 = arith.constant 1.280000e+02 : f32
    %376 = vector.broadcast %cst_138 : f32 to vector<128x1xf32>
    %377 = arith.divf %375, %376 : vector<128x1xf32>
    %378 = vector.broadcast %370 : vector<128x1xf32> to vector<128x128xf32>
    %379 = arith.subf %364, %378 : vector<128x128xf32>
    %cst_139 = arith.constant 9.99999974E-6 : f32
    %380 = vector.broadcast %cst_139 : f32 to vector<128x1xf32>
    %381 = arith.addf %377, %380 : vector<128x1xf32>
    %382 = math.rsqrt %381 : vector<128x1xf32>
    %383 = vector.broadcast %382 : vector<128x1xf32> to vector<128x128xf32>
    %384 = arith.mulf %379, %383 : vector<128x128xf32>
    %385 = vector.broadcast %365 : vector<1x128xf32> to vector<128x128xf32>
    %386 = arith.mulf %384, %385 : vector<128x128xf32>
    %387 = vector.broadcast %366 : vector<1x128xf32> to vector<128x128xf32>
    %388 = arith.addf %386, %387 : vector<128x128xf32>
    %c0_140 = arith.constant 0 : index
    %c0_141 = arith.constant 0 : index
    %389 = vector.load %arg9[%c0_140, %c0_141] : memref<2x128xf32, #tpu.memory_space<vmem>>, vector<1x64xf32>
    %390 = vector.extract_strided_slice %388 {offsets = [0, 0], sizes = [32, 128], strides = [1, 1]} : vector<128x128xf32> to vector<32x128xf32>
    %391 = arith.truncf %390 : vector<32x128xf32> to vector<32x128xbf16>
    %c0_142 = arith.constant 0 : index
    %c0_143 = arith.constant 0 : index
    %c0_144 = arith.constant 0 : index
    %392 = vector.load %arg7[%c0_142, %c0_143, %c0_144] : memref<4x128x64xbf16, #tpu.memory_space<vmem>>, vector<1x128x64xbf16>
    %393 = vector.shape_cast %392 : vector<1x128x64xbf16> to vector<128x64xbf16>
    %cst_145 = arith.constant dense<0.000000e+00> : vector<32x64xf32>
    %394 = tpu.matmul %391, %393, %cst_145 {dimension_numbers = #tpu.dot_dimension_numbers<[1], [0], [0], [1], [0, 0, 1, 1], [], []>} : vector<32x128xbf16>, vector<128x64xbf16>, vector<32x64xf32> -> vector<32x64xf32>
    %395 = vector.broadcast %389 : vector<1x64xf32> to vector<32x64xf32>
    %396 = arith.addf %395, %394 : vector<32x64xf32>
    %397 = vector.extract_strided_slice %388 {offsets = [32, 0], sizes = [32, 128], strides = [1, 1]} : vector<128x128xf32> to vector<32x128xf32>
    %398 = arith.truncf %397 : vector<32x128xf32> to vector<32x128xbf16>
    %c1_146 = arith.constant 1 : index
    %c0_147 = arith.constant 0 : index
    %c0_148 = arith.constant 0 : index
    %399 = vector.load %arg7[%c1_146, %c0_147, %c0_148] : memref<4x128x64xbf16, #tpu.memory_space<vmem>>, vector<1x128x64xbf16>
    %400 = vector.shape_cast %399 : vector<1x128x64xbf16> to vector<128x64xbf16>
    %cst_149 = arith.constant dense<0.000000e+00> : vector<32x64xf32>
    %401 = tpu.matmul %398, %400, %cst_149 {dimension_numbers = #tpu.dot_dimension_numbers<[1], [0], [0], [1], [0, 0, 1, 1], [], []>} : vector<32x128xbf16>, vector<128x64xbf16>, vector<32x64xf32> -> vector<32x64xf32>
    %402 = arith.addf %396, %401 : vector<32x64xf32>
    %403 = vector.extract_strided_slice %388 {offsets = [64, 0], sizes = [32, 128], strides = [1, 1]} : vector<128x128xf32> to vector<32x128xf32>
    %404 = arith.truncf %403 : vector<32x128xf32> to vector<32x128xbf16>
    %c2 = arith.constant 2 : index
    %c0_150 = arith.constant 0 : index
    %c0_151 = arith.constant 0 : index
    %405 = vector.load %arg7[%c2, %c0_150, %c0_151] : memref<4x128x64xbf16, #tpu.memory_space<vmem>>, vector<1x128x64xbf16>
    %406 = vector.shape_cast %405 : vector<1x128x64xbf16> to vector<128x64xbf16>
    %cst_152 = arith.constant dense<0.000000e+00> : vector<32x64xf32>
    %407 = tpu.matmul %404, %406, %cst_152 {dimension_numbers = #tpu.dot_dimension_numbers<[1], [0], [0], [1], [0, 0, 1, 1], [], []>} : vector<32x128xbf16>, vector<128x64xbf16>, vector<32x64xf32> -> vector<32x64xf32>
    %408 = arith.addf %402, %407 : vector<32x64xf32>
    %409 = vector.extract_strided_slice %388 {offsets = [96, 0], sizes = [32, 128], strides = [1, 1]} : vector<128x128xf32> to vector<32x128xf32>
    %410 = arith.truncf %409 : vector<32x128xf32> to vector<32x128xbf16>
    %c3 = arith.constant 3 : index
    %c0_153 = arith.constant 0 : index
    %c0_154 = arith.constant 0 : index
    %411 = vector.load %arg7[%c3, %c0_153, %c0_154] : memref<4x128x64xbf16, #tpu.memory_space<vmem>>, vector<1x128x64xbf16>
    %412 = vector.shape_cast %411 : vector<1x128x64xbf16> to vector<128x64xbf16>
    %cst_155 = arith.constant dense<0.000000e+00> : vector<32x64xf32>
    %413 = tpu.matmul %410, %412, %cst_155 {dimension_numbers = #tpu.dot_dimension_numbers<[1], [0], [0], [1], [0, 0, 1, 1], [], []>} : vector<32x128xbf16>, vector<128x64xbf16>, vector<32x64xf32> -> vector<32x64xf32>
    %414 = arith.addf %408, %413 : vector<32x64xf32>
    %cst_156 = arith.constant 0.000000e+00 : f32
    %415 = vector.broadcast %cst_156 : f32 to vector<32x64xf32>
    %416 = arith.maximumf %414, %415 : vector<32x64xf32>
    %417 = arith.truncf %416 : vector<32x64xf32> to vector<32x64xbf16>
    %c0_157 = arith.constant 0 : index
    %c0_158 = arith.constant 0 : index
    %418 = vector.load %arg8[%c0_157, %c0_158] : memref<64x128xbf16, #tpu.memory_space<vmem>>, vector<64x128xbf16>
    %cst_159 = arith.constant dense<0.000000e+00> : vector<32x128xf32>
    %419 = tpu.matmul %417, %418, %cst_159 {dimension_numbers = #tpu.dot_dimension_numbers<[1], [0], [0], [1], [0, 0, 1, 1], [], []>} : vector<32x64xbf16>, vector<64x128xbf16>, vector<32x128xf32> -> vector<32x128xf32>
    %c1_160 = arith.constant 1 : index
    %c0_161 = arith.constant 0 : index
    %420 = vector.load %arg9[%c1_160, %c0_161] : memref<2x128xf32, #tpu.memory_space<vmem>>, vector<1x128xf32>
    %421 = vector.broadcast %420 : vector<1x128xf32> to vector<32x128xf32>
    %422 = arith.addf %419, %421 : vector<32x128xf32>
    %c0_162 = arith.constant 0 : index
    %c0_163 = arith.constant 0 : index
    %423 = vector.load %arg10[%c0_162, %c0_163] : memref<32x128xf32, #tpu.memory_space<vmem>>, vector<32x128xf32>
    tpu.vector_store %arg10[%c0_162, %c0_163], %422 {strides = array<i32>} : memref<32x128xf32, #tpu.memory_space<vmem>>, vector<32x128xf32>,
    return
  }
  func.func @transform_0(%arg0: i32) -> (i32, i32) {
    %c0_i32 = arith.constant 0 : i32
    %c0_i32_0 = arith.constant 0 : i32
    return %arg0, %c0_i32 : i32, i32
  }
  func.func @transform_1(%arg0: i32) -> (i32, i32, i32) {
    %c0_i32 = arith.constant 0 : i32
    %c0_i32_0 = arith.constant 0 : i32
    %c0_i32_1 = arith.constant 0 : i32
    %c0_i32_2 = arith.constant 0 : i32
    return %c0_i32, %c0_i32_0, %c0_i32_1 : i32, i32, i32
  }
  func.func @transform_2(%arg0: i32) -> (i32, i32, i32) {
    %c0_i32 = arith.constant 0 : i32
    %c0_i32_0 = arith.constant 0 : i32
    %c0_i32_1 = arith.constant 0 : i32
    %c0_i32_2 = arith.constant 0 : i32
    return %c0_i32, %c0_i32_0, %c0_i32_1 : i32, i32, i32
  }
  func.func @transform_3(%arg0: i32) -> (i32, i32, i32) {
    %c0_i32 = arith.constant 0 : i32
    %c0_i32_0 = arith.constant 0 : i32
    %c0_i32_1 = arith.constant 0 : i32
    %c0_i32_2 = arith.constant 0 : i32
    return %c0_i32, %c0_i32_0, %c0_i32_1 : i32, i32, i32
  }
  func.func @transform_4(%arg0: i32) -> (i32, i32, i32) {
    %c0_i32 = arith.constant 0 : i32
    %c0_i32_0 = arith.constant 0 : i32
    %c0_i32_1 = arith.constant 0 : i32
    %c0_i32_2 = arith.constant 0 : i32
    return %c0_i32, %c0_i32_0, %c0_i32_1 : i32, i32, i32
  }
  func.func @transform_5(%arg0: i32) -> (i32, i32) {
    %c0_i32 = arith.constant 0 : i32
    %c0_i32_0 = arith.constant 0 : i32
    %c0_i32_1 = arith.constant 0 : i32
    return %c0_i32, %c0_i32_0 : i32, i32
  }
  func.func @transform_6(%arg0: i32) -> (i32, i32, i32) {
    %c0_i32 = arith.constant 0 : i32
    %c0_i32_0 = arith.constant 0 : i32
    %c0_i32_1 = arith.constant 0 : i32
    %c0_i32_2 = arith.constant 0 : i32
    return %c0_i32, %c0_i32_0, %c0_i32_1 : i32, i32, i32
  }
  func.func @transform_7(%arg0: i32) -> (i32, i32) {
    %c0_i32 = arith.constant 0 : i32
    %c0_i32_0 = arith.constant 0 : i32
    %c0_i32_1 = arith.constant 0 : i32
    return %c0_i32, %c0_i32_0 : i32, i32
  }
  func.func @transform_8(%arg0: i32) -> (i32, i32) {
    %c0_i32 = arith.constant 0 : i32
    %c0_i32_0 = arith.constant 0 : i32
    %c0_i32_1 = arith.constant 0 : i32
    return %c0_i32, %c0_i32_0 : i32, i32
  }
  func.func @transform_9(%arg0: i32) -> (i32, i32) {
    %c0_i32 = arith.constant 0 : i32
    %c0_i32_0 = arith.constant 0 : i32
    return %arg0, %c0_i32 : i32, i32
  }
}

</mosaic_0001>

<bundles_post_ra>
// kernel: tpu_custom_call.1
= control target key start
LH: loop header
LB: loop body
LE: loop exit
PB: predicated region body
PF: predicated region fallthrough
CT: control target
= control target key end

     0   :  { %s16464_s0 = inlined_call_operand.hbm [shape: f32[256,128], index: 0, kind: input, shape index: {}]   ;;  %s16465_s1 = inlined_call_operand.vmem [shape: bf16[2,128,384], index: 1, kind: input, shape index: {}]   ;;  %s16466_s2 = inlined_call_operand.hbm [shape: bf16[2,128,128], index: 2, kind: input, shape index: {}]   ;;  %s16467_s3 = inlined_call_operand.hbm [shape: bf16[2,128,256], index: 3, kind: input, shape index: {}]   ;;  %s16468_s4 = inlined_call_operand.hbm [shape: bf16[2,256,128], index: 4, kind: input, shape index: {}]   ;;  %s16469_s5 = inlined_call_operand.hbm [shape: f32[2,1408], index: 5, kind: input, shape index: {}]   ;;  %s16470_s6 = inlined_call_operand.vmem [shape: bf16[4,128,64], index: 6, kind: input, shape index: {}]   ;;  %s16471_s7 = inlined_call_operand.hbm [shape: bf16[64,128], index: 7, kind: input, shape index: {}]   ;;  %s16472_s8 = inlined_call_operand.vmem [shape: f32[2,128], index: 8, kind: input, shape index: {}]   ;;  %s16473_s9 = inlined_call_operand.hbm [shape: f32[64,128], index: 9, kind: output, shape index: {}]  }
   0x1   :  { %16612 = sst [smem:[#allocation60_spill]] %s16466_s2 }
   0x2   :  { %16613 = sst [smem:[#allocation61_spill]] %s16467_s3 }
   0x3   :  { %16614 = sst [smem:[#allocation62_spill]] %s16468_s4 }
   0x4   :  { %14 = vsyncpa [#allocation3], 0 }
   0x5   :  { %16 = vsyncpa [#allocation3 + $0x1], 0 }
   0x6   :  { %17 = vsyncpa [#allocation6], 0 }
   0x7   :  { %18 = vsyncpa [#allocation9], 0 }
   0x8   :  { %19 = vsyncpa [#allocation12], 0 }
   0x9   :  { %20 = vsyncpa [#allocation4], 0 }
   0xa   :  { %22 = vsyncpa [#allocation4 + $0x1], 0  ;;  %s12085_s30 = smov 0   ;;  %s12087_s10 = smov 0  }
   0xb   :  { %s12089_s11 = smov 0   ;;  %s12091_s12 = smov 0  }
   0xc LB: > { %s12018_s13 = smov [#allocation5]   ;;  %s12106_s15 = sadd.s32 4294967295, %s12016_s12   ;;  %s12016_s12 = sphi %s12091_s12, %s17017_s12   ;;  %s12012_s11 = sphi %s12089_s11, %s17016_s11   ;;  %s12008_s10 = sphi %s12087_s10, %s17015_s10   ;;  %s12004_s30 = sphi %s12085_s30, %s17014_s30  }
   0xd   : > { %s268_s14 = sshll.u32 %s12018_s13, 4  ;;  %p8975_p0 = scmp.ge.s32.totalorder %s12016_s12, 1  ;;  %s269_s14 = int_to_ptr.vmem [resolvable:$true] %s268_s14 }
   0xe   : > { %p16474_p1 = scmp.eq.s32.totalorder %s12106_s15, 0  ;;  %p253_p2 = scmp.lt.s32.totalorder %s12016_s12, 3 }
   0xf   : > { %s12019_s17 = smov [#allocation8]   ;;  %s12020_s20 = smov [#allocation7]  }
  0x10   : > { %p12111_p3 = pnand %p8975_p0, %p253_p2  ;;  %s294_s18 = sshll.u32 %s12019_s17, 4  ;;  %s12124_s18 = int_to_ptr.vmem [resolvable:$true] %s294_s18 }
  0x11   : > { %s281_s21 = sshll.u32 %s12020_s20, 4  ;;  %s11793_s23 = scalar_lea.vmem %s269_s14, 2048  ;;  %s12126_s21 = int_to_ptr.vmem [resolvable:$true] %s281_s21 }
  0x12   : > { %s16615_s16 = scalar_select %p12111_p3, 1, 0 }
  0x13   : > { %p10846_p5 = pneg %p12111_p3  ;;  %p11794_p8 = scmp.ne.s32.totalorder %s269_s14, %s11793_s23 }
  0x14   : > { %p11801_p11 = scmp.lt.s32.totalorder %s269_s14, %s269_s14  ;;  %p11802_p12 = scmp.lt.s32.totalorder %s11793_s23, %s11793_s23 }
  0x15   : > { %p12120_p6 = pnand %p10846_p5, %p16474_p1 }
  0x16   : > { %p11803_p13 = por %p11802_p12, %p11801_p11 }
  0x17   : > { %p12130_p7 = pneg %p12120_p6 }
  0x19   : > { %p11796_p9 = pnand %p11794_p8, %p12130_p7 }
  0x1b   : > { %p11797_p10 = pneg %p11796_p9 }
  0x1d   : > { %p11804_p0 = pnand %p11803_p13, %p11797_p10 }
  0x1f   : > { %11807 = shalt.err (!%p11804_p0)
}
  0x20   : > { %s12021_s24 = smov 64   ;;  %s12022_s25 = smov 4  }
  0x21   : > { %s16618_s2 = sld [smem:[#allocation60_spill]]  ;;  %s11819_s28 = scalar_lea.vmem %s12124_s18, 4096 }
  0x22   : > { %p11820_p2 = scmp.ne.s32.totalorder %s12124_s18, %s11819_s28  ;;  %p11827_p9 = scmp.lt.s32.totalorder %s12124_s18, %s12124_s18 }
  0x23   : > { %p11828_p10 = scmp.lt.s32.totalorder %s11819_s28, %s11819_s28 }
  0x24   : > { %p11822_p5 = pnand %p11820_p2, %p12130_p7 }
  0x25   : > { %p11829_p11 = por %p11828_p10, %p11827_p9 }
  0x26   : > { %p11823_p8 = pneg %p11822_p5 }
  0x27   : > { %10849 = dma.hbm_to_vmem [thread:$0]  (!%p12120_p6), %s16618_s2, 2048, %s269_s14, [#allocation6], %s12021_s24, %s12021_s24, %s12022_s25  }
  0x28   : > { %p11830_p12 = pnand %p11829_p11, %p11823_p8 }
  0x2a   : > { %11833 = shalt.err (!%p11830_p12)
}
  0x2b   : > { %s16619_s4 = sld [smem:[#allocation62_spill]]  ;;  %s11845_s14 = scalar_lea.vmem %s12126_s21, 4096 }
  0x2c   : > { %p11846_p13 = scmp.ne.s32.totalorder %s12126_s21, %s11845_s14  ;;  %p11853_p5 = scmp.lt.s32.totalorder %s12126_s21, %s12126_s21 }
  0x2d   : > { %p11854_p8 = scmp.lt.s32.totalorder %s11845_s14, %s11845_s14 }
  0x2e   : > { %p11848_p0 = pnand %p11846_p13, %p12130_p7 }
  0x2f   : > { %p11855_p9 = por %p11854_p8, %p11853_p5 }
  0x30   : > { %p11849_p2 = pneg %p11848_p0 }
  0x31   : > { %10855 = dma.hbm_to_vmem [thread:$0]  (!%p12120_p6), %s16619_s4, 4096, %s12124_s18, [#allocation9], %s12021_s24, %s12021_s24, %s12022_s25  }
  0x32   : > { %p11856_p10 = pnand %p11855_p9, %p11849_p2 }
  0x34   : > { %11859 = shalt.err (!%p11856_p10)
}
  0x35   : > { %s16476_s17 = smov 128   ;;  %s16477_s20 = smov 8  }
  0x36   : > { %s16620_s3 = sld [smem:[#allocation61_spill]]  ;;  %s12025_s26 = smov [#allocation10]  }
  0x37   : > { %s308_s27 = sshll.u32 %s12025_s26, 4  ;;  %s12026_s28 = smov [#allocation11]   ;;  %s309_s27 = int_to_ptr.vmem [resolvable:$true] %s308_s27 }
  0x38   : > { %s321_s29 = sshll.u32 %s12026_s28, 4  ;;  %s11871_s13 = scalar_lea.vmem %s309_s27, 352  ;;  %s322_s29 = int_to_ptr.vmem [resolvable:$true] %s321_s29 }
  0x39   : > { %p11872_p11 = scmp.ne.s32.totalorder %s309_s27, %s11871_s13  ;;  %p11879_p0 = scmp.lt.s32.totalorder %s309_s27, %s309_s27 }
  0x3a   : > { %p11880_p2 = scmp.lt.s32.totalorder %s11871_s13, %s11871_s13 }
  0x3b   : > { %p11874_p12 = pnand %p11872_p11, %p12130_p7 }
  0x3c   : > { %10852 = dma.hbm_to_vmem [thread:$0]  (!%p12120_p6), %s16620_s3, 4096, %s12126_s21, [#allocation6], %s16476_s17, %s16476_s17, %s16477_s20  }
  0x3d   : > { %p11875_p13 = pneg %p11874_p12  ;;  %p11881_p5 = por %p11880_p2, %p11879_p0 }
  0x3f   : > { %p11882_p8 = pnand %p11881_p5, %p11875_p13 }
  0x41   : > { %11885 = shalt.err (!%p11882_p8)
}
  0x42   : > { %10858 = dma.hbm_to_vmem [thread:$0]  (!%p12120_p6), %s16469_s5, 352, %s309_s27, [#allocation9]  }
  0x43   : > { %s11897_s21 = scalar_lea.vmem %s322_s29, 512  ;;  %p11905_p11 = scmp.lt.s32.totalorder %s322_s29, %s322_s29 }
  0x44   : > { %p11898_p9 = scmp.ne.s32.totalorder %s322_s29, %s11897_s21  ;;  %p11906_p12 = scmp.lt.s32.totalorder %s11897_s21, %s11897_s21 }
  0x46   : > { %p11900_p10 = pnand %p11898_p9, %p12130_p7  ;;  %p11907_p1 = por %p11906_p12, %p11905_p11 }
  0x48   : > { %p11901_p4 = pneg %p11900_p10 }
  0x4a   : > { %p11908_p3 = pnand %p11907_p1, %p11901_p4 }
  0x4c   : > { %11911 = shalt.err (!%p11908_p3)
}
  0x4d   : > { %10861 = dma.hbm_to_vmem [thread:$0]  (!%p12120_p6), %s16471_s7, 512, %s322_s29, [#allocation12], %s12021_s24, %s12021_s24, %s12022_s25  }
  0x4e   : > { %s8974_s19 = sadd.s32 4294967294, %s12016_s12   ;;  %s12193_s22 = sadd.s32 1, %s12016_s12  }
  0x4f   : > { %s35_s27 = sadd.s32 1, %s12012_s11  ;;  %s32_s28 = ssub.s32 %s12016_s12, %s12193_s22 }
  0x50   : > { %p42_p1 = scmp.ne.s32.totalorder %s12012_s11, %s12008_s10  ;;  %p33_p3 = scmp.eq.s32.totalorder %s32_s28, 0 }
  0x51   : > { %p43_p4 = scmp.eq.s32.totalorder %s12016_s12, 0  ;;  %p48_p7 = scmp.ne.s32.totalorder %s12008_s10, %s12004_s30 }
  0x52   : > { %p240_p13 = scmp.eq.s32.totalorder %s12106_s15, 1  ;;  %p16621_p2 = scmp.eq.s32.totalorder %s12106_s15, 0 }
  0x53   : > { %s12205_s13 = scalar_select %p33_p3, %s12012_s11, %s35_s27  }
  0x54   : > { %p44_p0 = por %p43_p4, %p42_p1  ;;  %p12209_p5 = por %p16621_p2, %p48_p7 }
  0x55   : > { %p12213_p6 = por %p240_p13, %p42_p1  ;;  %p246_p8 = scmp.eq.s32.totalorder %s8974_s19, 1 }
  0x56   : > { %s16622_s14 = scalar_select %p12209_p5, 1, 0 }
  0x57   : > { %s16623_s24 = scalar_select %p12213_p6, 1, 0 }
  0x58   : > { %p10875_p9 = scmp.lt.s32.totalorder %s12016_s12, 2  ;;  %s338_s25 = sand.u32 1, %s12012_s11  }
  0x59   : > { %p12219_p10 = por %p246_p8, %p48_p7  ;;  %s8982_s18 = sshll.u32 %s338_s25, 7 }
  0x5a   : > { %s9386_s21 = sshll.u32 %s12016_s12, 11  ;;  %s342_s28 = scalar_lea.vmem [#allocation2], %s8982_s18 }
  0x5b   : > { %s16624_s29 = scalar_select %p12219_p10, 1, 0 }
  0x5c   : > { %s12227_s27 = scalar_lea.hbm %s16464_s0, %s9386_s21  ;;  %s349_s17 = sshll.u32 %s342_s28, 4  ;;  %s12233_s17 = int_to_ptr.vmem [resolvable:$true] %s349_s17 }
  0x5d   : > { %p12229_p11 = pnand %p10875_p9, %p44_p0  ;;  %s12235_s20 = scalar_lea.sflag [#allocation3], %s338_s25 }
  0x5e   : > { %s11912_s2 = scalar_lea.hbm %s12227_s27, 2048  ;;  %s11917_s18 = scalar_lea.hbm %s16464_s0, 4096 }
  0x5f   : > { %p11913_p12 = scmp.ne.s32.totalorder %s12227_s27, %s11912_s2  ;;  %p11914_p1 = pneg %p12229_p11 }
  0x60   : > { %p11918_p7 = scmp.lt.s32.totalorder %s12227_s27, %s16464_s0  ;;  %p11919_p13 = scmp.lt.s32.totalorder %s11917_s18, %s11912_s2 }
  0x61   : > { %p11915_p3 = pnand %p11914_p1, %p11913_p12 }
  0x62   : > { %p11920_p0 = por %p11919_p13, %p11918_p7 }
  0x63   : > { %p11916_p4 = pneg %p11915_p3 }
  0x65   : > { %p11921_p2 = pnand %p11920_p0, %p11916_p4 }
  0x67   : > { %11924 = shalt.err (!%p11921_p2)
}
  0x68   : > { %s11925_s25 = scalar_lea.vmem %s12233_s17, 2048  ;;  %s12027_s3 = smov [#allocation2]  }
  0x69   : > { %p11926_p8 = scmp.ne.s32.totalorder %s12233_s17, %s11925_s25  ;;  %s11930_s4 = sshll.u32 %s12027_s3, 4  ;;  %s11931_s4 = int_to_ptr.vmem [resolvable:$false] %s11930_s4 }
  0x6a   : > { %s11932_s21 = scalar_lea.vmem %s11931_s4, 4096  ;;  %p11933_p3 = scmp.lt.s32.totalorder %s12233_s17, %s11931_s4 }
  0x6b   : > { %p11928_p9 = pnand %p11926_p8, %p11914_p1  ;;  %p11934_p10 = scmp.lt.s32.totalorder %s11932_s21, %s11925_s25 }
  0x6d   : > { %p11929_p12 = pneg %p11928_p9  ;;  %p11935_p6 = por %p11934_p10, %p11933_p3 }
  0x6f   : > { %p11936_p5 = pnand %p11935_p6, %p11929_p12 }
  0x71   : > { %11939 = shalt.err (!%p11936_p5)
}
  0x72   : > { %s16626_s2 = smov 8   ;;  %s16627_s23 = smov 128  }
  0x73   : > { %10865 = dma.hbm_to_vmem [thread:$0]  (!%p12229_p11), %s12227_s27, 2048, %s12233_s17, %s12235_s20, %s16627_s23, %s16627_s23, %s16626_s2  }
  0x74   : > { %p16628_p1 = scmp.ne.s32.totalorder %s16615_s16, 0 }
  0x76   : > { %361 = sbr.rel (%p16628_p1) target bundleno = 7119 (0x1bcf), region = 56 }
  0x7b   : > { %s12262_s3 = sand.u32 1, %s12008_s10   ;;  %p16629_p5 = scmp.ne.s32.totalorder %s16622_s14, 0 }
  0x7c   : > { %s8986_s4 = sshll.u32 %s12262_s3, 7  ;;  %s364_s18 = scalar_lea.sflag [#allocation3], %s12262_s3 }
  0x7d   : > { %s12266_s26 = scalar_lea.vmem [#allocation2], %s8986_s4 }
  0x7e   : > { %11983 = dma.done.wait (%p16629_p5), %s364_s18, 2048  }
  0x7f   : > { %11985 = vsyncadd (%p16629_p5), %s364_s18, 4294965248  ;;  %p16630_p6 = scmp.eq.s32.totalorder %s12106_s15, 0 }
  0x81   : > { %11987 = dma.done.wait (%p16630_p6), [#allocation6], 6144   ;;  %p16631_p10 = pmov %p16630_p6 }
  0x82   : > { %p16632_p11 = pmov %p16630_p6 }
  0x83   : > { %11989 = vsyncadd (%p16631_p10), [#allocation6], 4294961152 }
  0x84   : > { %11991 = dma.done.wait (%p16632_p11), [#allocation9], 4448   ;;  %p16633_p4 = pmov %p16630_p6 }
  0x86   : > { %11993 = vsyncadd (%p16633_p4), [#allocation9], 4294962848  ;;  %p16634_p7 = pmov %p16633_p4 }
  0x87   : > { %p16635_p13 = pmov %p16633_p4 }
  0x88   : > { %11995 = dma.done.wait (%p16634_p7), [#allocation12], 512  }
  0x89   : > { %11997 = vsyncadd (%p16635_p13), [#allocation12], 4294966784  ;;  %v16481_v0 = vmov 0   ;;  %v10929_v1 = vld [vmem:[%s16465_s1 + $0xac] ss:$12 sps:$4 sm:$0xff]   ;;  %v425_v8 = vld [vmem:[%s12266_s26] sm:$0xff]  ;;  %v441_v41 = vlaneseq }
  0x8a   : > { %694 = vmatprep.mubr.bf16.mxu0 %v16481_v0  ;;  %v10931_v2 = vld [vmem:[%s16465_s1 + $0xa8] ss:$12 sps:$4 sm:$0xff]   ;;  %662 = vmatprep.subr.bf16.mxu0 %v10929_v1  ;;  %v10934_v4 = vld [vmem:[%s16465_s1 + $0x90] ss:$12 sps:$4 sm:$0xff]   ;;  %v10937_v6 = vld [vmem:[%s16465_s1 + $0x78] ss:$12 sps:$4 sm:$0xff]  }
  0x8b   : > { %v10932_v3 = vld [vmem:[%s16465_s1 + $0x94] ss:$12 sps:$4 sm:$0xff]   ;;  %663 = vmatpush1.bf16.msra.mxu0 %v10931_v2  ;;  %v10935_v5 = vld [vmem:[%s16465_s1 + $0x7c] ss:$12 sps:$4 sm:$0xff]   ;;  %v10938_v7 = vld [vmem:[%s16465_s1 + $0x64] ss:$12 sps:$4 sm:$0xff]  }
  0x8c   : > { %664 = vmatprep.subr.bf16.mxu0 %v10932_v3  ;;  %v10940_v9 = vld [vmem:[%s16465_s1 + $0x60] ss:$12 sps:$4 sm:$0xff]   ;;  %v10943_v13 = vld [vmem:[%s16465_s1 + $0x48] ss:$12 sps:$4 sm:$0xff]   ;;  %v10946_v15 = vld [vmem:[%s16465_s1 + $0x30] ss:$12 sps:$4 sm:$0xff]  }
  0x8d   : > { %v426_v10 = vld [vmem:[%s12266_s26 + $0x8] sm:$0xff]  ;;  %v10944_v14 = vld [vmem:[%s16465_s1 + $0x34] ss:$12 sps:$4 sm:$0xff]   ;;  %v10949_v17 = vld [vmem:[%s16465_s1 + $0x18] ss:$12 sps:$4 sm:$0xff]   ;;  %v12378_v42 = vshrl.u32 %v441_v41, 7 }
  0x8e   : > { %v10941_v11 = vld [vmem:[%s16465_s1 + $0x4c] ss:$12 sps:$4 sm:$0xff]   ;;  %v477_v12 = vpack.c.bf16 %v426_v10, %v425_v8  ;;  %v10947_v16 = vld [vmem:[%s16465_s1 + $0x1c] ss:$12 sps:$4 sm:$0xff]   ;;  %v10950_v18 = vld [vmem:[%s16465_s1 + $0x4] ss:$12 sps:$4 sm:$0xff]  }
  0x8f   : > { %665 = vmatpush1.bf16.msra.mxu0 %v10934_v4  ;;  %v10952_v19 = vld [vmem:[%s16465_s1] ss:$12 sps:$4 sm:$0xff]   ;;  %v427_v20 = vld [vmem:[%s12266_s26 + $0x10] sm:$0xff]  ;;  %v428_v21 = vld [vmem:[%s12266_s26 + $0x18] sm:$0xff]  ;;  %16636 = vst [vmem:[#allocation19_spill] sm:$0xff] %v12378_v42  ;;  %v12381_v43 = vsub.s32 0, %v12378_v42 }
  0x90   : > { %666 = vmatprep.subr.bf16.mxu0 %v10935_v5  ;;  %9946 = vmatprep.mubr.bf16.mxu1 %v477_v12  ;;  %v12338_v22 = vpack.c.bf16 %v428_v21, %v427_v20  ;;  %v429_v23 = vld [vmem:[%s12266_s26 + $0x20] sm:$0xff]  ;;  %v430_v24 = vld [vmem:[%s12266_s26 + $0x28] sm:$0xff]  ;;  %v431_v26 = vld [vmem:[%s12266_s26 + $0x30] sm:$0xff]  ;;  %v12386_v45 = vsub.s32 1, %v12378_v42  ;;  %vm16480_vm0 = vcmask 261120   ;;  %s12029_s28 = smov 96  }
  0x91   : > { %v12344_v25 = vpack.c.bf16 %v430_v24, %v429_v23  ;;  %v432_v27 = vld [vmem:[%s12266_s26 + $0x38] sm:$0xff]  ;;  %v433_v29 = vld [vmem:[%s12266_s26 + $0x40] sm:$0xff]  ;;  %v434_v30 = vld [vmem:[%s12266_s26 + $0x48] sm:$0xff]  ;;  %16637 = vst [vmem:[#allocation20_spill] sm:$0xff] %v12381_v43  ;;  %s12030_s25 = smov 64   ;;  %s12031_s16 = smov 32  }
  0x92   : > { %v12350_v28 = vpack.c.bf16 %v432_v27, %v431_v26  ;;  %v12356_v31 = vpack.c.bf16 %v434_v30, %v433_v29  ;;  %v435_v32 = vld [vmem:[%s12266_s26 + $0x50] sm:$0xff]  ;;  %v436_v33 = vld [vmem:[%s12266_s26 + $0x58] sm:$0xff]  ;;  %v437_v35 = vld [vmem:[%s12266_s26 + $0x60] sm:$0xff]  ;;  %16638 = vst [vmem:[#allocation21_spill] sm:$0xff] %v12386_v45  ;;  %s8840_s21 = scalar_lea.sflag [#allocation4], %s12262_s3  ;;  %p17011_p2 = scmp.ne.s32.totalorder %s16623_s24, 0 }
  0x93   : > { %667 = vmatpush1.bf16.msra.mxu0 %v10937_v6  ;;  %v12362_v34 = vpack.c.bf16 %v436_v33, %v435_v32  ;;  %v438_v36 = vld [vmem:[%s12266_s26 + $0x68] sm:$0xff]  ;;  %v439_v38 = vld [vmem:[%s12266_s26 + $0x70] sm:$0xff]  ;;  %v440_v39 = vld [vmem:[%s12266_s26 + $0x78] sm:$0xff] }
  0x94   : > { %668 = vmatprep.subr.bf16.mxu0 %v10938_v7  ;;  %v12368_v37 = vpack.c.bf16 %v438_v36, %v437_v35  ;;  %v12374_v40 = vpack.c.bf16 %v440_v39, %v439_v38  ;;  %v12383_v44 = vld [vmem:[#allocation10] ss:$2 sm:$0x7] }
  0x95   : > { %v12390_v47 = vrot.slane %v12383_v44, %v12381_v43  ;;  %v12394_v49 = vrot.slane %v12383_v44, %v12386_v45 }
  0x97   : > { %669 = vmatpush1.bf16.msra.mxu0 %v10940_v9 }
  0x98   : > { %670 = vmatprep.subr.bf16.mxu0 %v10941_v11 }
  0x9b   : > { %671 = vmatpush1.bf16.msra.mxu0 %v10943_v13 }
  0x9c   : > { %672 = vmatprep.subr.bf16.mxu0 %v10944_v14 }
  0x9f   : > { %673 = vmatpush1.bf16.msra.mxu0 %v10946_v15 }
  0xa0   : > { %674 = vmatprep.subr.bf16.mxu0 %v10947_v16 }
  0xa3   : > { %675 = vmatpush1.bf16.msra.mxu0 %v10949_v17 }
  0xa4   : > { %676 = vmatprep.subr.bf16.mxu0 %v10950_v18 }
  0xa7   : > { %677 = vmatpush1.bf16.msra.mxu0 %v10952_v19 }
  0xaa   : > { %695 = vmatmul.mubr.bf16.vlgmr.msra.gmra.mxu0 %v477_v12 }
  0xab   : > { %704 = vmatprep.mubr.bf16.mxu0 %v16481_v0 }
  0xb2   : > { %705 = vmatmul.mubr.bf16.gmra.mxu0 %v12338_v22 }
  0xb3   : > { %714 = vmatprep.mubr.bf16.mxu0 %v16481_v0 }
  0xba   : > { %715 = vmatmul.mubr.bf16.gmra.mxu0 %v12344_v25 }
  0xbb   : > { %724 = vmatprep.mubr.bf16.mxu0 %v16481_v0 }
  0xc2   : > { %725 = vmatmul.mubr.bf16.gmra.mxu0 %v12350_v28 }
  0xc3   : > { %734 = vmatprep.mubr.bf16.mxu0 %v16481_v0 }
  0xca   : > { %735 = vmatmul.mubr.bf16.gmra.mxu0 %v12356_v31 }
  0xcb   : > { %744 = vmatprep.mubr.bf16.mxu0 %v16481_v0 }
  0xd2   : > { %745 = vmatmul.mubr.bf16.gmra.mxu0 %v12362_v34 }
  0xd3   : > { %754 = vmatprep.mubr.bf16.mxu0 %v16481_v0 }
  0xda   : > { %755 = vmatmul.mubr.bf16.gmra.mxu0 %v12368_v37 }
  0xdb   : > { %764 = vmatprep.mubr.bf16.mxu0 %v16481_v0 }
  0xe2   : > { %765 = vmatmul.mubr.bf16.gmra.mxu0 %v12374_v40 }
 0x16a   : > { %v696_v46 = vpop.f32.mrf.mxu0 }
 0x16b   : > { %v697_v51 = vadd.f32 %v696_v46, %v12390_v47 }
 0x16c   : > { %v698_v48 = vpop.f32.mrf.mxu0 }
 0x16d   : > { %v699_v54 = vadd.f32 %v698_v48, %v12394_v49 }
 0x16e   : > { %v700_v50 = vpop.f32.mrf.mxu0 }
 0x16f   : > { %v701_v52 = vadd.f32 %v700_v50, %v12390_v47 }
 0x170   : > { %v702_v53 = vpop.f32.mrf.mxu0 }
 0x171   : > { %v12399_v55 = vpack.c.bf16 %v701_v52, %v697_v51  ;;  %v703_v56 = vadd.f32 %v702_v53, %v12394_v49 }
 0x172   : > { %v706_v57 = vpop.f32.mrf.mxu0 }
 0x173   : > { %v12402_v58 = vpack.c.bf16 %v703_v56, %v699_v54  ;;  %1497 = vrot.lane.b32.xlu0 %v12399_v55, %s12029_s28  ;;  %9978 = vmatprep.mubr.msk.bf16.mxu0 %vm16480_vm0, %v12399_v55  ;;  %v707_v61 = vadd.f32 %v706_v57, %v12390_v47 }
 0x174   : > { %v708_v59 = vpop.f32.mrf.mxu0 }
 0x175   : > { %16639 = vst [vmem:[#allocation22_spill] sm:$0xff] %v12402_v58  ;;  %1521 = vrot.lane.b32.xlu1 %v12402_v58, %s12029_s28  ;;  %v709_v1 = vadd.f32 %v708_v59, %v12394_v49 }
 0x176   : > { %v710_v60 = vpop.f32.mrf.mxu0 }
 0x177   : > { %v711_v62 = vadd.f32 %v710_v60, %v12390_v47 }
 0x178   : > { %v712_v63 = vpop.f32.mrf.mxu0 }
 0x179   : > { %v12413_v2 = vpack.c.bf16 %v711_v62, %v707_v61  ;;  %v713_v3 = vadd.f32 %v712_v63, %v12394_v49 }
 0x17a   : > { %v716_v4 = vpop.f32.mrf.mxu0 }
 0x17b   : > { %16640 = vst [vmem:[#allocation23_spill] sm:$0xff] %v12413_v2  ;;  %v12416_v5 = vpack.c.bf16 %v713_v3, %v709_v1  ;;  %1499 = vrot.lane.b32.xlu1 %v12413_v2, %s12029_s28  ;;  %v717_v8 = vadd.f32 %v716_v4, %v12390_v47 }
 0x17c   : > { %v718_v6 = vpop.f32.mrf.mxu0 }
 0x17d   : > { %1523 = vrot.lane.b32.xlu0 %v12416_v5, %s12029_s28  ;;  %v719_v11 = vadd.f32 %v718_v6, %v12394_v49 }
 0x17e   : > { %v720_v7 = vpop.f32.mrf.mxu0 }
 0x17f   : > { %v721_v9 = vadd.f32 %v720_v7, %v12390_v47 }
 0x180   : > { %v722_v10 = vpop.f32.mrf.mxu0 }
 0x181   : > { %v12425_v12 = vpack.c.bf16 %v721_v9, %v717_v8  ;;  %v723_v13 = vadd.f32 %v722_v10, %v12394_v49 }
 0x182   : > { %v726_v14 = vpop.f32.mrf.mxu0 }
 0x183   : > { %v12428_v15 = vpack.c.bf16 %v723_v13, %v719_v11  ;;  %1501 = vrot.lane.b32.xlu0 %v12425_v12, %s12029_s28  ;;  %v727_v18 = vadd.f32 %v726_v14, %v12390_v47 }
 0x184   : > { %v728_v16 = vpop.f32.mrf.mxu0 }
 0x185   : > { %16641 = vst [vmem:[#allocation24_spill] sm:$0xff] %v12428_v15  ;;  %1525 = vrot.lane.b32.xlu1 %v12428_v15, %s12029_s28  ;;  %v729_v21 = vadd.f32 %v728_v16, %v12394_v49 }
 0x186   : > { %v730_v17 = vpop.f32.mrf.mxu0 }
 0x187   : > { %v731_v19 = vadd.f32 %v730_v17, %v12390_v47 }
 0x188   : > { %v732_v20 = vpop.f32.mrf.mxu0 }
 0x189   : > { %v12437_v23 = vpack.c.bf16 %v731_v19, %v727_v18  ;;  %v733_v24 = vadd.f32 %v732_v20, %v12394_v49 }
 0x18a   : > { %v736_v26 = vpop.f32.mrf.mxu0 }
 0x18b   : > { %16642 = vst [vmem:[#allocation25_spill] sm:$0xff] %v12437_v23  ;;  %v12440_v27 = vpack.c.bf16 %v733_v24, %v729_v21  ;;  %1503 = vrot.lane.b32.xlu1 %v12437_v23, %s12029_s28  ;;  %v737_v32 = vadd.f32 %v736_v26, %v12390_v47 }
 0x18c   : > { %v738_v29 = vpop.f32.mrf.mxu0 }
 0x18d   : > { %1527 = vrot.lane.b32.xlu0 %v12440_v27, %s12029_s28  ;;  %v739_v36 = vadd.f32 %v738_v29, %v12394_v49  ;;  %v932_v29 = vsel %vm16480_vm0, %v12440_v27, 0 }
 0x18e   : > { %v740_v30 = vpop.f32.mrf.mxu0 }
 0x18f   : > { %v741_v33 = vadd.f32 %v740_v30, %v12390_v47  ;;  %v929_v30 = vsel %vm16480_vm0, %v12428_v15, 0 }
 0x190   : > { %v742_v35 = vpop.f32.mrf.mxu0 }
 0x191   : > { %v12449_v38 = vpack.c.bf16 %v741_v33, %v737_v32  ;;  %v743_v39 = vadd.f32 %v742_v35, %v12394_v49  ;;  %v926_v32 = vsel %vm16480_vm0, %v12416_v5, 0  ;;  %v923_v33 = vsel %vm16480_vm0, %v12402_v58, 0 }
 0x192   : > { %v746_v46 = vpop.f32.mrf.mxu0 }
 0x193   : > { %16643 = vst [vmem:[#allocation26_spill] sm:$0xff] %v12449_v38  ;;  %v12452_v48 = vpack.c.bf16 %v743_v39, %v739_v36  ;;  %1505 = vrot.lane.b32.xlu0 %v12449_v38, %s12029_s28  ;;  %v747_v61 = vadd.f32 %v746_v46, %v12390_v47 }
 0x194   : > { %v748_v50 = vpop.f32.mrf.mxu0 }
 0x195   : > { %16644 = vst [vmem:[#allocation27_spill] sm:$0xff] %v12452_v48  ;;  %1529 = vrot.lane.b32.xlu1 %v12452_v48, %s12029_s28  ;;  %v749_v53 = vadd.f32 %v748_v50, %v12394_v49  ;;  %v935_v26 = vsel %vm16480_vm0, %v12452_v48, 0 }
 0x196   : > { %v750_v51 = vpop.f32.mrf.mxu0 }
 0x197   : > { %v751_v57 = vadd.f32 %v750_v51, %v12390_v47 }
 0x198   : > { %v752_v52 = vpop.f32.mrf.mxu0 }
 0x199   : > { %v753_v54 = vadd.f32 %v752_v52, %v12394_v49  ;;  %v12466_v63 = vpack.c.bf16 %v751_v57, %v747_v61 }
 0x19a   : > { %v756_v56 = vpop.f32.mrf.mxu0 }
 0x19b   : > { %v12461_v59 = vpack.c.bf16 %v753_v54, %v749_v53  ;;  %16645 = vst [vmem:[#allocation28_spill] sm:$0xff] %v12466_v63  ;;  %v757_v18 = vadd.f32 %v756_v56, %v12390_v47 }
 0x19c   : > { %v758_v60 = vpop.f32.mrf.mxu0 }
 0x19d   : > { %1531 = vrot.lane.b32.xlu1 %v12461_v59, %s12029_s28  ;;  %v759_v3 = vadd.f32 %v758_v60, %v12394_v49 }
 0x19e   : > { %v760_v62 = vpop.f32.mrf.mxu0 }
 0x19f   : > { %v761_v16 = vadd.f32 %v760_v62, %v12390_v47 }
 0x1a0   : > { %v762_v1 = vpop.f32.mrf.mxu0 }
 0x1a1   : > { %v763_v4 = vadd.f32 %v762_v1, %v12394_v49  ;;  %1507 = vrot.lane.b32.xlu1 %v12466_v63, %s12029_s28 }
 0x1a2   : > { %v766_v6 = vpop.f32.mrf.mxu0 }
 0x1a3   : > { %v12472_v7 = vpack.c.bf16 %v763_v4, %v759_v3  ;;  %v767_v20 = vadd.f32 %v766_v6, %v12390_v47 }
 0x1a4   : > { %v768_v8 = vpop.f32.mrf.mxu0 }
 0x1a5   : > { %2168 = vrot.lane.b32.xlu1 %v12472_v7, %s12030_s25  ;;  %1533 = vrot.lane.b32.xlu0 %v12472_v7, %s12029_s28  ;;  %v769_v11 = vadd.f32 %v768_v8, %v12394_v49  ;;  %v941_v24 = vsel %vm16480_vm0, %v12472_v7, 0 }
 0x1a6   : > { %v770_v9 = vpop.f32.mrf.mxu0 }
 0x1a7   : > { %v771_v19 = vadd.f32 %v770_v9, %v12390_v47  ;;  %v938_v47 = vsel %vm16480_vm0, %v12461_v59, 0 }
 0x1a8   : > { %v772_v10 = vpop.f32.mrf.mxu0 }
 0x1a9   : > { %v773_v13 = vadd.f32 %v772_v10, %v12394_v49  ;;  %2166 = vrot.lane.b32.xlu1 %v12461_v59, %s12030_s25  ;;  %v12496_v49 = vpack.c.bf16 %v761_v16, %v757_v18  ;;  %v12504_v21 = vpack.c.bf16 %v771_v19, %v767_v20  ;;  %v10955_v19 = vld [vmem:[%s16465_s1 + $0x80] ss:$12 sps:$4 sm:$0xff]  }
 0x1ab   : > { %v12482_v14 = vpack.c.bf16 %v773_v13, %v769_v11  ;;  %16647 = vst [vmem:[#allocation30_spill] sm:$0xff] %v12496_v49  ;;  %16648 = vst [vmem:[#allocation31_spill] sm:$0xff] %v12504_v21  ;;  %v10953_v13 = vld [vmem:[%s16465_s1 + $0xb0] ss:$12 sps:$4 sm:$0xff]  }
 0x1ac   : > { %9930 = vmatprep.subr.bf16.mxu1 %v10953_v13 }
 0x1ad   : > { %16646 = vst [vmem:[#allocation29_spill] sm:$0xff] %v12482_v14  ;;  %10758 = vmatprep.subr.msk.bf16.mxu0 %vm16480_vm0, %v12482_v14  ;;  %2164 = vrot.lane.b32.xlu1 %v12452_v48, %s12030_s25  ;;  %v944_v17 = vsel %vm16480_vm0, %v12482_v14, 0 }
 0x1ae   : > { %1535 = vrot.lane.b32.xlu0 %v12482_v14, %s12029_s28  ;;  %9963 = vmatpush3.bf16.xpose.msra.mxu0 %v944_v17  ;;  %v10954_v17 = vld [vmem:[%s16465_s1 + $0x98] ss:$12 sps:$4 sm:$0xff]  }
 0x1af   : > { %10759 = vmatprep.subr.msk.bf16.mxu0 %vm16480_vm0, %v12472_v7  ;;  %9931 = vmatpush3.bf16.msra.mxu1 %v10953_v13 }
 0x1b0   : > { %9932 = vmatprep.subr.bf16.mxu1 %v10954_v17 }
 0x1b1   : > { %2160 = vrot.lane.b32.xlu1 %v12428_v15, %s12030_s25 }
 0x1b2   : > { %1509 = vrot.lane.b32.xlu0 %v12496_v49, %s12029_s28 }
 0x1b3   : > { %9933 = vmatpush3.bf16.msra.mxu1 %v10954_v17  ;;  %v16658_v17 = vmov 0 }
 0x1b4   : > { %9934 = vmatprep.subr.bf16.mxu1 %v10955_v19 }
 0x1b5   : > { %2156 = vrot.lane.b32.xlu1 %v12402_v58, %s12030_s25 }
 0x1b6   : > { %1511 = vrot.lane.b32.xlu0 %v12504_v21, %s12029_s28  ;;  %9965 = vmatpush3.bf16.xpose.msra.mxu0 %v941_v24 }
 0x1b7   : > { %10760 = vmatprep.subr.msk.bf16.mxu0 %vm16480_vm0, %v12461_v59  ;;  %9935 = vmatpush3.bf16.msra.mxu1 %v10955_v19  ;;  %v446_v19 = vadd.s32 32, %v12378_v42 }
 0x1ba   : > { %2162 = vrot.lane.b32.xlu0 %v12440_v27, %s12030_s25 }
 0x1be   : > { %2158 = vrot.lane.b32.xlu0 %v12416_v5, %s12030_s25  ;;  %9967 = vmatpush3.bf16.xpose.msra.mxu0 %v938_v47  ;;  %v10956_v47 = vld [vmem:[%s16465_s1 + $0x68] ss:$12 sps:$4 sm:$0xff]  }
 0x1bf   : > { %10761 = vmatprep.subr.msk.bf16.mxu0 %vm16480_vm0, %v12452_v48  ;;  %9936 = vmatprep.subr.bf16.mxu1 %v10956_v47 }
 0x1c0   : > { %9937 = vmatpush3.bf16.msra.mxu1 %v10956_v47 }
 0x1c2   : > { %2170 = vrot.lane.b32.xlu0 %v12482_v14, %s12030_s25 }
 0x1c6   : > { %9969 = vmatpush3.bf16.xpose.msra.mxu0 %v935_v26 }
 0x1c7   : > { %10762 = vmatprep.subr.msk.bf16.mxu0 %vm16480_vm0, %v12440_v27 }
 0x1ce   : > { %9971 = vmatpush3.bf16.xpose.msra.mxu0 %v932_v29  ;;  %v10957_v29 = vld [vmem:[%s16465_s1 + $0x50] ss:$12 sps:$4 sm:$0xff]  }
 0x1cf   : > { %10763 = vmatprep.subr.msk.bf16.mxu0 %vm16480_vm0, %v12428_v15  ;;  %9938 = vmatprep.subr.bf16.mxu1 %v10957_v29 }
 0x1d0   : > { %9939 = vmatpush3.bf16.msra.mxu1 %v10957_v29  ;;  %v16660_v29 = vmov 0 }
 0x1d6   : > { %9973 = vmatpush3.bf16.xpose.msra.mxu0 %v929_v30 }
 0x1d7   : > { %10764 = vmatprep.subr.msk.bf16.mxu0 %vm16480_vm0, %v12416_v5 }
 0x1de   : > { %9975 = vmatpush3.bf16.xpose.msra.mxu0 %v926_v32 }
 0x1df   : > { %10765 = vmatprep.subr.msk.bf16.mxu0 %vm16480_vm0, %v12402_v58 }
 0x1e5   : > { %v1498_v35 = vpop.permute.xlu0 %1497 }
 0x1e6   : > { %9977 = vmatpush3.bf16.xpose.msra.mxu0 %v923_v33  ;;  %v10958_v33 = vld [vmem:[%s16465_s1 + $0x38] ss:$12 sps:$4 sm:$0xff]  }
 0x1e7   : > { %v1522_v50 = vpop.permute.xlu1 %1521  ;;  %9940 = vmatprep.subr.bf16.mxu1 %v10958_v33 }
 0x1e8   : > { %v1562_v20 = vsel %vm16480_vm0, %v1522_v50, 0  ;;  %9941 = vmatpush3.bf16.msra.mxu1 %v10958_v33 }
 0x1ed   : > { %9979 = vmatmul.mubr.msk.bf16.vlgmr.msra.gmra.mxu0 %vm16480_vm0, %v12413_v2  ;;  %v1500_v52 = vpop.permute.xlu1 %1499 }
 0x1ee   : > { %9982 = vmatprep.mubr.msk.bf16.mxu0 %vm16480_vm0, %v12425_v12 }
 0x1ef   : > { %v1524_v36 = vpop.permute.xlu0 %1523 }
 0x1f0   : > { %v1565_v16 = vsel %vm16480_vm0, %v1524_v36, 0 }
 0x1f5   : > { %9983 = vmatmul.mubr.msk.bf16.gmra.mxu0 %vm16480_vm0, %v12437_v23  ;;  %v1502_v39 = vpop.permute.xlu0 %1501 }
 0x1f6   : > { %9986 = vmatprep.mubr.msk.bf16.mxu0 %vm16480_vm0, %v12449_v38 }
 0x1f7   : > { %v1526_v54 = vpop.permute.xlu1 %1525 }
 0x1f8   : > { %v1568_v10 = vsel %vm16480_vm0, %v1526_v54, 0 }
 0x1fd   : > { %9987 = vmatmul.mubr.msk.bf16.gmra.mxu0 %vm16480_vm0, %v12466_v63  ;;  %v1504_v60 = vpop.permute.xlu1 %1503 }
 0x1fe   : > { %9990 = vmatprep.mubr.msk.bf16.mxu0 %vm16480_vm0, %v12496_v49 }
 0x1ff   : > { %v1528_v46 = vpop.permute.xlu0 %1527 }
 0x200   : > { %v1571_v6 = vsel %vm16480_vm0, %v1528_v46, 0 }
 0x205   : > { %9991 = vmatmul.mubr.msk.bf16.gmra.mxu0 %vm16480_vm0, %v12504_v21  ;;  %v12557_v51 = vpop.permute.xlu0 %1505 }
 0x206   : > { %10062 = vmatprep.mubr.msk.bf16.mxu0 %vm16480_vm0, %v1498_v35 }
 0x207   : > { %v1530_v61 = vpop.permute.xlu1 %1529 }
 0x208   : > { %v1574_v4 = vsel %vm16480_vm0, %v1530_v61, 0 }
 0x20f   : > { %v1532_v1 = vpop.permute.xlu1 %1531 }
 0x210   : > { %v1577_v3 = vsel %vm16480_vm0, %v1532_v1, 0 }
 0x213   : > { %v1508_v26 = vpop.permute.xlu1 %1507 }
 0x217   : > { %v1534_v53 = vpop.permute.xlu0 %1533  ;;  %v2169_v32 = vpop.permute.xlu1 %2168 }
 0x218   : > { %v1580_v62 = vsel %vm16480_vm0, %v1534_v53, 0  ;;  %v2215_v35 = vsel %vm16480_vm0, %v2169_v32, 0 }
 0x220   : > { %v1536_v56 = vpop.permute.xlu0 %1535 }
 0x221   : > { %10766 = vmatprep.subr.msk.bf16.mxu0 %vm16480_vm0, %v1536_v56  ;;  %v1583_v57 = vsel %vm16480_vm0, %v1536_v56, 0 }
 0x222   : > { %10047 = vmatpush3.bf16.xpose.msra.mxu0 %v1583_v57 }
 0x223   : > { %10767 = vmatprep.subr.msk.bf16.mxu0 %vm16480_vm0, %v1534_v53 }
 0x224   : > { %v1510_v8 = vpop.permute.xlu0 %1509 }
 0x228   : > { %v1512_v9 = vpop.permute.xlu0 %1511 }
 0x22a   : > { %10049 = vmatpush3.bf16.xpose.msra.mxu0 %v1580_v62  ;;  %v445_v62 = vadd.s32 24, %v12378_v42 }
 0x22b   : > { %10768 = vmatprep.subr.msk.bf16.mxu0 %vm16480_vm0, %v1532_v1 }
 0x22c   : > { %v2163_v11 = vpop.permute.xlu0 %2162 }
 0x22d   : > { %v2206_v53 = vsel %vm16480_vm0, %v2163_v11, 0 }
 0x230   : > { %v2159_v18 = vpop.permute.xlu0 %2158 }
 0x232   : > { %10051 = vmatpush3.bf16.xpose.msra.mxu0 %v1577_v3 }
 0x233   : > { %10769 = vmatprep.subr.msk.bf16.mxu0 %vm16480_vm0, %v1530_v61  ;;  %v458_v61 = vand.u32 31, %v12378_v42 }
 0x234   : > { %v2171_v24 = vpop.permute.xlu0 %2170 }
 0x235   : > { %v2218_v30 = vsel %vm16480_vm0, %v2171_v24, 0 }
 0x23a   : > { %10053 = vmatpush3.bf16.xpose.msra.mxu0 %v1574_v4 }
 0x23b   : > { %10770 = vmatprep.subr.msk.bf16.mxu0 %vm16480_vm0, %v1528_v46  ;;  %v10960_v46 = vld [vmem:[%s16465_s1 + $0x8] ss:$12 sps:$4 sm:$0xff]  }
 0x242   : > { %10055 = vmatpush3.bf16.xpose.msra.mxu0 %v1571_v6  ;;  %v16652_v6 = vmov 0 }
 0x243   : > { %10771 = vmatprep.subr.msk.bf16.mxu0 %vm16480_vm0, %v1526_v54 }
 0x24a   : > { %10057 = vmatpush3.bf16.xpose.msra.mxu0 %v1568_v10 }
 0x24b   : > { %10772 = vmatprep.subr.msk.bf16.mxu0 %vm16480_vm0, %v1524_v36  ;;  %v2167_v36 = vpop.permute.xlu1 %2166 }
 0x252   : > { %10059 = vmatpush3.bf16.xpose.msra.mxu0 %v1565_v16 }
 0x253   : > { %10773 = vmatprep.subr.msk.bf16.mxu0 %vm16480_vm0, %v1522_v50  ;;  %v2212_v50 = vsel %vm16480_vm0, %v2167_v36, 0 }
 0x25a   : > { %10061 = vmatpush3.bf16.xpose.msra.mxu0 %v1562_v20 }
 0x25b   : > { %10774 = vmatprep.subr.msk.bf16.mxu0 %vm16480_vm0, %v2171_v24 }
 0x261   : > { %10063 = vmatmul.mubr.msk.bf16.vlgmr.msra.gmra.mxu0 %vm16480_vm0, %v1500_v52 }
 0x262   : > { %10066 = vmatprep.mubr.msk.bf16.mxu0 %vm16480_vm0, %v1502_v39  ;;  %10131 = vmatpush3.bf16.xpose.msra.mxu0 %v2218_v30  ;;  %v10959_v39 = vld [vmem:[%s16465_s1 + $0x20] ss:$12 sps:$4 sm:$0xff]   ;;  %v462_v30 = vand.u32 31, %v446_v19 }
 0x263   : > { %10775 = vmatprep.subr.msk.bf16.mxu0 %vm16480_vm0, %v2169_v32  ;;  %9942 = vmatprep.subr.bf16.mxu1 %v10959_v39  ;;  %v449_v32 = vadd.s32 56, %v12378_v42 }
 0x264   : > { %9943 = vmatpush3.bf16.msra.mxu1 %v10959_v39 }
 0x265   : > { %9944 = vmatprep.subr.bf16.mxu1 %v10960_v46  ;;  %v465_v39 = vand.u32 31, %v449_v32  ;;  %v16681_v32 = vmov 0 }
 0x268   : > { %9945 = vmatpush3.bf16.msra.mxu1 %v10960_v46  ;;  %v447_v46 = vadd.s32 40, %v12378_v42 }
 0x269   : > { %10067 = vmatmul.mubr.msk.bf16.gmra.mxu0 %vm16480_vm0, %v1504_v60  ;;  %v443_v60 = vadd.s32 8, %v12378_v42 }
 0x26a   : > { %10070 = vmatprep.mubr.msk.bf16.mxu0 %vm16480_vm0, %v12557_v51  ;;  %10133 = vmatpush3.bf16.xpose.msra.mxu0 %v2215_v35  ;;  %v2165_v51 = vpop.permute.xlu1 %2164 }
 0x26b   : > { %10776 = vmatprep.subr.msk.bf16.mxu0 %vm16480_vm0, %v2167_v36  ;;  %9947 = vmatmul.mubr.bf16.vlgmr.msra.gmra.mxu1 %v12338_v22  ;;  %v2209_v52 = vsel %vm16480_vm0, %v2165_v51, 0  ;;  %v459_v3 = vand.u32 31, %v443_v60  ;;  %v16663_v36 = vmov 0  ;;  %v16672_v60 = vmov 0 }
 0x26c   : > { %9950 = vmatprep.mubr.bf16.mxu1 %v12344_v25  ;;  %v2200_v25 = vsel %vm16480_vm0, %v2159_v18, 0 }
 0x26e   : > { %v2161_v54 = vpop.permute.xlu1 %2160 }
 0x26f   : > { %v2203_v22 = vsel %vm16480_vm0, %v2161_v54, 0 }
 0x271   : > { %10071 = vmatmul.mubr.msk.bf16.gmra.mxu0 %vm16480_vm0, %v1508_v26 }
 0x272   : > { %10074 = vmatprep.mubr.msk.bf16.mxu0 %vm16480_vm0, %v1510_v8  ;;  %10135 = vmatpush3.bf16.xpose.msra.mxu0 %v2212_v50  ;;  %v461_v8 = vand.u32 31, %v445_v62  ;;  %v451_v62 = vadd.s32 72, %v12378_v42 }
 0x273   : > { %10777 = vmatprep.subr.msk.bf16.mxu0 %vm16480_vm0, %v2165_v51  ;;  %9951 = vmatmul.mubr.bf16.gmra.mxu1 %v12350_v28  ;;  %v2157_v28 = vpop.permute.xlu1 %2156 }
 0x274   : > { %9954 = vmatprep.mubr.bf16.mxu1 %v12356_v31  ;;  %v2197_v31 = vsel %vm16480_vm0, %v2157_v28, 0 }
 0x279   : > { %10075 = vmatmul.mubr.msk.bf16.gmra.mxu0 %vm16480_vm0, %v1512_v9  ;;  %v448_v9 = vadd.s32 48, %v12378_v42 }
 0x27a   : > { %10137 = vmatpush3.bf16.xpose.msra.mxu0 %v2209_v52  ;;  %v16666_v52 = vmov 0 }
 0x27b   : > { %10778 = vmatprep.subr.msk.bf16.mxu0 %vm16480_vm0, %v2163_v11  ;;  %9955 = vmatmul.mubr.bf16.gmra.mxu1 %v12362_v34  ;;  %v444_v34 = vadd.s32 16, %v12378_v42  ;;  %v16655_v11 = vmov 0 }
 0x27c   : > { %9958 = vmatprep.mubr.bf16.mxu1 %v12368_v37  ;;  %v475_v37 = vand.u32 127, %v441_v41 }
 0x27d   : > { %v460_v56 = vand.u32 31, %v444_v34  ;;  %v453_v34 = vadd.s32 88, %v12378_v42 }
 0x27e   : > { %v12632_v57 = vand.u32 31, %v475_v37 }
 0x280   : > { %vm12636_vm1 = vcmp.eq.s32.totalorder %v460_v56, %v12632_v57  ;;  %vm12648_vm2 = vcmp.eq.s32.totalorder %v458_v61, %v12632_v57  ;;  %vm12654_vm3 = vcmp.eq.s32.totalorder %v459_v3, %v12632_v57  ;;  %vm12664_vm4 = vcmp.eq.s32.totalorder %v461_v8, %v12632_v57 }
 0x281   : > { %v16653_v6 = vsel %vm12648_vm2, 4294967295, %v16652_v6  ;;  %v16656_v11 = vsel %vm12654_vm3, 4294967295, %v16655_v11  ;;  %v16659_v17 = vsel %vm12664_vm4, 4294967295, %v16658_v17  ;;  %vm12691_vm6 = vcmp.eq.s32.totalorder %v462_v30, %v12632_v57 }
 0x282   : > { %10139 = vmatpush3.bf16.xpose.msra.mxu0 %v2206_v53  ;;  %16654 = vst [vmem:[#allocation33_spill] sm:$0xff] %v16653_v6  ;;  %16657 = vst [vmem:[#allocation34_spill] sm:$0xff] %v16656_v11  ;;  %v16664_v36 = vsel %vm12691_vm6, 4294967295, %v16663_v36  ;;  %vm12702_vm7 = vcmp.eq.s32.totalorder %v465_v39, %v12632_v57  ;;  %v463_v53 = vand.u32 31, %v447_v46  ;;  %v469_v61 = vand.u32 31, %v453_v34 }
 0x283   : > { %10779 = vmatprep.subr.msk.bf16.mxu0 %vm16480_vm0, %v2161_v54  ;;  %9959 = vmatmul.mubr.bf16.gmra.mxu1 %v12374_v40  ;;  %v16649_v40 = vmov 0  ;;  %16665 = vst [vmem:[#allocation36_spill] sm:$0xff] %v16664_v36  ;;  %v16667_v52 = vsel %vm12702_vm7, 4294967295, %v16666_v52  ;;  %v452_v54 = vadd.s32 80, %v12378_v42  ;;  %v467_v8 = vand.u32 31, %v451_v62 }
 0x284   : > { %v16650_v40 = vsel %vm12636_vm1, 4294967295, %v16649_v40  ;;  %16668 = vst [vmem:[#allocation37_spill] sm:$0xff] %v16667_v52  ;;  %vm12713_vm8 = vcmp.eq.s32.totalorder %v463_v53, %v12632_v57  ;;  %vm12737_vm10 = vcmp.eq.s32.totalorder %v469_v61, %v12632_v57  ;;  %v457_v39 = vadd.s32 120, %v12378_v42 }
 0x285   : > { %16651 = vst [vmem:[#allocation32_spill] sm:$0xff] %v16650_v40  ;;  %vm12748_vm11 = vcmp.eq.s32.totalorder %v467_v8, %v12632_v57  ;;  %v16684_v53 = vmov 0  ;;  %v16687_v61 = vmov 0  ;;  %v450_v8 = vadd.s32 64, %v12378_v42 }
 0x28a   : > { %10141 = vmatpush3.bf16.xpose.msra.mxu0 %v2203_v22 }
 0x28b   : > { %10780 = vmatprep.subr.msk.bf16.mxu0 %vm16480_vm0, %v2159_v18  ;;  %v464_v18 = vand.u32 31, %v448_v9  ;;  %v456_v9 = vadd.s32 112, %v12378_v42 }
 0x28d   : > { %vm12680_vm5 = vcmp.eq.s32.totalorder %v464_v18, %v12632_v57  ;;  %v16678_v18 = vmov 0  ;;  %v472_v19 = vand.u32 31, %v456_v9 }
 0x28e   : > { %v16661_v29 = vsel %vm12680_vm5, 4294967295, %v16660_v29  ;;  %v16679_v18 = vsel %vm12748_vm11, 4294967295, %v16678_v18 }
 0x28f   : > { %16662 = vst [vmem:[#allocation35_spill] sm:$0xff] %v16661_v29  ;;  %16680 = vst [vmem:[#allocation41_spill] sm:$0xff] %v16679_v18  ;;  %vm12759_vm12 = vcmp.eq.s32.totalorder %v472_v19, %v12632_v57 }
 0x290   : > { %v16682_v32 = vsel %vm12759_vm12, 4294967295, %v16681_v32 }
 0x291   : > { %16683 = vst [vmem:[#allocation42_spill] sm:$0xff] %v16682_v32 }
 0x292   : > { %10143 = vmatpush3.bf16.xpose.msra.mxu0 %v2200_v25 }
 0x293   : > { %10781 = vmatprep.subr.msk.bf16.mxu0 %vm16480_vm0, %v2157_v28  ;;  %v16669_v28 = vmov 0 }
 0x294   : > { %v16670_v28 = vsel %vm12713_vm8, 4294967295, %v16669_v28 }
 0x295   : > { %16671 = vst [vmem:[#allocation38_spill] sm:$0xff] %v16670_v28 }
 0x29a   : > { %10145 = vmatpush3.bf16.xpose.msra.mxu0 %v2197_v31  ;;  %v468_v31 = vand.u32 31, %v452_v54  ;;  %v473_v54 = vand.u32 31, %v457_v39 }
 0x29c   : > { %vm12724_vm9 = vcmp.eq.s32.totalorder %v468_v31, %v12632_v57  ;;  %vm12781_vm14 = vcmp.eq.s32.totalorder %v473_v54, %v12632_v57 }
 0x29d   : > { %v16673_v60 = vsel %vm12724_vm9, 4294967295, %v16672_v60  ;;  %v16688_v61 = vsel %vm12781_vm14, 4294967295, %v16687_v61 }
 0x29e   : > { %16674 = vst [vmem:[#allocation39_spill] sm:$0xff] %v16673_v60  ;;  %16689 = vst [vmem:[#allocation44_spill] sm:$0xff] %v16688_v61 }
 0x2ad   : > { %v9980_v1 = vpop.f32.mrf.mxu0 }
 0x2ae   : > { %v12644_v4 = vsel %vm12636_vm1, %v9980_v1, -1e+30 }
 0x2af   : > { %1079 = vmax.xlane.f32.xlu1 %v12644_v4  ;;  %v980_v41 = vpop.f32.mrf.mxu0 }
 0x2b0   : > { %v12660_v13 = vsel %vm12648_vm2, %v980_v41, -1e+30  ;;  %v16675_v41 = vmov 0 }
 0x2b1   : > { %v9981_v10 = vpop.f32.mrf.mxu0  ;;  %v16676_v41 = vsel %vm12737_vm10, 4294967295, %v16675_v41 }
 0x2b2   : > { %v12676_v47 = vsel %vm12664_vm4, %v9981_v10, -1e+30  ;;  %16677 = vst [vmem:[#allocation40_spill] sm:$0xff] %v16676_v41 }
 0x2b3   : > { %1075 = vmax.xlane.f32.xlu1 %v12660_v13  ;;  %v983_v16 = vpop.f32.mrf.mxu0 }
 0x2b4   : > { %v12671_v20 = vsel %vm12654_vm3, %v983_v16, -1e+30 }
 0x2b5   : > { %1077 = vmax.xlane.f32.xlu0 %v12671_v20  ;;  %v9984_v24 = vpop.f32.mrf.mxu0 }
 0x2b6   : > { %v12687_v33 = vsel %vm12680_vm5, %v9984_v24, -1e+30  ;;  %v454_v24 = vadd.s32 96, %v12378_v42 }
 0x2b7   : > { %1081 = vmax.xlane.f32.xlu1 %v12676_v47  ;;  %v996_v26 = vpop.f32.mrf.mxu0 }
 0x2b8   : > { %v12698_v50 = vsel %vm12691_vm6, %v996_v26, -1e+30 }
 0x2b9   : > { %v9985_v35 = vpop.f32.mrf.mxu0 }
 0x2ba   : > { %v12709_v22 = vsel %vm12702_vm7, %v9985_v35, -1e+30  ;;  %v470_v35 = vand.u32 31, %v454_v24  ;;  %v466_v24 = vand.u32 31, %v450_v8  ;;  %vm16696_vm7 = vcmask 261120  }
 0x2bb   : > { %1087 = vmax.xlane.f32.xlu1 %v12687_v33  ;;  %v999_v51 = vpop.f32.mrf.mxu0 }
 0x2bc   : > { %v12720_v37 = vsel %vm12713_vm8, %v999_v51, -1e+30  ;;  %vm12770_vm13 = vcmp.eq.s32.totalorder %v470_v35, %v12632_v57  ;;  %vm12802_vm0 = vcmp.eq.s32.totalorder %v466_v24, %v12632_v57 }
 0x2bd   : > { %v9988_v25 = vpop.f32.mrf.mxu0  ;;  %v16685_v53 = vsel %vm12770_vm13, 4294967295, %v16684_v53 }
 0x2be   : > { %v12731_v1 = vsel %vm12724_vm9, %v9988_v25, -1e+30  ;;  %16686 = vst [vmem:[#allocation43_spill] sm:$0xff] %v16685_v53  ;;  %v455_v25 = vadd.s32 104, %v12378_v42 }
 0x2bf   : > { %1083 = vmax.xlane.f32.xlu1 %v12698_v50  ;;  %v1012_v56 = vpop.f32.mrf.mxu0 }
 0x2c0   : > { %v471_v62 = vand.u32 31, %v455_v25  ;;  %v12808_v35 = vsel %vm12802_vm0, %v1012_v56, -1e+30 }
 0x2c1   : > { %v9989_v3 = vpop.f32.mrf.mxu0 }
 0x2c2   : > { %v12744_v10 = vsel %vm12737_vm10, %v9989_v3, -1e+30  ;;  %vm12792_vm15 = vcmp.eq.s32.totalorder %v471_v62, %v12632_v57 }
 0x2c3   : > { %1089 = vmax.xlane.f32.xlu1 %v12709_v22  ;;  %v1015_v16 = vpop.f32.mrf.mxu0 }
 0x2c4   : > { %v12755_v26 = vsel %vm12748_vm11, %v1015_v16, -1e+30  ;;  %v16690_v16 = vmov 0 }
 0x2c5   : > { %v9992_v30 = vpop.f32.mrf.mxu0  ;;  %v16691_v16 = vsel %vm12792_vm15, 4294967295, %v16690_v16 }
 0x2c6   : > { %v12766_v46 = vsel %vm12759_vm12, %v9992_v30, -1e+30  ;;  %16692 = vst [vmem:[#allocation45_spill] sm:$0xff] %v16691_v16  ;;  %v16693_v30 = vmov 0  ;;  %vm16701_vm12 = vmmov %vm16696_vm7 }
 0x2c7   : > { %1085 = vmax.xlane.f32.xlu1 %v12720_v37  ;;  %v1028_v51 = vpop.f32.mrf.mxu0  ;;  %v16694_v30 = vsel %vm12802_vm0, 4294967295, %v16693_v30 }
 0x2c8   : > { %v12777_v31 = vsel %vm12770_vm13, %v1028_v51, -1e+30  ;;  %16695 = vst [vmem:[#allocation46_spill] sm:$0xff] %v16694_v30 }
 0x2c9   : > { %v9993_v34 = vpop.f32.mrf.mxu0 }
 0x2ca   : > { %v12787_v3 = vsel %vm12781_vm14, %v9993_v34, -1e+30  ;;  %vm16700_vm14 = vmmov %vm16696_vm7 }
 0x2cb   : > { %2140 = vrot.lane.b32.xlu0 %v12399_v55, %s12030_s25  ;;  %1095 = vmax.xlane.f32.xlu1 %v12731_v1  ;;  %v1031_v9 = vpop.f32.mrf.mxu0 }
 0x2cc   : > { %v12798_v19 = vsel %vm12792_vm15, %v1031_v9, -1e+30 }
 0x2cf   : > { %1097 = vmax.xlane.f32.xlu1 %v12744_v10 }
 0x2d3   : > { %1093 = vmax.xlane.f32.xlu1 %v12755_v26 }
 0x2d7   : > { %1103 = vmax.xlane.f32.xlu1 %v12766_v46 }
 0x2db   : > { %1099 = vmax.xlane.f32.xlu1 %v12777_v31 }
 0x2df   : > { %1105 = vmax.xlane.f32.xlu1 %v12787_v3 }
 0x2e3   : > { %1101 = vmax.xlane.f32.xlu1 %v12798_v19 }
 0x2ea   : > { %1091 = vmax.xlane.f32.xlu0 %v12808_v35 }
 0x2f4   : > { %2142 = vrot.lane.b32.xlu1 %v12413_v2, %s12030_s25 }
 0x2f8   : > { %2146 = vrot.lane.b32.xlu1 %v12437_v23, %s12030_s25 }
 0x300   : > { %2144 = vrot.lane.b32.xlu0 %v12425_v12, %s12030_s25 }
 0x304   : > { %2148 = vrot.lane.b32.xlu0 %v12449_v38, %s12030_s25 }
 0x32b   : > { %v12819_v57 = vpop.f32.mrf.mxu1 }
 0x32d   : > { %v12821_v39 = vpop.f32.mrf.mxu1 }
 0x32f   : > { %v12823_v51 = vpop.f32.mrf.mxu1 }
 0x331   : > { %v12826_v25 = vpop.f32.mrf.mxu1 }
 0x333   : > { %v12828_v8 = vpop.f32.mrf.mxu1 }
 0x335   : > { %v12831_v0 = vpop.f32.mrf.mxu1 }
 0x337   : > { %v12834_v23 = vpop.f32.mrf.mxu1 }
 0x338   : > { %v1080_v56 = vpop.xlane.xlu1 %1079 }
 0x339   : > { %v1109_v54 = vsub.f32 %v12644_v4, %v1080_v56 }
 0x33b   : > { %v1127_v34 = vmul.f32 1.442695, %v1109_v54  ;;  %v12837_v54 = vpop.f32.mrf.mxu1 }
 0x33c   : > { %v1076_v62 = vpop.xlane.xlu1 %1075 }
 0x33d   : > { %11125 = vpow2.f32 %v1127_v34  ;;  %v1107_v9 = vsub.f32 %v12660_v13, %v1076_v62  ;;  %v9956_v62 = vpop.f32.mrf.mxu1 }
 0x33e   : > { %v1078_v24 = vpop.xlane.xlu0 %1077 }
 0x33f   : > { %v1123_v43 = vmul.f32 1.442695, %v1107_v9  ;;  %v1108_v45 = vsub.f32 %v12671_v20, %v1078_v24  ;;  %v841_v58 = vpop.f32.mrf.mxu1  ;;  %v16495_v24 = vsub.s32 2, %v12378_v42 }
 0x340   : > { %v1082_v38 = vpop.xlane.xlu1 %1081 }
 0x341   : > { %11127 = vpow2.f32 %v1123_v43  ;;  %v1110_v4 = vsub.f32 %v12676_v47, %v1082_v38  ;;  %v1125_v34 = vmul.f32 1.442695, %v1108_v45  ;;  %v9957_v15 = vpop.f32.mrf.mxu1  ;;  %v12849_v45 = vrot.slane %v12383_v44, %v16495_v24 }
 0x342   : > { %v2141_v56 = vpop.permute.xlu0 %2140 }
 0x343   : > { %v1129_v2 = vmul.f32 1.442695, %v1110_v4  ;;  %10146 = vmatprep.mubr.msk.bf16.mxu0 %vm16696_vm7, %v2141_v56  ;;  %v844_v4 = vpop.f32.mrf.mxu1 }
 0x344   : > { %v1088_v13 = vpop.xlane.xlu1 %1087 }
 0x345   : > { %11129 = vpow2.f32 %v1129_v2  ;;  %v1113_v9 = vsub.f32 %v12687_v33, %v1088_v13  ;;  %v9960_v33 = vpop.f32.mrf.mxu1 }
 0x346   : > { %11131 = vpow2.f32 %v1125_v34 }
 0x347   : > { %v1135_v20 = vmul.f32 1.442695, %v1113_v9  ;;  %v857_v9 = vpop.f32.mrf.mxu1 }
 0x348   : > { %v1084_v43 = vpop.xlane.xlu1 %1083  ;;  %v858_v44 = vadd.f32 %v857_v9, %v12849_v45 }
 0x349   : > { %11133 = vpow2.f32 %v1135_v20  ;;  %v1111_v38 = vsub.f32 %v12698_v50, %v1084_v43  ;;  %v866_v20 = vadd.f32 %v9960_v33, %v12849_v45 }
 0x34a   : > { %v12843_v47 = vpop.eup %11125 }
 0x34b   : > { %v1131_v56 = vmul.f32 1.442695, %v1111_v38  ;;  %1159 = vadd.xlane.f32.xlu0 %v12843_v47  ;;  %v9961_v38 = vpop.f32.mrf.mxu1 }
 0x34c   : > { %v1090_v2 = vpop.xlane.xlu1 %1089  ;;  %v869_v24 = vadd.f32 %v9961_v38, %v12849_v45 }
 0x34d   : > { %11135 = vpow2.f32 %v1131_v56  ;;  %v1114_v34 = vsub.f32 %v12709_v22, %v1090_v2  ;;  %v850_v22 = vadd.f32 %v9956_v62, %v12849_v45  ;;  %v860_v2 = vpop.f32.mrf.mxu1 }
 0x34e   : > { %v12852_v13 = vpop.eup %11127  ;;  %v12864_v33 = vpack.c.bf16 %v869_v24, %v866_v20 }
 0x34f   : > { %v1137_v50 = vmul.f32 1.442695, %v1114_v34  ;;  %1155 = vadd.xlane.f32.xlu0 %v12852_v13  ;;  %v853_v34 = vadd.f32 %v9957_v15, %v12849_v45  ;;  %v842_v15 = vadd.f32 %v841_v58, %v12849_v45  ;;  %v834_v58 = vadd.f32 %v12828_v8, %v12849_v45 }
 0x350   : > { %v1086_v43 = vpop.xlane.xlu1 %1085  ;;  %9994 = vmatprep.subr.bf16.mxu1 %v12864_v33  ;;  %v826_v8 = vadd.f32 %v12831_v0, %v12849_v45  ;;  %v821_v0 = vadd.f32 %v12823_v51, %v12849_v45 }
 0x351   : > { %11137 = vpow2.f32 %v1137_v50  ;;  %v1112_v42 = vsub.f32 %v12720_v37, %v1086_v43  ;;  %v861_v50 = vadd.f32 %v860_v2, %v12849_v45  ;;  %9995 = vmatpush3.bf16.msra.mxu1 %v12864_v33  ;;  %v12879_v24 = vpack.c.bf16 %v853_v34, %v850_v22 }
 0x352   : > { %v12859_v56 = vpop.eup %11129 }
 0x353   : > { %v1133_v48 = vmul.f32 1.442695, %v1112_v42  ;;  %1161 = vadd.xlane.f32.xlu1 %v12859_v56  ;;  %v12867_v37 = vpop.eup %11131  ;;  %v12870_v43 = vpack.c.bf16 %v861_v50, %v858_v44  ;;  %v837_v44 = vadd.f32 %v12834_v23, %v12849_v45  ;;  %v829_v23 = vadd.f32 %v12837_v54, %v12849_v45 }
 0x354   : > { %v1096_v14 = vpop.xlane.xlu1 %1095 }
 0x355   : > { %11139 = vpow2.f32 %v1133_v48  ;;  %v1117_v9 = vsub.f32 %v12731_v1, %v1096_v14  ;;  %v845_v48 = vadd.f32 %v844_v4, %v12849_v45  ;;  %9996 = vmatprep.subr.bf16.mxu1 %v12870_v43  ;;  %v12902_v50 = vpack.c.bf16 %v837_v44, %v834_v58 }
 0x356   : > { %v12873_v62 = vpop.eup %11133  ;;  %9997 = vmatpush3.bf16.msra.mxu1 %v12870_v43 }
 0x357   : > { %v1143_v42 = vmul.f32 1.442695, %v1117_v9  ;;  %1167 = vadd.xlane.f32.xlu0 %v12873_v62  ;;  %1157 = vadd.xlane.f32.xlu1 %v12867_v37  ;;  %v12892_v4 = vpack.c.bf16 %v845_v48, %v842_v15  ;;  %v12915_v15 = vpack.c.bf16 %v829_v23, %v826_v8 }
 0x358   : > { %v1098_v14 = vpop.xlane.xlu1 %1097  ;;  %9998 = vmatprep.subr.bf16.mxu1 %v12879_v24 }
 0x359   : > { %11141 = vpow2.f32 %v1143_v42  ;;  %v1118_v1 = vsub.f32 %v12744_v10, %v1098_v14  ;;  %v818_v42 = vadd.f32 %v12819_v57, %v12849_v45  ;;  %16697 = vst [vmem:[#allocation47_spill] sm:$0xff] %v12915_v15  ;;  %v810_v14 = vadd.f32 %v12821_v39, %v12849_v45 }
 0x35a   : > { %v12884_v20 = vpop.eup %11135  ;;  %9999 = vmatpush3.bf16.msra.mxu1 %v12879_v24  ;;  %v813_v57 = vadd.f32 %v12826_v25, %v12849_v45 }
 0x35b   : > { %v1145_v38 = vmul.f32 1.442695, %v1118_v1  ;;  %1163 = vadd.xlane.f32.xlu0 %v12884_v20  ;;  %10000 = vmatprep.subr.bf16.mxu1 %v12892_v4  ;;  %v12924_v1 = vpack.c.bf16 %v821_v0, %v818_v42 }
 0x35c   : > { %v1094_v22 = vpop.xlane.xlu1 %1093 }
 0x35d   : > { %11143 = vpow2.f32 %v1145_v38  ;;  %v1116_v10 = vsub.f32 %v12755_v26, %v1094_v22  ;;  %16698 = vst [vmem:[#allocation48_spill] sm:$0xff] %v12924_v1  ;;  %v12934_v22 = vpack.c.bf16 %v813_v57, %v810_v14 }
 0x35e   : > { %v12896_v2 = vpop.eup %11137  ;;  %10001 = vmatpush3.bf16.msra.mxu1 %v12892_v4 }
 0x35f   : > { %v1141_v34 = vmul.f32 1.442695, %v1116_v10  ;;  %1169 = vadd.xlane.f32.xlu1 %v12896_v2  ;;  %10002 = vmatprep.subr.bf16.mxu1 %v12902_v50  ;;  %16699 = vst [vmem:[#allocation49_spill] sm:$0xff] %v12934_v22 }
 0x360   : > { %v1104_v9 = vpop.xlane.xlu1 %1103 }
 0x361   : > { %11145 = vpow2.f32 %v1141_v34  ;;  %v1121_v8 = vsub.f32 %v12766_v46, %v1104_v9 }
 0x362   : > { %v12907_v26 = vpop.eup %11139  ;;  %10003 = vmatpush3.bf16.msra.mxu1 %v12902_v50 }
 0x363   : > { %1165 = vadd.xlane.f32.xlu1 %v12907_v26  ;;  %10004 = vmatprep.subr.bf16.mxu1 %v12915_v15  ;;  %v1151_v0 = vmul.f32 1.442695, %v1121_v8 }
 0x364   : > { %v1100_v54 = vpop.xlane.xlu1 %1099 }
 0x365   : > { %v1119_v14 = vsub.f32 %v12777_v31, %v1100_v54 }
 0x366   : > { %v12918_v48 = vpop.eup %11141  ;;  %10005 = vmatpush3.bf16.msra.mxu1 %v12915_v15 }
 0x367   : > { %1175 = vadd.xlane.f32.xlu0 %v12918_v48  ;;  %10006 = vmatprep.subr.bf16.mxu1 %v12924_v1  ;;  %v1147_v46 = vmul.f32 1.442695, %v1119_v14 }
 0x368   : > { %v1106_v51 = vpop.xlane.xlu1 %1105 }
 0x369   : > { %v1122_v38 = vsub.f32 %v12787_v3, %v1106_v51 }
 0x36a   : > { %v12930_v58 = vpop.eup %11143  ;;  %10007 = vmatpush3.bf16.msra.mxu1 %v12924_v1 }
 0x36b   : > { %v1153_v44 = vmul.f32 1.442695, %v1122_v38  ;;  %1177 = vadd.xlane.f32.xlu1 %v12930_v58  ;;  %10008 = vmatprep.subr.bf16.mxu1 %v12934_v22 }
 0x36c   : > { %v1102_v39 = vpop.xlane.xlu1 %1101 }
 0x36d   : > { %11147 = vpow2.f32 %v1153_v44  ;;  %v1120_v25 = vsub.f32 %v12798_v19, %v1102_v39  ;;  %v10064_v44 = vpop.f32.mrf.mxu0 }
 0x36e   : > { %v12938_v45 = vpop.eup %11145  ;;  %10009 = vmatpush3.bf16.msra.mxu1 %v12934_v22 }
 0x36f   : > { %v1149_v3 = vmul.f32 1.442695, %v1120_v25  ;;  %1173 = vadd.xlane.f32.xlu1 %v12938_v45  ;;  %v1619_v39 = vpop.f32.mrf.mxu0 }
 0x370   : > { %v2143_v10 = vpop.permute.xlu1 %2142 }
 0x371   : > { %11149 = vpow2.f32 %v1149_v3  ;;  %10147 = vmatmul.mubr.msk.bf16.vlgmr.msra.gmra.mxu0 %vm16696_vm7, %v2143_v10  ;;  %v10065_v25 = vpop.f32.mrf.mxu0 }
 0x373   : > { %v1092_v34 = vpop.xlane.xlu0 %1091  ;;  %v1622_v3 = vpop.f32.mrf.mxu0 }
 0x374   : > { %v1115_v19 = vsub.f32 %v12808_v35, %v1092_v34  ;;  %v2147_v57 = vpop.permute.xlu1 %2146  ;;  %v12972_v34 = vsel %vm12648_vm2, %v1619_v39, -1e+30 }
 0x375   : > { %v10068_v10 = vpop.f32.mrf.mxu0 }
 0x376   : > { %v1139_v23 = vmul.f32 1.442695, %v1115_v19  ;;  %v12977_v19 = vsel %vm12636_vm1, %v10064_v44, -1e+30  ;;  %v13004_v39 = vsel %vm12680_vm5, %v10068_v10, -1e+30 }
 0x377   : > { %v2145_v42 = vpop.permute.xlu0 %2144  ;;  %v1635_v8 = vpop.f32.mrf.mxu0 }
 0x378   : > { %11151 = vpow2.f32 %v1139_v23  ;;  %10150 = vmatprep.mubr.msk.bf16.mxu0 %vm16700_vm14, %v2145_v42  ;;  %v12984_v42 = vsel %vm12664_vm4, %v10065_v25, -1e+30  ;;  %v12989_v14 = vsel %vm12691_vm6, %v1635_v8, -1e+30  ;;  %vm16703_vm14 = vnez %v16688_v61 }
 0x379   : > { %10151 = vmatmul.mubr.msk.bf16.gmra.mxu0 %vm16701_vm12, %v2147_v57  ;;  %11153 = vpow2.f32 %v1151_v0  ;;  %v12979_v23 = vpop.f32.mrf.mxu0  ;;  %vm16702_vm12 = vnez %v16682_v32 }
 0x37a   : > { %v12950_v51 = vpop.eup %11147  ;;  %11155 = vpow2.f32 %v1147_v46 }
 0x37b   : > { %v2149_v38 = vpop.permute.xlu0 %2148  ;;  %1185 = vadd.xlane.f32.xlu1 %v12950_v51  ;;  %v1638_v0 = vpop.f32.mrf.mxu0 }
 0x37c   : > { %10154 = vmatprep.mubr.msk.bf16.mxu0 %vm16696_vm7, %v2149_v38  ;;  %v12994_v38 = vsel %vm12654_vm3, %v1622_v3, -1e+30  ;;  %v12999_v46 = vsel %vm12713_vm8, %v1638_v0, -1e+30  ;;  %vm16704_vm7 = vnez %v16667_v52 }
 0x37d   : > { %v10072_v57 = vpop.f32.mrf.mxu0 }
 0x37e   : > { %v12954_v35 = vpop.eup %11149  ;;  %v13019_v10 = vsel %vm12724_vm9, %v10072_v57, -1e+30 }
 0x37f   : > { %1181 = vadd.xlane.f32.xlu1 %v12954_v35  ;;  %v1651_v44 = vpop.f32.mrf.mxu0 }
 0x380   : > { %v13009_v3 = vsel %vm12802_vm0, %v1651_v44, -1e+30 }
 0x381   : > { %v10073_v25 = vpop.f32.mrf.mxu0 }
 0x382   : > { %v13024_v44 = vsel %vm12737_vm10, %v10073_v25, -1e+30 }
 0x383   : > { %v1654_v8 = vpop.f32.mrf.mxu0 }
 0x384   : > { %v13014_v0 = vsel %vm12748_vm11, %v1654_v8, -1e+30 }
 0x385   : > { %v12957_v31 = vpop.eup %11151 }
 0x386   : > { %1171 = vadd.xlane.f32.xlu0 %v12957_v31  ;;  %v12960_v9 = vpop.eup %11153 }
 0x387   : > { %v12963_v54 = vpop.eup %11155 }
 0x38a   : > { %1183 = vadd.xlane.f32.xlu0 %v12960_v9 }
 0x38e   : > { %1179 = vadd.xlane.f32.xlu0 %v12963_v54 }
 0x390   : > { %2150 = vrot.lane.b32.xlu1 %v12466_v63, %s12030_s25 }
 0x3a4   : > { %2152 = vrot.lane.b32.xlu0 %v12496_v49, %s12030_s25  ;;  %v10076_v49 = vpop.f32.mrf.mxu0 }
 0x3a6   : > { %v1667_v29 = vpop.f32.mrf.mxu0 }
 0x3a7   : > { %v13031_v8 = vsel %vm12770_vm13, %v1667_v29, -1e+30  ;;  %v13041_v29 = vsel %vm16702_vm12, %v10076_v49, -1e+30  ;;  %vm16705_vm12 = vcmask 261120  }
 0x3a8   : > { %v10077_v40 = vpop.f32.mrf.mxu0 }
 0x3aa   : > { %v1670_v57 = vpop.f32.mrf.mxu0 }
 0x3ab   : > { %v13036_v25 = vsel %vm12792_vm15, %v1670_v57, -1e+30 }
 0x3b4   : > { %1698 = vmax.xlane.f32.xlu1 %v12972_v34 }
 0x3b8   : > { %1702 = vmax.xlane.f32.xlu1 %v12977_v19 }
 0x3bc   : > { %1704 = vmax.xlane.f32.xlu1 %v12984_v42 }
 0x3c0   : > { %1706 = vmax.xlane.f32.xlu1 %v12989_v14 }
 0x3c3   : > { %1700 = vmax.xlane.f32.xlu0 %v12994_v38 }
 0x3c4   : > { %1708 = vmax.xlane.f32.xlu1 %v12999_v46 }
 0x3c8   : > { %1710 = vmax.xlane.f32.xlu1 %v13004_v39 }
 0x3cc   : > { %1714 = vmax.xlane.f32.xlu1 %v13009_v3 }
 0x3d0   : > { %1716 = vmax.xlane.f32.xlu1 %v13014_v0 }
 0x3d4   : > { %1718 = vmax.xlane.f32.xlu1 %v13019_v10  ;;  %v1160_v30 = vpop.xlane.xlu0 %1159 }
 0x3d8   : > { %1720 = vmax.xlane.f32.xlu1 %v13024_v44  ;;  %v1156_v18 = vpop.xlane.xlu0 %1155 }
 0x3d9   : > { %2154 = vrot.lane.b32.xlu0 %v12504_v21, %s12030_s25 }
 0x3dc   : > { %1722 = vmax.xlane.f32.xlu1 %v13031_v8  ;;  %v1162_v60 = vpop.xlane.xlu1 %1161 }
 0x3dd   : > { %11157 = vrcp.f32 %v1162_v60  ;;  %v13046_v60 = vsel %vm16703_vm14, %v10077_v40, -1e+30 }
 0x3de   : > { %11159 = vrcp.f32 %v1156_v18 }
 0x3df   : > { %11161 = vrcp.f32 %v1160_v30 }
 0x3e0   : > { %1724 = vmax.xlane.f32.xlu1 %v13036_v25  ;;  %v1158_v11 = vpop.xlane.xlu1 %1157  ;;  %v1168_v21 = vpop.xlane.xlu0 %1167 }
 0x3e1   : > { %11163 = vrcp.f32 %v1158_v11 }
 0x3e4   : > { %1726 = vmax.xlane.f32.xlu1 %v13041_v29  ;;  %v1164_v16 = vpop.xlane.xlu0 %1163 }
 0x3e8   : > { %1728 = vmax.xlane.f32.xlu1 %v13046_v60  ;;  %v1170_v18 = vpop.xlane.xlu1 %1169 }
 0x3e9   : > { %11165 = vrcp.f32 %v1170_v18 }
 0x3ea   : > { %11167 = vrcp.f32 %v1164_v16  ;;  %v11158_v57 = vpop.eup %11157 }
 0x3eb   : > { %11169 = vrcp.f32 %v1168_v21  ;;  %v11160_v11 = vpop.eup %11159  ;;  %v1206_v53 = vmul.f32 %v11158_v57, %v12859_v56  ;;  %v13056_v21 = vsel %vm16704_vm7, %v12979_v23, -1e+30 }
 0x3ec   : > { %v1166_v30 = vpop.xlane.xlu1 %1165  ;;  %v11162_v32 = vpop.eup %11161  ;;  %v1203_v41 = vmul.f32 %v11160_v11, %v12852_v13 }
 0x3ed   : > { %11171 = vrcp.f32 %v1166_v30  ;;  %v1205_v61 = vmul.f32 %v11162_v32, %v12843_v47 }
 0x3ee   : > { %v11164_v49 = vpop.eup %11163 }
 0x3ef   : > { %v1204_v40 = vmul.f32 %v11164_v49, %v12867_v37  ;;  %v1220_v28 = vpack.c.bf16 %v1206_v53, %v1205_v61 }
 0x3f1   : > { %v1219_v63 = vpack.c.bf16 %v1204_v40, %v1203_v41  ;;  %v16706_v40 = vld [vmem:[#allocation29_spill] sm:$0xff] }
 0x3f3   : > { %10010 = vmatprep.mubr.bf16.mxu1 %v1219_v63 }
 0x3f4   : > { %10011 = vmatmul.mubr.bf16.vlgmr.msra.gmra.mxu1 %v1220_v28  ;;  %v1178_v37 = vpop.xlane.xlu1 %1177 }
 0x3f5   : > { %11173 = vrcp.f32 %v1178_v37 }
 0x3f6   : > { %v11166_v16 = vpop.eup %11165 }
 0x3f7   : > { %v11168_v18 = vpop.eup %11167  ;;  %v1210_v41 = vmul.f32 %v11166_v16, %v12896_v2 }
 0x3f8   : > { %1712 = vmax.xlane.f32.xlu0 %v13056_v21  ;;  %v11170_v56 = vpop.eup %11169  ;;  %v1207_v63 = vmul.f32 %v11168_v18, %v12884_v20  ;;  %v1174_v47 = vpop.xlane.xlu1 %1173 }
 0x3f9   : > { %1870 = vrot.lane.b32.xlu1 %v12870_v43, %s12029_s28  ;;  %v1209_v32 = vmul.f32 %v11170_v56, %v12873_v62  ;;  %v1176_v62 = vpop.xlane.xlu0 %1175  ;;  %11175 = vrcp.f32 %v1174_v47  ;;  %v16709_v47 = vld [vmem:[#allocation22_spill] sm:$0xff] }
 0x3fa   : > { %v11172_v13 = vpop.eup %11171  ;;  %11177 = vrcp.f32 %v1176_v62 }
 0x3fb   : > { %v1208_v28 = vmul.f32 %v11172_v13, %v12907_v26  ;;  %v1222_v61 = vpack.c.bf16 %v1210_v41, %v1209_v32  ;;  %v16707_v41 = vld [vmem:[#allocation27_spill] sm:$0xff]  ;;  %v16708_v32 = vld [vmem:[#allocation24_spill] sm:$0xff] }
 0x3fd   : > { %1864 = vrot.lane.b32.xlu1 %v12902_v50, %s12029_s28  ;;  %v1221_v53 = vpack.c.bf16 %v1208_v28, %v1207_v63 }
 0x3ff   : > { %10014 = vmatprep.mubr.bf16.mxu1 %v1221_v53 }
 0x400   : > { %10015 = vmatmul.mubr.bf16.gmra.mxu1 %v1222_v61 }
 0x401   : > { %1862 = vrot.lane.b32.xlu1 %v12915_v15, %s12029_s28 }
 0x402   : > { %v11174_v57 = vpop.eup %11173 }
 0x403   : > { %v1214_v49 = vmul.f32 %v11174_v57, %v12930_v58 }
 0x404   : > { %v1186_v23 = vpop.xlane.xlu1 %1185 }
 0x405   : > { %1858 = vrot.lane.b32.xlu1 %v12934_v22, %s12029_s28 }
 0x408   : > { %v1182_v20 = vpop.xlane.xlu1 %1181 }
 0x409   : > { %2795 = vrot.lane.b32.xlu1 %v12472_v7, %s12031_s16 }
 0x40c   : > { %v2151_v2 = vpop.permute.xlu1 %2150 }
 0x40d   : > { %2793 = vrot.lane.b32.xlu1 %v12461_v59, %s12031_s16  ;;  %10155 = vmatmul.mubr.msk.bf16.gmra.mxu0 %vm16705_vm12, %v2151_v2 }
 0x40e   : > { %1872 = vrot.lane.b32.xlu0 %v12864_v33, %s12029_s28 }
 0x40f   : > { %v1172_v26 = vpop.xlane.xlu0 %1171 }
 0x410   : > { %11179 = vrcp.f32 %v1172_v26 }
 0x411   : > { %2789 = vrot.lane.b32.xlu1 %v12440_v27, %s12031_s16  ;;  %v11176_v27 = vpop.eup %11175 }
 0x412   : > { %1868 = vrot.lane.b32.xlu0 %v12879_v24, %s12029_s28  ;;  %v11178_v11 = vpop.eup %11177  ;;  %v1212_v16 = vmul.f32 %v11176_v27, %v12938_v45 }
 0x413   : > { %v1184_v7 = vpop.xlane.xlu0 %1183  ;;  %v1213_v18 = vmul.f32 %v11178_v11, %v12918_v48 }
 0x414   : > { %11181 = vrcp.f32 %v1184_v7 }
 0x415   : > { %2785 = vrot.lane.b32.xlu1 %v12416_v5, %s12031_s16  ;;  %11183 = vrcp.f32 %v1182_v20  ;;  %v1224_v13 = vpack.c.bf16 %v1214_v49, %v1213_v18  ;;  %v10962_v20 = vld [vmem:[#allocation5] sm:$0xff]  }
 0x416   : > { %1866 = vrot.lane.b32.xlu0 %v12892_v4, %s12029_s28  ;;  %11185 = vrcp.f32 %v1186_v23  ;;  %v16710_v23 = vld [vmem:[#allocation23_spill] sm:$0xff] }
 0x417   : > { %v1180_v59 = vpop.xlane.xlu0 %1179 }
 0x418   : > { %11187 = vrcp.f32 %v1180_v59 }
 0x419   : > { %2767 = vrot.lane.b32.xlu1 %v12399_v55, %s12031_s16 }
 0x41a   : > { %1860 = vrot.lane.b32.xlu0 %v12924_v1, %s12029_s28 }
 0x41b   : > { %v2153_v30 = vpop.permute.xlu0 %2152 }
 0x41c   : > { %10158 = vmatprep.mubr.msk.bf16.mxu0 %vm16705_vm12, %v2153_v30 }
 0x41d   : > { %v11180_v5 = vpop.eup %11179  ;;  %2771 = vrot.lane.b32.xlu1 %v12425_v12, %s12031_s16 }
 0x41e   : > { %2797 = vrot.lane.b32.xlu0 %v16706_v40, %s12031_s16  ;;  %v1211_v55 = vmul.f32 %v11180_v5, %v12957_v31 }
 0x420   : > { %v1223_v56 = vpack.c.bf16 %v1212_v16, %v1211_v55 }
 0x421   : > { %v11182_v37 = vpop.eup %11181 }
 0x422   : > { %2791 = vrot.lane.b32.xlu0 %v16707_v41, %s12031_s16  ;;  %10018 = vmatprep.mubr.bf16.mxu1 %v1223_v56  ;;  %v11184_v63 = vpop.eup %11183  ;;  %v1217_v28 = vmul.f32 %v11182_v37, %v12960_v9  ;;  %v10961_v9 = vld [vmem:[#allocation5 + $0x8] sm:$0xff]  }
 0x423   : > { %10019 = vmatmul.mubr.bf16.gmra.mxu1 %v1224_v13  ;;  %v11186_v12 = vpop.eup %11185  ;;  %v1216_v48 = vmul.f32 %v11184_v63, %v12954_v35  ;;  %10026 = vmatprep.subr.bf16.mxu1 %v10961_v9 }
 0x424   : > { %v1218_v31 = vmul.f32 %v11186_v12, %v12950_v51  ;;  %10027 = vmatpush3.bf16.msra.mxu1 %v10961_v9 }
 0x425   : > { %v11188_v58 = vpop.eup %11187  ;;  %10028 = vmatprep.subr.bf16.mxu1 %v10962_v20 }
 0x426   : > { %2787 = vrot.lane.b32.xlu0 %v16708_v32, %s12031_s16  ;;  %v1215_v45 = vmul.f32 %v11188_v58, %v12963_v54  ;;  %v1226_v61 = vpack.c.bf16 %v1218_v31, %v1217_v28 }
 0x428   : > { %v1225_v53 = vpack.c.bf16 %v1216_v48, %v1215_v45  ;;  %10029 = vmatpush3.bf16.msra.mxu1 %v10962_v20 }
 0x42a   : > { %2783 = vrot.lane.b32.xlu0 %v16709_v47, %s12031_s16  ;;  %10022 = vmatprep.mubr.bf16.mxu1 %v1225_v53 }
 0x42b   : > { %10023 = vmatmul.mubr.bf16.gmra.mxu1 %v1226_v61 }
 0x42e   : > { %2769 = vrot.lane.b32.xlu0 %v16710_v23, %s12031_s16 }
 0x43d   : > { %v1699_v54 = vpop.xlane.xlu1 %1698 }
 0x43e   : > { %v1730_v51 = vsub.f32 %v12972_v34, %v1699_v54  ;;  %v13148_v54 = vpop.f32.mrf.mxu0 }
 0x440   : > { %v1746_v7 = vmul.f32 1.442695, %v1730_v51  ;;  %v2254_v51 = vpop.f32.mrf.mxu0 }
 0x441   : > { %v1703_v35 = vpop.xlane.xlu1 %1702 }
 0x442   : > { %v1732_v62 = vsub.f32 %v12977_v19, %v1703_v35 }
 0x444   : > { %v1750_v2 = vmul.f32 1.442695, %v1732_v62 }
 0x445   : > { %v1705_v26 = vpop.xlane.xlu1 %1704 }
 0x446   : > { %11189 = vpow2.f32 %v1750_v2  ;;  %v1733_v59 = vsub.f32 %v12984_v42, %v1705_v26  ;;  %v10149_v2 = vpop.f32.mrf.mxu0 }
 0x447   : > { %11191 = vpow2.f32 %v1746_v7 }
 0x448   : > { %v1752_v27 = vmul.f32 1.442695, %v1733_v59 }
 0x449   : > { %v1707_v57 = vpop.xlane.xlu1 %1706 }
 0x44a   : > { %11193 = vpow2.f32 %v1752_v27  ;;  %v1734_v16 = vsub.f32 %v12989_v14, %v1707_v57 }
 0x44c   : > { %v1701_v30 = vpop.xlane.xlu0 %1700  ;;  %v1754_v13 = vmul.f32 1.442695, %v1734_v16 }
 0x44d   : > { %v1731_v11 = vsub.f32 %v12994_v38, %v1701_v30  ;;  %v1709_v5 = vpop.xlane.xlu1 %1708 }
 0x44e   : > { %v1735_v49 = vsub.f32 %v12999_v46, %v1709_v5 }
 0x44f   : > { %v1748_v40 = vmul.f32 1.442695, %v1731_v11 }
 0x450   : > { %v2155_v34 = vpop.permute.xlu0 %2154  ;;  %v1756_v19 = vmul.f32 1.442695, %v1735_v49 }
 0x451   : > { %11195 = vpow2.f32 %v1748_v40  ;;  %10159 = vmatmul.mubr.msk.bf16.gmra.mxu0 %vm16705_vm12, %v2155_v34  ;;  %v1711_v55 = vpop.xlane.xlu1 %1710 }
 0x452   : > { %v1736_v42 = vsub.f32 %v13004_v39, %v1711_v55  ;;  %11197 = vpow2.f32 %v1756_v19 }
 0x453   : > { %v13119_v18 = vpop.eup %11189 }
 0x454   : > { %v1758_v56 = vmul.f32 1.442695, %v1736_v42  ;;  %1782 = vadd.xlane.f32.xlu1 %v13119_v18  ;;  %v13122_v46 = vpop.eup %11191 }
 0x455   : > { %v1715_v38 = vpop.xlane.xlu1 %1714 }
 0x456   : > { %11199 = vpow2.f32 %v1758_v56  ;;  %v1738_v34 = vsub.f32 %v13009_v3, %v1715_v38  ;;  %v13184_v3 = vsel %vm12664_vm4, %v10149_v2, -1e+30 }
 0x457   : > { %11201 = vpow2.f32 %v1754_v13  ;;  %v13126_v14 = vpop.eup %11193 }
 0x458   : > { %1778 = vadd.xlane.f32.xlu1 %v13122_v46  ;;  %v1762_v42 = vmul.f32 1.442695, %v1738_v34 }
 0x459   : > { %v1717_v37 = vpop.xlane.xlu1 %1716 }
 0x45a   : > { %v1739_v41 = vsub.f32 %v13014_v0, %v1717_v37 }
 0x45c   : > { %v1764_v39 = vmul.f32 1.442695, %v1739_v41  ;;  %1784 = vadd.xlane.f32.xlu1 %v13126_v14 }
 0x45d   : > { %v1719_v63 = vpop.xlane.xlu1 %1718 }
 0x45e   : > { %v13129_v12 = vpop.eup %11195  ;;  %11203 = vpow2.f32 %v1764_v39  ;;  %v1740_v57 = vsub.f32 %v13019_v10, %v1719_v63  ;;  %v13176_v10 = vsel %vm12648_vm2, %v2254_v51, -1e+30 }
 0x45f   : > { %v13132_v28 = vpop.eup %11197 }
 0x460   : > { %1780 = vadd.xlane.f32.xlu1 %v13129_v12  ;;  %v1766_v19 = vmul.f32 1.442695, %v1740_v57 }
 0x461   : > { %v1721_v58 = vpop.xlane.xlu1 %1720 }
 0x462   : > { %v1741_v56 = vsub.f32 %v13024_v44, %v1721_v58 }
 0x463   : > { %v13134_v32 = vpop.eup %11199 }
 0x464   : > { %1788 = vadd.xlane.f32.xlu1 %v13132_v28  ;;  %1790 = vadd.xlane.f32.xlu0 %v13134_v32  ;;  %v13138_v45 = vpop.eup %11201  ;;  %v1768_v41 = vmul.f32 1.442695, %v1741_v56 }
 0x465   : > { %v1723_v0 = vpop.xlane.xlu1 %1722 }
 0x466   : > { %v1742_v61 = vsub.f32 %v13031_v8, %v1723_v0  ;;  %v13158_v8 = vpop.f32.mrf.mxu0 }
 0x468   : > { %1786 = vadd.xlane.f32.xlu0 %v13138_v45  ;;  %v1770_v20 = vmul.f32 1.442695, %v1742_v61  ;;  %v13167_v11 = vpop.f32.mrf.mxu0 }
 0x469   : > { %v13141_v48 = vpop.xlane.xlu1 %1724 }
 0x46b   : > { %v13143_v31 = vpop.eup %11203 }
 0x46c   : > { %1796 = vadd.xlane.f32.xlu1 %v13143_v31 }
 0x46d   : > { %v1727_v53 = vpop.xlane.xlu1 %1726 }
 0x46e   : > { %v1744_v47 = vsub.f32 %v13041_v29, %v1727_v53  ;;  %v1743_v53 = vsub.f32 %v13036_v25, %v13141_v48 }
 0x470   : > { %v1774_v23 = vmul.f32 1.442695, %v1744_v47  ;;  %v1772_v51 = vmul.f32 1.442695, %v1743_v53 }
 0x471   : > { %v1729_v9 = vpop.xlane.xlu1 %1728 }
 0x472   : > { %11205 = vpow2.f32 %v1774_v23  ;;  %v1745_v39 = vsub.f32 %v13046_v60, %v1729_v9  ;;  %v16711_v23 = vld [vmem:[#allocation38_spill] sm:$0xff] }
 0x473   : > { %11207 = vpow2.f32 %v1770_v20 }
 0x474   : > { %v1776_v61 = vmul.f32 1.442695, %v1745_v39 }
 0x475   : > { %v13150_v35 = vpop.permute.xlu1 %1870 }
 0x479   : > { %v13152_v62 = vpop.permute.xlu1 %1864 }
 0x47d   : > { %v13154_v26 = vpop.permute.xlu1 %1862 }
 0x47f   : > { %v13156_v7 = vpop.eup %11205 }
 0x480   : > { %1806 = vadd.xlane.f32.xlu1 %v13156_v7  ;;  %v13165_v30 = vpop.eup %11207 }
 0x481   : > { %v1713_v29 = vpop.xlane.xlu0 %1712  ;;  %v13161_v59 = vpop.permute.xlu1 %1858 }
 0x482   : > { %v1737_v27 = vsub.f32 %v13056_v21, %v1713_v29  ;;  %v2270_v21 = vpop.f32.mrf.mxu0 }
 0x483   : > { %v13194_v63 = vsel %vm12691_vm6, %v2270_v21, -1e+30  ;;  %vm16712_vm6 = vmmov %vm16705_vm12 }
 0x484   : > { %v1760_v5 = vmul.f32 1.442695, %v1737_v27  ;;  %1802 = vadd.xlane.f32.xlu1 %v13165_v30  ;;  %v13186_v38 = vpop.f32.mrf.mxu0  ;;  %vm16713_vm4 = vmmov %vm16712_vm6 }
 0x485   : > { %v13170_v49 = vpop.permute.xlu0 %1872  ;;  %v2796_v40 = vpop.permute.xlu1 %2795  ;;  %vm16714_vm2 = vmmov %vm16713_vm4 }
 0x486   : > { %11209 = vpow2.f32 %v1760_v5  ;;  %10078 = vmatprep.subr.bf16.mxu1 %v13170_v49  ;;  %v2273_v44 = vpop.f32.mrf.mxu0  ;;  %v16717_v5 = vld [vmem:[#allocation28_spill] sm:$0xff]  ;;  %vm16722_vm14 = vmmov %vm16714_vm2 }
 0x487   : > { %11211 = vpow2.f32 %v1766_v19  ;;  %v13207_v60 = vsel %vm12713_vm8, %v2273_v44, -1e+30  ;;  %vm16715_vm8 = vmmov %vm16714_vm2 }
 0x488   : > { %2333 = vmax.xlane.f32.xlu1 %v13176_v10  ;;  %11213 = vpow2.f32 %v1762_v42  ;;  %v2842_v29 = vsel %vm16715_vm8, %v2796_v40, 0  ;;  %vm16719_vm8 = vmmov %vm16714_vm2 }
 0x489   : > { %v13179_v55 = vpop.permute.xlu0 %1868  ;;  %v2794_v16 = vpop.permute.xlu1 %2793  ;;  %11215 = vpow2.f32 %v1768_v41 }
 0x48a   : > { %11217 = vpow2.f32 %v1776_v61  ;;  %v2839_v34 = vsel %vm16714_vm2, %v2794_v16, 0 }
 0x48b   : > { %11219 = vpow2.f32 %v1772_v51 }
 0x48c   : > { %2339 = vmax.xlane.f32.xlu1 %v13184_v3 }
 0x48d   : > { %v13189_v13 = vpop.permute.xlu0 %1866  ;;  %v2790_v37 = vpop.permute.xlu1 %2789 }
 0x490   : > { %2341 = vmax.xlane.f32.xlu1 %v13194_v63 }
 0x491   : > { %v13197_v58 = vpop.permute.xlu0 %1860  ;;  %v13199_v0 = vpop.permute.xlu1 %2785 }
 0x493   : > { %v13203_v47 = vpop.eup %11209 }
 0x494   : > { %1792 = vadd.xlane.f32.xlu0 %v13203_v47  ;;  %2343 = vmax.xlane.f32.xlu1 %v13207_v60  ;;  %v13214_v48 = vpop.eup %11211 }
 0x495   : > { %v2798_v9 = vpop.permute.xlu0 %2797  ;;  %v2768_v20 = vpop.permute.xlu1 %2767 }
 0x496   : > { %10782 = vmatprep.subr.msk.bf16.mxu0 %vm16705_vm12, %v2798_v9  ;;  %10230 = vmatprep.mubr.msk.bf16.mxu0 %vm16712_vm6, %v2768_v20  ;;  %v2845_v25 = vsel %vm16713_vm4, %v2798_v9, 0  ;;  %v13218_v2 = vpop.eup %11213  ;;  %vm16716_vm4 = vmmov %vm16714_vm2  ;;  %v16723_v9 = vld [vmem:[#allocation25_spill] sm:$0xff] }
 0x497   : > { %10215 = vmatpush3.bf16.xpose.msra.mxu0 %v2845_v25  ;;  %v13222_v57 = vpop.eup %11215  ;;  %vm16718_vm6 = vmmov %vm16714_vm2 }
 0x498   : > { %1798 = vadd.xlane.f32.xlu0 %v13214_v48  ;;  %10783 = vmatprep.subr.msk.bf16.mxu0 %vm16714_vm2, %v2796_v40  ;;  %v13226_v27 = vpop.eup %11217  ;;  %vm16720_vm12 = vmmov %vm16714_vm2 }
 0x499   : > { %v13232_v19 = vpop.eup %11219  ;;  %v2792_v21 = vpop.permute.xlu0 %2791 }
 0x49a   : > { %v2836_v40 = vsel %vm16719_vm8, %v2792_v21, 0  ;;  %vm16725_vm8 = vmmov %vm16714_vm2 }
 0x49c   : > { %1794 = vadd.xlane.f32.xlu0 %v13218_v2 }
 0x49d   : > { %v2788_v41 = vpop.permute.xlu0 %2787 }
 0x49f   : > { %10217 = vmatpush3.bf16.xpose.msra.mxu0 %v2842_v29 }
 0x4a0   : > { %1800 = vadd.xlane.f32.xlu0 %v13222_v57  ;;  %10784 = vmatprep.subr.msk.bf16.mxu0 %vm16716_vm4, %v2794_v16  ;;  %vm16721_vm4 = vmmov %vm16714_vm2 }
 0x4a1   : > { %v2833_v56 = vsel %vm16721_vm4, %v2790_v37, 0  ;;  %vm16728_vm4 = vmmov %vm16714_vm2 }
 0x4a4   : > { %1808 = vadd.xlane.f32.xlu0 %v13226_v27 }
 0x4a5   : > { %2777 = vrot.lane.b32.xlu1 %v16717_v5, %s12031_s16 }
 0x4a7   : > { %10219 = vmatpush3.bf16.xpose.msra.mxu0 %v2839_v34  ;;  %v2784_v34 = vpop.permute.xlu0 %2783 }
 0x4a8   : > { %1804 = vadd.xlane.f32.xlu0 %v13232_v19  ;;  %10785 = vmatprep.subr.msk.bf16.mxu0 %vm16718_vm6, %v2792_v21  ;;  %vm16724_vm6 = vmmov %vm16714_vm2 }
 0x4a9   : > { %v2830_v20 = vsel %vm16724_vm6, %v2788_v41, 0  ;;  %vm16729_vm6 = vmmov %vm16714_vm2 }
 0x4af   : > { %10221 = vmatpush3.bf16.xpose.msra.mxu0 %v2836_v40  ;;  %v13258_v40 = vsel %vm16704_vm7, %v13186_v38, -1e+30 }
 0x4b0   : > { %10786 = vmatprep.subr.msk.bf16.mxu0 %vm16720_vm12, %v2790_v37  ;;  %vm16726_vm12 = vmmov %vm16714_vm2 }
 0x4b4   : > { %v10012_v42 = vpop.f32.mrf.mxu1 }
 0x4b6   : > { %v1261_v39 = vpop.f32.mrf.mxu1 }
 0x4b7   : > { %10223 = vmatpush3.bf16.xpose.msra.mxu0 %v2833_v56 }
 0x4b8   : > { %10787 = vmatprep.subr.msk.bf16.mxu0 %vm16714_vm2, %v2788_v41  ;;  %v10013_v16 = vpop.f32.mrf.mxu1  ;;  %v2772_v41 = vpop.permute.xlu1 %2771 }
 0x4b9   : > { %v1325_v61 = vpack.c.bf16 %v10013_v16, %v10012_v42 }
 0x4ba   : > { %v1264_v44 = vpop.f32.mrf.mxu1 }
 0x4bb   : > { %v1324_v53 = vpack.c.bf16 %v1264_v44, %v1261_v39  ;;  %v13288_v39 = vsel %vm12654_vm3, %v13158_v8, -1e+30  ;;  %v13294_v44 = vsel %vm12636_vm1, %v13148_v54, -1e+30 }
 0x4bd   : > { %10030 = vmatprep.mubr.msk.bf16.mxu1 %vm16722_vm14, %v1324_v53  ;;  %vm16727_vm14 = vmmov %vm16714_vm2 }
 0x4be   : > { %2773 = vrot.lane.b32.xlu0 %v16723_v9, %s12031_s16  ;;  %10031 = vmatmul.mubr.msk.bf16.vlgmr.msra.gmra.mxu1 %vm16725_vm8, %v1325_v61  ;;  %v2827_v5 = vsel %vm16727_vm14, %v13199_v0, 0  ;;  %vm16730_vm8 = vmmov %vm16714_vm2 }
 0x4bf   : > { %10225 = vmatpush3.bf16.xpose.msra.mxu0 %v2830_v20  ;;  %10079 = vmatpush3.bf16.msra.mxu1 %v13170_v49  ;;  %vm16733_vm14 = vmmov %vm16714_vm2 }
 0x4c0   : > { %v10016_v37 = vpop.f32.mrf.mxu1  ;;  %10788 = vmatprep.subr.msk.bf16.mxu0 %vm16726_vm12, %v13199_v0  ;;  %10080 = vmatprep.subr.bf16.mxu1 %v13150_v35  ;;  %vm16732_vm12 = vmmov %vm16714_vm2 }
 0x4c2   : > { %v1277_v51 = vpop.f32.mrf.mxu1 }
 0x4c3   : > { %10081 = vmatpush3.bf16.msra.mxu1 %v13150_v35 }
 0x4c4   : > { %v10017_v25 = vpop.f32.mrf.mxu1  ;;  %10082 = vmatprep.subr.bf16.mxu1 %v13179_v55 }
 0x4c5   : > { %v1327_v49 = vpack.c.bf16 %v10017_v25, %v10016_v37 }
 0x4c6   : > { %v1280_v29 = vpop.f32.mrf.mxu1 }
 0x4c7   : > { %v1326_v21 = vpack.c.bf16 %v1280_v29, %v1277_v51  ;;  %10227 = vmatpush3.bf16.xpose.msra.mxu0 %v2827_v5  ;;  %10083 = vmatpush3.bf16.msra.mxu1 %v13179_v55  ;;  %v2824_v55 = vsel %vm16730_vm8, %v2784_v34, 0  ;;  %vm16738_vm8 = vmmov %vm16714_vm2 }
 0x4c8   : > { %10789 = vmatprep.subr.msk.bf16.mxu0 %vm16728_vm4, %v2784_v34  ;;  %10084 = vmatprep.subr.bf16.mxu1 %v13189_v13  ;;  %vm16736_vm4 = vmmov %vm16714_vm2 }
 0x4c9   : > { %10034 = vmatprep.mubr.msk.bf16.mxu1 %vm16714_vm2, %v1326_v21  ;;  %2347 = vmax.xlane.f32.xlu1 %v13258_v40 }
 0x4ca   : > { %10035 = vmatmul.mubr.msk.bf16.gmra.mxu1 %vm16729_vm6, %v1327_v49  ;;  %vm16737_vm6 = vmmov %vm16714_vm2 }
 0x4cb   : > { %10085 = vmatpush3.bf16.msra.mxu1 %v13189_v13  ;;  %v2770_v13 = vpop.permute.xlu0 %2769 }
 0x4cc   : > { %10086 = vmatprep.subr.bf16.mxu1 %v13152_v62 }
 0x4cd   : > { %v13266_v35 = vpop.f32.mrf.mxu0 }
 0x4cf   : > { %v13269_v0 = vpop.f32.mrf.mxu0  ;;  %10229 = vmatpush3.bf16.xpose.msra.mxu0 %v2824_v55  ;;  %10087 = vmatpush3.bf16.msra.mxu1 %v13152_v62  ;;  %v16734_v62 = vld [vmem:[#allocation34_spill] sm:$0xff] }
 0x4d0   : > { %10088 = vmatprep.subr.bf16.mxu1 %v13154_v26 }
 0x4d1   : > { %v10157_v38 = vpop.f32.mrf.mxu0 }
 0x4d2   : > { %v13275_v56 = vsel %vm12737_vm10, %v10157_v38, -1e+30 }
 0x4d3   : > { %2355 = vmax.xlane.f32.xlu1 %v13275_v56  ;;  %10089 = vmatpush3.bf16.msra.mxu1 %v13154_v26 }
 0x4d4   : > { %10090 = vmatprep.subr.bf16.mxu1 %v13197_v58 }
 0x4d6   : > { %10231 = vmatmul.mubr.msk.bf16.vlgmr.msra.gmra.mxu0 %vm16732_vm12, %v2770_v13  ;;  %vm16747_vm12 = vmmov %vm16714_vm2 }
 0x4d7   : > { %10234 = vmatprep.mubr.msk.bf16.mxu0 %vm16733_vm14, %v2772_v41  ;;  %10091 = vmatpush3.bf16.msra.mxu1 %v13197_v58 }
 0x4d8   : > { %10092 = vmatprep.subr.bf16.mxu1 %v13161_v59 }
 0x4db   : > { %10093 = vmatpush3.bf16.msra.mxu1 %v13161_v59 }
 0x4dd   : > { %2335 = vmax.xlane.f32.xlu0 %v13288_v39  ;;  %v1783_v26 = vpop.xlane.xlu1 %1782 }
 0x4e1   : > { %2337 = vmax.xlane.f32.xlu0 %v13294_v44  ;;  %v1779_v58 = vpop.xlane.xlu1 %1778 }
 0x4e3   : > { %v10020_v53 = vpop.f32.mrf.mxu1 }
 0x4e5   : > { %v1293_v61 = vpop.f32.mrf.mxu1  ;;  %v1785_v9 = vpop.xlane.xlu1 %1784 }
 0x4e6   : > { %11221 = vrcp.f32 %v1785_v9 }
 0x4e7   : > { %v10021_v59 = vpop.f32.mrf.mxu1  ;;  %11223 = vrcp.f32 %v1779_v58 }
 0x4e8   : > { %11225 = vrcp.f32 %v1783_v26  ;;  %v1329_v51 = vpack.c.bf16 %v10021_v59, %v10020_v53  ;;  %v16739_v53 = vld [vmem:[#allocation26_spill] sm:$0xff] }
 0x4e9   : > { %v1296_v8 = vpop.f32.mrf.mxu1  ;;  %v1781_v20 = vpop.xlane.xlu1 %1780 }
 0x4ea   : > { %v1328_v37 = vpack.c.bf16 %v1296_v8, %v1293_v61  ;;  %11227 = vrcp.f32 %v1781_v20 }
 0x4eb   : > { %v10024_v25 = vpop.f32.mrf.mxu1 }
 0x4ec   : > { %10038 = vmatprep.mubr.msk.bf16.mxu1 %vm16736_vm4, %v1328_v37 }
 0x4ed   : > { %v1309_v54 = vpop.f32.mrf.mxu1  ;;  %10039 = vmatmul.mubr.msk.bf16.gmra.mxu1 %vm16714_vm2, %v1329_v51  ;;  %v1791_v29 = vpop.xlane.xlu0 %1790 }
 0x4ee   : > { %v1789_v5 = vpop.xlane.xlu1 %1788 }
 0x4ef   : > { %v10025_v34 = vpop.f32.mrf.mxu1  ;;  %11229 = vrcp.f32 %v1789_v5 }
 0x4f0   : > { %v1331_v38 = vpack.c.bf16 %v10025_v34, %v10024_v25 }
 0x4f1   : > { %v1312_v21 = vpop.f32.mrf.mxu1  ;;  %v1787_v49 = vpop.xlane.xlu0 %1786 }
 0x4f2   : > { %v1330_v55 = vpack.c.bf16 %v1312_v21, %v1309_v54  ;;  %11231 = vrcp.f32 %v1787_v49  ;;  %v2289_v21 = vpop.f32.mrf.mxu0  ;;  %v16740_v49 = vld [vmem:[#allocation43_spill] sm:$0xff] }
 0x4f3   : > { %v11222_v13 = vpop.eup %11221  ;;  %11233 = vrcp.f32 %v1791_v29 }
 0x4f4   : > { %10042 = vmatprep.mubr.msk.bf16.mxu1 %vm16737_vm6, %v1330_v55  ;;  %v11224_v41 = vpop.eup %11223  ;;  %v1829_v61 = vmul.f32 %v11222_v13, %v13126_v14  ;;  %v13318_v55 = vsel %vm12680_vm5, %v13167_v11, -1e+30  ;;  %vm16753_vm6 = vmmov %vm16714_vm2 }
 0x4f5   : > { %10043 = vmatmul.mubr.msk.bf16.gmra.mxu1 %vm16738_vm8, %v1331_v38  ;;  %v11226_v26 = vpop.eup %11225  ;;  %v1826_v9 = vmul.f32 %v11224_v41, %v13122_v46  ;;  %vm16756_vm8 = vmmov %vm16714_vm2 }
 0x4f6   : > { %v1828_v8 = vmul.f32 %v11226_v26, %v13119_v18  ;;  %v13331_v26 = vsel %vm12802_vm0, %v13269_v0, -1e+30  ;;  %v1797_v0 = vpop.xlane.xlu1 %1796 }
 0x4f7   : > { %v11228_v58 = vpop.eup %11227  ;;  %2775 = vrot.lane.b32.xlu0 %v16739_v53, %s12031_s16  ;;  %v13337_v53 = vsel %vm12748_vm11, %v2289_v21, -1e+30 }
 0x4f8   : > { %v1827_v59 = vmul.f32 %v11228_v58, %v13129_v12  ;;  %v1843_v37 = vpack.c.bf16 %v1829_v61, %v1828_v8 }
 0x4fa   : > { %v1842_v20 = vpack.c.bf16 %v1827_v59, %v1826_v9  ;;  %v13343_v9 = vsel %vm12724_vm9, %v13266_v35, -1e+30 }
 0x4fc   : > { %10094 = vmatprep.mubr.bf16.mxu1 %v1842_v20  ;;  %v11230_v51 = vpop.eup %11229 }
 0x4fd   : > { %10095 = vmatmul.mubr.bf16.vlgmr.msra.gmra.mxu1 %v1843_v37  ;;  %v1831_v5 = vmul.f32 %v11230_v51, %v13132_v28  ;;  %v16746_v51 = vld [vmem:[#allocation31_spill] sm:$0xff] }
 0x4ff   : > { %v11232_v25 = vpop.eup %11231 }
 0x500   : > { %v1830_v54 = vmul.f32 %v11232_v25, %v13138_v45  ;;  %v16742_v45 = vld [vmem:[#allocation45_spill] sm:$0xff]  ;;  %v11234_v37 = vpop.eup %11233 }
 0x501   : > { %v1832_v35 = vmul.f32 %v11234_v37, %v13134_v32 }
 0x502   : > { %v1844_v34 = vpack.c.bf16 %v1831_v5, %v1830_v54 }
 0x504   : > { %10098 = vmatprep.mubr.bf16.mxu1 %v1844_v34 }
 0x509   : > { %v1807_v29 = vpop.xlane.xlu1 %1806 }
 0x50d   : > { %v1803_v54 = vpop.xlane.xlu1 %1802 }
 0x511   : > { %v13309_v14 = vpop.f32.mrf.mxu0 }
 0x513   : > { %v2302_v46 = vpop.f32.mrf.mxu0 }
 0x514   : > { %v13313_v12 = vsel %vm12770_vm13, %v2302_v46, -1e+30 }
 0x515   : > { %v13320_v38 = vpop.f32.mrf.mxu0  ;;  %2357 = vmax.xlane.f32.xlu1 %v13313_v12 }
 0x516   : > { %2345 = vmax.xlane.f32.xlu0 %v13318_v55 }
 0x517   : > { %v2305_v28 = vpop.f32.mrf.mxu0 }
 0x518   : > { %v13326_v13 = vsel %vm12792_vm15, %v2305_v28, -1e+30 }
 0x519   : > { %2359 = vmax.xlane.f32.xlu1 %v13326_v13 }
 0x51a   : > { %2349 = vmax.xlane.f32.xlu0 %v13331_v26 }
 0x51d   : > { %v1793_v11 = vpop.xlane.xlu0 %1792 }
 0x51e   : > { %2351 = vmax.xlane.f32.xlu0 %v13337_v53  ;;  %11235 = vrcp.f32 %v1793_v11 }
 0x51f   : > { %11237 = vrcp.f32 %v1797_v0 }
 0x521   : > { %v1799_v59 = vpop.xlane.xlu0 %1798 }
 0x522   : > { %2353 = vmax.xlane.f32.xlu0 %v13343_v9 }
 0x525   : > { %v1795_v8 = vpop.xlane.xlu0 %1794 }
 0x526   : > { %11239 = vrcp.f32 %v1795_v8 }
 0x527   : > { %11241 = vrcp.f32 %v1799_v59 }
 0x529   : > { %v1801_v20 = vpop.xlane.xlu0 %1800 }
 0x52a   : > { %11243 = vrcp.f32 %v1801_v20  ;;  %2781 = vrot.lane.b32.xlu1 %v16746_v51, %s12031_s16 }
 0x52b   : > { %v11236_v25 = vpop.eup %11235 }
 0x52c   : > { %v1833_v34 = vmul.f32 %v11236_v25, %v13203_v47  ;;  %v11238_v46 = vpop.eup %11237  ;;  %v16748_v47 = vld [vmem:[#allocation30_spill] sm:$0xff] }
 0x52d   : > { %v1809_v5 = vpop.xlane.xlu0 %1808  ;;  %v1835_v59 = vmul.f32 %v11238_v46, %v13143_v31 }
 0x52e   : > { %11245 = vrcp.f32 %v1809_v5  ;;  %v1845_v21 = vpack.c.bf16 %v1833_v34, %v1832_v35  ;;  %v10963_v34 = vld [vmem:[#allocation5 + $0x18] sm:$0xff]  }
 0x52f   : > { %11247 = vrcp.f32 %v1803_v54  ;;  %10110 = vmatprep.subr.bf16.mxu1 %v10963_v34 }
 0x530   : > { %11249 = vrcp.f32 %v1807_v29  ;;  %10099 = vmatmul.mubr.bf16.gmra.mxu1 %v1845_v21 }
 0x531   : > { %v1805_v28 = vpop.xlane.xlu0 %1804  ;;  %10111 = vmatpush3.bf16.msra.mxu1 %v10963_v34 }
 0x532   : > { %11251 = vrcp.f32 %v1805_v28 }
 0x533   : > { %v11240_v11 = vpop.eup %11239 }
 0x534   : > { %v1834_v0 = vmul.f32 %v11240_v11, %v13218_v2  ;;  %v11242_v8 = vpop.eup %11241 }
 0x535   : > { %v2774_v20 = vpop.permute.xlu0 %2773  ;;  %v1836_v29 = vmul.f32 %v11242_v8, %v13214_v48 }
 0x536   : > { %10235 = vmatmul.mubr.msk.bf16.gmra.mxu0 %vm16747_vm12, %v2774_v20  ;;  %v1846_v32 = vpack.c.bf16 %v1835_v59, %v1834_v0  ;;  %v16749_v0 = vld [vmem:[#allocation44_spill] sm:$0xff]  ;;  %vm16758_vm12 = vmmov %vm16714_vm2 }
 0x537   : > { %v11244_v37 = vpop.eup %11243  ;;  %vm16750_vm14 = vnez %v16749_v0 }
 0x538   : > { %2779 = vrot.lane.b32.xlu0 %v16748_v47, %s12031_s16  ;;  %10102 = vmatprep.mubr.bf16.mxu1 %v1846_v32  ;;  %v1837_v51 = vmul.f32 %v11244_v37, %v13222_v57  ;;  %v10964_v57 = vld [vmem:[#allocation5 + $0x10] sm:$0xff]  }
 0x539   : > { %10112 = vmatprep.subr.bf16.mxu1 %v10964_v57 }
 0x53a   : > { %v1847_v25 = vpack.c.bf16 %v1837_v51, %v1836_v29  ;;  %10113 = vmatpush3.bf16.msra.mxu1 %v10964_v57 }
 0x53b   : > { %v11246_v54 = vpop.eup %11245 }
 0x53c   : > { %10103 = vmatmul.mubr.bf16.gmra.mxu1 %v1847_v25  ;;  %v11248_v2 = vpop.eup %11247  ;;  %v1841_v35 = vmul.f32 %v11246_v54, %v13226_v27  ;;  %v13364_v27 = vsel %vm16750_vm14, %v13320_v38, -1e+30 }
 0x53d   : > { %v11250_v5 = vpop.eup %11249  ;;  %v1838_v21 = vmul.f32 %v11248_v2, %v13165_v30  ;;  %v16751_v30 = vld [vmem:[#allocation42_spill] sm:$0xff] }
 0x53e   : > { %v1840_v28 = vmul.f32 %v11250_v5, %v13156_v7  ;;  %vm16752_vm4 = vnez %v16751_v30 }
 0x53f   : > { %v11252_v31 = vpop.eup %11251  ;;  %v13370_v7 = vsel %vm16752_vm4, %v13309_v14, -1e+30 }
 0x540   : > { %v1839_v46 = vmul.f32 %v11252_v31, %v13232_v19  ;;  %v1849_v48 = vpack.c.bf16 %v1841_v35, %v1840_v28  ;;  %v2334_v19 = vpop.xlane.xlu1 %2333 }
 0x541   : > { %v2365_v29 = vsub.f32 %v13176_v10, %v2334_v19 }
 0x542   : > { %v1848_v11 = vpack.c.bf16 %v1839_v46, %v1838_v21 }
 0x543   : > { %v2381_v54 = vmul.f32 1.442695, %v2365_v29 }
 0x544   : > { %10106 = vmatprep.mubr.bf16.mxu1 %v1848_v11  ;;  %v2340_v59 = vpop.xlane.xlu1 %2339 }
 0x545   : > { %10107 = vmatmul.mubr.bf16.gmra.mxu1 %v1849_v48  ;;  %v2368_v25 = vsub.f32 %v13184_v3, %v2340_v59 }
 0x547   : > { %v2387_v5 = vmul.f32 1.442695, %v2368_v25 }
 0x548   : > { %v2342_v8 = vpop.xlane.xlu1 %2341 }
 0x549   : > { %v2369_v31 = vsub.f32 %v13194_v63, %v2342_v8 }
 0x54b   : > { %v2389_v34 = vmul.f32 1.442695, %v2369_v31 }
 0x54c   : > { %v2344_v20 = vpop.xlane.xlu1 %2343 }
 0x54e   : > { %2363 = vmax.xlane.f32.xlu1 %v13364_v27 }
 0x550   : > { %v2778_v37 = vpop.permute.xlu1 %2777 }
 0x554   : > { %v2348_v46 = vpop.xlane.xlu1 %2347 }
 0x557   : > { %2361 = vmax.xlane.f32.xlu0 %v13370_v7 }
 0x55c   : > { %v2356_v48 = vpop.xlane.xlu1 %2355 }
 0x55f   : > { %2497 = vrot.lane.b32.xlu1 %v12870_v43, %s12030_s25 }
 0x563   : > { %2495 = vrot.lane.b32.xlu1 %v12879_v24, %s12030_s25 }
 0x566   : > { %v2336_v38 = vpop.xlane.xlu0 %2335 }
 0x567   : > { %2491 = vrot.lane.b32.xlu1 %v12902_v50, %s12030_s25  ;;  %v2366_v2 = vsub.f32 %v13288_v39, %v2336_v38  ;;  %v2372_v38 = vsub.f32 %v13258_v40, %v2348_v46 }
 0x569   : > { %v2383_v35 = vmul.f32 1.442695, %v2366_v2 }
 0x56a   : > { %v2338_v32 = vpop.xlane.xlu0 %2337 }
 0x56b   : > { %2487 = vrot.lane.b32.xlu1 %v12924_v1, %s12030_s25  ;;  %v2367_v47 = vsub.f32 %v13294_v44, %v2338_v32 }
 0x56d   : > { %2499 = vrot.lane.b32.xlu0 %v12864_v33, %s12030_s25  ;;  %v2385_v51 = vmul.f32 1.442695, %v2367_v47 }
 0x56e   : > { %v2776_v14 = vpop.permute.xlu0 %2775 }
 0x56f   : > { %10238 = vmatprep.mubr.msk.bf16.mxu0 %vm16714_vm2, %v2776_v14  ;;  %11253 = vpow2.f32 %v2385_v51  ;;  %v2395_v51 = vmul.f32 1.442695, %v2372_v38 }
 0x570   : > { %10239 = vmatmul.mubr.msk.bf16.gmra.mxu0 %vm16753_vm6, %v2778_v37  ;;  %11255 = vpow2.f32 %v2381_v54  ;;  %v2370_v37 = vsub.f32 %v13207_v60, %v2344_v20  ;;  %vm16765_vm6 = vmmov %vm16714_vm2 }
 0x571   : > { %2493 = vrot.lane.b32.xlu0 %v12892_v4, %s12030_s25  ;;  %11257 = vpow2.f32 %v2387_v5 }
 0x572   : > { %11259 = vpow2.f32 %v2383_v35  ;;  %v2391_v54 = vmul.f32 1.442695, %v2370_v37 }
 0x573   : > { %11261 = vpow2.f32 %v2389_v34 }
 0x575   : > { %2489 = vrot.lane.b32.xlu0 %v12915_v15, %s12030_s25 }
 0x57c   : > { %v13394_v21 = vpop.eup %11253 }
 0x57d   : > { %v13399_v3 = vpop.eup %11255 }
 0x57e   : > { %v13397_v10 = vpop.f32.mrf.mxu1  ;;  %v13401_v44 = vpop.eup %11257 }
 0x57f   : > { %v13407_v39 = vpop.eup %11259 }
 0x580   : > { %v13405_v63 = vpop.f32.mrf.mxu1  ;;  %v13412_v11 = vpop.eup %11261 }
 0x582   : > { %v13410_v28 = vpop.f32.mrf.mxu1 }
 0x584   : > { %v13415_v57 = vpop.f32.mrf.mxu1 }
 0x585   : > { %16754 = vst [vmem:[#allocation29_spill] sm:$0xff] %v13415_v57 }
 0x58a   : > { %v13419_v59 = vpop.f32.mrf.mxu1 }
 0x58c   : > { %v13424_v47 = vpop.f32.mrf.mxu1 }
 0x58e   : > { %v13426_v2 = vpop.f32.mrf.mxu1 }
 0x58f   : > { %2417 = vadd.xlane.f32.xlu1 %v13394_v21 }
 0x593   : > { %2413 = vadd.xlane.f32.xlu1 %v13399_v3 }
 0x594   : > { %2419 = vadd.xlane.f32.xlu0 %v13401_v44 }
 0x597   : > { %2415 = vadd.xlane.f32.xlu1 %v13407_v39 }
 0x59b   : > { %2421 = vadd.xlane.f32.xlu1 %v13412_v11 }
 0x59e   : > { %v13417_v19 = vpop.xlane.xlu1 %2357 }
 0x59f   : > { %v2346_v8 = vpop.xlane.xlu0 %2345 }
 0x5a0   : > { %v2371_v32 = vsub.f32 %v13318_v55, %v2346_v8  ;;  %v13430_v55 = vpop.f32.mrf.mxu1 }
 0x5a1   : > { %16755 = vst [vmem:[#allocation27_spill] sm:$0xff] %v13430_v55  ;;  %v2377_v55 = vsub.f32 %v13313_v12, %v13417_v19 }
 0x5a2   : > { %v2393_v14 = vmul.f32 1.442695, %v2371_v32  ;;  %v2360_v25 = vpop.xlane.xlu1 %2359 }
 0x5a3   : > { %v2350_v29 = vpop.xlane.xlu0 %2349  ;;  %v2378_v5 = vsub.f32 %v13326_v13, %v2360_v25 }
 0x5a4   : > { %11263 = vpow2.f32 %v2393_v14  ;;  %v2373_v34 = vsub.f32 %v13331_v26, %v2350_v29 }
 0x5a5   : > { %11265 = vpow2.f32 %v2395_v51  ;;  %v2407_v60 = vmul.f32 1.442695, %v2378_v5 }
 0x5a6   : > { %11267 = vpow2.f32 %v2391_v54  ;;  %v2397_v14 = vmul.f32 1.442695, %v2373_v34  ;;  %v2782_v37 = vpop.permute.xlu1 %2781 }
 0x5a7   : > { %v2352_v31 = vpop.xlane.xlu0 %2351 }
 0x5a8   : > { %v2374_v40 = vsub.f32 %v13337_v53, %v2352_v31  ;;  %v2376_v53 = vsub.f32 %v13275_v56, %v2356_v48  ;;  %v13451_v48 = vld [vmem:[#allocation10 + $0x6] ss:$0 sm:$0xff] }
 0x5aa   : > { %v2399_v35 = vmul.f32 1.442695, %v2374_v40  ;;  %v2403_v25 = vmul.f32 1.442695, %v2376_v53 }
 0x5ab   : > { %v2354_v20 = vpop.xlane.xlu0 %2353 }
 0x5ac   : > { %11269 = vpow2.f32 %v2399_v35  ;;  %v2375_v46 = vsub.f32 %v13343_v9, %v2354_v20  ;;  %v16759_v9 = vmov 0  }
 0x5ad   : > { %v13434_v8 = vpop.f32.mrf.mxu1  ;;  %11271 = vpow2.f32 %v2407_v60 }
 0x5ae   : > { %v2401_v38 = vmul.f32 1.442695, %v2375_v46 }
 0x5af   : > { %v13436_v13 = vpop.f32.mrf.mxu1  ;;  %v2780_v32 = vpop.permute.xlu0 %2779 }
 0x5b0   : > { %11273 = vpow2.f32 %v2401_v38  ;;  %10242 = vmatprep.mubr.msk.bf16.mxu0 %vm16756_vm8, %v2780_v32  ;;  %vm16766_vm8 = vmmov %vm16714_vm2 }
 0x5b1   : > { %v13440_v51 = vpop.eup %11263  ;;  %v13442_v26 = vpop.f32.mrf.mxu1  ;;  %10243 = vmatmul.mubr.msk.bf16.gmra.mxu0 %vm16758_vm12, %v2782_v37  ;;  %11275 = vpow2.f32 %v2397_v14  ;;  %vm16767_vm12 = vmmov %vm16714_vm2 }
 0x5b2   : > { %16757 = vst [vmem:[#allocation24_spill] sm:$0xff] %v13442_v26  ;;  %2425 = vadd.xlane.f32.xlu0 %v13440_v51  ;;  %3778 = vmatprep.mubr.bf16.mxu0 %v16759_v9  ;;  %v13449_v56 = vpop.eup %11265  ;;  %11277 = vpow2.f32 %v2403_v25 }
 0x5b3   : > { %v13447_v29 = vpop.f32.mrf.mxu1  ;;  %v13457_v40 = vpop.eup %11267 }
 0x5b4   : > { %16760 = vst [vmem:[#allocation22_spill] sm:$0xff] %v13447_v29 }
 0x5b5   : > { %v10044_v54 = vpop.f32.mrf.mxu1 }
 0x5b6   : > { %v13454_v5 = vadd.f32 %v10044_v54, %v13451_v48  ;;  %2427 = vadd.xlane.f32.xlu0 %v13449_v56 }
 0x5b7   : > { %v1454_v31 = vpop.f32.mrf.mxu1 }
 0x5b8   : > { %16761 = vst [vmem:[#allocation23_spill] sm:$0xff] %v13454_v5  ;;  %v13460_v35 = vadd.f32 %v13451_v48, %v1454_v31 }
 0x5b9   : > { %v13462_v60 = vpop.eup %11269  ;;  %v10045_v20 = vpop.f32.mrf.mxu1 }
 0x5ba   : > { %16762 = vst [vmem:[#allocation28_spill] sm:$0xff] %v13460_v35  ;;  %v13465_v34 = vadd.f32 %v10045_v20, %v13451_v48  ;;  %2431 = vadd.xlane.f32.xlu1 %v13462_v60  ;;  %2423 = vadd.xlane.f32.xlu0 %v13457_v40  ;;  %v13471_v38 = vpop.eup %11271 }
 0x5bb   : > { %v13469_v46 = vpop.f32.mrf.mxu1 }
 0x5bc   : > { %16763 = vst [vmem:[#allocation25_spill] sm:$0xff] %v13465_v34  ;;  %16764 = vst [vmem:[#allocation32_spill] sm:$0xff] %v13469_v46 }
 0x5bd   : > { %v13473_v32 = vpop.eup %11273  ;;  %v10096_v53 = vpop.f32.mrf.mxu1 }
 0x5be   : > { %2433 = vadd.xlane.f32.xlu0 %v13473_v32  ;;  %2439 = vadd.xlane.f32.xlu1 %v13471_v38  ;;  %v13477_v37 = vpop.eup %11275 }
 0x5bf   : > { %v1916_v14 = vpop.f32.mrf.mxu1  ;;  %v13480_v20 = vpop.eup %11277 }
 0x5c1   : > { %v10097_v25 = vpop.f32.mrf.mxu1 }
 0x5c2   : > { %2429 = vadd.xlane.f32.xlu0 %v13477_v37  ;;  %v1980_v9 = vpack.c.bf16 %v10097_v25, %v10096_v53  ;;  %v2405_v53 = vmul.f32 1.442695, %v2377_v55 }
 0x5c3   : > { %v1919_v54 = vpop.f32.mrf.mxu1 }
 0x5c4   : > { %v1979_v31 = vpack.c.bf16 %v1919_v54, %v1916_v14 }
 0x5c6   : > { %10114 = vmatprep.mubr.msk.bf16.mxu1 %vm16714_vm2, %v1979_v31  ;;  %2435 = vadd.xlane.f32.xlu0 %v13480_v20  ;;  %vm16768_vm2 = vnez %v16711_v23 }
 0x5c7   : > { %10115 = vmatmul.mubr.msk.bf16.vlgmr.msra.gmra.mxu1 %vm16765_vm6, %v1980_v9  ;;  %v10232_v9 = vpop.f32.mrf.mxu0  ;;  %vm16769_vm6 = vnez %v16653_v6 }
 0x5c9   : > { %v2881_v35 = vpop.f32.mrf.mxu0 }
 0x5cf   : > { %2485 = vrot.lane.b32.xlu1 %v12934_v22, %s12030_s25 }
 0x5d7   : > { %v2364_v46 = vpop.xlane.xlu1 %2363 }
 0x5d8   : > { %v2380_v25 = vsub.f32 %v13364_v27, %v2364_v46 }
 0x5da   : > { %v2411_v31 = vmul.f32 1.442695, %v2380_v25 }
 0x5db   : > { %v2498_v54 = vpop.permute.xlu1 %2497 }
 0x5df   : > { %v2496_v34 = vpop.permute.xlu1 %2495 }
 0x5e0   : > { %v2362_v29 = vpop.xlane.xlu0 %2361 }
 0x5e1   : > { %v2379_v57 = vsub.f32 %v13370_v7, %v2362_v29  ;;  %v10233_v7 = vpop.f32.mrf.mxu0 }
 0x5e3   : > { %v2409_v14 = vmul.f32 1.442695, %v2379_v57  ;;  %v2492_v27 = vpop.permute.xlu1 %2491 }
 0x5e4   : > { %v2500_v1 = vpop.permute.xlu0 %2499 }
 0x5e5   : > { %11279 = vpow2.f32 %v2409_v14  ;;  %10162 = vmatprep.subr.bf16.mxu1 %v2500_v1 }
 0x5e6   : > { %10163 = vmatpush3.bf16.msra.mxu1 %v2500_v1  ;;  %11281 = vpow2.f32 %v2405_v53  ;;  %v2884_v1 = vpop.f32.mrf.mxu0 }
 0x5e7   : > { %10164 = vmatprep.subr.bf16.mxu1 %v2498_v54  ;;  %11283 = vpow2.f32 %v2411_v31  ;;  %v2488_v5 = vpop.permute.xlu1 %2487 }
 0x5e8   : > { %v2494_v12 = vpop.permute.xlu0 %2493 }
 0x5ea   : > { %10165 = vmatpush3.bf16.msra.mxu1 %v2498_v54 }
 0x5eb   : > { %10166 = vmatprep.subr.bf16.mxu1 %v2496_v34 }
 0x5ec   : > { %v2490_v14 = vpop.permute.xlu0 %2489 }
 0x5ee   : > { %10167 = vmatpush3.bf16.msra.mxu1 %v2496_v34 }
 0x5ef   : > { %10168 = vmatprep.subr.bf16.mxu1 %v2494_v12 }
 0x5f0   : > { %v10100_v57 = vpop.f32.mrf.mxu1 }
 0x5f2   : > { %v13491_v19 = vpop.eup %11279  ;;  %10169 = vmatpush3.bf16.msra.mxu1 %v2494_v12  ;;  %v1932_v55 = vpop.f32.mrf.mxu1 }
 0x5f3   : > { %2441 = vadd.xlane.f32.xlu0 %v13491_v19  ;;  %10170 = vmatprep.subr.bf16.mxu1 %v2492_v27  ;;  %v13494_v46 = vpop.eup %11281 }
 0x5f4   : > { %v10101_v29 = vpop.f32.mrf.mxu1  ;;  %v13497_v22 = vpop.eup %11283 }
 0x5f5   : > { %v1982_v31 = vpack.c.bf16 %v10101_v29, %v10100_v57  ;;  %v13508_v57 = vsel %vm16769_vm6, %v2881_v35, -1e+30  ;;  %v13520_v35 = vsel %vm12636_vm1, %v10232_v9, -1e+30 }
 0x5f6   : > { %10171 = vmatpush3.bf16.msra.mxu1 %v2492_v27  ;;  %v10236_v54 = vpop.f32.mrf.mxu0  ;;  %v1935_v53 = vpop.f32.mrf.mxu1 }
 0x5f7   : > { %2437 = vadd.xlane.f32.xlu0 %v13494_v46  ;;  %10172 = vmatprep.subr.bf16.mxu1 %v2490_v14  ;;  %v1981_v34 = vpack.c.bf16 %v1935_v53, %v1932_v55  ;;  %v13514_v53 = vsel %vm12654_vm3, %v2884_v1, -1e+30  ;;  %v13538_v9 = vsel %vm12680_vm5, %v10236_v54, -1e+30 }
 0x5f8   : > { %v2897_v25 = vpop.f32.mrf.mxu0 }
 0x5f9   : > { %10118 = vmatprep.mubr.msk.bf16.mxu1 %vm16766_vm8, %v1981_v34 }
 0x5fa   : > { %10173 = vmatpush3.bf16.msra.mxu1 %v2490_v14  ;;  %v10237_v12 = vpop.f32.mrf.mxu0 }
 0x5fb   : > { %10119 = vmatmul.mubr.msk.bf16.gmra.mxu1 %vm16767_vm12, %v1982_v31  ;;  %2443 = vadd.xlane.f32.xlu0 %v13497_v22  ;;  %vm16770_vm12 = vmmov %vm16766_vm8 }
 0x5fc   : > { %10174 = vmatprep.subr.bf16.mxu1 %v2488_v5  ;;  %v10104_v27 = vpop.f32.mrf.mxu1  ;;  %v2900_v15 = vpop.f32.mrf.mxu0  ;;  %vm16773_vm3 = vmmov %vm16770_vm12 }
 0x5fd   : > { %v13504_v26 = vsel %vm16768_vm2, %v2900_v15, -1e+30  ;;  %vm16771_vm2 = vnez %v16659_v17 }
 0x5fe   : > { %v1948_v55 = vpop.f32.mrf.mxu1  ;;  %2970 = vmax.xlane.f32.xlu1 %v13504_v26  ;;  %10175 = vmatpush3.bf16.msra.mxu1 %v2488_v5  ;;  %v13526_v1 = vsel %vm16771_vm2, %v10233_v7, -1e+30  ;;  %v13543_v7 = vsel %vm16704_vm7, %v10237_v12, -1e+30 }
 0x5ff   : > { %2960 = vmax.xlane.f32.xlu0 %v13508_v57 }
 0x600   : > { %v10105_v29 = vpop.f32.mrf.mxu1 }
 0x601   : > { %v1984_v15 = vpack.c.bf16 %v10105_v29, %v10104_v27 }
 0x602   : > { %v1951_v14 = vpop.f32.mrf.mxu1 }
 0x603   : > { %v1983_v34 = vpack.c.bf16 %v1951_v14, %v1948_v55  ;;  %2962 = vmax.xlane.f32.xlu0 %v13514_v53 }
 0x605   : > { %v10108_v31 = vpop.f32.mrf.mxu1  ;;  %10122 = vmatprep.mubr.msk.bf16.mxu1 %vm16766_vm8, %v1983_v34  ;;  %vm16772_vm8 = vnez %v16664_v36 }
 0x606   : > { %10123 = vmatmul.mubr.msk.bf16.gmra.mxu1 %vm16770_vm12, %v1984_v15  ;;  %v13531_v14 = vsel %vm16772_vm8, %v2897_v25, -1e+30  ;;  %vm16774_vm12 = vmmov %vm16773_vm3 }
 0x607   : > { %v1964_v5 = vpop.f32.mrf.mxu1  ;;  %2964 = vmax.xlane.f32.xlu0 %v13520_v35 }
 0x609   : > { %v10109_v23 = vpop.f32.mrf.mxu1 }
 0x60a   : > { %v1986_v29 = vpack.c.bf16 %v10109_v23, %v10108_v31 }
 0x60b   : > { %v1967_v55 = vpop.f32.mrf.mxu1  ;;  %2966 = vmax.xlane.f32.xlu0 %v13526_v1 }
 0x60c   : > { %v1985_v27 = vpack.c.bf16 %v1967_v55, %v1964_v5 }
 0x60e   : > { %10126 = vmatprep.mubr.msk.bf16.mxu1 %vm16773_vm3, %v1985_v27 }
 0x60f   : > { %10127 = vmatmul.mubr.msk.bf16.gmra.mxu1 %vm16774_vm12, %v1986_v29  ;;  %2968 = vmax.xlane.f32.xlu0 %v13531_v14  ;;  %vm16782_vm12 = vmmov %vm16773_vm3 }
 0x613   : > { %2972 = vmax.xlane.f32.xlu0 %v13538_v9 }
 0x617   : > { %2974 = vmax.xlane.f32.xlu0 %v13543_v7 }
 0x618   : > { %v2418_v23 = vpop.xlane.xlu1 %2417 }
 0x61c   : > { %v2414_v25 = vpop.xlane.xlu1 %2413 }
 0x61d   : > { %11285 = vrcp.f32 %v2414_v25  ;;  %v2420_v18 = vpop.xlane.xlu0 %2419 }
 0x620   : > { %v2416_v34 = vpop.xlane.xlu1 %2415 }
 0x621   : > { %11287 = vrcp.f32 %v2416_v34 }
 0x622   : > { %11289 = vrcp.f32 %v2420_v18 }
 0x623   : > { %11291 = vrcp.f32 %v2418_v23 }
 0x62a   : > { %v11286_v15 = vpop.eup %11285 }
 0x62b   : > { %v2461_v5 = vmul.f32 %v11286_v15, %v13399_v3  ;;  %v2422_v15 = vpop.xlane.xlu1 %2421 }
 0x62c   : > { %11293 = vrcp.f32 %v2422_v15 }
 0x62e   : > { %v11288_v31 = vpop.eup %11287 }
 0x62f   : > { %v2462_v54 = vmul.f32 %v11288_v31, %v13407_v39 }
 0x630   : > { %v10240_v55 = vpop.f32.mrf.mxu0 }
 0x631   : > { %v2477_v27 = vpack.c.bf16 %v2462_v54, %v2461_v5  ;;  %v13560_v3 = vsel %vm12724_vm9, %v10240_v55, -1e+30  ;;  %v11290_v55 = vpop.eup %11289 }
 0x632   : > { %v2913_v29 = vpop.f32.mrf.mxu0  ;;  %v11292_v23 = vpop.eup %11291 }
 0x633   : > { %v13550_v12 = vsel %vm12802_vm0, %v2913_v29, -1e+30  ;;  %10178 = vmatprep.mubr.bf16.mxu1 %v2477_v27  ;;  %vm16857_vm0 = vmmov %vm16773_vm3 }
 0x634   : > { %v10241_v36 = vpop.f32.mrf.mxu0  ;;  %2976 = vmax.xlane.f32.xlu0 %v13550_v12 }
 0x635   : > { %v13565_v31 = vsel %vm12737_vm10, %v10241_v36, -1e+30  ;;  %v2463_v36 = vmul.f32 %v11292_v23, %v13394_v21  ;;  %vm16854_vm10 = vmmov %vm16773_vm3 }
 0x636   : > { %v2916_v25 = vpop.f32.mrf.mxu0 }
 0x637   : > { %v13555_v34 = vsel %vm12748_vm11, %v2916_v25, -1e+30  ;;  %v2464_v25 = vmul.f32 %v11290_v55, %v13401_v44  ;;  %vm16843_vm11 = vmmov %vm16773_vm3 }
 0x638   : > { %2978 = vmax.xlane.f32.xlu0 %v13555_v34 }
 0x639   : > { %v11294_v15 = vpop.eup %11293 }
 0x63b   : > { %v2426_v39 = vpop.xlane.xlu0 %2425 }
 0x63c   : > { %2980 = vmax.xlane.f32.xlu0 %v13560_v3 }
 0x63f   : > { %v2428_v5 = vpop.xlane.xlu0 %2427 }
 0x640   : > { %2982 = vmax.xlane.f32.xlu0 %v13565_v31  ;;  %11295 = vrcp.f32 %v2428_v5 }
 0x641   : > { %11297 = vrcp.f32 %v2426_v39  ;;  %v2478_v39 = vpack.c.bf16 %v2464_v25, %v2463_v36 }
 0x643   : > { %v2424_v18 = vpop.xlane.xlu0 %2423  ;;  %v2432_v54 = vpop.xlane.xlu1 %2431 }
 0x644   : > { %11299 = vrcp.f32 %v2424_v18 }
 0x645   : > { %11301 = vrcp.f32 %v2432_v54  ;;  %v2465_v54 = vmul.f32 %v11294_v15, %v13412_v11 }
 0x647   : > { %v2434_v27 = vpop.xlane.xlu0 %2433  ;;  %v2440_v29 = vpop.xlane.xlu1 %2439 }
 0x64b   : > { %v2430_v58 = vpop.xlane.xlu0 %2429  ;;  %v2486_v42 = vpop.permute.xlu1 %2485 }
 0x64c   : > { %11303 = vrcp.f32 %v2430_v58  ;;  %10176 = vmatprep.subr.bf16.mxu1 %v2486_v42 }
 0x64d   : > { %10177 = vmatpush3.bf16.msra.mxu1 %v2486_v42  ;;  %11305 = vrcp.f32 %v2434_v27  ;;  %v11296_v5 = vpop.eup %11295 }
 0x64e   : > { %v11298_v18 = vpop.eup %11297  ;;  %v2468_v55 = vmul.f32 %v11296_v5, %v13449_v56 }
 0x64f   : > { %v2436_v41 = vpop.xlane.xlu0 %2435  ;;  %v2467_v52 = vmul.f32 %v11298_v18, %v13440_v51 }
 0x650   : > { %11307 = vrcp.f32 %v2436_v41  ;;  %10179 = vmatmul.mubr.bf16.vlgmr.msra.gmra.mxu1 %v2478_v39 }
 0x651   : > { %v11300_v61 = vpop.eup %11299  ;;  %v2480_v42 = vpack.c.bf16 %v2468_v55, %v2467_v52  ;;  %11309 = vrcp.f32 %v2440_v29  ;;  %v1475_v55 = vadd.f32 %v13397_v10, %v13451_v48 }
 0x652   : > { %v2466_v44 = vmul.f32 %v11300_v61, %v13457_v40  ;;  %v11302_v21 = vpop.eup %11301 }
 0x653   : > { %v2470_v41 = vmul.f32 %v11302_v21, %v13462_v60 }
 0x654   : > { %v2479_v58 = vpack.c.bf16 %v2466_v44, %v2465_v54  ;;  %v10965_v44 = vld [vmem:[#allocation5 + $0x28] sm:$0xff]  }
 0x655   : > { %10194 = vmatprep.subr.bf16.mxu1 %v10965_v44 }
 0x656   : > { %10182 = vmatprep.mubr.bf16.mxu1 %v2479_v58  ;;  %10195 = vmatpush3.bf16.msra.mxu1 %v10965_v44 }
 0x658   : > { %10183 = vmatmul.mubr.bf16.gmra.mxu1 %v2480_v42  ;;  %v1473_v42 = vadd.f32 %v13451_v48, %v13405_v63 }
 0x659   : > { %v11304_v27 = vpop.eup %11303 }
 0x65a   : > { %v2469_v23 = vmul.f32 %v11304_v27, %v13477_v37  ;;  %v11306_v25 = vpop.eup %11305 }
 0x65b   : > { %v2471_v61 = vmul.f32 %v11306_v25, %v13473_v32 }
 0x65c   : > { %v2481_v36 = vpack.c.bf16 %v2470_v41, %v2469_v23  ;;  %v10966_v23 = vld [vmem:[#allocation5 + $0x20] sm:$0xff]   ;;  %v1476_v41 = vadd.f32 %v13410_v28, %v13451_v48 }
 0x65d   : > { %v11308_v39 = vpop.eup %11307  ;;  %10196 = vmatprep.subr.bf16.mxu1 %v10966_v23 }
 0x65e   : > { %10186 = vmatprep.mubr.bf16.mxu1 %v2481_v36  ;;  %v2472_v11 = vmul.f32 %v11308_v39, %v13480_v20  ;;  %v11310_v36 = vpop.eup %11309  ;;  %10197 = vmatpush3.bf16.msra.mxu1 %v10966_v23 }
 0x660   : > { %v2482_v56 = vpack.c.bf16 %v2472_v11, %v2471_v61 }
 0x662   : > { %10187 = vmatmul.mubr.bf16.gmra.mxu1 %v2482_v56 }
 0x671   : > { %v10244_v51 = vpop.f32.mrf.mxu0 }
 0x672   : > { %v13595_v20 = vsel %vm16752_vm4, %v10244_v51, -1e+30  ;;  %vm16838_vm4 = vmmov %vm16773_vm3 }
 0x673   : > { %v2929_v40 = vpop.f32.mrf.mxu0 }
 0x674   : > { %v13580_v52 = vsel %vm12770_vm13, %v2929_v40, -1e+30  ;;  %vm16791_vm13 = vmmov %vm16773_vm3 }
 0x675   : > { %v10245_v15 = vpop.f32.mrf.mxu0  ;;  %2984 = vmax.xlane.f32.xlu0 %v13580_v52 }
 0x676   : > { %v13585_v60 = vsel %vm16750_vm14, %v10245_v15, -1e+30  ;;  %vm16785_vm14 = vmmov %vm16773_vm3 }
 0x677   : > { %2990 = vmax.xlane.f32.xlu1 %v13585_v60  ;;  %v2932_v32 = vpop.f32.mrf.mxu0 }
 0x678   : > { %v13590_v37 = vsel %vm12792_vm15, %v2932_v32, -1e+30  ;;  %vm16783_vm15 = vmmov %vm16773_vm3 }
 0x679   : > { %2986 = vmax.xlane.f32.xlu0 %v13590_v37 }
 0x67c   : > { %v2442_v5 = vpop.xlane.xlu0 %2441 }
 0x67d   : > { %2988 = vmax.xlane.f32.xlu0 %v13595_v20 }
 0x680   : > { %v2438_v18 = vpop.xlane.xlu0 %2437 }
 0x681   : > { %11311 = vrcp.f32 %v2438_v18 }
 0x682   : > { %11313 = vrcp.f32 %v2442_v5 }
 0x684   : > { %v2444_v54 = vpop.xlane.xlu0 %2443 }
 0x685   : > { %11315 = vrcp.f32 %v2444_v54 }
 0x687   : > { %v10116_v58 = vpop.f32.mrf.mxu1 }
 0x688   : > { %v13602_v21 = vadd.f32 %v10116_v58, %v1475_v55  ;;  %3124 = vrot.lane.b32.xlu1 %v12870_v43, %s12031_s16  ;;  %v2961_v29 = vpop.xlane.xlu0 %2960  ;;  %v2474_v43 = vmul.f32 %v11310_v36, %v13471_v38 }
 0x689   : > { %v2061_v27 = vpop.f32.mrf.mxu1  ;;  %v2992_v38 = vsub.f32 %v13508_v57, %v2961_v29 }
 0x68a   : > { %v13608_v25 = vadd.f32 %v2061_v27, %v1473_v42 }
 0x68b   : > { %v10117_v10 = vpop.f32.mrf.mxu1  ;;  %v3008_v44 = vmul.f32 1.442695, %v2992_v38 }
 0x68c   : > { %v13610_v39 = vadd.f32 %v10117_v10, %v1476_v41  ;;  %v2963_v63 = vpop.xlane.xlu0 %2962 }
 0x68e   : > { %v11312_v61 = vpop.eup %11311 }
 0x68f   : > { %v2473_v11 = vmul.f32 %v11312_v61, %v13494_v46  ;;  %v11314_v56 = vpop.eup %11313  ;;  %v1477_v61 = vadd.f32 %v13451_v48, %v13424_v47 }
 0x690   : > { %v2965_v51 = vpop.xlane.xlu0 %2964  ;;  %v2475_v28 = vmul.f32 %v11314_v56, %v13491_v19 }
 0x691   : > { %v2483_v40 = vpack.c.bf16 %v2474_v43, %v2473_v11  ;;  %v2994_v18 = vsub.f32 %v13520_v35, %v2965_v51  ;;  %v1480_v51 = vadd.f32 %v13426_v2, %v13451_v48  ;;  %v1481_v2 = vadd.f32 %v13451_v48, %v13436_v13 }
 0x692   : > { %v11316_v15 = vpop.eup %11315 }
 0x693   : > { %3126 = vrot.lane.b32.xlu0 %v12864_v33, %s12031_s16  ;;  %10190 = vmatprep.mubr.bf16.mxu1 %v2483_v40  ;;  %v2476_v32 = vmul.f32 %v11316_v15, %v13497_v22  ;;  %v3012_v46 = vmul.f32 1.442695, %v2994_v18  ;;  %v2993_v22 = vsub.f32 %v13514_v53, %v2963_v63 }
 0x694   : > { %v2967_v54 = vpop.xlane.xlu0 %2966 }
 0x695   : > { %v2484_v5 = vpack.c.bf16 %v2476_v32, %v2475_v28  ;;  %11317 = vpow2.f32 %v3012_v46  ;;  %v2995_v19 = vsub.f32 %v13526_v1, %v2967_v54  ;;  %v3010_v55 = vmul.f32 1.442695, %v2993_v22  ;;  %v16775_v46 = vld [vmem:[#allocation24_spill] sm:$0xff] }
 0x696   : > { %11319 = vpow2.f32 %v3008_v44 }
 0x697   : > { %3122 = vrot.lane.b32.xlu0 %v12879_v24, %s12031_s16  ;;  %10191 = vmatmul.mubr.bf16.gmra.mxu1 %v2484_v5  ;;  %v3014_v35 = vmul.f32 1.442695, %v2995_v19  ;;  %v1483_v5 = vadd.f32 %v13434_v8, %v13451_v48  ;;  %v16776_v8 = vld [vmem:[#allocation47_spill] sm:$0xff] }
 0x698   : > { %v2969_v33 = vpop.xlane.xlu0 %2968 }
 0x699   : > { %11321 = vpow2.f32 %v3014_v35  ;;  %v2996_v57 = vsub.f32 %v13531_v14, %v2969_v33  ;;  %v1484_v33 = vadd.f32 %v16775_v46, %v13451_v48 }
 0x69a   : > { %11323 = vpow2.f32 %v3010_v55 }
 0x69b   : > { %3120 = vrot.lane.b32.xlu0 %v12892_v4, %s12031_s16  ;;  %v3016_v42 = vmul.f32 1.442695, %v2996_v57  ;;  %v16777_v57 = vld [vmem:[#allocation23_spill] sm:$0xff] }
 0x69c   : > { %v2973_v24 = vpop.xlane.xlu0 %2972 }
 0x69d   : > { %v2998_v58 = vsub.f32 %v13538_v9, %v2973_v24  ;;  %11325 = vpow2.f32 %v3016_v42 }
 0x69f   : > { %3118 = vrot.lane.b32.xlu0 %v12902_v50, %s12031_s16  ;;  %v3020_v1 = vmul.f32 1.442695, %v2998_v58  ;;  %v2971_v50 = vpop.xlane.xlu1 %2970 }
 0x6a0   : > { %v2975_v4 = vpop.xlane.xlu0 %2974  ;;  %v2997_v23 = vsub.f32 %v13504_v26, %v2971_v50  ;;  %v1479_v26 = vadd.f32 %v13419_v59, %v13451_v48  ;;  %v16779_v48 = vld [vmem:[#allocation28_spill] sm:$0xff]  ;;  %v16780_v50 = vld [vmem:[#allocation25_spill] sm:$0xff] }
 0x6a1   : > { %v2999_v27 = vsub.f32 %v13543_v7, %v2975_v4  ;;  %11327 = vpow2.f32 %v3020_v1  ;;  %v13644_v7 = vpop.f32.mrf.mxu1  ;;  %v16778_v4 = vld [vmem:[#allocation49_spill] sm:$0xff] }
 0x6a2   : > { %v13630_v29 = vpop.eup %11317  ;;  %v3018_v41 = vmul.f32 1.442695, %v2997_v23 }
 0x6a3   : > { %v13634_v53 = vpop.eup %11319  ;;  %v3022_v14 = vmul.f32 1.442695, %v2999_v27 }
 0x6a5   : > { %11329 = vpow2.f32 %v3022_v14 }
 0x6a6   : > { %v13638_v9 = vpop.eup %11321  ;;  %11331 = vpow2.f32 %v3018_v41  ;;  %v16781_v41 = vld [vmem:[#allocation48_spill] sm:$0xff] }
 0x6a7   : > { %v13641_v10 = vpop.eup %11323 }
 0x6aa   : > { %v13648_v36 = vpop.eup %11325 }
 0x6ac   : > { %3044 = vadd.xlane.f32.xlu1 %v13630_v29 }
 0x6ae   : > { %v13655_v43 = vpop.eup %11327 }
 0x6b0   : > { %3040 = vadd.xlane.f32.xlu1 %v13634_v53 }
 0x6b2   : > { %v13664_v28 = vpop.eup %11329 }
 0x6b3   : > { %v13669_v32 = vpop.eup %11331 }
 0x6b4   : > { %3046 = vadd.xlane.f32.xlu1 %v13638_v9 }
 0x6b8   : > { %3042 = vadd.xlane.f32.xlu1 %v13641_v10 }
 0x6bb   : > { %v10120_v63 = vpop.f32.mrf.mxu1 }
 0x6bc   : > { %v13652_v11 = vadd.f32 %v10120_v63, %v1479_v26  ;;  %3048 = vadd.xlane.f32.xlu1 %v13648_v36 }
 0x6bd   : > { %v2077_v56 = vpop.f32.mrf.mxu1  ;;  %v2977_v24 = vpop.xlane.xlu0 %2976 }
 0x6be   : > { %v13659_v40 = vadd.f32 %v2077_v56, %v1477_v61  ;;  %3052 = vadd.xlane.f32.xlu0 %v13655_v43  ;;  %v3000_v26 = vsub.f32 %v13550_v12, %v2977_v24 }
 0x6bf   : > { %v10121_v59 = vpop.f32.mrf.mxu1 }
 0x6c0   : > { %v13662_v15 = vadd.f32 %v10121_v59, %v1480_v51  ;;  %v3024_v61 = vmul.f32 1.442695, %v3000_v26 }
 0x6c1   : > { %v13667_v47 = vpop.f32.mrf.mxu1  ;;  %v2979_v27 = vpop.xlane.xlu0 %2978 }
 0x6c2   : > { %3054 = vadd.xlane.f32.xlu0 %v13664_v28  ;;  %v3001_v51 = vsub.f32 %v13555_v34, %v2979_v27  ;;  %11333 = vpow2.f32 %v3024_v61 }
 0x6c5   : > { %v2981_v14 = vpop.xlane.xlu0 %2980 }
 0x6c6   : > { %v10124_v18 = vpop.f32.mrf.mxu1  ;;  %3050 = vadd.xlane.f32.xlu0 %v13669_v32 }
 0x6c7   : > { %v13676_v54 = vadd.f32 %v10124_v18, %v1483_v5  ;;  %v3026_v5 = vmul.f32 1.442695, %v3001_v51  ;;  %v3002_v18 = vsub.f32 %v13560_v3, %v2981_v14 }
 0x6c8   : > { %v2093_v38 = vpop.f32.mrf.mxu1 }
 0x6c9   : > { %v13680_v44 = vadd.f32 %v2093_v38, %v1481_v2  ;;  %v2983_v63 = vpop.xlane.xlu0 %2982  ;;  %v3028_v2 = vmul.f32 1.442695, %v3002_v18 }
 0x6ca   : > { %v10125_v19 = vpop.f32.mrf.mxu1  ;;  %v3003_v56 = vsub.f32 %v13565_v31, %v2983_v63 }
 0x6cb   : > { %v13682_v22 = vadd.f32 %v10125_v19, %v1484_v33 }
 0x6cc   : > { %v13684_v35 = vpop.f32.mrf.mxu1  ;;  %v3030_v59 = vmul.f32 1.442695, %v3003_v56 }
 0x6cd   : > { %3116 = vrot.lane.b32.xlu1 %v16776_v8, %s12031_s16 }
 0x6ce   : > { %11335 = vpow2.f32 %v3030_v59 }
 0x6cf   : > { %v10128_v55 = vpop.f32.mrf.mxu1  ;;  %11337 = vpow2.f32 %v3026_v5  ;;  %v13705_v38 = vpop.eup %11333 }
 0x6d0   : > { %v13689_v13 = vadd.f32 %v10128_v55, %v16777_v57  ;;  %11339 = vpow2.f32 %v3028_v2 }
 0x6d1   : > { %v2109_v58 = vpop.f32.mrf.mxu1  ;;  %3112 = vrot.lane.b32.xlu1 %v16778_v4, %s12031_s16 }
 0x6d2   : > { %v13694_v42 = vadd.f32 %v2109_v58, %v16779_v48 }
 0x6d3   : > { %v10129_v1 = vpop.f32.mrf.mxu1 }
 0x6d4   : > { %v13697_v23 = vadd.f32 %v10129_v1, %v16780_v50 }
 0x6db   : > { %v13708_v12 = vpop.eup %11335 }
 0x6dc   : > { %3114 = vrot.lane.b32.xlu0 %v16781_v41, %s12031_s16  ;;  %v13711_v31 = vpop.eup %11337 }
 0x6dd   : > { %v13714_v34 = vpop.eup %11339 }
 0x6f5   : > { %3056 = vadd.xlane.f32.xlu1 %v13705_v38 }
 0x6f9   : > { %3062 = vadd.xlane.f32.xlu1 %v13708_v12 }
 0x6fb   : > { %3058 = vadd.xlane.f32.xlu0 %v13711_v31 }
 0x6fe   : > { %v2985_v46 = vpop.xlane.xlu0 %2984 }
 0x6ff   : > { %v3004_v3 = vsub.f32 %v13580_v52, %v2985_v46  ;;  %3060 = vadd.xlane.f32.xlu0 %v13714_v34  ;;  %v13721_v52 = vpop.f32.mrf.mxu1 }
 0x700   : > { %v2991_v19 = vpop.xlane.xlu1 %2990 }
 0x701   : > { %v3032_v33 = vmul.f32 1.442695, %v3004_v3  ;;  %v3007_v55 = vsub.f32 %v13585_v60, %v2991_v19 }
 0x702   : > { %v2987_v8 = vpop.xlane.xlu0 %2986 }
 0x703   : > { %11341 = vpow2.f32 %v3032_v33  ;;  %v3005_v24 = vsub.f32 %v13590_v37, %v2987_v8  ;;  %v3038_v48 = vmul.f32 1.442695, %v3007_v55 }
 0x704   : > { %v3125_v5 = vpop.permute.xlu1 %3124 }
 0x705   : > { %v3034_v57 = vmul.f32 1.442695, %v3005_v24 }
 0x706   : > { %v2989_v58 = vpop.xlane.xlu0 %2988 }
 0x707   : > { %11343 = vpow2.f32 %v3034_v57  ;;  %v3006_v4 = vsub.f32 %v13595_v20, %v2989_v58 }
 0x709   : > { %v3036_v1 = vmul.f32 1.442695, %v3006_v4 }
 0x70a   : > { %v3127_v27 = vpop.permute.xlu0 %3126 }
 0x70b   : > { %11345 = vpow2.f32 %v3036_v1  ;;  %10246 = vmatprep.subr.bf16.mxu1 %v3127_v27 }
 0x70c   : > { %11347 = vpow2.f32 %v3038_v48 }
 0x70e   : > { %v3123_v18 = vpop.permute.xlu0 %3122 }
 0x710   : > { %v13723_v50 = vpop.eup %11341  ;;  %v10180_v14 = vpop.f32.mrf.mxu1 }
 0x711   : > { %3064 = vadd.xlane.f32.xlu0 %v13723_v50 }
 0x712   : > { %v2543_v37 = vpop.f32.mrf.mxu1  ;;  %v3121_v19 = vpop.permute.xlu0 %3120 }
 0x714   : > { %v13726_v60 = vpop.eup %11343  ;;  %v10181_v41 = vpop.f32.mrf.mxu1 }
 0x715   : > { %3066 = vadd.xlane.f32.xlu1 %v13726_v60  ;;  %v2607_v61 = vpack.c.bf16 %v10181_v41, %v10180_v14 }
 0x716   : > { %v2546_v20 = vpop.f32.mrf.mxu1  ;;  %v3119_v57 = vpop.permute.xlu0 %3118 }
 0x717   : > { %v2606_v26 = vpack.c.bf16 %v2546_v20, %v2543_v37 }
 0x718   : > { %v13729_v63 = vpop.eup %11345  ;;  %v10184_v56 = vpop.f32.mrf.mxu1 }
 0x719   : > { %v13731_v51 = vpop.eup %11347  ;;  %10198 = vmatprep.mubr.msk.bf16.mxu1 %vm16773_vm3, %v2606_v26  ;;  %3068 = vadd.xlane.f32.xlu0 %v13729_v63 }
 0x71a   : > { %3070 = vadd.xlane.f32.xlu1 %v13731_v51  ;;  %v2559_v59 = vpop.f32.mrf.mxu1  ;;  %10199 = vmatmul.mubr.msk.bf16.vlgmr.msra.gmra.mxu1 %vm16782_vm12, %v2607_v61  ;;  %vm16784_vm12 = vmmov %vm16773_vm3 }
 0x71b   : > { %10247 = vmatpush3.bf16.msra.mxu1 %v3127_v27 }
 0x71c   : > { %10248 = vmatprep.subr.bf16.mxu1 %v3125_v5  ;;  %v10185_v2 = vpop.f32.mrf.mxu1 }
 0x71d   : > { %v2609_v33 = vpack.c.bf16 %v10185_v2, %v10184_v56 }
 0x71e   : > { %v2562_v46 = vpop.f32.mrf.mxu1 }
 0x71f   : > { %v2608_v3 = vpack.c.bf16 %v2562_v46, %v2559_v59  ;;  %10249 = vmatpush3.bf16.msra.mxu1 %v3125_v5 }
 0x720   : > { %10250 = vmatprep.subr.bf16.mxu1 %v3123_v18 }
 0x721   : > { %10202 = vmatprep.mubr.msk.bf16.mxu1 %vm16783_vm15, %v2608_v3  ;;  %vm16786_vm15 = vmmov %vm16773_vm3 }
 0x722   : > { %v10188_v8 = vpop.f32.mrf.mxu1  ;;  %10203 = vmatmul.mubr.msk.bf16.gmra.mxu1 %vm16773_vm3, %v2609_v33 }
 0x723   : > { %10251 = vmatpush3.bf16.msra.mxu1 %v3123_v18 }
 0x724   : > { %10252 = vmatprep.subr.bf16.mxu1 %v3121_v19  ;;  %v2575_v24 = vpop.f32.mrf.mxu1 }
 0x726   : > { %v10189_v55 = vpop.f32.mrf.mxu1 }
 0x727   : > { %10253 = vmatpush3.bf16.msra.mxu1 %v3121_v19  ;;  %v2611_v48 = vpack.c.bf16 %v10189_v55, %v10188_v8 }
 0x728   : > { %10254 = vmatprep.subr.bf16.mxu1 %v3119_v57  ;;  %v2578_v58 = vpop.f32.mrf.mxu1 }
 0x729   : > { %v2610_v4 = vpack.c.bf16 %v2578_v58, %v2575_v24 }
 0x72b   : > { %10255 = vmatpush3.bf16.msra.mxu1 %v3119_v57  ;;  %10206 = vmatprep.mubr.msk.bf16.mxu1 %vm16784_vm12, %v2610_v4  ;;  %vm16788_vm12 = vmmov %vm16773_vm3 }
 0x72c   : > { %10207 = vmatmul.mubr.msk.bf16.gmra.mxu1 %vm16785_vm14, %v2611_v48  ;;  %vm16787_vm14 = vmmov %vm16773_vm3 }
 0x735   : > { %v3045_v1 = vpop.xlane.xlu1 %3044 }
 0x739   : > { %v3041_v27 = vpop.xlane.xlu1 %3040 }
 0x73d   : > { %v3047_v14 = vpop.xlane.xlu1 %3046 }
 0x741   : > { %v3043_v37 = vpop.xlane.xlu1 %3042 }
 0x742   : > { %11349 = vrcp.f32 %v3043_v37 }
 0x743   : > { %11351 = vrcp.f32 %v3041_v27 }
 0x744   : > { %11353 = vrcp.f32 %v3047_v14 }
 0x745   : > { %v3049_v41 = vpop.xlane.xlu1 %3048 }
 0x747   : > { %v3053_v20 = vpop.xlane.xlu0 %3052 }
 0x749   : > { %v3117_v26 = vpop.permute.xlu1 %3116 }
 0x74a   : > { %10256 = vmatprep.subr.bf16.mxu1 %v3117_v26 }
 0x74b   : > { %v3055_v61 = vpop.xlane.xlu0 %3054  ;;  %10257 = vmatpush3.bf16.msra.mxu1 %v3117_v26 }
 0x74d   : > { %v3113_v5 = vpop.permute.xlu1 %3112 }
 0x74f   : > { %v3051_v56 = vpop.xlane.xlu0 %3050  ;;  %v11350_v2 = vpop.eup %11349 }
 0x750   : > { %11355 = vrcp.f32 %v3051_v56  ;;  %v11352_v3 = vpop.eup %11351  ;;  %v3089_v19 = vmul.f32 %v11350_v2, %v13641_v10 }
 0x751   : > { %11357 = vrcp.f32 %v3045_v1  ;;  %v3088_v55 = vmul.f32 %v11352_v3, %v13634_v53  ;;  %v11354_v58 = vpop.eup %11353 }
 0x752   : > { %11359 = vrcp.f32 %v3049_v41  ;;  %v3091_v14 = vmul.f32 %v11354_v58, %v13638_v9 }
 0x753   : > { %v3115_v59 = vpop.permute.xlu0 %3114  ;;  %11361 = vrcp.f32 %v3055_v61  ;;  %v3104_v4 = vpack.c.bf16 %v3089_v19, %v3088_v55 }
 0x754   : > { %10258 = vmatprep.subr.bf16.mxu1 %v3115_v59  ;;  %11363 = vrcp.f32 %v3053_v20 }
 0x755   : > { %10259 = vmatpush3.bf16.msra.mxu1 %v3115_v59 }
 0x756   : > { %10260 = vmatprep.subr.bf16.mxu1 %v3113_v5 }
 0x757   : > { %v10192_v18 = vpop.f32.mrf.mxu1 }
 0x759   : > { %v2591_v46 = vpop.f32.mrf.mxu1  ;;  %10261 = vmatpush3.bf16.msra.mxu1 %v3113_v5 }
 0x75b   : > { %v10193_v33 = vpop.f32.mrf.mxu1 }
 0x75c   : > { %v2613_v57 = vpack.c.bf16 %v10193_v33, %v10192_v18 }
 0x75d   : > { %v2594_v8 = vpop.f32.mrf.mxu1  ;;  %v11356_v48 = vpop.eup %11355 }
 0x75e   : > { %v2612_v24 = vpack.c.bf16 %v2594_v8, %v2591_v46  ;;  %v11358_v1 = vpop.eup %11357  ;;  %v3093_v10 = vmul.f32 %v11356_v48, %v13669_v32 }
 0x75f   : > { %v11360_v27 = vpop.eup %11359  ;;  %v3090_v37 = vmul.f32 %v11358_v1, %v13630_v29 }
 0x760   : > { %10210 = vmatprep.mubr.msk.bf16.mxu1 %vm16786_vm15, %v2612_v24  ;;  %v3092_v41 = vmul.f32 %v11360_v27, %v13648_v36  ;;  %v11362_v20 = vpop.eup %11361  ;;  %vm16789_vm15 = vmmov %vm16773_vm3 }
 0x761   : > { %10211 = vmatmul.mubr.msk.bf16.gmra.mxu1 %vm16787_vm14, %v2613_v57  ;;  %v3105_v53 = vpack.c.bf16 %v3091_v14, %v3090_v37  ;;  %v11364_v61 = vpop.eup %11363  ;;  %v3095_v56 = vmul.f32 %v11362_v20, %v13664_v28  ;;  %vm16790_vm14 = vmmov %vm16773_vm3 }
 0x762   : > { %10262 = vmatprep.mubr.bf16.mxu1 %v3104_v4  ;;  %v3106_v26 = vpack.c.bf16 %v3093_v10, %v3092_v41  ;;  %v3094_v59 = vmul.f32 %v11364_v61, %v13655_v43 }
 0x764   : > { %v3107_v5 = vpack.c.bf16 %v3095_v56, %v3094_v59 }
 0x769   : > { %10263 = vmatmul.mubr.bf16.vlgmr.msra.gmra.mxu1 %v3105_v53 }
 0x76a   : > { %10266 = vmatprep.mubr.bf16.mxu1 %v3106_v26 }
 0x771   : > { %10267 = vmatmul.mubr.bf16.gmra.mxu1 %v3107_v5 }
 0x77e   : > { %v3057_v18 = vpop.xlane.xlu1 %3056 }
 0x77f   : > { %11365 = vrcp.f32 %v3057_v18 }
 0x782   : > { %v3063_v9 = vpop.xlane.xlu1 %3062 }
 0x784   : > { %v3059_v32 = vpop.xlane.xlu0 %3058 }
 0x785   : > { %11367 = vrcp.f32 %v3059_v32 }
 0x786   : > { %11369 = vrcp.f32 %v3063_v9 }
 0x788   : > { %v3061_v29 = vpop.xlane.xlu0 %3060 }
 0x789   : > { %11371 = vrcp.f32 %v3061_v29 }
 0x78c   : > { %v11366_v36 = vpop.eup %11365 }
 0x78d   : > { %v3096_v46 = vmul.f32 %v11366_v36, %v13705_v38 }
 0x792   : > { %v11368_v2 = vpop.eup %11367 }
 0x793   : > { %v3097_v3 = vmul.f32 %v11368_v2, %v13711_v31  ;;  %v11370_v33 = vpop.eup %11369  ;;  %v10967_v31 = vld [vmem:[#allocation5 + $0x38] sm:$0xff]  }
 0x794   : > { %v3099_v8 = vmul.f32 %v11370_v33, %v13708_v12  ;;  %10278 = vmatprep.subr.bf16.mxu1 %v10967_v31 }
 0x795   : > { %v3108_v28 = vpack.c.bf16 %v3097_v3, %v3096_v46  ;;  %10279 = vmatpush3.bf16.msra.mxu1 %v10967_v31 }
 0x796   : > { %v11372_v19 = vpop.eup %11371 }
 0x797   : > { %10270 = vmatprep.mubr.bf16.mxu1 %v3108_v28  ;;  %v3098_v43 = vmul.f32 %v11372_v19, %v13714_v34  ;;  %v10968_v34 = vld [vmem:[#allocation5 + $0x30] sm:$0xff]  }
 0x798   : > { %10280 = vmatprep.subr.bf16.mxu1 %v10968_v34 }
 0x799   : > { %v3109_v24 = vpack.c.bf16 %v3099_v8, %v3098_v43  ;;  %10281 = vmatpush3.bf16.msra.mxu1 %v10968_v34 }
 0x79a   : > { %v3065_v55 = vpop.xlane.xlu0 %3064 }
 0x79b   : > { %10271 = vmatmul.mubr.bf16.gmra.mxu1 %v3109_v24  ;;  %11373 = vrcp.f32 %v3065_v55 }
 0x79e   : > { %v3067_v57 = vpop.xlane.xlu1 %3066 }
 0x79f   : > { %11375 = vrcp.f32 %v3067_v57 }
 0x7a2   : > { %v3069_v58 = vpop.xlane.xlu0 %3068 }
 0x7a3   : > { %11377 = vrcp.f32 %v3069_v58  ;;  %v3071_v4 = vpop.xlane.xlu1 %3070 }
 0x7a4   : > { %11379 = vrcp.f32 %v3071_v4 }
 0x7a8   : > { %v11374_v38 = vpop.eup %11373 }
 0x7a9   : > { %v3100_v1 = vmul.f32 %v11374_v38, %v13723_v50 }
 0x7ac   : > { %v11376_v48 = vpop.eup %11375 }
 0x7ad   : > { %v3101_v27 = vmul.f32 %v11376_v48, %v13726_v60 }
 0x7af   : > { %v3110_v12 = vpack.c.bf16 %v3101_v27, %v3100_v1 }
 0x7b0   : > { %v11378_v14 = vpop.eup %11377 }
 0x7b1   : > { %v11380_v10 = vpop.eup %11379  ;;  %10274 = vmatprep.mubr.bf16.mxu1 %v3110_v12  ;;  %v3102_v37 = vmul.f32 %v11378_v14, %v13729_v63 }
 0x7b2   : > { %v3103_v41 = vmul.f32 %v11380_v10, %v13731_v51 }
 0x7b4   : > { %v3111_v53 = vpack.c.bf16 %v3103_v41, %v3102_v37 }
 0x7b6   : > { %10275 = vmatmul.mubr.bf16.gmra.mxu1 %v3111_v53 }
 0x7da   : > { %v10200_v20 = vpop.f32.mrf.mxu1 }
 0x7db   : > { %v13760_v50 = vadd.f32 %v10200_v20, %v13602_v21 }
 0x7dc   : > { %v2688_v60 = vpop.f32.mrf.mxu1 }
 0x7dd   : > { %v2751_v26 = vadd.f32 %v2688_v60, %v13608_v25  ;;  %v13807_v60 = vld [vmem:[#allocation10 + $0x6] ss:$0 sm:$0xff] }
 0x7de   : > { %v10201_v61 = vpop.f32.mrf.mxu1 }
 0x7df   : > { %v13764_v56 = vadd.f32 %v10201_v61, %v13610_v39  ;;  %v16794_v61 = vld [vmem:[#allocation29_spill] sm:$0xff] }
 0x7e0   : > { %v2691_v59 = vpop.f32.mrf.mxu1 }
 0x7e2   : > { %v10204_v5 = vpop.f32.mrf.mxu1 }
 0x7e3   : > { %v13767_v63 = vadd.f32 %v10204_v5, %v13652_v11  ;;  %v1474_v5 = vadd.f32 %v13807_v60, %v16794_v61 }
 0x7e4   : > { %v2704_v51 = vpop.f32.mrf.mxu1 }
 0x7e5   : > { %v13770_v18 = vadd.f32 %v2704_v51, %v13659_v40 }
 0x7e6   : > { %v10205_v9 = vpop.f32.mrf.mxu1 }
 0x7e7   : > { %v13773_v21 = vadd.f32 %v10205_v9, %v13662_v15  ;;  %v2125_v9 = vadd.f32 %v13644_v7, %v1474_v5 }
 0x7e8   : > { %v13775_v32 = vpop.f32.mrf.mxu1 }
 0x7ec   : > { %v10208_v25 = vpop.f32.mrf.mxu1 }
 0x7ed   : > { %v13778_v29 = vadd.f32 %v10208_v25, %v13676_v54 }
 0x7ee   : > { %v2720_v39 = vpop.f32.mrf.mxu1 }
 0x7ef   : > { %v13781_v36 = vadd.f32 %v2720_v39, %v13680_v44 }
 0x7f0   : > { %v10209_v11 = vpop.f32.mrf.mxu1 }
 0x7f1   : > { %v13784_v2 = vadd.f32 %v10209_v11, %v13682_v22  ;;  %v2752_v11 = vadd.f32 %v2691_v59, %v2125_v9  ;;  %v11768_v59 = vld [vmem:[%s12266_s26 + $0x8] sm:$0xff]  ;;  %v11774_v9 = vld [vmem:[%s12266_s26 + $0x40] sm:$0xff] }
 0x7f2   : > { %v13786_v40 = vpop.f32.mrf.mxu1 }
 0x821   : > { %v10212_v46 = vpop.f32.mrf.mxu1 }
 0x822   : > { %v13789_v15 = vadd.f32 %v10212_v46, %v13689_v13 }
 0x823   : > { %v2736_v3 = vpop.f32.mrf.mxu1 }
 0x824   : > { %v13792_v33 = vadd.f32 %v2736_v3, %v13694_v42  ;;  %v11766_v3 = vld [vmem:[%s12266_s26] sm:$0xff] }
 0x825   : > { %v10213_v54 = vpop.f32.mrf.mxu1 }
 0x826   : > { %v13795_v28 = vadd.f32 %v10213_v54, %v13697_v23 }
 0x827   : > { %v13797_v44 = vpop.f32.mrf.mxu1 }
 0x829   : > { %v10264_v19 = vpop.f32.mrf.mxu1 }
 0x82b   : > { %v3170_v43 = vpop.f32.mrf.mxu1 }
 0x82d   : > { %v10265_v22 = vpop.f32.mrf.mxu1 }
 0x82e   : > { %v3234_v55 = vpack.c.bf16 %v10265_v22, %v10264_v19 }
 0x82f   : > { %v3173_v8 = vpop.f32.mrf.mxu1 }
 0x830   : > { %v3233_v24 = vpack.c.bf16 %v3173_v8, %v3170_v43  ;;  %v16795_v8 = vld [vmem:[#allocation27_spill] sm:$0xff] }
 0x831   : > { %v10268_v57 = vpop.f32.mrf.mxu1 }
 0x832   : > { %10282 = vmatprep.mubr.msk.bf16.mxu1 %vm16773_vm3, %v3233_v24  ;;  %v1478_v24 = vadd.f32 %v13807_v60, %v16795_v8 }
 0x833   : > { %v3186_v13 = vpop.f32.mrf.mxu1  ;;  %10283 = vmatmul.mubr.msk.bf16.vlgmr.msra.gmra.mxu1 %vm16788_vm12, %v3234_v55  ;;  %vm16792_vm12 = vmmov %vm16773_vm3  ;;  %v11767_v55 = vld [vmem:[%s12266_s26 + $0x10] sm:$0xff] }
 0x835   : > { %v10269_v42 = vpop.f32.mrf.mxu1 }
 0x836   : > { %v3236_v38 = vpack.c.bf16 %v10269_v42, %v10268_v57 }
 0x837   : > { %v3189_v58 = vpop.f32.mrf.mxu1 }
 0x838   : > { %v3235_v4 = vpack.c.bf16 %v3189_v58, %v3186_v13  ;;  %v2129_v13 = vadd.f32 %v13667_v47, %v1478_v24 }
 0x83a   : > { %10286 = vmatprep.mubr.msk.bf16.mxu1 %vm16789_vm15, %v3235_v4  ;;  %vm16793_vm15 = vmmov %vm16773_vm3  ;;  %v2756_v4 = vadd.f32 %v13775_v32, %v2129_v13  ;;  %v11778_v13 = vld [vmem:[%s12266_s26 + $0x60] sm:$0xff] }
 0x83b   : > { %10287 = vmatmul.mubr.msk.bf16.gmra.mxu1 %vm16790_vm14, %v3236_v38  ;;  %v11769_v38 = vld [vmem:[%s12266_s26 + $0x18] sm:$0xff]  ;;  %vm16825_vm14 = vmmov %vm16773_vm3 }
 0x85b   : > { %v10272_v23 = vpop.f32.mrf.mxu1 }
 0x85d   : > { %v3202_v31 = vpop.f32.mrf.mxu1 }
 0x85f   : > { %v10273_v48 = vpop.f32.mrf.mxu1 }
 0x860   : > { %v3238_v12 = vpack.c.bf16 %v10273_v48, %v10272_v23 }
 0x861   : > { %v3205_v1 = vpop.f32.mrf.mxu1 }
 0x862   : > { %v3237_v27 = vpack.c.bf16 %v3205_v1, %v3202_v31  ;;  %v11770_v31 = vld [vmem:[%s12266_s26 + $0x20] sm:$0xff] }
 0x864   : > { %10290 = vmatprep.mubr.msk.bf16.mxu1 %vm16791_vm13, %v3237_v27  ;;  %vm16818_vm13 = vmmov %vm16773_vm3 }
 0x865   : > { %10291 = vmatmul.mubr.msk.bf16.gmra.mxu1 %vm16773_vm3, %v3238_v12  ;;  %v11772_v12 = vld [vmem:[%s12266_s26 + $0x28] sm:$0xff] }
 0x876   : > { %v10276_v34 = vpop.f32.mrf.mxu1 }
 0x878   : > { %v3218_v14 = vpop.f32.mrf.mxu1 }
 0x87a   : > { %v10277_v10 = vpop.f32.mrf.mxu1 }
 0x87b   : > { %v3240_v53 = vpack.c.bf16 %v10277_v10, %v10276_v34 }
 0x87c   : > { %v3221_v37 = vpop.f32.mrf.mxu1 }
 0x87d   : > { %v3239_v41 = vpack.c.bf16 %v3221_v37, %v3218_v14  ;;  %v16796_v37 = vld [vmem:[#allocation22_spill] sm:$0xff] }
 0x87f   : > { %10294 = vmatprep.mubr.msk.bf16.mxu1 %vm16792_vm12, %v3239_v41  ;;  %v1482_v41 = vadd.f32 %v13807_v60, %v16796_v37  ;;  %vm16826_vm12 = vmmov %vm16773_vm3 }
 0x880   : > { %10295 = vmatmul.mubr.msk.bf16.gmra.mxu1 %vm16793_vm15, %v3240_v53  ;;  %vm16828_vm15 = vmmov %vm16773_vm3 }
 0x881   : > { %v2133_v53 = vadd.f32 %v13684_v35, %v1482_v41 }
 0x883   : > { %v2760_v5 = vadd.f32 %v13786_v40, %v2133_v53 }
 0x8f3   : > { %v10284_v20 = vpop.f32.mrf.mxu1 }
 0x8f4   : > { %v3380_v46 = vadd.f32 %v10284_v20, %v13760_v50 }
 0x8f5   : > { %v3315_v51 = vpop.f32.mrf.mxu1 }
 0x8f6   : > { %v3378_v25 = vadd.f32 %v3315_v51, %v2751_v26  ;;  %v13820_v7 = vadd.f32 %v11767_v55, %v3380_v46  ;;  %v11775_v46 = vld [vmem:[%s12266_s26 + $0x50] sm:$0xff] }
 0x8f7   : > { %v10285_v39 = vpop.f32.mrf.mxu1 }
 0x8f8   : > { %v13814_v54 = vadd.f32 %v11766_v3, %v3378_v25  ;;  %v3381_v26 = vadd.f32 %v10285_v39, %v13764_v56 }
 0x8f9   : > { %v3318_v19 = vpop.f32.mrf.mxu1 }
 0x8fa   : > { %v3379_v43 = vadd.f32 %v3318_v19, %v2752_v11  ;;  %3412 = vadd.xlane.f32.xlu0 %v13814_v54  ;;  %v13832_v56 = vadd.f32 %v11769_v38, %v3381_v26  ;;  %v11779_v38 = vld [vmem:[%s12266_s26 + $0x70] sm:$0xff] }
 0x8fb   : > { %v10288_v22 = vpop.f32.mrf.mxu1 }
 0x8fc   : > { %v13824_v50 = vadd.f32 %v11768_v59, %v3379_v43  ;;  %v3384_v23 = vadd.f32 %v10288_v22, %v13767_v63  ;;  %v11773_v63 = vld [vmem:[%s12266_s26 + $0x38] sm:$0xff] }
 0x8fd   : > { %v3331_v57 = vpop.f32.mrf.mxu1  ;;  %v16797_v22 = vld [vmem:[#allocation32_spill] sm:$0xff] }
 0x8fe   : > { %v3382_v42 = vadd.f32 %v3331_v57, %v13770_v18  ;;  %3416 = vadd.xlane.f32.xlu0 %v13820_v7  ;;  %3414 = vadd.xlane.f32.xlu1 %v13824_v50  ;;  %v11771_v18 = vld [vmem:[%s12266_s26 + $0x30] sm:$0xff]  ;;  %v1486_v8 = vadd.f32 %v13807_v60, %v16797_v22 }
 0x8ff   : > { %v10289_v58 = vpop.f32.mrf.mxu1  ;;  %v13841_v27 = vadd.f32 %v11771_v18, %v3384_v23  ;;  %v11780_v23 = vld [vmem:[%s12266_s26 + $0x68] sm:$0xff] }
 0x900   : > { %v13836_v48 = vadd.f32 %v11770_v31, %v3382_v42  ;;  %v3385_v32 = vadd.f32 %v10289_v58, %v13773_v21  ;;  %v2137_v24 = vadd.f32 %v13721_v52, %v1486_v8  ;;  %v10969_v31 = vld [vmem:[#allocation7 + $0x70] ss:$8 sps:$4 sm:$0xff]  }
 0x901   : > { %v3334_v47 = vpop.f32.mrf.mxu1 }
 0x902   : > { %v3383_v1 = vadd.f32 %v3334_v47, %v2756_v4  ;;  %3418 = vadd.xlane.f32.xlu1 %v13832_v56  ;;  %3420 = vadd.xlane.f32.xlu0 %v13836_v48  ;;  %v13850_v14 = vadd.f32 %v11773_v63, %v3385_v32  ;;  %v2764_v59 = vadd.f32 %v13797_v44, %v2137_v24  ;;  %v10971_v47 = vld [vmem:[#allocation7 + $0x74] ss:$8 sps:$4 sm:$0xff]   ;;  %v10972_v24 = vld [vmem:[#allocation7 + $0x60] ss:$8 sps:$4 sm:$0xff]  }
 0x903   : > { %3746 = vmatprep.subr.bf16.mxu0 %v10971_v47 }
 0x904   : > { %v13845_v34 = vadd.f32 %v11772_v12, %v3383_v1  ;;  %3747 = vmatpush1.bf16.msra.mxu0 %v10969_v31 }
 0x906   : > { %3424 = vadd.xlane.f32.xlu0 %v13841_v27  ;;  %3422 = vadd.xlane.f32.xlu1 %v13845_v34 }
 0x90a   : > { %3426 = vadd.xlane.f32.xlu1 %v13850_v14 }
 0x925   : > { %v10292_v10 = vpop.f32.mrf.mxu1 }
 0x926   : > { %v3388_v51 = vadd.f32 %v10292_v10, %v13778_v29  ;;  %v11777_v29 = vld [vmem:[%s12266_s26 + $0x58] sm:$0xff] }
 0x927   : > { %v3347_v21 = vpop.f32.mrf.mxu1 }
 0x928   : > { %v3386_v20 = vadd.f32 %v3347_v21, %v13781_v36  ;;  %v13864_v3 = vadd.f32 %v11775_v46, %v3388_v51  ;;  %v11776_v36 = vld [vmem:[%s12266_s26 + $0x48] sm:$0xff] }
 0x929   : > { %v10293_v61 = vpop.f32.mrf.mxu1 }
 0x92a   : > { %v13860_v25 = vadd.f32 %v11774_v9, %v3386_v20  ;;  %v3389_v35 = vadd.f32 %v10293_v61, %v13784_v2 }
 0x92b   : > { %v3350_v39 = vpop.f32.mrf.mxu1 }
 0x92c   : > { %v3387_v11 = vadd.f32 %v3350_v39, %v2760_v5  ;;  %3428 = vadd.xlane.f32.xlu0 %v13860_v25  ;;  %v13873_v40 = vadd.f32 %v11777_v29, %v3389_v35 }
 0x92e   : > { %v13868_v19 = vadd.f32 %v11776_v36, %v3387_v11 }
 0x930   : > { %3432 = vadd.xlane.f32.xlu0 %v13864_v3  ;;  %3430 = vadd.xlane.f32.xlu1 %v13868_v19 }
 0x934   : > { %3434 = vadd.xlane.f32.xlu1 %v13873_v40 }
 0x940   : > { %v10296_v43 = vpop.f32.mrf.mxu1 }
 0x941   : > { %v3392_v57 = vadd.f32 %v10296_v43, %v13789_v15  ;;  %v11781_v15 = vld [vmem:[%s12266_s26 + $0x78] sm:$0xff]  ;;  %s8992_s26 = sshll.u32 %s12262_s3, 5 }
 0x942   : > { %v3363_v2 = vpop.f32.mrf.mxu1  ;;  %s421_s14 = scalar_lea.vmem [#allocation13], %s8992_s26 }
 0x943   : > { %v3390_v55 = vadd.f32 %v3363_v2, %v13792_v33  ;;  %v13887_v60 = vadd.f32 %v11779_v38, %v3392_v57  ;;  %v10978_v57 = vld [vmem:[#allocation7 + $0x40] ss:$8 sps:$4 sm:$0xff]   ;;  %v10989_v38 = vld [vmem:[#allocation7 + $0x14] ss:$8 sps:$4 sm:$0xff]  }
 0x944   : > { %v10297_v26 = vpop.f32.mrf.mxu1 }
 0x945   : > { %v13883_v42 = vadd.f32 %v11778_v13, %v3390_v55  ;;  %v3393_v52 = vadd.f32 %v10297_v26, %v13795_v28  ;;  %v10977_v55 = vld [vmem:[#allocation7 + $0x54] ss:$8 sps:$4 sm:$0xff]   ;;  %v10975_v26 = vld [vmem:[#allocation7 + $0x50] ss:$8 sps:$4 sm:$0xff]  }
 0x946   : > { %v3366_v58 = vpop.f32.mrf.mxu1  ;;  %v10981_v13 = vld [vmem:[#allocation7 + $0x30] ss:$8 sps:$4 sm:$0xff]  }
 0x947   : > { %v3391_v4 = vadd.f32 %v3366_v58, %v2764_v59  ;;  %3436 = vadd.xlane.f32.xlu0 %v13883_v42  ;;  %v13896_v44 = vadd.f32 %v11781_v15, %v3393_v52  ;;  %v10980_v59 = vld [vmem:[#allocation7 + $0x44] ss:$8 sps:$4 sm:$0xff]   ;;  %v10987_v52 = vld [vmem:[#allocation7 + $0x10] ss:$8 sps:$4 sm:$0xff]   ;;  %v10990_v15 = vld [vmem:[#allocation7] ss:$8 sps:$4 sm:$0xff]  }
 0x948   : > { %v10986_v58 = vld [vmem:[#allocation7 + $0x24] ss:$8 sps:$4 sm:$0xff]  }
 0x949   : > { %v13891_v33 = vadd.f32 %v11780_v23, %v3391_v4  ;;  %v10984_v4 = vld [vmem:[#allocation7 + $0x20] ss:$8 sps:$4 sm:$0xff]   ;;  %v10992_v23 = vld [vmem:[#allocation7 + $0x4] ss:$8 sps:$4 sm:$0xff]  }
 0x94b   : > { %3440 = vadd.xlane.f32.xlu0 %v13887_v60  ;;  %3438 = vadd.xlane.f32.xlu1 %v13891_v33 }
 0x94f   : > { %3442 = vadd.xlane.f32.xlu1 %v13896_v44 }
 0x983   : > { %v3413_v1 = vpop.xlane.xlu0 %3412 }
 0x984   : > { %v3445_v18 = vmul.f32 0.0078125, %v3413_v1 }
 0x986   : > { %v13900_v28 = vsub.f32 %v13814_v54, %v3445_v18 }
 0x987   : > { %v3417_v32 = vpop.xlane.xlu0 %3416  ;;  %v3415_v12 = vpop.xlane.xlu1 %3414 }
 0x988   : > { %v3447_v63 = vmul.f32 0.0078125, %v3417_v32  ;;  %v3446_v10 = vmul.f32 0.0078125, %v3415_v12  ;;  %v3477_v37 = vmul.f32 %v13900_v28, %v13900_v28 }
 0x98a   : > { %v13905_v41 = vsub.f32 %v13820_v7, %v3447_v63  ;;  %v13908_v21 = vsub.f32 %v13824_v50, %v3446_v10  ;;  %3493 = vadd.xlane.f32.xlu0 %v3477_v37 }
 0x98b   : > { %v3419_v53 = vpop.xlane.xlu1 %3418  ;;  %v3421_v20 = vpop.xlane.xlu0 %3420 }
 0x98c   : > { %v3448_v61 = vmul.f32 0.0078125, %v3419_v53  ;;  %v3449_v5 = vmul.f32 0.0078125, %v3421_v20  ;;  %v3479_v54 = vmul.f32 %v13905_v41, %v13905_v41  ;;  %v3478_v51 = vmul.f32 %v13908_v21, %v13908_v21 }
 0x98e   : > { %v13915_v9 = vsub.f32 %v13832_v56, %v3448_v61  ;;  %v13918_v7 = vsub.f32 %v13836_v48, %v3449_v5  ;;  %3497 = vadd.xlane.f32.xlu0 %v3479_v54  ;;  %3495 = vadd.xlane.f32.xlu1 %v3478_v51 }
 0x98f   : > { %v3425_v50 = vpop.xlane.xlu0 %3424  ;;  %v3423_v39 = vpop.xlane.xlu1 %3422 }
 0x990   : > { %v3451_v11 = vmul.f32 0.0078125, %v3425_v50  ;;  %v3450_v46 = vmul.f32 0.0078125, %v3423_v39  ;;  %v3481_v35 = vmul.f32 %v13918_v7, %v13918_v7  ;;  %v3480_v36 = vmul.f32 %v13915_v9, %v13915_v9 }
 0x992   : > { %v13925_v29 = vsub.f32 %v13841_v27, %v3451_v11  ;;  %v13928_v56 = vsub.f32 %v13845_v34, %v3450_v46  ;;  %3501 = vadd.xlane.f32.xlu0 %v3481_v35  ;;  %3499 = vadd.xlane.f32.xlu1 %v3480_v36  ;;  %v10974_v27 = vld [vmem:[#allocation7 + $0x64] ss:$8 sps:$4 sm:$0xff]  }
 0x993   : > { %v3427_v48 = vpop.xlane.xlu1 %3426  ;;  %3748 = vmatprep.subr.bf16.mxu0 %v10974_v27 }
 0x994   : > { %v3452_v43 = vmul.f32 0.0078125, %v3427_v48  ;;  %v3483_v22 = vmul.f32 %v13925_v29, %v13925_v29  ;;  %v3482_v8 = vmul.f32 %v13928_v56, %v13928_v56  ;;  %3749 = vmatpush1.bf16.msra.mxu0 %v10972_v24  ;;  %v10994_v24 = vld [vmem:[#allocation8 + $0x38] sm:$0xff]  }
 0x995   : > { %3750 = vmatprep.subr.bf16.mxu0 %v10977_v55  ;;  %v10996_v55 = vld [vmem:[#allocation8 + $0x30] sm:$0xff]  }
 0x996   : > { %v13935_v2 = vsub.f32 %v13850_v14, %v3452_v43  ;;  %3505 = vadd.xlane.f32.xlu0 %v3483_v22  ;;  %3503 = vadd.xlane.f32.xlu1 %v3482_v8  ;;  %v10983_v14 = vld [vmem:[#allocation7 + $0x34] ss:$8 sps:$4 sm:$0xff]  }
 0x998   : > { %v3484_v34 = vmul.f32 %v13935_v2, %v13935_v2  ;;  %3751 = vmatpush1.bf16.msra.mxu0 %v10975_v26  ;;  %v10997_v26 = vld [vmem:[#allocation8 + $0x68] sm:$0xff]  }
 0x999   : > { %3752 = vmatprep.subr.bf16.mxu0 %v10980_v59  ;;  %v10998_v59 = vld [vmem:[#allocation8 + $0x28] sm:$0xff]  }
 0x99a   : > { %3507 = vadd.xlane.f32.xlu1 %v3484_v34  ;;  %v10995_v34 = vld [vmem:[#allocation8 + $0x70] sm:$0xff]  }
 0x99c   : > { %3753 = vmatpush1.bf16.msra.mxu0 %v10978_v57  ;;  %v10999_v57 = vld [vmem:[#allocation8 + $0x60] sm:$0xff]  }
 0x99d   : > { %3754 = vmatprep.subr.bf16.mxu0 %v10983_v14  ;;  %v11000_v14 = vld [vmem:[#allocation8 + $0x20] sm:$0xff]  }
 0x9a0   : > { %3755 = vmatpush1.bf16.msra.mxu0 %v10981_v13 }
 0x9a1   : > { %3756 = vmatprep.subr.bf16.mxu0 %v10986_v58  ;;  %v11001_v58 = vld [vmem:[#allocation8 + $0x58] sm:$0xff]  }
 0x9a4   : > { %3757 = vmatpush1.bf16.msra.mxu0 %v10984_v4 }
 0x9a5   : > { %3758 = vmatprep.subr.bf16.mxu0 %v10989_v38 }
 0x9a8   : > { %3759 = vmatpush1.bf16.msra.mxu0 %v10987_v52 }
 0x9a9   : > { %3760 = vmatprep.subr.bf16.mxu0 %v10992_v23  ;;  %v11002_v23 = vld [vmem:[#allocation8 + $0x18] sm:$0xff]  }
 0x9ac   : > { %3761 = vmatpush1.bf16.msra.mxu0 %v10990_v15 }
 0x9b5   : > { %v3429_v31 = vpop.xlane.xlu0 %3428 }
 0x9b6   : > { %v3453_v47 = vmul.f32 0.0078125, %v3429_v31 }
 0x9b8   : > { %v13940_v1 = vsub.f32 %v13860_v25, %v3453_v47 }
 0x9b9   : > { %v3433_v18 = vpop.xlane.xlu0 %3432  ;;  %v3431_v32 = vpop.xlane.xlu1 %3430 }
 0x9ba   : > { %v3455_v12 = vmul.f32 0.0078125, %v3433_v18  ;;  %v3454_v63 = vmul.f32 0.0078125, %v3431_v32  ;;  %v3485_v10 = vmul.f32 %v13940_v1, %v13940_v1 }
 0x9bc   : > { %v13945_v37 = vsub.f32 %v13864_v3, %v3455_v12  ;;  %v13948_v53 = vsub.f32 %v13868_v19, %v3454_v63  ;;  %3509 = vadd.xlane.f32.xlu0 %v3485_v10 }
 0x9bd   : > { %v3435_v20 = vpop.xlane.xlu1 %3434 }
 0x9be   : > { %v3456_v61 = vmul.f32 0.0078125, %v3435_v20  ;;  %v3487_v25 = vmul.f32 %v13945_v37, %v13945_v37  ;;  %v3486_v5 = vmul.f32 %v13948_v53, %v13948_v53 }
 0x9c0   : > { %v13955_v54 = vsub.f32 %v13873_v40, %v3456_v61  ;;  %3513 = vadd.xlane.f32.xlu0 %v3487_v25  ;;  %3511 = vadd.xlane.f32.xlu1 %v3486_v5 }
 0x9c2   : > { %v3488_v3 = vmul.f32 %v13955_v54, %v13955_v54 }
 0x9c4   : > { %3515 = vadd.xlane.f32.xlu1 %v3488_v3 }
 0x9d0   : > { %v3437_v19 = vpop.xlane.xlu0 %3436 }
 0x9d1   : > { %v3457_v51 = vmul.f32 0.0078125, %v3437_v19 }
 0x9d3   : > { %v13960_v50 = vsub.f32 %v13883_v42, %v3457_v51 }
 0x9d4   : > { %v3441_v39 = vpop.xlane.xlu0 %3440  ;;  %v3439_v11 = vpop.xlane.xlu1 %3438 }
 0x9d5   : > { %v3459_v46 = vmul.f32 0.0078125, %v3441_v39  ;;  %v3458_v35 = vmul.f32 0.0078125, %v3439_v11  ;;  %v3489_v36 = vmul.f32 %v13960_v50, %v13960_v50 }
 0x9d7   : > { %v13965_v40 = vsub.f32 %v13887_v60, %v3459_v46  ;;  %v13968_v48 = vsub.f32 %v13891_v33, %v3458_v35  ;;  %3517 = vadd.xlane.f32.xlu0 %v3489_v36  ;;  %v10993_v33 = vld [vmem:[#allocation8 + $0x78] sm:$0xff]   ;;  %v13980_v36 = vld [vmem:[#allocation10 + $0x8] ss:$0 sm:$0xff] }
 0x9d8   : > { %v3443_v43 = vpop.xlane.xlu1 %3442  ;;  %9572 = vmatprep.subr.bf16.mxu1 %v10993_v33 }
 0x9d9   : > { %v3460_v22 = vmul.f32 0.0078125, %v3443_v43  ;;  %v3491_v42 = vmul.f32 %v13965_v40, %v13965_v40  ;;  %v3490_v8 = vmul.f32 %v13968_v48, %v13968_v48  ;;  %9573 = vmatpush3.bf16.msra.mxu1 %v10994_v24  ;;  %v13984_v24 = vld [vmem:[#allocation10 + $0xa] ss:$0 sm:$0xff] }
 0x9da   : > { %9574 = vmatprep.subr.bf16.mxu1 %v10995_v34 }
 0x9db   : > { %v13975_v27 = vsub.f32 %v13896_v44, %v3460_v22  ;;  %3521 = vadd.xlane.f32.xlu0 %v3491_v42  ;;  %3519 = vadd.xlane.f32.xlu1 %v3490_v8 }
 0x9dd   : > { %v3492_v60 = vmul.f32 %v13975_v27, %v13975_v27  ;;  %9575 = vmatpush3.bf16.msra.mxu1 %v10996_v55 }
 0x9de   : > { %9576 = vmatprep.subr.bf16.mxu1 %v10997_v26 }
 0x9df   : > { %3523 = vadd.xlane.f32.xlu1 %v3492_v60 }
 0x9e1   : > { %9577 = vmatpush3.bf16.msra.mxu1 %v10998_v59 }
 0x9e2   : > { %9578 = vmatprep.subr.bf16.mxu1 %v10999_v57 }
 0x9e5   : > { %9579 = vmatpush3.bf16.msra.mxu1 %v11000_v14 }
 0x9e6   : > { %9580 = vmatprep.subr.bf16.mxu1 %v11001_v58 }
 0x9e9   : > { %9581 = vmatpush3.bf16.msra.mxu1 %v11002_v23 }
 0xa13   : > { %v3494_v44 = vpop.xlane.xlu0 %3493 }
 0xa14   : > { %v3525_v13 = vmul.f32 0.0078125, %v3494_v44 }
 0xa16   : > { %v3541_v4 = vadd.f32 1e-05, %v3525_v13 }
 0xa17   : > { %v3498_v38 = vpop.xlane.xlu0 %3497  ;;  %v3496_v52 = vpop.xlane.xlu1 %3495 }
 0xa18   : > { %11381 = vrsqrt.f32 %v3541_v4  ;;  %v3527_v15 = vmul.f32 0.0078125, %v3498_v38  ;;  %v3526_v31 = vmul.f32 0.0078125, %v3496_v52  ;;  %v16798_v4 = vmov 0  }
 0xa1a   : > { %v3542_v47 = vadd.f32 1e-05, %v3526_v31  ;;  %v3543_v18 = vadd.f32 1e-05, %v3527_v15 }
 0xa1b   : > { %v3500_v32 = vpop.xlane.xlu1 %3499  ;;  %v3502_v12 = vpop.xlane.xlu0 %3501 }
 0xa1c   : > { %v3528_v63 = vmul.f32 0.0078125, %v3500_v32  ;;  %11383 = vrsqrt.f32 %v3542_v47  ;;  %v3529_v20 = vmul.f32 0.0078125, %v3502_v12 }
 0xa1d   : > { %11385 = vrsqrt.f32 %v3543_v18 }
 0xa1e   : > { %v3544_v10 = vadd.f32 1e-05, %v3528_v63  ;;  %v3545_v3 = vadd.f32 1e-05, %v3529_v20 }
 0xa1f   : > { %v3504_v61 = vpop.xlane.xlu1 %3503  ;;  %v3506_v19 = vpop.xlane.xlu0 %3505 }
 0xa20   : > { %v3530_v25 = vmul.f32 0.0078125, %v3504_v61  ;;  %11387 = vrsqrt.f32 %v3544_v10  ;;  %v3531_v46 = vmul.f32 0.0078125, %v3506_v19 }
 0xa22   : > { %v3546_v5 = vadd.f32 1e-05, %v3530_v25  ;;  %v3547_v42 = vadd.f32 1e-05, %v3531_v46 }
 0xa23   : > { %v3508_v51 = vpop.xlane.xlu1 %3507 }
 0xa24   : > { %11389 = vrsqrt.f32 %v3546_v5  ;;  %v3532_v11 = vmul.f32 0.0078125, %v3508_v51 }
 0xa25   : > { %v11382_v39 = vpop.eup %11381  ;;  %11391 = vrsqrt.f32 %v3545_v3 }
 0xa26   : > { %v3573_v35 = vmul.f32 %v11382_v39, %v13900_v28  ;;  %v3548_v43 = vadd.f32 1e-05, %v3532_v11 }
 0xa28   : > { %v3593_v60 = vmul.f32 %v13980_v36, %v3573_v35  ;;  %11393 = vrsqrt.f32 %v3548_v43 }
 0xa29   : > { %v11384_v22 = vpop.eup %11383  ;;  %11395 = vrsqrt.f32 %v3547_v42 }
 0xa2a   : > { %v3574_v8 = vmul.f32 %v11384_v22, %v13908_v21  ;;  %v11386_v33 = vpop.eup %11385  ;;  %v13988_v28 = vadd.f32 %v13984_v24, %v3593_v60 }
 0xa2b   : > { %v3575_v59 = vmul.f32 %v11386_v33, %v13905_v41 }
 0xa2c   : > { %v3594_v34 = vmul.f32 %v13980_v36, %v3574_v8 }
 0xa2d   : > { %v11388_v55 = vpop.eup %11387  ;;  %v3595_v13 = vmul.f32 %v13980_v36, %v3575_v59 }
 0xa2e   : > { %v13991_v26 = vadd.f32 %v13984_v24, %v3594_v34  ;;  %v3576_v21 = vmul.f32 %v11388_v55, %v13915_v9 }
 0xa2f   : > { %v14005_v41 = vadd.f32 %v13984_v24, %v3595_v13 }
 0xa30   : > { %v3629_v57 = vpack.c.bf16 %v13991_v26, %v13988_v28  ;;  %v3596_v44 = vmul.f32 %v13980_v36, %v3576_v21 }
 0xa31   : > { %v11390_v14 = vpop.eup %11389 }
 0xa32   : > { %3779 = vmatmul.mubr.bf16.vlgmr.msra.gmra.mxu0 %v3629_v57  ;;  %v11392_v58 = vpop.eup %11391  ;;  %v14001_v38 = vadd.f32 %v13984_v24, %v3596_v44  ;;  %v3578_v52 = vmul.f32 %v11390_v14, %v13928_v56 }
 0xa33   : > { %3788 = vmatprep.mubr.bf16.mxu0 %v16798_v4  ;;  %v3577_v9 = vmul.f32 %v11392_v58, %v13918_v7 }
 0xa34   : > { %v3630_v23 = vpack.c.bf16 %v14001_v38, %v14005_v41  ;;  %v3598_v15 = vmul.f32 %v13980_v36, %v3578_v52 }
 0xa35   : > { %v11394_v31 = vpop.eup %11393  ;;  %v3597_v18 = vmul.f32 %v13980_v36, %v3577_v9 }
 0xa36   : > { %v11396_v47 = vpop.eup %11395  ;;  %v14014_v32 = vadd.f32 %v13984_v24, %v3598_v15  ;;  %v3580_v56 = vmul.f32 %v11394_v31, %v13935_v2 }
 0xa37   : > { %v14018_v12 = vadd.f32 %v13984_v24, %v3597_v18  ;;  %v3579_v7 = vmul.f32 %v11396_v47, %v13925_v29 }
 0xa38   : > { %v3600_v10 = vmul.f32 %v13980_v36, %v3580_v56 }
 0xa39   : > { %v3631_v63 = vpack.c.bf16 %v14014_v32, %v14018_v12  ;;  %v3599_v20 = vmul.f32 %v13980_v36, %v3579_v7 }
 0xa3a   : > { %3789 = vmatmul.mubr.bf16.gmra.mxu0 %v3630_v23  ;;  %v14027_v25 = vadd.f32 %v13984_v24, %v3600_v10 }
 0xa3b   : > { %3798 = vmatprep.mubr.bf16.mxu0 %v16798_v4  ;;  %v14030_v5 = vadd.f32 %v13984_v24, %v3599_v20 }
 0xa3d   : > { %v3632_v51 = vpack.c.bf16 %v14027_v25, %v14030_v5 }
 0xa42   : > { %3799 = vmatmul.mubr.bf16.gmra.mxu0 %v3631_v63 }
 0xa43   : > { %3808 = vmatprep.mubr.bf16.mxu0 %v16798_v4 }
 0xa45   : > { %v3510_v61 = vpop.xlane.xlu0 %3509 }
 0xa46   : > { %v3533_v2 = vmul.f32 0.0078125, %v3510_v61 }
 0xa48   : > { %v3549_v3 = vadd.f32 1e-05, %v3533_v2 }
 0xa49   : > { %v3514_v29 = vpop.xlane.xlu0 %3513  ;;  %v3512_v19 = vpop.xlane.xlu1 %3511 }
 0xa4a   : > { %11397 = vrsqrt.f32 %v3549_v3  ;;  %v3535_v39 = vmul.f32 0.0078125, %v3514_v29  ;;  %v3534_v11 = vmul.f32 0.0078125, %v3512_v19  ;;  %3809 = vmatmul.mubr.bf16.gmra.mxu0 %v3632_v51  ;;  %v11003_v19 = vld [vmem:[#allocation8 + $0x50] sm:$0xff]  }
 0xa4b   : > { %3818 = vmatprep.mubr.bf16.mxu0 %v16798_v4  ;;  %v11004_v51 = vld [vmem:[#allocation8 + $0x10] sm:$0xff]   ;;  %9582 = vmatprep.subr.bf16.mxu1 %v11003_v19 }
 0xa4c   : > { %v3550_v46 = vadd.f32 1e-05, %v3534_v11  ;;  %v3551_v35 = vadd.f32 1e-05, %v3535_v39  ;;  %9583 = vmatpush3.bf16.msra.mxu1 %v11004_v51 }
 0xa4d   : > { %v3516_v43 = vpop.xlane.xlu1 %3515 }
 0xa4e   : > { %v3536_v22 = vmul.f32 0.0078125, %v3516_v43  ;;  %11399 = vrsqrt.f32 %v3550_v46 }
 0xa4f   : > { %11401 = vrsqrt.f32 %v3551_v35  ;;  %v11005_v35 = vld [vmem:[#allocation8 + $0x48] sm:$0xff]  }
 0xa50   : > { %v3552_v42 = vadd.f32 1e-05, %v3536_v22  ;;  %v11006_v22 = vld [vmem:[#allocation8 + $0x8] sm:$0xff]   ;;  %9584 = vmatprep.subr.bf16.mxu1 %v11005_v35 }
 0xa51   : > { %9585 = vmatpush3.bf16.msra.mxu1 %v11006_v22 }
 0xa52   : > { %11403 = vrsqrt.f32 %v3552_v42 }
 0xa57   : > { %v11398_v8 = vpop.eup %11397 }
 0xa58   : > { %v3581_v60 = vmul.f32 %v11398_v8, %v13940_v1 }
 0xa5a   : > { %v3601_v55 = vmul.f32 %v13980_v36, %v3581_v60 }
 0xa5b   : > { %v11400_v33 = vpop.eup %11399 }
 0xa5c   : > { %v3582_v34 = vmul.f32 %v11400_v33, %v13948_v53  ;;  %v11402_v59 = vpop.eup %11401  ;;  %v14041_v58 = vadd.f32 %v13984_v24, %v3601_v55  ;;  %v11008_v55 = vld [vmem:[#allocation8] sm:$0xff]  }
 0xa5d   : > { %v3583_v1 = vmul.f32 %v11402_v59, %v13945_v37 }
 0xa5e   : > { %v3602_v57 = vmul.f32 %v13980_v36, %v3582_v34  ;;  %v11007_v34 = vld [vmem:[#allocation8 + $0x40] sm:$0xff]  }
 0xa5f   : > { %v11404_v21 = vpop.eup %11403  ;;  %v3603_v18 = vmul.f32 %v13980_v36, %v3583_v1  ;;  %9586 = vmatprep.subr.bf16.mxu1 %v11007_v34  ;;  %v16799_v1 = vld [vmem:[#allocation21_spill] sm:$0xff] }
 0xa60   : > { %v3518_v44 = vpop.xlane.xlu0 %3517  ;;  %v3584_v14 = vmul.f32 %v11404_v21, %v13955_v54  ;;  %v14044_v52 = vadd.f32 %v13984_v24, %v3602_v57  ;;  %9587 = vmatpush3.bf16.msra.mxu1 %v11008_v55 }
 0xa61   : > { %v3537_v13 = vmul.f32 0.0078125, %v3518_v44  ;;  %v14056_v20 = vadd.f32 %v13984_v24, %v3603_v18 }
 0xa62   : > { %v3633_v53 = vpack.c.bf16 %v14044_v52, %v14041_v58  ;;  %v3604_v23 = vmul.f32 %v13980_v36, %v3584_v14  ;;  %v3654_v14 = vld [vmem:[#allocation10 + $0xc] ss:$2 sm:$0x3] }
 0xa63   : > { %v3553_v9 = vadd.f32 1e-05, %v3537_v13 }
 0xa64   : > { %v3522_v15 = vpop.xlane.xlu0 %3521  ;;  %v3520_v31 = vpop.xlane.xlu1 %3519  ;;  %3819 = vmatmul.mubr.bf16.gmra.mxu0 %v3633_v53  ;;  %v14053_v7 = vadd.f32 %v13984_v24, %v3604_v23 }
 0xa65   : > { %11405 = vrsqrt.f32 %v3553_v9  ;;  %v3539_v47 = vmul.f32 0.0078125, %v3522_v15  ;;  %v3538_v54 = vmul.f32 0.0078125, %v3520_v31  ;;  %3828 = vmatprep.mubr.bf16.mxu0 %v16798_v4  ;;  %v14088_v9 = vrot.slane %v3654_v14, %v16799_v1 }
 0xa66   : > { %v3634_v2 = vpack.c.bf16 %v14053_v7, %v14056_v20 }
 0xa67   : > { %v3554_v56 = vadd.f32 1e-05, %v3538_v54  ;;  %v3555_v37 = vadd.f32 1e-05, %v3539_v47 }
 0xa68   : > { %v3524_v63 = vpop.xlane.xlu1 %3523 }
 0xa69   : > { %v3540_v10 = vmul.f32 0.0078125, %v3524_v63  ;;  %11407 = vrsqrt.f32 %v3554_v56 }
 0xa6a   : > { %11409 = vrsqrt.f32 %v3555_v37 }
 0xa6b   : > { %v3556_v61 = vadd.f32 1e-05, %v3540_v10 }
 0xa6c   : > { %3829 = vmatmul.mubr.bf16.gmra.mxu0 %v3634_v2 }
 0xa6d   : > { %11411 = vrsqrt.f32 %v3556_v61  ;;  %3838 = vmatprep.mubr.bf16.mxu0 %v16798_v4 }
 0xa72   : > { %v11406_v3 = vpop.eup %11405 }
 0xa73   : > { %v3585_v29 = vmul.f32 %v11406_v3, %v13960_v50 }
 0xa75   : > { %v3605_v46 = vmul.f32 %v13980_v36, %v3585_v29 }
 0xa76   : > { %v11408_v39 = vpop.eup %11407 }
 0xa77   : > { %v3586_v11 = vmul.f32 %v11408_v39, %v13968_v48  ;;  %v11410_v43 = vpop.eup %11409  ;;  %v14067_v50 = vadd.f32 %v13984_v24, %v3605_v46 }
 0xa78   : > { %v3587_v48 = vmul.f32 %v11410_v43, %v13965_v40 }
 0xa79   : > { %v3606_v8 = vmul.f32 %v13980_v36, %v3586_v11 }
 0xa7a   : > { %v11412_v42 = vpop.eup %11411 }
 0xa7b   : > { %v3588_v60 = vmul.f32 %v11412_v42, %v13975_v27  ;;  %v14070_v33 = vadd.f32 %v13984_v24, %v3606_v8  ;;  %v3607_v27 = vmul.f32 %v13980_v36, %v3587_v48 }
 0xa7d   : > { %v3635_v59 = vpack.c.bf16 %v14070_v33, %v14067_v50  ;;  %v3608_v21 = vmul.f32 %v13980_v36, %v3588_v60  ;;  %v14082_v44 = vadd.f32 %v13984_v24, %v3607_v27  ;;  %v16800_v36 = vld [vmem:[#allocation20_spill] sm:$0xff] }
 0xa7e   : > { %v14091_v53 = vrot.slane %v3654_v14, %v16800_v36 }
 0xa7f   : > { %3839 = vmatmul.mubr.bf16.gmra.mxu0 %v3635_v59  ;;  %v14079_v57 = vadd.f32 %v13984_v24, %v3608_v21 }
 0xa80   : > { %3848 = vmatprep.mubr.bf16.mxu0 %v16798_v4 }
 0xa81   : > { %v3636_v40 = vpack.c.bf16 %v14079_v57, %v14082_v44 }
 0xa87   : > { %3849 = vmatmul.mubr.bf16.gmra.mxu0 %v3636_v40 }
 0xa88   : > { %4590 = vmatprep.mubr.bf16.mxu0 %v16798_v4 }
 0xaf2   : > { %v3780_v13 = vpop.f32.mrf.mxu0 }
 0xaf3   : > { %v3781_v47 = vadd.f32 %v3780_v13, %v14091_v53 }
 0xaf4   : > { %v3782_v23 = vpop.f32.mrf.mxu0 }
 0xaf5   : > { %v3783_v31 = vadd.f32 %v3782_v23, %v14088_v9  ;;  %v3859_v61 = vmax.f32 %v3781_v47, 0.0 }
 0xaf6   : > { %v3784_v15 = vpop.f32.mrf.mxu0 }
 0xaf7   : > { %v3785_v24 = vadd.f32 %v3784_v15, %v14091_v53  ;;  %v3860_v63 = vmax.f32 %v3783_v31, 0.0 }
 0xaf8   : > { %v3786_v54 = vpop.f32.mrf.mxu0 }
 0xaf9   : > { %v3787_v18 = vadd.f32 %v3786_v54, %v14088_v9  ;;  %v3861_v56 = vmax.f32 %v3785_v24, 0.0 }
 0xafa   : > { %v3790_v37 = vpop.f32.mrf.mxu0 }
 0xafb   : > { %v3862_v10 = vmax.f32 %v3787_v18, 0.0  ;;  %v3891_v29 = vpack.c.bf16 %v3861_v56, %v3859_v61  ;;  %v3791_v11 = vadd.f32 %v3790_v37, %v14091_v53 }
 0xafc   : > { %v3792_v2 = vpop.f32.mrf.mxu0 }
 0xafd   : > { %v3892_v3 = vpack.c.bf16 %v3862_v10, %v3860_v63  ;;  %v3793_v51 = vadd.f32 %v3792_v2, %v14088_v9  ;;  %v3863_v60 = vmax.f32 %v3791_v11, 0.0 }
 0xafe   : > { %v3794_v19 = vpop.f32.mrf.mxu0 }
 0xaff   : > { %v3795_v39 = vadd.f32 %v3794_v19, %v14091_v53  ;;  %4072 = vmatprep.mubr.bf16.mxu1 %v3892_v3  ;;  %v3864_v42 = vmax.f32 %v3793_v51, 0.0 }
 0xb00   : > { %v3796_v46 = vpop.f32.mrf.mxu0  ;;  %4073 = vmatmul.mubr.bf16.vlgmr.msra.gmra.mxu1 %v3891_v29 }
 0xb01   : > { %v3797_v35 = vadd.f32 %v3796_v46, %v14088_v9  ;;  %v3865_v43 = vmax.f32 %v3795_v39, 0.0 }
 0xb02   : > { %v3800_v22 = vpop.f32.mrf.mxu0 }
 0xb03   : > { %v3866_v8 = vmax.f32 %v3797_v35, 0.0  ;;  %v3893_v55 = vpack.c.bf16 %v3865_v43, %v3863_v60  ;;  %v3801_v40 = vadd.f32 %v3800_v22, %v14091_v53 }
 0xb04   : > { %v3802_v48 = vpop.f32.mrf.mxu0 }
 0xb05   : > { %v3894_v34 = vpack.c.bf16 %v3866_v8, %v3864_v42  ;;  %v3803_v21 = vadd.f32 %v3802_v48, %v14088_v9  ;;  %v3867_v47 = vmax.f32 %v3801_v40, 0.0 }
 0xb06   : > { %v3804_v59 = vpop.f32.mrf.mxu0 }
 0xb07   : > { %v3805_v27 = vadd.f32 %v3804_v59, %v14091_v53  ;;  %4080 = vmatprep.mubr.bf16.mxu1 %v3894_v34  ;;  %v3868_v31 = vmax.f32 %v3803_v21, 0.0 }
 0xb08   : > { %v3806_v14 = vpop.f32.mrf.mxu0  ;;  %4081 = vmatmul.mubr.bf16.gmra.mxu1 %v3893_v55 }
 0xb09   : > { %v3807_v13 = vadd.f32 %v3806_v14, %v14088_v9  ;;  %v3869_v23 = vmax.f32 %v3805_v27, 0.0 }
 0xb0a   : > { %v3810_v15 = vpop.f32.mrf.mxu0 }
 0xb0b   : > { %v3870_v24 = vmax.f32 %v3807_v13, 0.0  ;;  %v3895_v56 = vpack.c.bf16 %v3869_v23, %v3867_v47  ;;  %v3811_v61 = vadd.f32 %v3810_v15, %v14091_v53 }
 0xb0c   : > { %v3812_v54 = vpop.f32.mrf.mxu0 }
 0xb0d   : > { %v3896_v18 = vpack.c.bf16 %v3870_v24, %v3868_v31  ;;  %v3813_v63 = vadd.f32 %v3812_v54, %v14088_v9  ;;  %v3871_v39 = vmax.f32 %v3811_v61, 0.0 }
 0xb0e   : > { %v3814_v37 = vpop.f32.mrf.mxu0 }
 0xb0f   : > { %v3815_v10 = vadd.f32 %v3814_v37, %v14091_v53  ;;  %4088 = vmatprep.mubr.bf16.mxu1 %v3896_v18  ;;  %v3872_v19 = vmax.f32 %v3813_v63, 0.0 }
 0xb10   : > { %v3816_v2 = vpop.f32.mrf.mxu0  ;;  %4089 = vmatmul.mubr.bf16.gmra.mxu1 %v3895_v56 }
 0xb11   : > { %v3817_v3 = vadd.f32 %v3816_v2, %v14088_v9  ;;  %v3873_v29 = vmax.f32 %v3815_v10, 0.0 }
 0xb13   : > { %v3874_v51 = vmax.f32 %v3817_v3, 0.0  ;;  %v3897_v46 = vpack.c.bf16 %v3873_v29, %v3871_v39 }
 0xb15   : > { %v3898_v11 = vpack.c.bf16 %v3874_v51, %v3872_v19 }
 0xb17   : > { %4096 = vmatprep.mubr.bf16.mxu1 %v3898_v11 }
 0xb18   : > { %4097 = vmatmul.mubr.bf16.gmra.mxu1 %v3897_v46 }
 0xb24   : > { %v3820_v35 = vpop.f32.mrf.mxu0 }
 0xb25   : > { %v3821_v60 = vadd.f32 %v3820_v35, %v14091_v53 }
 0xb26   : > { %v3822_v43 = vpop.f32.mrf.mxu0 }
 0xb27   : > { %v3823_v42 = vadd.f32 %v3822_v43, %v14088_v9  ;;  %v3875_v40 = vmax.f32 %v3821_v60, 0.0 }
 0xb28   : > { %v3824_v22 = vpop.f32.mrf.mxu0 }
 0xb29   : > { %v3825_v8 = vadd.f32 %v3824_v22, %v14091_v53  ;;  %v3876_v21 = vmax.f32 %v3823_v42, 0.0 }
 0xb2a   : > { %v3826_v48 = vpop.f32.mrf.mxu0 }
 0xb2b   : > { %v3827_v34 = vadd.f32 %v3826_v48, %v14088_v9  ;;  %v3877_v55 = vmax.f32 %v3825_v8, 0.0 }
 0xb2c   : > { %v3830_v59 = vpop.f32.mrf.mxu0 }
 0xb2d   : > { %v3878_v27 = vmax.f32 %v3827_v34, 0.0  ;;  %v3899_v23 = vpack.c.bf16 %v3877_v55, %v3875_v40  ;;  %v3831_v47 = vadd.f32 %v3830_v59, %v14091_v53 }
 0xb2e   : > { %v3832_v14 = vpop.f32.mrf.mxu0 }
 0xb2f   : > { %v3900_v13 = vpack.c.bf16 %v3878_v27, %v3876_v21  ;;  %v3833_v31 = vadd.f32 %v3832_v14, %v14088_v9  ;;  %v3879_v10 = vmax.f32 %v3831_v47, 0.0 }
 0xb30   : > { %v3834_v15 = vpop.f32.mrf.mxu0 }
 0xb31   : > { %v3835_v24 = vadd.f32 %v3834_v15, %v14091_v53  ;;  %4104 = vmatprep.mubr.bf16.mxu1 %v3900_v13  ;;  %v3880_v37 = vmax.f32 %v3833_v31, 0.0 }
 0xb32   : > { %v3836_v54 = vpop.f32.mrf.mxu0  ;;  %4105 = vmatmul.mubr.bf16.gmra.mxu1 %v3899_v23 }
 0xb33   : > { %v3837_v18 = vadd.f32 %v3836_v54, %v14088_v9  ;;  %v3881_v56 = vmax.f32 %v3835_v24, 0.0 }
 0xb35   : > { %v3882_v63 = vmax.f32 %v3837_v18, 0.0  ;;  %v3901_v2 = vpack.c.bf16 %v3881_v56, %v3879_v10  ;;  %v14125_v56 = vld [vmem:[#allocation10 + $0x10] ss:$0 sm:$0xff] }
 0xb37   : > { %v3902_v61 = vpack.c.bf16 %v3882_v63, %v3880_v37 }
 0xb39   : > { %4112 = vmatprep.mubr.bf16.mxu1 %v3902_v61 }
 0xb3a   : > { %4113 = vmatmul.mubr.bf16.gmra.mxu1 %v3901_v2 }
 0xb3f   : > { %v3840_v3 = vpop.f32.mrf.mxu0 }
 0xb40   : > { %v3841_v11 = vadd.f32 %v3840_v3, %v14091_v53 }
 0xb41   : > { %v3842_v29 = vpop.f32.mrf.mxu0 }
 0xb42   : > { %v3843_v51 = vadd.f32 %v3842_v29, %v14088_v9  ;;  %v3883_v60 = vmax.f32 %v3841_v11, 0.0 }
 0xb43   : > { %v3844_v19 = vpop.f32.mrf.mxu0 }
 0xb44   : > { %v3845_v39 = vadd.f32 %v3844_v19, %v14091_v53  ;;  %v3884_v42 = vmax.f32 %v3843_v51, 0.0 }
 0xb45   : > { %v3846_v46 = vpop.f32.mrf.mxu0 }
 0xb46   : > { %v3847_v35 = vadd.f32 %v3846_v46, %v14088_v9  ;;  %v3885_v43 = vmax.f32 %v3845_v39, 0.0 }
 0xb47   : > { %v3850_v22 = vpop.f32.mrf.mxu0 }
 0xb48   : > { %v3886_v8 = vmax.f32 %v3847_v35, 0.0  ;;  %v3903_v55 = vpack.c.bf16 %v3885_v43, %v3883_v60  ;;  %v3851_v40 = vadd.f32 %v3850_v22, %v14091_v53 }
 0xb49   : > { %v3852_v48 = vpop.f32.mrf.mxu0 }
 0xb4a   : > { %v3904_v34 = vpack.c.bf16 %v3886_v8, %v3884_v42  ;;  %v3853_v21 = vadd.f32 %v3852_v48, %v14088_v9  ;;  %v3887_v24 = vmax.f32 %v3851_v40, 0.0 }
 0xb4b   : > { %v3854_v59 = vpop.f32.mrf.mxu0 }
 0xb4c   : > { %v3855_v27 = vadd.f32 %v3854_v59, %v14091_v53  ;;  %4120 = vmatprep.mubr.bf16.mxu1 %v3904_v34  ;;  %v3888_v15 = vmax.f32 %v3853_v21, 0.0 }
 0xb4d   : > { %v3856_v14 = vpop.f32.mrf.mxu0  ;;  %4121 = vmatmul.mubr.bf16.gmra.mxu1 %v3903_v55 }
 0xb4e   : > { %v3857_v13 = vadd.f32 %v3856_v14, %v14088_v9  ;;  %v3889_v23 = vmax.f32 %v3855_v27, 0.0 }
 0xb50   : > { %v3890_v31 = vmax.f32 %v3857_v13, 0.0  ;;  %v3905_v54 = vpack.c.bf16 %v3889_v23, %v3887_v24 }
 0xb52   : > { %v3906_v47 = vpack.c.bf16 %v3890_v31, %v3888_v15 }
 0xb54   : > { %4128 = vmatprep.mubr.bf16.mxu1 %v3906_v47 }
 0xb55   : > { %4129 = vmatmul.mubr.bf16.gmra.mxu1 %v3905_v54 }
 0xbc0   : > { %v9588_v18 = vpop.f32.mrf.mxu1 }
 0xbc2   : > { %v9589_v37 = vpop.f32.mrf.mxu1 }
 0xbc3   : > { %v9590_v63 = vadd.f32 %v9589_v37, %v9588_v18 }
 0xbc4   : > { %v9591_v10 = vpop.f32.mrf.mxu1 }
 0xbc5   : > { %v4075_v53 = vadd.f32 %v9590_v63, %v14125_v56 }
 0xbc6   : > { %v9592_v61 = vpop.f32.mrf.mxu1 }
 0xbc7   : > { %v9593_v2 = vadd.f32 %v9592_v61, %v9591_v10  ;;  %v14129_v9 = vadd.f32 %v4075_v53, %v13988_v28 }
 0xbc8   : > { %v9594_v3 = vpop.f32.mrf.mxu1 }
 0xbc9   : > { %v4078_v29 = vadd.f32 %v9593_v2, %v14125_v56  ;;  %4155 = vadd.xlane.f32.xlu0 %v14129_v9 }
 0xbca   : > { %v9595_v19 = vpop.f32.mrf.mxu1 }
 0xbcb   : > { %v9596_v51 = vadd.f32 %v9595_v19, %v9594_v3  ;;  %v14134_v39 = vadd.f32 %v4078_v29, %v13991_v26 }
 0xbcc   : > { %v9597_v11 = vpop.f32.mrf.mxu1 }
 0xbcd   : > { %v4083_v46 = vadd.f32 %v9596_v51, %v14125_v56  ;;  %4157 = vadd.xlane.f32.xlu1 %v14134_v39 }
 0xbce   : > { %v9598_v35 = vpop.f32.mrf.mxu1 }
 0xbcf   : > { %v9599_v43 = vadd.f32 %v9598_v35, %v9597_v11  ;;  %v14139_v28 = vadd.f32 %v4083_v46, %v14005_v41 }
 0xbd0   : > { %v9600_v22 = vpop.f32.mrf.mxu1 }
 0xbd1   : > { %v4086_v42 = vadd.f32 %v9599_v43, %v14125_v56  ;;  %4159 = vadd.xlane.f32.xlu0 %v14139_v28 }
 0xbd2   : > { %v9601_v8 = vpop.f32.mrf.mxu1 }
 0xbd3   : > { %v9602_v60 = vadd.f32 %v9601_v8, %v9600_v22  ;;  %v14144_v26 = vadd.f32 %v4086_v42, %v14001_v38 }
 0xbd4   : > { %v9603_v48 = vpop.f32.mrf.mxu1 }
 0xbd5   : > { %v4091_v34 = vadd.f32 %v9602_v60, %v14125_v56  ;;  %4161 = vadd.xlane.f32.xlu1 %v14144_v26 }
 0xbd6   : > { %v9604_v55 = vpop.f32.mrf.mxu1 }
 0xbd7   : > { %v9605_v59 = vadd.f32 %v9604_v55, %v9603_v48  ;;  %v14149_v41 = vadd.f32 %v4091_v34, %v14018_v12 }
 0xbd8   : > { %v9606_v21 = vpop.f32.mrf.mxu1 }
 0xbd9   : > { %v4094_v27 = vadd.f32 %v9605_v59, %v14125_v56  ;;  %4163 = vadd.xlane.f32.xlu0 %v14149_v41 }
 0xbda   : > { %v9607_v40 = vpop.f32.mrf.mxu1 }
 0xbdb   : > { %v9608_v14 = vadd.f32 %v9607_v40, %v9606_v21  ;;  %v14154_v38 = vadd.f32 %v4094_v27, %v14014_v32 }
 0xbdc   : > { %v9609_v13 = vpop.f32.mrf.mxu1 }
 0xbdd   : > { %v4099_v23 = vadd.f32 %v9608_v14, %v14125_v56  ;;  %4165 = vadd.xlane.f32.xlu1 %v14154_v38 }
 0xbde   : > { %v9610_v15 = vpop.f32.mrf.mxu1 }
 0xbdf   : > { %v9611_v31 = vadd.f32 %v9610_v15, %v9609_v13  ;;  %v14159_v12 = vadd.f32 %v4099_v23, %v14030_v5 }
 0xbe1   : > { %v4102_v24 = vadd.f32 %v9611_v31, %v14125_v56  ;;  %4167 = vadd.xlane.f32.xlu0 %v14159_v12 }
 0xbe3   : > { %v14164_v47 = vadd.f32 %v4102_v24, %v14027_v25  ;;  %v11011_v24 = vld [vmem:[%s16465_s1 + $0x16c] ss:$12 sps:$4 sm:$0xff]  }
 0xbe4   : > { %4558 = vmatprep.subr.bf16.mxu0 %v11011_v24  ;;  %v11029_v24 = vld [vmem:[%s16465_s1 + $0xf4] ss:$12 sps:$4 sm:$0xff]  }
 0xbe5   : > { %4169 = vadd.xlane.f32.xlu1 %v14164_v47 }
 0xbf2   : > { %v9612_v32 = vpop.f32.mrf.mxu1 }
 0xbf4   : > { %v9613_v54 = vpop.f32.mrf.mxu1 }
 0xbf5   : > { %v9614_v18 = vadd.f32 %v9613_v54, %v9612_v32 }
 0xbf6   : > { %v9615_v37 = vpop.f32.mrf.mxu1 }
 0xbf7   : > { %v4107_v63 = vadd.f32 %v9614_v18, %v14125_v56 }
 0xbf8   : > { %v9616_v10 = vpop.f32.mrf.mxu1 }
 0xbf9   : > { %v9617_v53 = vadd.f32 %v9616_v10, %v9615_v37  ;;  %v14169_v5 = vadd.f32 %v4107_v63, %v14041_v58 }
 0xbfa   : > { %v9618_v61 = vpop.f32.mrf.mxu1 }
 0xbfb   : > { %v4110_v2 = vadd.f32 %v9617_v53, %v14125_v56  ;;  %4171 = vadd.xlane.f32.xlu0 %v14169_v5 }
 0xbfc   : > { %v9619_v25 = vpop.f32.mrf.mxu1 }
 0xbfd   : > { %v9620_v3 = vadd.f32 %v9619_v25, %v9618_v61  ;;  %v14174_v29 = vadd.f32 %v4110_v2, %v14044_v52 }
 0xbfe   : > { %v9621_v19 = vpop.f32.mrf.mxu1 }
 0xbff   : > { %v4115_v51 = vadd.f32 %v9620_v3, %v14125_v56  ;;  %4173 = vadd.xlane.f32.xlu1 %v14174_v29 }
 0xc00   : > { %v9622_v11 = vpop.f32.mrf.mxu1 }
 0xc01   : > { %v9623_v46 = vadd.f32 %v9622_v11, %v9621_v19  ;;  %v14179_v58 = vadd.f32 %v4115_v51, %v14056_v20 }
 0xc03   : > { %v4118_v35 = vadd.f32 %v9623_v46, %v14125_v56  ;;  %4175 = vadd.xlane.f32.xlu0 %v14179_v58  ;;  %v11012_v46 = vld [vmem:[%s16465_s1 + $0x150] ss:$12 sps:$4 sm:$0xff]  }
 0xc05   : > { %v14184_v43 = vadd.f32 %v4118_v35, %v14053_v7 }
 0xc07   : > { %4177 = vadd.xlane.f32.xlu1 %v14184_v43 }
 0xc0d   : > { %v9624_v52 = vpop.f32.mrf.mxu1 }
 0xc0f   : > { %v9625_v22 = vpop.f32.mrf.mxu1 }
 0xc10   : > { %v9626_v42 = vadd.f32 %v9625_v22, %v9624_v52  ;;  %v11017_v22 = vld [vmem:[%s16465_s1 + $0x13c] ss:$12 sps:$4 sm:$0xff]  }
 0xc11   : > { %v9627_v8 = vpop.f32.mrf.mxu1 }
 0xc12   : > { %v4123_v60 = vadd.f32 %v9626_v42, %v14125_v56 }
 0xc13   : > { %v9628_v48 = vpop.f32.mrf.mxu1 }
 0xc14   : > { %v9629_v34 = vadd.f32 %v9628_v48, %v9627_v8  ;;  %v14189_v20 = vadd.f32 %v4123_v60, %v14067_v50  ;;  %v11015_v8 = vld [vmem:[%s16465_s1 + $0x138] ss:$12 sps:$4 sm:$0xff]  }
 0xc15   : > { %v9630_v55 = vpop.f32.mrf.mxu1 }
 0xc16   : > { %v4126_v59 = vadd.f32 %v9629_v34, %v14125_v56  ;;  %4179 = vadd.xlane.f32.xlu0 %v14189_v20 }
 0xc17   : > { %v9631_v7 = vpop.f32.mrf.mxu1 }
 0xc18   : > { %v9632_v21 = vadd.f32 %v9631_v7, %v9630_v55  ;;  %v14194_v27 = vadd.f32 %v4126_v59, %v14070_v33  ;;  %v11009_v33 = vld [vmem:[%s16465_s1 + $0x168] ss:$12 sps:$4 sm:$0xff]   ;;  %v11021_v55 = vld [vmem:[%s16465_s1 + $0x124] ss:$12 sps:$4 sm:$0xff]   ;;  %v11019_v7 = vld [vmem:[%s16465_s1 + $0x120] ss:$12 sps:$4 sm:$0xff]  }
 0xc19   : > { %v9633_v40 = vpop.f32.mrf.mxu1  ;;  %4559 = vmatpush1.bf16.msra.mxu0 %v11009_v33 }
 0xc1a   : > { %v4131_v14 = vadd.f32 %v9632_v21, %v14125_v56  ;;  %4181 = vadd.xlane.f32.xlu1 %v14194_v27 }
 0xc1b   : > { %v9634_v13 = vpop.f32.mrf.mxu1 }
 0xc1c   : > { %v9635_v23 = vadd.f32 %v9634_v13, %v9633_v40  ;;  %v14199_v50 = vadd.f32 %v4131_v14, %v14082_v44  ;;  %v11025_v13 = vld [vmem:[%s16465_s1 + $0x10c] ss:$12 sps:$4 sm:$0xff]  }
 0xc1e   : > { %v4134_v15 = vadd.f32 %v9635_v23, %v14125_v56  ;;  %4183 = vadd.xlane.f32.xlu0 %v14199_v50 }
 0xc20   : > { %v14204_v31 = vadd.f32 %v4134_v15, %v14079_v57  ;;  %v11023_v15 = vld [vmem:[%s16465_s1 + $0x108] ss:$12 sps:$4 sm:$0xff]  }
 0xc22   : > { %4185 = vadd.xlane.f32.xlu1 %v14204_v31 }
 0xc52   : > { %v4156_v44 = vpop.xlane.xlu0 %4155 }
 0xc53   : > { %v4187_v32 = vmul.f32 0.0078125, %v4156_v44  ;;  %v11027_v44 = vld [vmem:[%s16465_s1 + $0xf0] ss:$12 sps:$4 sm:$0xff]  }
 0xc55   : > { %v14214_v56 = vsub.f32 %v14129_v9, %v4187_v32  ;;  %v11033_v32 = vld [vmem:[%s16465_s1 + $0xdc] ss:$12 sps:$4 sm:$0xff]  }
 0xc56   : > { %v4158_v54 = vpop.xlane.xlu1 %4157 }
 0xc57   : > { %v4188_v57 = vmul.f32 0.0078125, %v4158_v54  ;;  %v4219_v18 = vmul.f32 %v14214_v56, %v14214_v56  ;;  %v11034_v54 = vld [vmem:[%s16465_s1 + $0x110] ss:$12 sps:$4 sm:$0xff]  }
 0xc59   : > { %v14219_v37 = vsub.f32 %v14134_v39, %v4188_v57  ;;  %4235 = vadd.xlane.f32.xlu0 %v4219_v18  ;;  %v11031_v57 = vld [vmem:[%s16465_s1 + $0xd8] ss:$12 sps:$4 sm:$0xff]  }
 0xc5a   : > { %v4160_v63 = vpop.xlane.xlu0 %4159  ;;  %v11037_v18 = vld [vmem:[%s16465_s1 + $0xc4] ss:$12 sps:$4 sm:$0xff]  }
 0xc5b   : > { %v4189_v10 = vmul.f32 0.0078125, %v4160_v63  ;;  %v4220_v53 = vmul.f32 %v14219_v37, %v14219_v37  ;;  %v11038_v63 = vld [vmem:[%s16465_s1 + $0xf8] ss:$12 sps:$4 sm:$0xff]  }
 0xc5d   : > { %v14224_v61 = vsub.f32 %v14139_v28, %v4189_v10  ;;  %4237 = vadd.xlane.f32.xlu1 %v4220_v53  ;;  %v11014_v28 = vld [vmem:[%s16465_s1 + $0x154] ss:$12 sps:$4 sm:$0xff]  }
 0xc5e   : > { %v4162_v9 = vpop.xlane.xlu1 %4161  ;;  %4560 = vmatprep.subr.bf16.mxu0 %v11014_v28  ;;  %v11035_v10 = vld [vmem:[%s16465_s1 + $0xc0] ss:$12 sps:$4 sm:$0xff]  }
 0xc5f   : > { %v4190_v2 = vmul.f32 0.0078125, %v4162_v9  ;;  %v4221_v25 = vmul.f32 %v14224_v61, %v14224_v61  ;;  %4561 = vmatpush1.bf16.msra.mxu0 %v11012_v46  ;;  %v11039_v53 = vld [vmem:[%s16465_s1 + $0xe0] ss:$12 sps:$4 sm:$0xff]   ;;  %v11040_v9 = vld [vmem:[%s16465_s1 + $0xc8] ss:$12 sps:$4 sm:$0xff]  }
 0xc60   : > { %4562 = vmatprep.subr.bf16.mxu0 %v11017_v22 }
 0xc61   : > { %v14229_v3 = vsub.f32 %v14144_v26, %v4190_v2  ;;  %4239 = vadd.xlane.f32.xlu0 %v4221_v25 }
 0xc62   : > { %v4164_v39 = vpop.xlane.xlu0 %4163 }
 0xc63   : > { %v4191_v19 = vmul.f32 0.0078125, %v4164_v39  ;;  %v4222_v51 = vmul.f32 %v14229_v3, %v14229_v3  ;;  %4563 = vmatpush1.bf16.msra.mxu0 %v11015_v8 }
 0xc64   : > { %4564 = vmatprep.subr.bf16.mxu0 %v11021_v55 }
 0xc65   : > { %v14237_v11 = vsub.f32 %v14149_v41, %v4191_v19  ;;  %4241 = vadd.xlane.f32.xlu1 %v4222_v51  ;;  %v11018_v41 = vld [vmem:[%s16465_s1 + $0x170] ss:$12 sps:$4 sm:$0xff]  }
 0xc66   : > { %v4166_v26 = vpop.xlane.xlu1 %4165  ;;  %10298 = vmatprep.subr.bf16.mxu1 %v11018_v41 }
 0xc67   : > { %v4192_v35 = vmul.f32 0.0078125, %v4166_v26  ;;  %v4223_v52 = vmul.f32 %v14237_v11, %v14237_v11  ;;  %10299 = vmatpush3.bf16.msra.mxu1 %v11018_v41  ;;  %4565 = vmatpush1.bf16.msra.mxu0 %v11019_v7 }
 0xc68   : > { %4566 = vmatprep.subr.bf16.mxu0 %v11025_v13 }
 0xc69   : > { %v14251_v42 = vsub.f32 %v14154_v38, %v4192_v35  ;;  %4243 = vadd.xlane.f32.xlu0 %v4223_v52  ;;  %v11022_v38 = vld [vmem:[%s16465_s1 + $0x158] ss:$12 sps:$4 sm:$0xff]  }
 0xc6a   : > { %v4168_v60 = vpop.xlane.xlu0 %4167  ;;  %10300 = vmatprep.subr.bf16.mxu1 %v11022_v38 }
 0xc6b   : > { %v4193_v48 = vmul.f32 0.0078125, %v4168_v60  ;;  %v4224_v34 = vmul.f32 %v14251_v42, %v14251_v42  ;;  %10301 = vmatpush3.bf16.msra.mxu1 %v11022_v38  ;;  %4567 = vmatpush1.bf16.msra.mxu0 %v11023_v15 }
 0xc6c   : > { %4568 = vmatprep.subr.bf16.mxu0 %v11029_v24 }
 0xc6d   : > { %v14265_v59 = vsub.f32 %v14159_v12, %v4193_v48  ;;  %4245 = vadd.xlane.f32.xlu1 %v4224_v34  ;;  %v11026_v12 = vld [vmem:[%s16465_s1 + $0x140] ss:$12 sps:$4 sm:$0xff]  }
 0xc6e   : > { %v4170_v21 = vpop.xlane.xlu1 %4169  ;;  %10302 = vmatprep.subr.bf16.mxu1 %v11026_v12 }
 0xc6f   : > { %v4194_v40 = vmul.f32 0.0078125, %v4170_v21  ;;  %v4225_v14 = vmul.f32 %v14265_v59, %v14265_v59  ;;  %10303 = vmatpush3.bf16.msra.mxu1 %v11026_v12  ;;  %4569 = vmatpush1.bf16.msra.mxu0 %v11027_v44 }
 0xc70   : > { %4570 = vmatprep.subr.bf16.mxu0 %v11033_v32 }
 0xc71   : > { %v14279_v23 = vsub.f32 %v14164_v47, %v4194_v40  ;;  %4247 = vadd.xlane.f32.xlu0 %v4225_v14  ;;  %v11030_v47 = vld [vmem:[%s16465_s1 + $0x128] ss:$12 sps:$4 sm:$0xff]  }
 0xc72   : > { %10304 = vmatprep.subr.bf16.mxu1 %v11030_v47 }
 0xc73   : > { %v4226_v33 = vmul.f32 %v14279_v23, %v14279_v23  ;;  %10305 = vmatpush3.bf16.msra.mxu1 %v11030_v47  ;;  %4571 = vmatpush1.bf16.msra.mxu0 %v11031_v57 }
 0xc74   : > { %10306 = vmatprep.subr.bf16.mxu1 %v11034_v54  ;;  %4572 = vmatprep.subr.bf16.mxu0 %v11037_v18 }
 0xc75   : > { %4249 = vadd.xlane.f32.xlu1 %v4226_v33 }
 0xc77   : > { %10307 = vmatpush3.bf16.msra.mxu1 %v11034_v54  ;;  %4573 = vmatpush1.bf16.msra.mxu0 %v11035_v10 }
 0xc78   : > { %10308 = vmatprep.subr.bf16.mxu1 %v11038_v63 }
 0xc7b   : > { %10309 = vmatpush3.bf16.msra.mxu1 %v11038_v63 }
 0xc7c   : > { %10310 = vmatprep.subr.bf16.mxu1 %v11039_v53 }
 0xc7f   : > { %10311 = vmatpush3.bf16.msra.mxu1 %v11039_v53 }
 0xc80   : > { %10312 = vmatprep.subr.bf16.mxu1 %v11040_v9 }
 0xc83   : > { %10313 = vmatpush3.bf16.msra.mxu1 %v11040_v9 }
 0xc84   : > { %v4172_v2 = vpop.xlane.xlu0 %4171 }
 0xc85   : > { %v4195_v25 = vmul.f32 0.0078125, %v4172_v2 }
 0xc87   : > { %v14320_v39 = vsub.f32 %v14169_v5, %v4195_v25 }
 0xc88   : > { %v4174_v19 = vpop.xlane.xlu1 %4173 }
 0xc89   : > { %v4196_v51 = vmul.f32 0.0078125, %v4174_v19  ;;  %v4227_v28 = vmul.f32 %v14320_v39, %v14320_v39 }
 0xc8b   : > { %v14325_v46 = vsub.f32 %v14174_v29, %v4196_v51  ;;  %4251 = vadd.xlane.f32.xlu0 %v4227_v28  ;;  %v14360_v28 = vld [vmem:[#allocation10 + $0x12] ss:$0 sm:$0xff] }
 0xc8c   : > { %v4176_v26 = vpop.xlane.xlu0 %4175 }
 0xc8d   : > { %v4197_v35 = vmul.f32 0.0078125, %v4176_v26  ;;  %v4228_v52 = vmul.f32 %v14325_v46, %v14325_v46 }
 0xc8f   : > { %v14330_v22 = vsub.f32 %v14179_v58, %v4197_v35  ;;  %4253 = vadd.xlane.f32.xlu1 %v4228_v52 }
 0xc90   : > { %v4178_v5 = vpop.xlane.xlu1 %4177 }
 0xc91   : > { %v4198_v41 = vmul.f32 0.0078125, %v4178_v5  ;;  %v4229_v8 = vmul.f32 %v14330_v22, %v14330_v22 }
 0xc93   : > { %v14335_v60 = vsub.f32 %v14184_v43, %v4198_v41  ;;  %4255 = vadd.xlane.f32.xlu0 %v4229_v8 }
 0xc95   : > { %v4230_v29 = vmul.f32 %v14335_v60, %v14335_v60 }
 0xc97   : > { %4257 = vadd.xlane.f32.xlu1 %v4230_v29 }
 0xc9f   : > { %v4180_v48 = vpop.xlane.xlu0 %4179 }
 0xca0   : > { %v4199_v34 = vmul.f32 0.0078125, %v4180_v48  ;;  %v14364_v48 = vld [vmem:[#allocation10 + $0x14] ss:$0 sm:$0xff] }
 0xca2   : > { %v14340_v55 = vsub.f32 %v14189_v20, %v4199_v34 }
 0xca3   : > { %v4182_v58 = vpop.xlane.xlu1 %4181 }
 0xca4   : > { %v4200_v38 = vmul.f32 0.0078125, %v4182_v58  ;;  %v4231_v7 = vmul.f32 %v14340_v55, %v14340_v55 }
 0xca6   : > { %v14345_v21 = vsub.f32 %v14194_v27, %v4200_v38  ;;  %4259 = vadd.xlane.f32.xlu0 %v4231_v7 }
 0xca7   : > { %v4184_v43 = vpop.xlane.xlu0 %4183 }
 0xca8   : > { %v4201_v40 = vmul.f32 0.0078125, %v4184_v43  ;;  %v4232_v14 = vmul.f32 %v14345_v21, %v14345_v21 }
 0xcaa   : > { %v14350_v13 = vsub.f32 %v14199_v50, %v4201_v40  ;;  %4261 = vadd.xlane.f32.xlu1 %v4232_v14 }
 0xcab   : > { %v4186_v20 = vpop.xlane.xlu1 %4185 }
 0xcac   : > { %v4202_v12 = vmul.f32 0.0078125, %v4186_v20  ;;  %v4233_v15 = vmul.f32 %v14350_v13, %v14350_v13 }
 0xcae   : > { %v14355_v33 = vsub.f32 %v14204_v31, %v4202_v12  ;;  %4263 = vadd.xlane.f32.xlu0 %v4233_v15 }
 0xcb0   : > { %v4234_v27 = vmul.f32 %v14355_v33, %v14355_v33 }
 0xcb2   : > { %4265 = vadd.xlane.f32.xlu1 %v4234_v27 }
 0xce2   : > { %v4236_v24 = vpop.xlane.xlu0 %4235 }
 0xce3   : > { %v4267_v47 = vmul.f32 0.0078125, %v4236_v24 }
 0xce5   : > { %v4283_v44 = vadd.f32 1e-05, %v4267_v47 }
 0xce6   : > { %v4238_v32 = vpop.xlane.xlu1 %4237 }
 0xce7   : > { %11413 = vrsqrt.f32 %v4283_v44  ;;  %v4268_v50 = vmul.f32 0.0078125, %v4238_v32 }
 0xce9   : > { %v4284_v54 = vadd.f32 1e-05, %v4268_v50 }
 0xcea   : > { %v4240_v57 = vpop.xlane.xlu0 %4239 }
 0xceb   : > { %11415 = vrsqrt.f32 %v4284_v54  ;;  %v4269_v18 = vmul.f32 0.0078125, %v4240_v57 }
 0xced   : > { %v4285_v63 = vadd.f32 1e-05, %v4269_v18 }
 0xcee   : > { %v4242_v10 = vpop.xlane.xlu1 %4241 }
 0xcef   : > { %11417 = vrsqrt.f32 %v4285_v63  ;;  %v4270_v31 = vmul.f32 0.0078125, %v4242_v10 }
 0xcf1   : > { %v4286_v53 = vadd.f32 1e-05, %v4270_v31 }
 0xcf2   : > { %v4244_v9 = vpop.xlane.xlu0 %4243 }
 0xcf3   : > { %11419 = vrsqrt.f32 %v4286_v53  ;;  %v4271_v2 = vmul.f32 0.0078125, %v4244_v9 }
 0xcf4   : > { %v11414_v25 = vpop.eup %11413 }
 0xcf5   : > { %v4315_v19 = vmul.f32 %v11414_v25, %v14214_v56  ;;  %v4287_v51 = vadd.f32 1e-05, %v4271_v2 }
 0xcf6   : > { %v4246_v26 = vpop.xlane.xlu1 %4245 }
 0xcf7   : > { %11421 = vrsqrt.f32 %v4287_v51  ;;  %v4272_v35 = vmul.f32 0.0078125, %v4246_v26  ;;  %v4335_v5 = vmul.f32 %v14360_v28, %v4315_v19 }
 0xcf8   : > { %v11416_v52 = vpop.eup %11415 }
 0xcf9   : > { %v4316_v41 = vmul.f32 %v11416_v52, %v14219_v37  ;;  %v4288_v8 = vadd.f32 1e-05, %v4272_v35  ;;  %v14368_v7 = vadd.f32 %v14364_v48, %v4335_v5 }
 0xcfa   : > { %v4248_v29 = vpop.xlane.xlu0 %4247 }
 0xcfb   : > { %v4336_v34 = vmul.f32 %v14360_v28, %v4316_v41  ;;  %11423 = vrsqrt.f32 %v4288_v8  ;;  %v4273_v58 = vmul.f32 0.0078125, %v4248_v29  ;;  %16801 = vst [vmem:[#allocation26_spill] sm:$0xff] %v14368_v7 }
 0xcfc   : > { %v11418_v56 = vpop.eup %11417 }
 0xcfd   : > { %v4289_v38 = vadd.f32 1e-05, %v4273_v58  ;;  %v14371_v43 = vadd.f32 %v14364_v48, %v4336_v34  ;;  %v4317_v40 = vmul.f32 %v11418_v56, %v14224_v61 }
 0xcfe   : > { %v4250_v14 = vpop.xlane.xlu1 %4249 }
 0xcff   : > { %16802 = vst [vmem:[#allocation31_spill] sm:$0xff] %v14371_v43  ;;  %11425 = vrsqrt.f32 %v4289_v38  ;;  %v4274_v37 = vmul.f32 0.0078125, %v4250_v14  ;;  %v4371_v20 = vpack.c.bf16 %v14371_v43, %v14368_v7  ;;  %v4337_v24 = vmul.f32 %v14360_v28, %v4317_v40 }
 0xd00   : > { %v11420_v12 = vpop.eup %11419 }
 0xd01   : > { %v4290_v15 = vadd.f32 1e-05, %v4274_v37  ;;  %4591 = vmatmul.mubr.bf16.vlgmr.msra.gmra.mxu0 %v4371_v20  ;;  %10314 = vmatprep.mubr.bf16.mxu1 %v4371_v20  ;;  %v4318_v27 = vmul.f32 %v11420_v12, %v14229_v3  ;;  %v14381_v44 = vadd.f32 %v14364_v48, %v4337_v24 }
 0xd02   : > { %4600 = vmatprep.mubr.bf16.mxu0 %v16798_v4 }
 0xd03   : > { %11427 = vrsqrt.f32 %v4290_v15  ;;  %v4338_v47 = vmul.f32 %v14360_v28, %v4318_v27  ;;  %16803 = vst [vmem:[#allocation30_spill] sm:$0xff] %v14381_v44 }
 0xd04   : > { %v11422_v61 = vpop.eup %11421 }
 0xd05   : > { %v14384_v32 = vadd.f32 %v14364_v48, %v4338_v47  ;;  %v4319_v50 = vmul.f32 %v11422_v61, %v14237_v11 }
 0xd07   : > { %16804 = vst [vmem:[#allocation24_spill] sm:$0xff] %v14384_v32  ;;  %v4372_v54 = vpack.c.bf16 %v14384_v32, %v14381_v44  ;;  %v4339_v18 = vmul.f32 %v14360_v28, %v4319_v50 }
 0xd08   : > { %v11424_v3 = vpop.eup %11423 }
 0xd09   : > { %4601 = vmatmul.mubr.bf16.gmra.mxu0 %v4372_v54  ;;  %10315 = vmatmul.mubr.bf16.vlgmr.msra.gmra.mxu1 %v4372_v54  ;;  %v4320_v57 = vmul.f32 %v11424_v3, %v14251_v42  ;;  %v14394_v31 = vadd.f32 %v14364_v48, %v4339_v18 }
 0xd0a   : > { %4610 = vmatprep.mubr.bf16.mxu0 %v16798_v4 }
 0xd0b   : > { %v4340_v63 = vmul.f32 %v14360_v28, %v4320_v57  ;;  %16805 = vst [vmem:[#allocation47_spill] sm:$0xff] %v14394_v31 }
 0xd0c   : > { %v11426_v10 = vpop.eup %11425 }
 0xd0d   : > { %v14397_v11 = vadd.f32 %v14364_v48, %v4340_v63  ;;  %v4321_v53 = vmul.f32 %v11426_v10, %v14265_v59 }
 0xd0f   : > { %16806 = vst [vmem:[#allocation23_spill] sm:$0xff] %v14397_v11  ;;  %v4373_v9 = vpack.c.bf16 %v14397_v11, %v14394_v31  ;;  %v4341_v25 = vmul.f32 %v14360_v28, %v4321_v53 }
 0xd10   : > { %v11428_v2 = vpop.eup %11427 }
 0xd11   : > { %4611 = vmatmul.mubr.bf16.gmra.mxu0 %v4373_v9  ;;  %10318 = vmatprep.mubr.bf16.mxu1 %v4373_v9  ;;  %v4322_v42 = vmul.f32 %v11428_v2, %v14279_v23  ;;  %v14407_v35 = vadd.f32 %v14364_v48, %v4341_v25 }
 0xd12   : > { %4620 = vmatprep.mubr.bf16.mxu0 %v16798_v4 }
 0xd13   : > { %v4342_v19 = vmul.f32 %v14360_v28, %v4322_v42  ;;  %16807 = vst [vmem:[#allocation49_spill] sm:$0xff] %v14407_v35 }
 0xd14   : > { %v4252_v51 = vpop.xlane.xlu0 %4251 }
 0xd15   : > { %v4275_v26 = vmul.f32 0.0078125, %v4252_v51  ;;  %v14410_v59 = vadd.f32 %v14364_v48, %v4342_v19 }
 0xd17   : > { %16808 = vst [vmem:[#allocation28_spill] sm:$0xff] %v14410_v59  ;;  %v4291_v52 = vadd.f32 1e-05, %v4275_v26  ;;  %v4374_v5 = vpack.c.bf16 %v14410_v59, %v14407_v35 }
 0xd18   : > { %v4254_v41 = vpop.xlane.xlu1 %4253 }
 0xd19   : > { %11429 = vrsqrt.f32 %v4291_v52  ;;  %v4276_v23 = vmul.f32 0.0078125, %v4254_v41  ;;  %4621 = vmatmul.mubr.bf16.gmra.mxu0 %v4374_v5  ;;  %10319 = vmatmul.mubr.bf16.gmra.mxu1 %v4374_v5 }
 0xd1a   : > { %4630 = vmatprep.mubr.bf16.mxu0 %v16798_v4 }
 0xd1b   : > { %v4292_v8 = vadd.f32 1e-05, %v4276_v23 }
 0xd1c   : > { %v4256_v29 = vpop.xlane.xlu0 %4255 }
 0xd1d   : > { %11431 = vrsqrt.f32 %v4292_v8  ;;  %v4277_v34 = vmul.f32 0.0078125, %v4256_v29 }
 0xd1f   : > { %v4293_v58 = vadd.f32 1e-05, %v4277_v34 }
 0xd20   : > { %v4258_v56 = vpop.xlane.xlu1 %4257 }
 0xd21   : > { %11433 = vrsqrt.f32 %v4293_v58  ;;  %v4278_v38 = vmul.f32 0.0078125, %v4258_v56 }
 0xd23   : > { %v4294_v40 = vadd.f32 1e-05, %v4278_v38 }
 0xd25   : > { %11435 = vrsqrt.f32 %v4294_v40 }
 0xd26   : > { %v11430_v14 = vpop.eup %11429 }
 0xd27   : > { %v4323_v37 = vmul.f32 %v11430_v14, %v14320_v39 }
 0xd29   : > { %v4343_v15 = vmul.f32 %v14360_v28, %v4323_v37 }
 0xd2a   : > { %v11432_v20 = vpop.eup %11431 }
 0xd2b   : > { %v4324_v12 = vmul.f32 %v11432_v20, %v14325_v46  ;;  %v14420_v61 = vadd.f32 %v14364_v48, %v4343_v15 }
 0xd2d   : > { %v4344_v27 = vmul.f32 %v14360_v28, %v4324_v12  ;;  %16809 = vst [vmem:[#allocation25_spill] sm:$0xff] %v14420_v61 }
 0xd2e   : > { %v11434_v24 = vpop.eup %11433 }
 0xd2f   : > { %v4260_v47 = vpop.xlane.xlu0 %4259  ;;  %v14423_v50 = vadd.f32 %v14364_v48, %v4344_v27  ;;  %v4325_v54 = vmul.f32 %v11434_v24, %v14330_v22  ;;  %v14466_v24 = vld [vmem:[#allocation10 + $0x1] ss:$2 sm:$0x7] }
 0xd30   : > { %v4279_v3 = vmul.f32 0.0078125, %v4260_v47  ;;  %v14470_v47 = vrot.slane %v14466_v24, %v16800_v36 }
 0xd31   : > { %16810 = vst [vmem:[#allocation48_spill] sm:$0xff] %v14423_v50  ;;  %v4375_v39 = vpack.c.bf16 %v14423_v50, %v14420_v61  ;;  %v4345_v10 = vmul.f32 %v14360_v28, %v4325_v54  ;;  %v16822_v50 = vld [vmem:[#allocation19_spill] sm:$0xff] }
 0xd32   : > { %v11436_v57 = vpop.eup %11435  ;;  %v4295_v46 = vadd.f32 1e-05, %v4279_v3 }
 0xd33   : > { %v4262_v18 = vpop.xlane.xlu1 %4261  ;;  %4631 = vmatmul.mubr.bf16.gmra.mxu0 %v4375_v39  ;;  %10322 = vmatprep.mubr.bf16.mxu1 %v4375_v39  ;;  %v4326_v63 = vmul.f32 %v11436_v57, %v14335_v60  ;;  %v14433_v42 = vadd.f32 %v14364_v48, %v4345_v10 }
 0xd34   : > { %11437 = vrsqrt.f32 %v4295_v46  ;;  %v4280_v53 = vmul.f32 0.0078125, %v4262_v18  ;;  %4640 = vmatprep.mubr.bf16.mxu0 %v16798_v4 }
 0xd35   : > { %v4346_v9 = vmul.f32 %v14360_v28, %v4326_v63  ;;  %16811 = vst [vmem:[#allocation29_spill] sm:$0xff] %v14433_v42 }
 0xd36   : > { %v4296_v22 = vadd.f32 1e-05, %v4280_v53 }
 0xd37   : > { %v4264_v2 = vpop.xlane.xlu0 %4263  ;;  %v14436_v25 = vadd.f32 %v14364_v48, %v4346_v9 }
 0xd38   : > { %11439 = vrsqrt.f32 %v4296_v22  ;;  %v4281_v19 = vmul.f32 0.0078125, %v4264_v2 }
 0xd39   : > { %16812 = vst [vmem:[#allocation27_spill] sm:$0xff] %v14436_v25  ;;  %v4376_v60 = vpack.c.bf16 %v14436_v25, %v14433_v42  ;;  %v16823_v42 = vsub.s32 2, %v16822_v50 }
 0xd3a   : > { %v4297_v51 = vadd.f32 1e-05, %v4281_v19 }
 0xd3b   : > { %v4266_v26 = vpop.xlane.xlu1 %4265  ;;  %4641 = vmatmul.mubr.bf16.gmra.mxu0 %v4376_v60  ;;  %10323 = vmatmul.mubr.bf16.gmra.mxu1 %v4376_v60  ;;  %v14565_v61 = vrot.slane %v14466_v24, %v16823_v42 }
 0xd3c   : > { %11441 = vrsqrt.f32 %v4297_v51  ;;  %v4282_v52 = vmul.f32 0.0078125, %v4266_v26  ;;  %4650 = vmatprep.mubr.bf16.mxu0 %v16798_v4  ;;  %v14492_v51 = vrot.slane %v14466_v24, %v16799_v1 }
 0xd3e   : > { %v4298_v5 = vadd.f32 1e-05, %v4282_v52 }
 0xd40   : > { %11443 = vrsqrt.f32 %v4298_v5 }
 0xd41   : > { %v11438_v41 = vpop.eup %11437 }
 0xd42   : > { %v4327_v23 = vmul.f32 %v11438_v41, %v14340_v55 }
 0xd44   : > { %v4347_v34 = vmul.f32 %v14360_v28, %v4327_v23 }
 0xd45   : > { %v11440_v8 = vpop.eup %11439 }
 0xd46   : > { %v4328_v29 = vmul.f32 %v11440_v8, %v14345_v21  ;;  %v14446_v38 = vadd.f32 %v14364_v48, %v4347_v34 }
 0xd48   : > { %v4348_v58 = vmul.f32 %v14360_v28, %v4328_v29  ;;  %16813 = vst [vmem:[#allocation22_spill] sm:$0xff] %v14446_v38 }
 0xd49   : > { %v11442_v56 = vpop.eup %11441 }
 0xd4a   : > { %v14449_v40 = vadd.f32 %v14364_v48, %v4348_v58  ;;  %v4329_v14 = vmul.f32 %v11442_v56, %v14350_v13 }
 0xd4c   : > { %16814 = vst [vmem:[#allocation32_spill] sm:$0xff] %v14449_v40  ;;  %v4377_v37 = vpack.c.bf16 %v14449_v40, %v14446_v38  ;;  %v4349_v20 = vmul.f32 %v14360_v28, %v4329_v14 }
 0xd4d   : > { %v11444_v55 = vpop.eup %11443 }
 0xd4e   : > { %4651 = vmatmul.mubr.bf16.gmra.mxu0 %v4377_v37  ;;  %10326 = vmatprep.mubr.bf16.mxu1 %v4377_v37  ;;  %v4330_v21 = vmul.f32 %v11444_v55, %v14355_v33  ;;  %v14459_v15 = vadd.f32 %v14364_v48, %v4349_v20 }
 0xd4f   : > { %4660 = vmatprep.mubr.bf16.mxu0 %v16798_v4 }
 0xd50   : > { %v4350_v12 = vmul.f32 %v14360_v28, %v4330_v21  ;;  %16815 = vst [vmem:[#allocation50_spill] sm:$0xff] %v14459_v15 }
 0xd52   : > { %v14462_v27 = vadd.f32 %v14364_v48, %v4350_v12 }
 0xd54   : > { %16816 = vst [vmem:[#allocation51_spill] sm:$0xff] %v14462_v27  ;;  %v4378_v13 = vpack.c.bf16 %v14462_v27, %v14459_v15 }
 0xd56   : > { %4661 = vmatmul.mubr.bf16.gmra.mxu0 %v4378_v13  ;;  %10327 = vmatmul.mubr.bf16.gmra.mxu1 %v4378_v13 }
 0xdc1   : > { %v4592_v33 = vpop.f32.mrf.mxu0 }
 0xdc2   : > { %v4593_v3 = vadd.f32 %v4592_v33, %v14470_v47 }
 0xdc3   : > { %v14472_v54 = vpop.f32.mrf.mxu0 }
 0xdc4   : > { %v4595_v25 = vadd.f32 %v14472_v54, %v14492_v51 }
 0xdc5   : > { %v4596_v28 = vpop.f32.mrf.mxu0 }
 0xdc6   : > { %v4597_v48 = vadd.f32 %v4596_v28, %v14470_v47 }
 0xdc7   : > { %v14476_v39 = vpop.f32.mrf.mxu0 }
 0xdc8   : > { %v14478_v57 = vpack.c.bf16 %v4597_v48, %v4593_v3  ;;  %v4599_v27 = vadd.f32 %v14476_v39, %v14492_v51 }
 0xdc9   : > { %v4602_v46 = vpop.f32.mrf.mxu0  ;;  %v14514_v33 = vpop.f32.mrf.mxu1 }
 0xdca   : > { %16817 = vst [vmem:[#allocation52_spill] sm:$0xff] %v14478_v57  ;;  %10346 = vmatprep.mubr.msk.bf16.mxu0 %vm16818_vm13, %v14478_v57  ;;  %v4603_v10 = vadd.f32 %v4602_v46, %v14470_v47  ;;  %v14571_v59 = vpack.c.bf16 %v4599_v27, %v4595_v25  ;;  %vm16829_vm13 = vmmov %vm16773_vm3 }
 0xdcb   : > { %v14482_v18 = vpop.f32.mrf.mxu0  ;;  %v14516_v28 = vpop.f32.mrf.mxu1 }
 0xdcc   : > { %16824 = vst [vmem:[#allocation19_spill] sm:$0xff] %v14571_v59 }
 0xdcd   : > { %v4606_v63 = vpop.f32.mrf.mxu0  ;;  %v14520_v48 = vpop.f32.mrf.mxu1 }
 0xdce   : > { %v4607_v53 = vadd.f32 %v4606_v63, %v14470_v47 }
 0xdcf   : > { %v14486_v9 = vpop.f32.mrf.mxu0 }
 0xdd0   : > { %v14488_v22 = vpack.c.bf16 %v4607_v53, %v4603_v10  ;;  %v14524_v10 = vpop.f32.mrf.mxu1 }
 0xdd1   : > { %v4612_v2 = vpop.f32.mrf.mxu0 }
 0xdd2   : > { %16819 = vst [vmem:[#allocation53_spill] sm:$0xff] %v14488_v22  ;;  %v4613_v26 = vadd.f32 %v4612_v2, %v14470_v47 }
 0xdd3   : > { %v4614_v19 = vpop.f32.mrf.mxu0 }
 0xdd4   : > { %v4615_v41 = vadd.f32 %v4614_v19, %v14492_v51 }
 0xdd5   : > { %v4616_v60 = vpop.f32.mrf.mxu0 }
 0xdd6   : > { %v4617_v52 = vadd.f32 %v4616_v60, %v14470_v47 }
 0xdd7   : > { %v4618_v5 = vpop.f32.mrf.mxu0 }
 0xdd8   : > { %v14497_v23 = vpack.c.bf16 %v4617_v52, %v4613_v26  ;;  %v4619_v8 = vadd.f32 %v4618_v5, %v14492_v51 }
 0xdd9   : > { %v4622_v29 = vpop.f32.mrf.mxu0  ;;  %v14526_v2 = vpop.f32.mrf.mxu1 }
 0xdda   : > { %16820 = vst [vmem:[#allocation54_spill] sm:$0xff] %v14497_v23  ;;  %v14500_v34 = vpack.c.bf16 %v4619_v8, %v4615_v41  ;;  %v4623_v14 = vadd.f32 %v4622_v29, %v14470_v47 }
 0xddb   : > { %v4624_v58 = vpop.f32.mrf.mxu0  ;;  %v14534_v41 = vpop.f32.mrf.mxu1 }
 0xddc   : > { %5405 = vrot.lane.b32.xlu1 %v14500_v34, %s12029_s28  ;;  %v4625_v21 = vadd.f32 %v4624_v58, %v14492_v51 }
 0xddd   : > { %v4626_v56 = vpop.f32.mrf.mxu0  ;;  %v14538_v58 = vpop.f32.mrf.mxu1 }
 0xdde   : > { %v4627_v37 = vadd.f32 %v4626_v56, %v14470_v47 }
 0xddf   : > { %v4628_v55 = vpop.f32.mrf.mxu0 }
 0xde0   : > { %v14507_v20 = vpack.c.bf16 %v4627_v37, %v4623_v14  ;;  %v4629_v12 = vadd.f32 %v4628_v55, %v14492_v51  ;;  %v14544_v55 = vpop.f32.mrf.mxu1 }
 0xde2   : > { %16821 = vst [vmem:[#allocation55_spill] sm:$0xff] %v14507_v20  ;;  %v14510_v13 = vpack.c.bf16 %v4629_v12, %v4625_v21 }
 0xde4   : > { %5407 = vrot.lane.b32.xlu0 %v14510_v13, %s12029_s28 }
 0xdf3   : > { %v14518_v3 = vpop.f32.mrf.mxu0 }
 0xdf5   : > { %v4634_v46 = vpop.f32.mrf.mxu0 }
 0xdf6   : > { %v4635_v19 = vadd.f32 %v4634_v46, %v14492_v51 }
 0xdf7   : > { %v14522_v63 = vpop.f32.mrf.mxu0 }
 0xdf9   : > { %v4638_v53 = vpop.f32.mrf.mxu0 }
 0xdfa   : > { %v4639_v60 = vadd.f32 %v4638_v53, %v14492_v51 }
 0xdfb   : > { %v14530_v26 = vpop.f32.mrf.mxu0  ;;  %v10324_v21 = vpop.f32.mrf.mxu1 }
 0xdfc   : > { %v14532_v52 = vpack.c.bf16 %v4639_v60, %v4635_v19 }
 0xdfd   : > { %v4644_v5 = vpop.f32.mrf.mxu0  ;;  %v4737_v12 = vpop.f32.mrf.mxu1 }
 0xdfe   : > { %5409 = vrot.lane.b32.xlu1 %v14532_v52, %s12029_s28  ;;  %v4645_v56 = vadd.f32 %v4644_v5, %v14492_v51 }
 0xdff   : > { %v4646_v8 = vpop.f32.mrf.mxu0  ;;  %v10325_v53 = vpop.f32.mrf.mxu1 }
 0xe00   : > { %v4749_v25 = vadd.f32 %v10325_v53, %v14565_v61 }
 0xe01   : > { %v4648_v29 = vpop.f32.mrf.mxu0  ;;  %v4740_v36 = vpop.f32.mrf.mxu1 }
 0xe02   : > { %v4649_v14 = vadd.f32 %v4648_v29, %v14492_v51  ;;  %v4741_v53 = vadd.f32 %v4740_v36, %v14565_v61  ;;  %v4733_v36 = vadd.f32 %v14538_v58, %v14565_v61 }
 0xe04   : > { %v14542_v37 = vpack.c.bf16 %v4649_v14, %v4645_v56 }
 0xe06   : > { %5411 = vrot.lane.b32.xlu1 %v14542_v37, %s12029_s28 }
 0xe0e   : > { %v14548_v46 = vpop.f32.mrf.mxu0 }
 0xe10   : > { %v4654_v19 = vpop.f32.mrf.mxu0 }
 0xe11   : > { %v4655_v5 = vadd.f32 %v4654_v19, %v14492_v51 }
 0xe12   : > { %v14550_v60 = vpop.f32.mrf.mxu0 }
 0xe14   : > { %v4658_v1 = vpop.f32.mrf.mxu0 }
 0xe15   : > { %v4659_v29 = vadd.f32 %v4658_v1, %v14492_v51 }
 0xe16   : > { %v14554_v56 = vpop.f32.mrf.mxu0  ;;  %v10328_v14 = vpop.f32.mrf.mxu1 }
 0xe17   : > { %v14558_v40 = vpack.c.bf16 %v4659_v29, %v4655_v5  ;;  %v4762_v39 = vadd.f32 %v10328_v14, %v14565_v61 }
 0xe18   : > { %v4664_v15 = vpop.f32.mrf.mxu0  ;;  %v4753_v38 = vpop.f32.mrf.mxu1 }
 0xe19   : > { %5413 = vrot.lane.b32.xlu1 %v14558_v40, %s12029_s28  ;;  %v4665_v29 = vadd.f32 %v4664_v15, %v14492_v51  ;;  %v4754_v50 = vadd.f32 %v4753_v38, %v14565_v61  ;;  %v4609_v38 = vadd.f32 %v14486_v9, %v14492_v51  ;;  %v4746_v15 = vadd.f32 %v10324_v21, %v14565_v61 }
 0xe1a   : > { %v14569_v1 = vpop.f32.mrf.mxu0  ;;  %v10329_v19 = vpop.f32.mrf.mxu1  ;;  %v4647_v9 = vadd.f32 %v4646_v8, %v14470_v47  ;;  %v4836_v58 = vsel %vm16828_vm15, %v14558_v40, 0  ;;  %vm16835_vm15 = vmmov %vm16773_vm3 }
 0xe1b   : > { %v4765_v5 = vadd.f32 %v10329_v19, %v14565_v61  ;;  %v14605_v21 = vpack.c.bf16 %v4749_v25, %v4746_v15  ;;  %v4663_v15 = vadd.f32 %v14554_v56, %v14470_v47 }
 0xe1c   : > { %v4668_v54 = vpop.f32.mrf.mxu0  ;;  %v4756_v11 = vpop.f32.mrf.mxu1 }
 0xe1d   : > { %v14577_v42 = vpack.c.bf16 %v4765_v5, %v4762_v39  ;;  %v4669_v24 = vadd.f32 %v4668_v54, %v14492_v51  ;;  %v4757_v35 = vadd.f32 %v4756_v11, %v14565_v61  ;;  %5401 = vrot.lane.b32.xlu1 %v14571_v59, %s12029_s28  ;;  %v4725_v5 = vadd.f32 %v14544_v55, %v14565_v61 }
 0xe1e   : > { %v4633_v54 = vadd.f32 %v14518_v3, %v14470_v47  ;;  %v4717_v55 = vadd.f32 %v14520_v48, %v14565_v61  ;;  %v4653_v3 = vadd.f32 %v14548_v46, %v14470_v47  ;;  %v4706_v46 = vadd.f32 %v14516_v28, %v14565_v61 }
 0xe1f   : > { %v14584_v27 = vpack.c.bf16 %v4669_v24, %v4665_v29  ;;  %v14586_v14 = vpack.c.bf16 %v4757_v35, %v4754_v50  ;;  %10362 = vmatprep.subr.bf16.mxu1 %v14577_v42  ;;  %v4605_v35 = vadd.f32 %v14482_v18, %v14492_v51  ;;  %v4643_v18 = vadd.f32 %v14530_v26, %v14470_v47 }
 0xe20   : > { %10363 = vmatpush3.bf16.msra.mxu1 %v14577_v42  ;;  %v4738_v51 = vadd.f32 %v4737_v12, %v14565_v61  ;;  %v4730_v26 = vadd.f32 %v14526_v2, %v14565_v61  ;;  %v4637_v2 = vadd.f32 %v14522_v63, %v14470_v47  ;;  %v4722_v29 = vadd.f32 %v14534_v41, %v14565_v61 }
 0xe21   : > { %5379 = vrot.lane.b32.xlu1 %v14488_v22, %s12029_s28  ;;  %10364 = vmatprep.subr.bf16.mxu1 %v14586_v14  ;;  %v4839_v11 = vsel %vm16825_vm14, %v14584_v27, 0  ;;  %v14608_v19 = vpack.c.bf16 %v4609_v38, %v4605_v35  ;;  %v14623_v8 = vpack.c.bf16 %v4647_v9, %v4643_v18  ;;  %v4657_v24 = vadd.f32 %v14550_v60, %v14470_v47  ;;  %vm16831_vm14 = vmmov %vm16773_vm3 }
 0xe22   : > { %5415 = vrot.lane.b32.xlu0 %v14584_v27, %s12029_s28  ;;  %10790 = vmatprep.subr.msk.bf16.mxu0 %vm16773_vm3, %v14584_v27  ;;  %v14625_v39 = vpack.c.bf16 %v4741_v53, %v4738_v51  ;;  %v14637_v12 = vpack.c.bf16 %v4733_v36, %v4730_v26  ;;  %v14655_v63 = vpack.c.bf16 %v4725_v5, %v4722_v29  ;;  %v4833_v48 = vsel %vm16831_vm14, %v14542_v37, 0  ;;  %vm16837_vm14 = vmmov %vm16773_vm3 }
 0xe23   : > { %10331 = vmatpush3.bf16.xpose.msra.mxu0 %v4839_v11  ;;  %16827 = vst [vmem:[#allocation56_spill] sm:$0xff] %v14623_v8  ;;  %v14657_v50 = vpack.c.bf16 %v4637_v2, %v4633_v54  ;;  %v4714_v41 = vadd.f32 %v14514_v33, %v14565_v61  ;;  %v4709_v60 = vadd.f32 %v14524_v10, %v14565_v61  ;;  %v4824_v28 = vsel %vm16773_vm3, %v14500_v34, 0 }
 0xe24   : > { %10791 = vmatprep.subr.msk.bf16.mxu0 %vm16826_vm12, %v14558_v40  ;;  %10365 = vmatpush3.bf16.msra.mxu1 %v14586_v14  ;;  %v14675_v38 = vpack.c.bf16 %v4657_v24, %v4653_v3  ;;  %v4667_v33 = vadd.f32 %v14569_v1, %v14470_v47  ;;  %vm16834_vm12 = vmmov %vm16773_vm3 }
 0xe25   : > { %5383 = vrot.lane.b32.xlu1 %v14507_v20, %s12029_s28  ;;  %10366 = vmatprep.subr.bf16.mxu1 %v14605_v21  ;;  %16830 = vst [vmem:[#allocation57_spill] sm:$0xff] %v14657_v50  ;;  %v14671_v25 = vpack.c.bf16 %v4717_v55, %v4714_v41  ;;  %v14689_v10 = vpack.c.bf16 %v4709_v60, %v4706_v46  ;;  %v4830_v61 = vsel %vm16834_vm12, %v14532_v52, 0  ;;  %vm16839_vm12 = vmmov %vm16773_vm3 }
 0xe26   : > { %5403 = vrot.lane.b32.xlu0 %v14608_v19, %s12029_s28  ;;  %16832 = vst [vmem:[#allocation58_spill] sm:$0xff] %v14675_v38  ;;  %v14691_v11 = vpack.c.bf16 %v4667_v33, %v4663_v15  ;;  %v4821_v56 = vsel %vm16839_vm12, %v14608_v19, 0  ;;  %vm16845_vm12 = vmmov %vm16773_vm3 }
 0xe28   : > { %10367 = vmatpush3.bf16.msra.mxu1 %v14605_v21  ;;  %16833 = vst [vmem:[#allocation59_spill] sm:$0xff] %v14691_v11 }
 0xe29   : > { %5387 = vrot.lane.b32.xlu1 %v14623_v8, %s12029_s28  ;;  %10368 = vmatprep.subr.bf16.mxu1 %v14625_v39 }
 0xe2a   : > { %5377 = vrot.lane.b32.xlu0 %v14478_v57, %s12029_s28 }
 0xe2b   : > { %10333 = vmatpush3.bf16.xpose.msra.mxu0 %v4836_v58 }
 0xe2c   : > { %10792 = vmatprep.subr.msk.bf16.mxu0 %vm16829_vm13, %v14542_v37  ;;  %10369 = vmatpush3.bf16.msra.mxu1 %v14625_v39  ;;  %vm16836_vm13 = vmmov %vm16773_vm3 }
 0xe2d   : > { %10370 = vmatprep.subr.bf16.mxu1 %v14637_v12  ;;  %v4827_v47 = vsel %vm16836_vm13, %v14510_v13, 0  ;;  %vm16841_vm13 = vmmov %vm16773_vm3 }
 0xe2e   : > { %5381 = vrot.lane.b32.xlu0 %v14497_v23, %s12029_s28  ;;  %v4818_v1 = vsel %vm16841_vm13, %v14571_v59, 0  ;;  %vm16847_vm13 = vmmov %vm16773_vm3 }
 0xe30   : > { %10371 = vmatpush3.bf16.msra.mxu1 %v14637_v12 }
 0xe31   : > { %10372 = vmatprep.subr.bf16.mxu1 %v14655_v63 }
 0xe32   : > { %5385 = vrot.lane.b32.xlu0 %v14657_v50, %s12029_s28 }
 0xe33   : > { %10335 = vmatpush3.bf16.xpose.msra.mxu0 %v4833_v48 }
 0xe34   : > { %10793 = vmatprep.subr.msk.bf16.mxu0 %vm16773_vm3, %v14532_v52  ;;  %10373 = vmatpush3.bf16.msra.mxu1 %v14655_v63 }
 0xe35   : > { %10374 = vmatprep.subr.bf16.mxu1 %v14671_v25 }
 0xe36   : > { %5389 = vrot.lane.b32.xlu0 %v14675_v38, %s12029_s28 }
 0xe38   : > { %10375 = vmatpush3.bf16.msra.mxu1 %v14671_v25 }
 0xe39   : > { %10376 = vmatprep.subr.bf16.mxu1 %v14689_v10 }
 0xe3a   : > { %5391 = vrot.lane.b32.xlu0 %v14691_v11, %s12029_s28 }
 0xe3b   : > { %10337 = vmatpush3.bf16.xpose.msra.mxu0 %v4830_v61 }
 0xe3c   : > { %10794 = vmatprep.subr.msk.bf16.mxu0 %vm16835_vm15, %v14510_v13  ;;  %10377 = vmatpush3.bf16.msra.mxu1 %v14689_v10  ;;  %vm16840_vm15 = vmmov %vm16773_vm3 }
 0xe43   : > { %10339 = vmatpush3.bf16.xpose.msra.mxu0 %v4827_v47 }
 0xe44   : > { %10795 = vmatprep.subr.msk.bf16.mxu0 %vm16837_vm14, %v14500_v34  ;;  %vm16842_vm14 = vmmov %vm16773_vm3 }
 0xe4b   : > { %10341 = vmatpush3.bf16.xpose.msra.mxu0 %v4824_v28 }
 0xe4c   : > { %10796 = vmatprep.subr.msk.bf16.mxu0 %vm16838_vm4, %v14608_v19  ;;  %vm16844_vm4 = vmmov %vm16773_vm3 }
 0xe4e   : > { %v5406_v35 = vpop.permute.xlu1 %5405 }
 0xe53   : > { %10343 = vmatpush3.bf16.xpose.msra.mxu0 %v4821_v56 }
 0xe54   : > { %10797 = vmatprep.subr.msk.bf16.mxu0 %vm16840_vm15, %v14571_v59  ;;  %vm16846_vm15 = vmmov %vm16773_vm3 }
 0xe56   : > { %v5408_v53 = vpop.permute.xlu0 %5407 }
 0xe57   : > { %v5451_v55 = vsel %vm16773_vm3, %v5408_v53, 0 }
 0xe5b   : > { %10345 = vmatpush3.bf16.xpose.msra.mxu0 %v4818_v1 }
 0xe62   : > { %10347 = vmatmul.mubr.msk.bf16.vlgmr.msra.gmra.mxu0 %vm16842_vm14, %v14488_v22  ;;  %vm16848_vm14 = vmmov %vm16773_vm3 }
 0xe63   : > { %10350 = vmatprep.mubr.msk.bf16.mxu0 %vm16773_vm3, %v14497_v23 }
 0xe6a   : > { %10351 = vmatmul.mubr.msk.bf16.gmra.mxu0 %vm16843_vm11, %v14507_v20  ;;  %vm16849_vm11 = vmmov %vm16773_vm3 }
 0xe6b   : > { %10354 = vmatprep.mubr.msk.bf16.mxu0 %vm16844_vm4, %v14657_v50  ;;  %vm16850_vm4 = vmmov %vm16773_vm3 }
 0xe70   : > { %v5410_v9 = vpop.permute.xlu1 %5409 }
 0xe72   : > { %10355 = vmatmul.mubr.msk.bf16.gmra.mxu0 %vm16845_vm12, %v14623_v8  ;;  %vm16851_vm12 = vmmov %vm16773_vm3 }
 0xe73   : > { %10358 = vmatprep.mubr.msk.bf16.mxu0 %vm16846_vm15, %v14675_v38  ;;  %vm16852_vm15 = vmmov %vm16773_vm3 }
 0xe78   : > { %v5412_v18 = vpop.permute.xlu1 %5411 }
 0xe7a   : > { %10359 = vmatmul.mubr.msk.bf16.gmra.mxu0 %vm16847_vm13, %v14691_v11  ;;  %vm16853_vm13 = vmmov %vm16773_vm3 }
 0xe7b   : > { %v5457_v29 = vsel %vm16853_vm13, %v5412_v18, 0  ;;  %vm16862_vm13 = vmmov %vm16857_vm0 }
 0xe8b   : > { %v5414_v26 = vpop.permute.xlu1 %5413 }
 0xe8c   : > { %v5460_v2 = vsel %vm16851_vm12, %v5414_v26, 0  ;;  %vm16859_vm12 = vmmov %vm16857_vm0 }
 0xe8f   : > { %v5402_v3 = vpop.permute.xlu1 %5401 }
 0xe90   : > { %v5442_v48 = vsel %vm16862_vm13, %v5402_v3, 0 }
 0xe93   : > { %v5380_v60 = vpop.permute.xlu1 %5379 }
 0xe94   : > { %v5416_v51 = vpop.permute.xlu0 %5415 }
 0xe95   : > { %10798 = vmatprep.subr.msk.bf16.mxu0 %vm16848_vm14, %v5416_v51  ;;  %v5463_v36 = vsel %vm16849_vm11, %v5416_v51, 0  ;;  %vm16855_vm14 = vmmov %vm16773_vm3 }
 0xe96   : > { %10415 = vmatpush3.bf16.xpose.msra.mxu0 %v5463_v36  ;;  %v5454_v54 = vsel %vm16855_vm14, %v5410_v9, 0  ;;  %vm16856_vm11 = vmmov %vm16773_vm3 }
 0xe97   : > { %10799 = vmatprep.subr.msk.bf16.mxu0 %vm16773_vm3, %v5414_v26  ;;  %vm16863_vm14 = vmmov %vm16857_vm0  ;;  %v5384_v46 = vpop.permute.xlu1 %5383 }
 0xe98   : > { %v5404_v58 = vpop.permute.xlu0 %5403  ;;  %vm16865_vm3 = vmmov %vm16857_vm0 }
 0xe9b   : > { %v5388_v61 = vpop.permute.xlu1 %5387 }
 0xe9c   : > { %v5378_v5 = vpop.permute.xlu0 %5377 }
 0xe9d   : > { %10430 = vmatprep.mubr.msk.bf16.mxu0 %vm16850_vm4, %v5378_v5  ;;  %vm16858_vm4 = vmmov %vm16857_vm0 }
 0xe9e   : > { %10417 = vmatpush3.bf16.xpose.msra.mxu0 %v5460_v2  ;;  %v5448_v24 = vsel %vm16858_vm4, %v5406_v35, 0  ;;  %vm16866_vm4 = vmmov %vm16857_vm0 }
 0xe9f   : > { %10800 = vmatprep.subr.msk.bf16.mxu0 %vm16852_vm15, %v5412_v18  ;;  %vm16860_vm15 = vmmov %vm16857_vm0 }
 0xea0   : > { %v5445_v41 = vsel %vm16860_vm15, %v5404_v58, 0  ;;  %v5382_v33 = vpop.permute.xlu0 %5381  ;;  %vm16868_vm15 = vmmov %vm16857_vm0 }
 0xea4   : > { %v5386_v15 = vpop.permute.xlu0 %5385 }
 0xea6   : > { %10419 = vmatpush3.bf16.xpose.msra.mxu0 %v5457_v29 }
 0xea7   : > { %10801 = vmatprep.subr.msk.bf16.mxu0 %vm16854_vm10, %v5410_v9  ;;  %vm16861_vm10 = vmmov %vm16857_vm0 }
 0xea8   : > { %v5390_v47 = vpop.permute.xlu0 %5389 }
 0xeac   : > { %v5392_v28 = vpop.permute.xlu0 %5391 }
 0xeae   : > { %10421 = vmatpush3.bf16.xpose.msra.mxu0 %v5454_v54  ;;  %v16871_v54 = vld [vmem:[#allocation35_spill] sm:$0xff] }
 0xeaf   : > { %10802 = vmatprep.subr.msk.bf16.mxu0 %vm16856_vm11, %v5408_v53  ;;  %vm16864_vm11 = vmmov %vm16857_vm0 }
 0xeb6   : > { %10423 = vmatpush3.bf16.xpose.msra.mxu0 %v5451_v55 }
 0xeb7   : > { %10803 = vmatprep.subr.msk.bf16.mxu0 %vm16857_vm0, %v5406_v35 }
 0xebe   : > { %10425 = vmatpush3.bf16.xpose.msra.mxu0 %v5448_v24  ;;  %v16872_v24 = vld [vmem:[#allocation36_spill] sm:$0xff] }
 0xebf   : > { %10804 = vmatprep.subr.msk.bf16.mxu0 %vm16859_vm12, %v5404_v58  ;;  %vm16867_vm12 = vmmov %vm16857_vm0 }
 0xec6   : > { %10427 = vmatpush3.bf16.xpose.msra.mxu0 %v5445_v41 }
 0xec7   : > { %10805 = vmatprep.subr.msk.bf16.mxu0 %vm16861_vm10, %v5402_v3  ;;  %vm16869_vm10 = vnez %v16734_v62 }
 0xece   : > { %10429 = vmatpush3.bf16.xpose.msra.mxu0 %v5442_v48  ;;  %v16873_v48 = vld [vmem:[#allocation38_spill] sm:$0xff] }
 0xecf   : > { %vm16874_vm13 = vnez %v16873_v48 }
 0xed5   : > { %10431 = vmatmul.mubr.msk.bf16.vlgmr.msra.gmra.mxu0 %vm16863_vm14, %v5380_v60 }
 0xed6   : > { %10434 = vmatprep.mubr.msk.bf16.mxu0 %vm16864_vm11, %v5382_v33 }
 0xedd   : > { %10435 = vmatmul.mubr.msk.bf16.gmra.mxu0 %vm16857_vm0, %v5384_v46 }
 0xede   : > { %10438 = vmatprep.mubr.msk.bf16.mxu0 %vm16865_vm3, %v5386_v15  ;;  %vm16880_vm3 = vmmov %vm16857_vm0 }
 0xee5   : > { %10439 = vmatmul.mubr.msk.bf16.gmra.mxu0 %vm16866_vm4, %v5388_v61 }
 0xee6   : > { %10442 = vmatprep.mubr.msk.bf16.mxu0 %vm16867_vm12, %v5390_v47  ;;  %vm16883_vm12 = vmmov %vm16857_vm0 }
 0xeed   : > { %10443 = vmatmul.mubr.msk.bf16.gmra.mxu0 %vm16868_vm15, %v5392_v28  ;;  %vm16884_vm15 = vnez %v16751_v30 }
 0xf22   : > { %v10348_v56 = vpop.f32.mrf.mxu0 }
 0xf23   : > { %v4940_v1 = vsel %vm12636_vm1, %v10348_v56, -1e+30 }
 0xf24   : > { %4958 = vmax.xlane.f32.xlu1 %v4940_v1  ;;  %v4875_v35 = vpop.f32.mrf.mxu0 }
 0xf25   : > { %v4938_v53 = vsel %vm16769_vm6, %v4875_v35, -1e+30  ;;  %v16876_v35 = vld [vmem:[#allocation46_spill] sm:$0xff] }
 0xf26   : > { %v10349_v9 = vpop.f32.mrf.mxu0  ;;  %vm16877_vm14 = vnez %v16876_v35 }
 0xf27   : > { %v14765_v36 = vsel %vm16771_vm2, %v10349_v9, -1e+30 }
 0xf28   : > { %4954 = vmax.xlane.f32.xlu1 %v4938_v53  ;;  %v4878_v18 = vpop.f32.mrf.mxu0 }
 0xf29   : > { %v14760_v51 = vsel %vm16869_vm10, %v4878_v18, -1e+30 }
 0xf2a   : > { %4956 = vmax.xlane.f32.xlu0 %v14760_v51  ;;  %v10352_v26 = vpop.f32.mrf.mxu0 }
 0xf2b   : > { %v14781_v55 = vsel %vm12680_vm5, %v10352_v26, -1e+30  ;;  %vm16888_vm5 = vnez %v16742_v45 }
 0xf2c   : > { %4960 = vmax.xlane.f32.xlu1 %v14765_v36  ;;  %v4891_v58 = vpop.f32.mrf.mxu0 }
 0xf2d   : > { %v14786_v41 = vsel %vm16772_vm8, %v4891_v58, -1e+30 }
 0xf2e   : > { %v10353_v5 = vpop.f32.mrf.mxu0 }
 0xf2f   : > { %v14776_v29 = vsel %vm16704_vm7, %v10353_v5, -1e+30 }
 0xf30   : > { %v4894_v3 = vpop.f32.mrf.mxu0 }
 0xf31   : > { %v14809_v60 = vsel %vm16874_vm13, %v4894_v3, -1e+30 }
 0xf32   : > { %v10356_v33 = vpop.f32.mrf.mxu0 }
 0xf33   : > { %v14814_v15 = vsel %vm12724_vm9, %v10356_v33, -1e+30  ;;  %v16878_v33 = vld [vmem:[#allocation40_spill] sm:$0xff] }
 0xf34   : > { %v4907_v47 = vpop.f32.mrf.mxu0  ;;  %vm16879_vm11 = vnez %v16878_v33 }
 0xf35   : > { %v14819_v9 = vsel %vm16877_vm14, %v4907_v47, -1e+30 }
 0xf36   : > { %v10357_v26 = vpop.f32.mrf.mxu0 }
 0xf37   : > { %v14824_v31 = vsel %vm16879_vm11, %v10357_v26, -1e+30  ;;  %vm16899_vm11 = vmmov %vm16857_vm0 }
 0xf3d   : > { %6048 = vrot.lane.b32.xlu1 %v14558_v40, %s12030_s25 }
 0xf40   : > { %6050 = vrot.lane.b32.xlu0 %v14584_v27, %s12030_s25 }
 0xf41   : > { %6046 = vrot.lane.b32.xlu1 %v14542_v37, %s12030_s25 }
 0xf5f   : > { %4968 = vmax.xlane.f32.xlu0 %v14776_v29 }
 0xf65   : > { %4966 = vmax.xlane.f32.xlu1 %v14781_v55 }
 0xf69   : > { %4962 = vmax.xlane.f32.xlu1 %v14786_v41 }
 0xf75   : > { %6044 = vrot.lane.b32.xlu0 %v14532_v52, %s12030_s25 }
 0xf79   : > { %6040 = vrot.lane.b32.xlu0 %v14500_v34, %s12030_s25 }
 0xf7a   : > { %6042 = vrot.lane.b32.xlu1 %v14510_v13, %s12030_s25 }
 0xf7d   : > { %6036 = vrot.lane.b32.xlu0 %v14571_v59, %s12030_s25 }
 0xf7e   : > { %6038 = vrot.lane.b32.xlu1 %v14608_v19, %s12030_s25 }
 0xf81   : > { %6022 = vrot.lane.b32.xlu0 %v14488_v22, %s12030_s25 }
 0xf82   : > { %6020 = vrot.lane.b32.xlu1 %v14478_v57, %s12030_s25 }
 0xf85   : > { %6026 = vrot.lane.b32.xlu0 %v14507_v20, %s12030_s25 }
 0xf86   : > { %6024 = vrot.lane.b32.xlu1 %v14497_v23, %s12030_s25 }
 0xfaa   : > { %4964 = vmax.xlane.f32.xlu1 %v14809_v60 }
 0xfad   : > { %v4959_v61 = vpop.xlane.xlu1 %4958 }
 0xfae   : > { %v4988_v28 = vsub.f32 %v4940_v1, %v4959_v61  ;;  %4974 = vmax.xlane.f32.xlu1 %v14814_v15  ;;  %v4910_v61 = vpop.f32.mrf.mxu0 }
 0xfb0   : > { %v5006_v56 = vmul.f32 1.442695, %v4988_v28 }
 0xfb1   : > { %v4955_v18 = vpop.xlane.xlu1 %4954 }
 0xfb2   : > { %11445 = vpow2.f32 %v5006_v56  ;;  %v4986_v58 = vsub.f32 %v4938_v53, %v4955_v18  ;;  %4970 = vmax.xlane.f32.xlu1 %v14819_v9  ;;  %v16881_v56 = vld [vmem:[#allocation41_spill] sm:$0xff] }
 0xfb3   : > { %v4957_v5 = vpop.xlane.xlu0 %4956  ;;  %vm16882_vm4 = vnez %v16881_v56 }
 0xfb4   : > { %v5002_v3 = vmul.f32 1.442695, %v4986_v58  ;;  %v14831_v53 = vsel %vm16882_vm4, %v4910_v61, -1e+30  ;;  %v10360_v58 = vpop.f32.mrf.mxu0  ;;  %v4987_v20 = vsub.f32 %v14760_v51, %v4957_v5 }
 0xfb5   : > { %v4961_v1 = vpop.xlane.xlu1 %4960  ;;  %v14837_v26 = vsel %vm16884_vm15, %v10360_v58, -1e+30  ;;  %vm16887_vm15 = vnez %v16749_v0 }
 0xfb6   : > { %11447 = vpow2.f32 %v5002_v3  ;;  %4976 = vmax.xlane.f32.xlu1 %v14824_v31  ;;  %v4923_v3 = vpop.f32.mrf.mxu0  ;;  %v4989_v4 = vsub.f32 %v14765_v36, %v4961_v1  ;;  %v5004_v22 = vmul.f32 1.442695, %v4987_v20 }
 0xfb7   : > { %v6051_v28 = vpop.permute.xlu0 %6050 }
 0xfb8   : > { %10806 = vmatprep.subr.msk.bf16.mxu0 %vm16857_vm0, %v6051_v28  ;;  %v6098_v47 = vsel %vm16880_vm3, %v6051_v28, 0  ;;  %vm16885_vm3 = vnez %v16740_v49  ;;  %v10361_v43 = vpop.f32.mrf.mxu0  ;;  %v5008_v23 = vmul.f32 1.442695, %v4989_v4 }
 0xfb9   : > { %10499 = vmatpush3.bf16.xpose.msra.mxu0 %v6098_v47  ;;  %v6049_v18 = vpop.permute.xlu1 %6048  ;;  %v14846_v28 = vsel %vm16885_vm3, %v4923_v3, -1e+30  ;;  %v14855_v44 = vsel %vm16887_vm15, %v10361_v43, -1e+30  ;;  %vm16891_vm15 = vmmov %vm16857_vm0 }
 0xfba   : > { %4972 = vmax.xlane.f32.xlu1 %v14831_v53  ;;  %10807 = vmatprep.subr.msk.bf16.mxu0 %vm16883_vm12, %v6049_v18  ;;  %v6095_v61 = vsel %vm16857_vm0, %v6049_v18, 0  ;;  %vm16886_vm12 = vmmov %vm16857_vm0  ;;  %v4926_v18 = vpop.f32.mrf.mxu0  ;;  %11449 = vpow2.f32 %v5008_v23 }
 0xfbb   : > { %vm16893_vm3 = vmmov %vm16857_vm0 }
 0xfbd   : > { %v6047_v47 = vpop.permute.xlu1 %6046 }
 0xfbe   : > { %4982 = vmax.xlane.f32.xlu1 %v14837_v26  ;;  %v6092_v3 = vsel %vm16857_vm0, %v6047_v47, 0 }
 0xfbf   : > { %v14840_v32 = vpop.eup %11445 }
 0xfc0   : > { %5038 = vadd.xlane.f32.xlu0 %v14840_v32 }
 0xfc1   : > { %10501 = vmatpush3.bf16.xpose.msra.mxu0 %v6095_v61  ;;  %v14861_v61 = vsel %vm16888_vm5, %v4926_v18, -1e+30  ;;  %vm16892_vm5 = vmmov %vm16857_vm0 }
 0xfc2   : > { %4978 = vmax.xlane.f32.xlu1 %v14846_v28  ;;  %10808 = vmatprep.subr.msk.bf16.mxu0 %vm16886_vm12, %v6047_v47  ;;  %vm16889_vm12 = vmmov %vm16857_vm0 }
 0xfc3   : > { %v14850_v58 = vpop.eup %11447 }
 0xfc4   : > { %5034 = vadd.xlane.f32.xlu0 %v14850_v58 }
 0xfc6   : > { %4984 = vmax.xlane.f32.xlu1 %v14855_v44 }
 0xfc7   : > { %v14876_v23 = vpop.eup %11449 }
 0xfc9   : > { %10503 = vmatpush3.bf16.xpose.msra.mxu0 %v6092_v3 }
 0xfca   : > { %4980 = vmax.xlane.f32.xlu1 %v14861_v61 }
 0xfdb   : > { %6028 = vrot.lane.b32.xlu1 %v14657_v50, %s12030_s25 }
 0xfe8   : > { %v4969_v7 = vpop.xlane.xlu0 %4968 }
 0xfe9   : > { %v4993_v57 = vsub.f32 %v14776_v29, %v4969_v7 }
 0xfeb   : > { %v5016_v51 = vmul.f32 1.442695, %v4993_v57 }
 0xfec   : > { %v6045_v43 = vpop.permute.xlu0 %6044 }
 0xfed   : > { %10809 = vmatprep.subr.msk.bf16.mxu0 %vm16889_vm12, %v6045_v43  ;;  %v6089_v47 = vsel %vm16857_vm0, %v6045_v43, 0  ;;  %vm16890_vm12 = vmmov %vm16857_vm0 }
 0xfee   : > { %10505 = vmatpush3.bf16.xpose.msra.mxu0 %v6089_v47  ;;  %v4967_v18 = vpop.xlane.xlu1 %4966 }
 0xfef   : > { %v4992_v3 = vsub.f32 %v14781_v55, %v4967_v18 }
 0xff0   : > { %v6041_v43 = vpop.permute.xlu0 %6040 }
 0xff1   : > { %v5014_v50 = vmul.f32 1.442695, %v4992_v3 }
 0xff2   : > { %v4963_v59 = vpop.xlane.xlu1 %4962 }
 0xff3   : > { %11451 = vpow2.f32 %v5014_v50  ;;  %v4990_v36 = vsub.f32 %v14786_v41, %v4963_v59  ;;  %v6083_v59 = vsel %vm16893_vm3, %v6041_v43, 0  ;;  %vm16897_vm3 = vmmov %vm16857_vm0 }
 0xff4   : > { %11453 = vpow2.f32 %v5004_v22  ;;  %v6037_v41 = vpop.permute.xlu0 %6036 }
 0xff5   : > { %v5010_v4 = vmul.f32 1.442695, %v4990_v36  ;;  %v6077_v47 = vsel %vm16897_vm3, %v6037_v41, 0  ;;  %vm16904_vm3 = vnez %v16742_v45 }
 0xff6   : > { %v6043_v5 = vpop.permute.xlu1 %6042 }
 0xff7   : > { %11455 = vpow2.f32 %v5010_v4  ;;  %10810 = vmatprep.subr.msk.bf16.mxu0 %vm16890_vm12, %v6043_v5  ;;  %v6086_v1 = vsel %vm16857_vm0, %v6043_v5, 0  ;;  %vm16894_vm12 = vmmov %vm16857_vm0 }
 0xff8   : > { %10507 = vmatpush3.bf16.xpose.msra.mxu0 %v6086_v1  ;;  %11457 = vpow2.f32 %v5016_v51  ;;  %v6023_v18 = vpop.permute.xlu0 %6022 }
 0xff9   : > { %10811 = vmatprep.subr.msk.bf16.mxu0 %vm16891_vm15, %v6041_v43  ;;  %vm16896_vm15 = vmmov %vm16857_vm0 }
 0xffa   : > { %v6039_v7 = vpop.permute.xlu1 %6038 }
 0xffc   : > { %v6027_v36 = vpop.permute.xlu0 %6026 }
 0xffe   : > { %v6021_v20 = vpop.permute.xlu1 %6020 }
 0xfff   : > { %5040 = vadd.xlane.f32.xlu1 %v14876_v23  ;;  %10514 = vmatprep.mubr.msk.bf16.mxu0 %vm16892_vm5, %v6021_v20  ;;  %vm16895_vm5 = vmmov %vm16857_vm0 }
0x1000   : > { %v14881_v57 = vpop.eup %11451  ;;  %10509 = vmatpush3.bf16.xpose.msra.mxu0 %v6083_v59  ;;  %v6080_v55 = vsel %vm16895_vm5, %v6039_v7, 0  ;;  %vm16902_vm5 = vnez %v16878_v33 }
0x1001   : > { %5046 = vadd.xlane.f32.xlu0 %v14881_v57  ;;  %10812 = vmatprep.subr.msk.bf16.mxu0 %vm16894_vm12, %v6039_v7  ;;  %v14885_v22 = vpop.eup %11453  ;;  %vm16898_vm12 = vmmov %vm16857_vm0 }
0x1002   : > { %v6025_v3 = vpop.permute.xlu1 %6024 }
0x1003   : > { %5036 = vadd.xlane.f32.xlu1 %v14885_v22 }
0x1004   : > { %v14888_v50 = vpop.eup %11455 }
0x1005   : > { %5042 = vadd.xlane.f32.xlu0 %v14888_v50  ;;  %v14891_v29 = vpop.eup %11457 }
0x1007   : > { %5048 = vadd.xlane.f32.xlu1 %v14891_v29 }
0x1008   : > { %10511 = vmatpush3.bf16.xpose.msra.mxu0 %v6080_v55 }
0x1009   : > { %10813 = vmatprep.subr.msk.bf16.mxu0 %vm16896_vm15, %v6037_v41  ;;  %vm16903_vm15 = vnez %v16740_v49 }
0x1010   : > { %10513 = vmatpush3.bf16.xpose.msra.mxu0 %v6077_v47 }
0x1017   : > { %10515 = vmatmul.mubr.msk.bf16.vlgmr.msra.gmra.mxu0 %vm16857_vm0, %v6023_v18 }
0x1018   : > { %10518 = vmatprep.mubr.msk.bf16.mxu0 %vm16898_vm12, %v6025_v3  ;;  %vm16906_vm12 = vnez %v16751_v30  ;;  %v11042_v30 = vld [vmem:[#allocation5 + $0x40] sm:$0xff]  }
0x101f   : > { %10519 = vmatmul.mubr.msk.bf16.gmra.mxu0 %vm16899_vm11, %v6027_v36  ;;  %vm16900_vm11 = vmmov %vm16857_vm0  ;;  %vm16905_vm0 = vnez %v16871_v54 }
0x1033   : > { %v4965_v51 = vpop.xlane.xlu1 %4964 }
0x1034   : > { %v4991_v4 = vsub.f32 %v14809_v60, %v4965_v51 }
0x1036   : > { %v5012_v5 = vmul.f32 1.442695, %v4991_v4 }
0x1037   : > { %v4975_v1 = vpop.xlane.xlu1 %4974 }
0x1038   : > { %11459 = vpow2.f32 %v5012_v5  ;;  %v4996_v43 = vsub.f32 %v14814_v15, %v4975_v1 }
0x103a   : > { %v5022_v7 = vmul.f32 1.442695, %v4996_v43 }
0x103b   : > { %v4971_v20 = vpop.xlane.xlu1 %4970 }
0x103c   : > { %11461 = vpow2.f32 %v5022_v7  ;;  %v4994_v59 = vsub.f32 %v14819_v9, %v4971_v20 }
0x103e   : > { %v5018_v55 = vmul.f32 1.442695, %v4994_v59 }
0x103f   : > { %v4977_v41 = vpop.xlane.xlu1 %4976 }
0x1040   : > { %11463 = vpow2.f32 %v5018_v55  ;;  %v4997_v47 = vsub.f32 %v14824_v31, %v4977_v41 }
0x1042   : > { %v5024_v18 = vmul.f32 1.442695, %v4997_v47 }
0x1043   : > { %v4973_v3 = vpop.xlane.xlu1 %4972 }
0x1044   : > { %11465 = vpow2.f32 %v5024_v18  ;;  %v4995_v60 = vsub.f32 %v14831_v53, %v4973_v3 }
0x1045   : > { %v14905_v36 = vpop.eup %11459 }
0x1046   : > { %v5020_v51 = vmul.f32 1.442695, %v4995_v60  ;;  %5044 = vadd.xlane.f32.xlu1 %v14905_v36 }
0x1047   : > { %v4983_v15 = vpop.xlane.xlu1 %4982 }
0x1048   : > { %11467 = vpow2.f32 %v5020_v51  ;;  %v5000_v4 = vsub.f32 %v14837_v26, %v4983_v15  ;;  %v10432_v15 = vpop.f32.mrf.mxu0 }
0x1049   : > { %v14909_v9 = vpop.eup %11461  ;;  %v5039_v51 = vpop.xlane.xlu0 %5038  ;;  %v14957_v6 = vsel %vm12636_vm1, %v10432_v15, -1e+30 }
0x104a   : > { %v5030_v5 = vmul.f32 1.442695, %v5000_v4  ;;  %5054 = vadd.xlane.f32.xlu0 %v14909_v9 }
0x104b   : > { %v4979_v31 = vpop.xlane.xlu1 %4978 }
0x104c   : > { %11469 = vpow2.f32 %v5030_v5  ;;  %v4998_v1 = vsub.f32 %v14846_v28, %v4979_v31  ;;  %v5499_v31 = vpop.f32.mrf.mxu0 }
0x104d   : > { %v14913_v43 = vpop.eup %11463  ;;  %v5035_v4 = vpop.xlane.xlu0 %5034 }
0x104e   : > { %v5026_v53 = vmul.f32 1.442695, %v4998_v1  ;;  %5050 = vadd.xlane.f32.xlu0 %v14913_v43 }
0x104f   : > { %v4985_v7 = vpop.xlane.xlu1 %4984 }
0x1050   : > { %11471 = vpow2.f32 %v5026_v53  ;;  %v5001_v20 = vsub.f32 %v14855_v44, %v4985_v7  ;;  %v10433_v53 = vpop.f32.mrf.mxu0  ;;  %v14943_v7 = vsel %vm16769_vm6, %v5499_v31, -1e+30 }
0x1051   : > { %v14917_v59 = vpop.eup %11465  ;;  %16901 = vst [vmem:[#allocation37_spill] sm:$0xff] %v14943_v7 }
0x1052   : > { %v5032_v26 = vmul.f32 1.442695, %v5001_v20  ;;  %5056 = vadd.xlane.f32.xlu1 %v14917_v59  ;;  %v5502_v20 = vpop.f32.mrf.mxu0 }
0x1053   : > { %v4981_v55 = vpop.xlane.xlu1 %4980 }
0x1054   : > { %11473 = vpow2.f32 %v5032_v26  ;;  %v4999_v41 = vsub.f32 %v14861_v61, %v4981_v55  ;;  %v10436_v55 = vpop.f32.mrf.mxu0 }
0x1055   : > { %v14921_v47 = vpop.eup %11467 }
0x1056   : > { %v5028_v28 = vmul.f32 1.442695, %v4999_v41  ;;  %5052 = vadd.xlane.f32.xlu1 %v14921_v47 }
0x1057   : > { %v6029_v18 = vpop.permute.xlu1 %6028 }
0x1058   : > { %11475 = vpow2.f32 %v5028_v28  ;;  %10522 = vmatprep.mubr.msk.bf16.mxu0 %vm16900_vm11, %v6029_v18  ;;  %vm16907_vm11 = vnez %v16749_v0 }
0x1059   : > { %v14925_v3 = vpop.eup %11469 }
0x105a   : > { %5062 = vadd.xlane.f32.xlu0 %v14925_v3 }
0x105d   : > { %v14928_v44 = vpop.eup %11471 }
0x105e   : > { %5058 = vadd.xlane.f32.xlu0 %v14928_v44 }
0x1061   : > { %v14931_v60 = vpop.eup %11473 }
0x1062   : > { %5064 = vadd.xlane.f32.xlu1 %v14931_v60 }
0x1065   : > { %v14934_v61 = vpop.eup %11475 }
0x1066   : > { %5060 = vadd.xlane.f32.xlu1 %v14934_v61 }
0x1074   : > { %6030 = vrot.lane.b32.xlu0 %v14623_v8, %s12030_s25 }
0x1077   : > { %6032 = vrot.lane.b32.xlu1 %v14675_v38, %s12030_s25 }
0x1088   : > { %v5041_v5 = vpop.xlane.xlu1 %5040 }
0x1089   : > { %11477 = vrcp.f32 %v5041_v5  ;;  %v14948_v5 = vsel %vm16869_vm10, %v5502_v20, -1e+30 }
0x108a   : > { %11479 = vrcp.f32 %v5035_v4  ;;  %v5515_v4 = vpop.f32.mrf.mxu0 }
0x108b   : > { %11481 = vrcp.f32 %v5039_v51 }
0x108c   : > { %v5037_v1 = vpop.xlane.xlu1 %5036  ;;  %v10437_v62 = vpop.f32.mrf.mxu0 }
0x108d   : > { %11483 = vrcp.f32 %v5037_v1  ;;  %v14979_v15 = vsel %vm16704_vm7, %v10437_v62, -1e+30 }
0x1093   : > { %5578 = vmax.xlane.f32.xlu0 %v14943_v7 }
0x1096   : > { %v11478_v26 = vpop.eup %11477 }
0x1097   : > { %v11480_v41 = vpop.eup %11479  ;;  %v5085_v51 = vmul.f32 %v11478_v26, %v14876_v23  ;;  %v14962_v23 = vsel %vm16771_vm2, %v10433_v53, -1e+30 }
0x1098   : > { %v11482_v28 = vpop.eup %11481  ;;  %v5082_v31 = vmul.f32 %v11480_v41, %v14850_v58  ;;  %v5518_v58 = vpop.f32.mrf.mxu0 }
0x1099   : > { %v5084_v38 = vmul.f32 %v11482_v28, %v14840_v32  ;;  %v14967_v32 = vsel %vm16772_vm8, %v5515_v4, -1e+30 }
0x109a   : > { %v11484_v18 = vpop.eup %11483 }
0x109b   : > { %5580 = vmax.xlane.f32.xlu1 %v14948_v5  ;;  %v5083_v1 = vmul.f32 %v11484_v18, %v14885_v22  ;;  %v5099_v7 = vpack.c.bf16 %v5085_v51, %v5084_v38  ;;  %v10440_v22 = vpop.f32.mrf.mxu0 }
0x109c   : > { %v14994_v62 = vsel %vm12724_vm9, %v10440_v22, -1e+30  ;;  %v15013_v22 = vsel %vm16905_vm0, %v10436_v55, -1e+30 }
0x109d   : > { %v5098_v8 = vpack.c.bf16 %v5083_v1, %v5082_v31  ;;  %v5531_v38 = vpop.f32.mrf.mxu0  ;;  %v5047_v1 = vpop.xlane.xlu0 %5046 }
0x109f   : > { %5582 = vmax.xlane.f32.xlu1 %v14957_v6  ;;  %10378 = vmatprep.mubr.bf16.mxu1 %v5098_v8  ;;  %v14974_v8 = vsel %vm16874_vm13, %v5518_v58, -1e+30  ;;  %v10441_v53 = vpop.f32.mrf.mxu0 }
0x10a0   : > { %10379 = vmatmul.mubr.bf16.vlgmr.msra.gmra.mxu1 %v5099_v7  ;;  %v14984_v7 = vsel %vm16877_vm14, %v5531_v38, -1e+30  ;;  %v14999_v18 = vsel %vm16902_vm5, %v10441_v53, -1e+30  ;;  %v5049_v53 = vpop.xlane.xlu1 %5048 }
0x10a1   : > { %v5534_v20 = vpop.f32.mrf.mxu0  ;;  %11485 = vrcp.f32 %v5049_v53 }
0x10a2   : > { %v14989_v26 = vsel %vm16882_vm4, %v5534_v20, -1e+30 }
0x10a3   : > { %5584 = vmax.xlane.f32.xlu1 %v14962_v23  ;;  %v10444_v41 = vpop.f32.mrf.mxu0 }
0x10a4   : > { %v15019_v38 = vsel %vm16906_vm12, %v10444_v41, -1e+30  ;;  %vm16908_vm12 = vcmask 261120  }
0x10a5   : > { %v5547_v28 = vpop.f32.mrf.mxu0 }
0x10a6   : > { %v15004_v4 = vsel %vm16903_vm15, %v5547_v28, -1e+30  ;;  %v5043_v28 = vpop.xlane.xlu0 %5042 }
0x10a7   : > { %5586 = vmax.xlane.f32.xlu1 %v14967_v32  ;;  %v10445_v51 = vpop.f32.mrf.mxu0  ;;  %11487 = vrcp.f32 %v5043_v28 }
0x10a8   : > { %v15023_v20 = vsel %vm16907_vm11, %v10445_v51, -1e+30  ;;  %11489 = vrcp.f32 %v5047_v1  ;;  %vm16914_vm11 = vmmov %vm16908_vm12 }
0x10a9   : > { %6034 = vrot.lane.b32.xlu0 %v14691_v11, %s12030_s25  ;;  %v5550_v31 = vpop.f32.mrf.mxu0  ;;  %vm16915_vm9 = vmmov %vm16914_vm11 }
0x10aa   : > { %v15009_v58 = vsel %vm16904_vm3, %v5550_v31, -1e+30  ;;  %v11041_v31 = vld [vmem:[#allocation5 + $0x48] sm:$0xff]   ;;  %vm16917_vm4 = vmmov %vm16915_vm9 }
0x10ab   : > { %5588 = vmax.xlane.f32.xlu1 %v14974_v8  ;;  %10394 = vmatprep.subr.bf16.mxu1 %v11041_v31 }
0x10ac   : > { %10395 = vmatpush3.bf16.msra.mxu1 %v11041_v31 }
0x10ad   : > { %10396 = vmatprep.subr.bf16.mxu1 %v11042_v30 }
0x10ae   : > { %v11486_v0 = vpop.eup %11485 }
0x10af   : > { %5592 = vmax.xlane.f32.xlu1 %v14979_v15  ;;  %v5089_v1 = vmul.f32 %v11486_v0, %v14891_v29 }
0x10b0   : > { %10397 = vmatpush3.bf16.msra.mxu1 %v11042_v30 }
0x10b3   : > { %5594 = vmax.xlane.f32.xlu1 %v14984_v7 }
0x10b4   : > { %v11488_v51 = vpop.eup %11487 }
0x10b5   : > { %v11490_v56 = vpop.eup %11489  ;;  %v5086_v28 = vmul.f32 %v11488_v51, %v14888_v50 }
0x10b6   : > { %v5088_v30 = vmul.f32 %v11490_v56, %v14881_v57 }
0x10b7   : > { %5596 = vmax.xlane.f32.xlu1 %v14989_v26 }
0x10b8   : > { %v5101_v54 = vpack.c.bf16 %v5089_v1, %v5088_v30 }
0x10bb   : > { %5598 = vmax.xlane.f32.xlu1 %v14994_v62 }
0x10bf   : > { %5600 = vmax.xlane.f32.xlu1 %v14999_v18 }
0x10c3   : > { %5602 = vmax.xlane.f32.xlu1 %v15004_v4 }
0x10c7   : > { %5604 = vmax.xlane.f32.xlu1 %v15009_v58 }
0x10c8   : > { %5590 = vmax.xlane.f32.xlu0 %v15013_v22 }
0x10cb   : > { %5606 = vmax.xlane.f32.xlu1 %v15019_v38 }
0x10cc   : > { %5608 = vmax.xlane.f32.xlu0 %v15023_v20 }
0x10cf   : > { %v5045_v55 = vpop.xlane.xlu1 %5044 }
0x10d0   : > { %11491 = vrcp.f32 %v5045_v55 }
0x10d3   : > { %v5055_v41 = vpop.xlane.xlu0 %5054 }
0x10d7   : > { %v5051_v11 = vpop.xlane.xlu0 %5050 }
0x10db   : > { %v5057_v46 = vpop.xlane.xlu1 %5056 }
0x10dc   : > { %5752 = vrot.lane.b32.xlu1 %v14577_v42, %s12029_s28  ;;  %11493 = vrcp.f32 %v5057_v46 }
0x10dd   : > { %v11492_v53 = vpop.eup %11491  ;;  %11495 = vrcp.f32 %v5051_v11 }
0x10de   : > { %v5087_v55 = vmul.f32 %v11492_v53, %v14905_v36  ;;  %11497 = vrcp.f32 %v5055_v41 }
0x10df   : > { %v5053_v31 = vpop.xlane.xlu1 %5052 }
0x10e0   : > { %11499 = vrcp.f32 %v5053_v31  ;;  %5750 = vrot.lane.b32.xlu1 %v14586_v14, %s12029_s28  ;;  %v5100_v35 = vpack.c.bf16 %v5087_v55, %v5086_v28  ;;  %v16910_v28 = vld [vmem:[#allocation52_spill] sm:$0xff]  ;;  %v16911_v31 = vld [vmem:[#allocation53_spill] sm:$0xff] }
0x10e2   : > { %5748 = vrot.lane.b32.xlu0 %v14605_v21, %s12029_s28  ;;  %10382 = vmatprep.mubr.bf16.mxu1 %v5100_v35 }
0x10e3   : > { %v5063_v0 = vpop.xlane.xlu0 %5062  ;;  %10383 = vmatmul.mubr.bf16.gmra.mxu1 %v5101_v54 }
0x10e4   : > { %5746 = vrot.lane.b32.xlu1 %v14625_v39, %s12029_s28 }
0x10e6   : > { %5744 = vrot.lane.b32.xlu0 %v14637_v12, %s12029_s28 }
0x10e7   : > { %v5059_v11 = vpop.xlane.xlu0 %5058 }
0x10e8   : > { %5740 = vrot.lane.b32.xlu1 %v14671_v25, %s12029_s28 }
0x10e9   : > { %v11494_v46 = vpop.eup %11493 }
0x10ea   : > { %5742 = vrot.lane.b32.xlu0 %v14655_v63, %s12029_s28  ;;  %v11496_v56 = vpop.eup %11495  ;;  %v5093_v29 = vmul.f32 %v11494_v46, %v14917_v59 }
0x10eb   : > { %v6031_v57 = vpop.permute.xlu0 %6030  ;;  %v5065_v50 = vpop.xlane.xlu1 %5064  ;;  %v5090_v36 = vmul.f32 %v11496_v56, %v14913_v43  ;;  %v16909_v43 = vld [vmem:[#allocation19_spill] sm:$0xff]  ;;  %v16913_v56 = vld [vmem:[#allocation37_spill] sm:$0xff] }
0x10ec   : > { %v11498_v35 = vpop.eup %11497  ;;  %6677 = vrot.lane.b32.xlu1 %v14584_v27, %s12031_s16  ;;  %10523 = vmatmul.mubr.msk.bf16.gmra.mxu0 %vm16908_vm12, %v6031_v57  ;;  %11501 = vrcp.f32 %v5065_v50 }
0x10ed   : > { %v11500_v54 = vpop.eup %11499  ;;  %11503 = vrcp.f32 %v5059_v11  ;;  %v5092_v53 = vmul.f32 %v11498_v35, %v14909_v9 }
0x10ee   : > { %5738 = vrot.lane.b32.xlu0 %v14689_v10, %s12029_s28  ;;  %v5091_v41 = vmul.f32 %v11500_v54, %v14921_v47  ;;  %11505 = vrcp.f32 %v5063_v0  ;;  %v16912_v0 = vld [vmem:[#allocation54_spill] sm:$0xff]  ;;  %s8853_s28 = sshll.u32 %s421_s14, 4  ;;  %s16416_s28 = int_to_ptr.vmem [resolvable:$true] %s8853_s28 }
0x10ef   : > { %v5061_v51 = vpop.xlane.xlu1 %5060  ;;  %v5103_v1 = vpack.c.bf16 %v5093_v29, %v5092_v53  ;;  %s11940_s2 = scalar_lea.vmem %s16416_s28, 512 }
0x10f0   : > { %11507 = vrcp.f32 %v5061_v51  ;;  %6675 = vrot.lane.b32.xlu1 %v14558_v40, %s12031_s16  ;;  %v5102_v27 = vpack.c.bf16 %v5091_v41, %v5090_v36  ;;  %p11941_p0 = scmp.ne.s32.totalorder %s16416_s28, %s11940_s2 }
0x10f2   : > { %6673 = vrot.lane.b32.xlu0 %v14542_v37, %s12031_s16  ;;  %10386 = vmatprep.mubr.bf16.mxu1 %v5102_v27  ;;  %p11942_p8 = pnand %p11941_p0, %p17011_p2 }
0x10f3   : > { %10387 = vmatmul.mubr.bf16.gmra.mxu1 %v5103_v1  ;;  %v6033_v59 = vpop.permute.xlu1 %6032 }
0x10f4   : > { %6671 = vrot.lane.b32.xlu1 %v14532_v52, %s12031_s16  ;;  %10526 = vmatprep.mubr.msk.bf16.mxu0 %vm16908_vm12, %v6033_v59  ;;  %p11943_p9 = pneg %p11942_p8 }
0x10f6   : > { %6669 = vrot.lane.b32.xlu0 %v14510_v13, %s12031_s16 }
0x10f8   : > { %6667 = vrot.lane.b32.xlu1 %v14500_v34, %s12031_s16 }
0x10f9   : > { %v11502_v40 = vpop.eup %11501 }
0x10fa   : > { %6665 = vrot.lane.b32.xlu0 %v14608_v19, %s12031_s16  ;;  %v11504_v9 = vpop.eup %11503  ;;  %v5097_v52 = vmul.f32 %v11502_v40, %v14931_v60 }
0x10fb   : > { %v11506_v37 = vpop.eup %11505  ;;  %v5094_v13 = vmul.f32 %v11504_v9, %v14928_v44 }
0x10fc   : > { %6663 = vrot.lane.b32.xlu1 %v16909_v43, %s12031_s16  ;;  %v5096_v34 = vmul.f32 %v11506_v37, %v14925_v3 }
0x10fd   : > { %v11508_v47 = vpop.eup %11507 }
0x10fe   : > { %6647 = vrot.lane.b32.xlu0 %v16910_v28, %s12031_s16  ;;  %v5095_v55 = vmul.f32 %v11508_v47, %v14934_v61  ;;  %v5105_v30 = vpack.c.bf16 %v5097_v52, %v5096_v34 }
0x1100   : > { %6649 = vrot.lane.b32.xlu1 %v16911_v31, %s12031_s16  ;;  %v5104_v19 = vpack.c.bf16 %v5095_v55, %v5094_v13 }
0x1102   : > { %6651 = vrot.lane.b32.xlu0 %v16912_v0, %s12031_s16  ;;  %10390 = vmatprep.mubr.bf16.mxu1 %v5104_v19 }
0x1103   : > { %10391 = vmatmul.mubr.bf16.gmra.mxu1 %v5105_v30 }
0x111c   : > { %v5579_v60 = vpop.xlane.xlu0 %5578 }
0x111d   : > { %v5610_v61 = vsub.f32 %v16913_v56, %v5579_v60 }
0x111f   : > { %v5626_v35 = vmul.f32 1.442695, %v5610_v61 }
0x1120   : > { %v6035_v11 = vpop.permute.xlu0 %6034 }
0x1121   : > { %10527 = vmatmul.mubr.msk.bf16.gmra.mxu0 %vm16908_vm12, %v6035_v11 }
0x1124   : > { %v5581_v46 = vpop.xlane.xlu1 %5580 }
0x1125   : > { %v5611_v36 = vsub.f32 %v14948_v5, %v5581_v46 }
0x1127   : > { %v5628_v53 = vmul.f32 1.442695, %v5611_v36 }
0x1128   : > { %v5583_v44 = vpop.xlane.xlu1 %5582 }
0x1129   : > { %v5612_v3 = vsub.f32 %v14957_v6, %v5583_v44 }
0x112b   : > { %v5630_v57 = vmul.f32 1.442695, %v5612_v3 }
0x112c   : > { %v5585_v50 = vpop.xlane.xlu1 %5584 }
0x112d   : > { %11509 = vpow2.f32 %v5630_v57  ;;  %v5613_v54 = vsub.f32 %v14962_v23, %v5585_v50 }
0x112e   : > { %11511 = vpow2.f32 %v5626_v35  ;;  %v10516_v35 = vpop.f32.mrf.mxu0 }
0x112f   : > { %v5632_v41 = vmul.f32 1.442695, %v5613_v54 }
0x1130   : > { %v5587_v29 = vpop.xlane.xlu1 %5586 }
0x1131   : > { %11513 = vpow2.f32 %v5632_v41  ;;  %v5614_v31 = vsub.f32 %v14967_v32, %v5587_v29 }
0x1132   : > { %11515 = vpow2.f32 %v5628_v53  ;;  %v6134_v53 = vpop.f32.mrf.mxu0 }
0x1133   : > { %v5634_v46 = vmul.f32 1.442695, %v5614_v31 }
0x1134   : > { %v5589_v51 = vpop.xlane.xlu1 %5588 }
0x1135   : > { %v5615_v27 = vsub.f32 %v14974_v8, %v5589_v51 }
0x1137   : > { %v5636_v59 = vmul.f32 1.442695, %v5615_v27 }
0x1138   : > { %v5593_v1 = vpop.xlane.xlu1 %5592 }
0x1139   : > { %11517 = vpow2.f32 %v5636_v59  ;;  %v5617_v44 = vsub.f32 %v14979_v15, %v5593_v1 }
0x113a   : > { %v15085_v6 = vpop.eup %11509 }
0x113b   : > { %5662 = vadd.xlane.f32.xlu0 %v15085_v6  ;;  %v15088_v23 = vpop.eup %11511  ;;  %v5640_v32 = vmul.f32 1.442695, %v5617_v44 }
0x113c   : > { %v5595_v40 = vpop.xlane.xlu1 %5594 }
0x113d   : > { %v5618_v54 = vsub.f32 %v14984_v7, %v5595_v40 }
0x113e   : > { %v15092_v37 = vpop.eup %11513 }
0x113f   : > { %5658 = vadd.xlane.f32.xlu0 %v15088_v23  ;;  %v15095_v47 = vpop.eup %11515  ;;  %v5642_v27 = vmul.f32 1.442695, %v5618_v54 }
0x1140   : > { %v5597_v5 = vpop.xlane.xlu1 %5596 }
0x1141   : > { %v5619_v9 = vsub.f32 %v14989_v26, %v5597_v5 }
0x1143   : > { %v5644_v43 = vmul.f32 1.442695, %v5619_v9  ;;  %5664 = vadd.xlane.f32.xlu0 %v15092_v37 }
0x1144   : > { %v5599_v8 = vpop.xlane.xlu1 %5598 }
0x1145   : > { %11519 = vpow2.f32 %v5644_v43 }
0x1146   : > { %v15098_v28 = vpop.eup %11517 }
0x1147   : > { %5660 = vadd.xlane.f32.xlu0 %v15095_v47 }
0x1148   : > { %v5601_v52 = vpop.xlane.xlu1 %5600 }
0x114b   : > { %5668 = vadd.xlane.f32.xlu0 %v15098_v28 }
0x114c   : > { %v15101_v13 = vpop.xlane.xlu1 %5602 }
0x1150   : > { %v5605_v55 = vpop.xlane.xlu1 %5604 }
0x1151   : > { %v5591_v26 = vpop.xlane.xlu0 %5590  ;;  %v5623_v7 = vsub.f32 %v15009_v58, %v5605_v55 }
0x1152   : > { %v15103_v34 = vpop.eup %11519  ;;  %v5616_v19 = vsub.f32 %v15013_v22, %v5591_v26  ;;  %v5620_v22 = vsub.f32 %v14994_v62, %v5599_v8  ;;  %v5621_v62 = vsub.f32 %v14999_v18, %v5601_v52  ;;  %v10517_v8 = vpop.f32.mrf.mxu0  ;;  %v5622_v18 = vsub.f32 %v15004_v4, %v15101_v13 }
0x1153   : > { %5676 = vadd.xlane.f32.xlu0 %v15103_v34  ;;  %v5652_v55 = vmul.f32 1.442695, %v5623_v7 }
0x1154   : > { %v5638_v30 = vmul.f32 1.442695, %v5616_v19  ;;  %v5607_v0 = vpop.xlane.xlu1 %5606  ;;  %v5648_v26 = vmul.f32 1.442695, %v5621_v62  ;;  %v15149_v13 = vpop.f32.mrf.mxu0 }
0x1155   : > { %v5624_v60 = vsub.f32 %v15019_v38, %v5607_v0  ;;  %v15109_v11 = vpop.xlane.xlu0 %5608  ;;  %v5646_v38 = vmul.f32 1.442695, %v5620_v22  ;;  %v15158_v22 = vsel %vm12636_vm1, %v10516_v35, -1e+30  ;;  %v15170_v35 = vsel %vm16771_vm2, %v10517_v8, -1e+30  ;;  %vm16931_vm2 = vmmov %vm16917_vm4 }
0x1156   : > { %11521 = vpow2.f32 %v5638_v30  ;;  %v5625_v44 = vsub.f32 %v15023_v20, %v15109_v11  ;;  %v15162_v54 = vpop.f32.mrf.mxu0 }
0x1157   : > { %v5654_v56 = vmul.f32 1.442695, %v5624_v60  ;;  %v15144_v60 = vsel %vm16769_vm6, %v6134_v53, -1e+30 }
0x1158   : > { %v5753_v61 = vpop.permute.xlu1 %5752  ;;  %v5656_v20 = vmul.f32 1.442695, %v5625_v44 }
0x1159   : > { %11523 = vpow2.f32 %v5654_v56  ;;  %v15112_v3 = vpop.permute.xlu0 %5748  ;;  %10446 = vmatprep.subr.bf16.mxu1 %v5753_v61 }
0x115a   : > { %11525 = vpow2.f32 %v5634_v46  ;;  %v5650_v46 = vmul.f32 1.442695, %v5622_v18 }
0x115b   : > { %11527 = vpow2.f32 %v5640_v32 }
0x115c   : > { %v5751_v57 = vpop.permute.xlu1 %5750  ;;  %11529 = vpow2.f32 %v5646_v38 }
0x115d   : > { %v15115_v50 = vpop.permute.xlu0 %5744  ;;  %11531 = vpow2.f32 %v5642_v27 }
0x115e   : > { %11533 = vpow2.f32 %v5648_v26 }
0x115f   : > { %11535 = vpow2.f32 %v5652_v55 }
0x1160   : > { %v10380_v15 = vpop.f32.mrf.mxu1  ;;  %v15118_v29 = vpop.permute.xlu1 %5746  ;;  %11537 = vpow2.f32 %v5650_v46 }
0x1161   : > { %v15120_v36 = vpop.permute.xlu0 %5742  ;;  %11539 = vpow2.f32 %v5656_v20 }
0x1162   : > { %v5140_v41 = vpop.f32.mrf.mxu1 }
0x1163   : > { %v15122_v51 = vpop.eup %11521 }
0x1164   : > { %5670 = vadd.xlane.f32.xlu1 %v15122_v51  ;;  %v10381_v1 = vpop.f32.mrf.mxu1  ;;  %v15126_v59 = vpop.permute.xlu1 %5740 }
0x1165   : > { %v15129_v40 = vpop.permute.xlu0 %5738  ;;  %v5204_v31 = vpack.c.bf16 %v10381_v1, %v10380_v15  ;;  %v6150_v15 = vpop.f32.mrf.mxu0 }
0x1166   : > { %v15131_v5 = vpop.eup %11523  ;;  %v5143_v9 = vpop.f32.mrf.mxu1  ;;  %v15181_v53 = vsel %vm16772_vm8, %v6150_v15, -1e+30  ;;  %vm16925_vm8 = vmmov %vm16917_vm4 }
0x1167   : > { %v15133_v43 = vpop.eup %11525  ;;  %v5203_v52 = vpack.c.bf16 %v5143_v9, %v5140_v41  ;;  %5686 = vadd.xlane.f32.xlu0 %v15131_v5  ;;  %v10521_v27 = vpop.f32.mrf.mxu0 }
0x1168   : > { %5666 = vadd.xlane.f32.xlu1 %v15133_v43  ;;  %v6678_v58 = vpop.permute.xlu1 %6677  ;;  %v15147_v4 = vpop.eup %11527 }
0x1169   : > { %v6674_v19 = vpop.permute.xlu0 %6673  ;;  %10398 = vmatprep.mubr.msk.bf16.mxu1 %vm16908_vm12, %v5203_v52  ;;  %10814 = vmatprep.subr.msk.bf16.mxu0 %vm16914_vm11, %v6678_v58  ;;  %v6725_v30 = vsel %vm16915_vm9, %v6678_v58, 0  ;;  %vm16918_vm9 = vmmov %vm16917_vm4  ;;  %v15160_v38 = vpop.eup %11529 }
0x116a   : > { %10399 = vmatmul.mubr.msk.bf16.vlgmr.msra.gmra.mxu1 %vm16917_vm4, %v5204_v31  ;;  %10583 = vmatpush3.bf16.xpose.msra.mxu0 %v6725_v30  ;;  %vm16919_vm11 = vmmov %vm16917_vm4  ;;  %v6153_v7 = vpop.f32.mrf.mxu0  ;;  %v16926_v31 = vld [vmem:[#allocation55_spill] sm:$0xff] }
0x116b   : > { %10447 = vmatpush3.bf16.msra.mxu1 %v5753_v61  ;;  %6213 = vmax.xlane.f32.xlu0 %v15144_v60  ;;  %vm16920_vm12 = vmmov %vm16917_vm4  ;;  %v15202_v8 = vsel %vm16874_vm13, %v6153_v7, -1e+30 }
0x116c   : > { %10448 = vmatprep.subr.bf16.mxu1 %v5751_v57  ;;  %5672 = vadd.xlane.f32.xlu1 %v15147_v4  ;;  %v6676_v56 = vpop.permute.xlu1 %6675 }
0x116d   : > { %v6670_v32 = vpop.permute.xlu0 %6669  ;;  %10815 = vmatprep.subr.msk.bf16.mxu0 %vm16918_vm9, %v6676_v56  ;;  %v6722_v61 = vsel %vm16917_vm4, %v6676_v56, 0  ;;  %vm16921_vm9 = vmmov %vm16917_vm4 }
0x116e   : > { %v6719_v62 = vsel %vm16921_vm9, %v6674_v19, 0  ;;  %vm16924_vm9 = vmmov %vm16917_vm4 }
0x116f   : > { %10449 = vmatpush3.bf16.msra.mxu1 %v5751_v57  ;;  %6217 = vmax.xlane.f32.xlu0 %v15158_v22  ;;  %v15174_v57 = vpop.eup %11531 }
0x1170   : > { %10450 = vmatprep.subr.bf16.mxu1 %v15112_v3  ;;  %5678 = vadd.xlane.f32.xlu1 %v15160_v38  ;;  %v6672_v9 = vpop.permute.xlu1 %6671 }
0x1171   : > { %v6666_v11 = vpop.permute.xlu0 %6665 }
0x1172   : > { %10585 = vmatpush3.bf16.xpose.msra.mxu0 %v6722_v61 }
0x1173   : > { %10451 = vmatpush3.bf16.msra.mxu1 %v15112_v3  ;;  %6219 = vmax.xlane.f32.xlu0 %v15170_v35  ;;  %v15186_v3 = vpop.eup %11533 }
0x1174   : > { %10452 = vmatprep.subr.bf16.mxu1 %v15118_v29  ;;  %10816 = vmatprep.subr.msk.bf16.mxu0 %vm16919_vm11, %v6674_v19  ;;  %v15191_v1 = vpop.eup %11535  ;;  %vm16922_vm11 = vmmov %vm16917_vm4  ;;  %v6668_v18 = vpop.permute.xlu1 %6667 }
0x1175   : > { %5674 = vadd.xlane.f32.xlu1 %v15174_v57  ;;  %v6648_v41 = vpop.permute.xlu0 %6647  ;;  %v6710_v52 = vsel %vm16925_vm8, %v6668_v18, 0  ;;  %vm16932_vm8 = vmmov %vm16931_vm2 }
0x1176   : > { %10598 = vmatprep.mubr.msk.bf16.mxu0 %vm16920_vm12, %v6648_v41  ;;  %vm16923_vm12 = vmmov %vm16917_vm4  ;;  %v15234_v41 = vsel %vm16704_vm7, %v10521_v27, -1e+30 }
0x1177   : > { %10453 = vmatpush3.bf16.msra.mxu1 %v15118_v29  ;;  %6221 = vmax.xlane.f32.xlu0 %v15181_v53  ;;  %v15195_v29 = vpop.eup %11537 }
0x1178   : > { %10454 = vmatprep.subr.bf16.mxu1 %v15115_v50  ;;  %v15206_v26 = vpop.eup %11539 }
0x1179   : > { %5680 = vadd.xlane.f32.xlu1 %v15186_v3  ;;  %v6652_v56 = vpop.permute.xlu0 %6651 }
0x117a   : > { %10587 = vmatpush3.bf16.xpose.msra.mxu0 %v6719_v62 }
0x117b   : > { %10455 = vmatpush3.bf16.msra.mxu1 %v15115_v50  ;;  %5684 = vadd.xlane.f32.xlu0 %v15191_v1  ;;  %v6716_v50 = vsel %vm16922_vm11, %v6672_v9, 0  ;;  %vm16927_vm11 = vmmov %vm16917_vm4 }
0x117c   : > { %10456 = vmatprep.subr.bf16.mxu1 %v15120_v36  ;;  %10817 = vmatprep.subr.msk.bf16.mxu0 %vm16917_vm4, %v6672_v9 }
0x117d   : > { %5682 = vadd.xlane.f32.xlu1 %v15195_v29 }
0x117f   : > { %10457 = vmatpush3.bf16.msra.mxu1 %v15120_v36  ;;  %6223 = vmax.xlane.f32.xlu0 %v15202_v8  ;;  %v6713_v36 = vsel %vm16924_vm9, %v6670_v32, 0  ;;  %vm16930_vm9 = vmmov %vm16917_vm4 }
0x1180   : > { %10458 = vmatprep.subr.bf16.mxu1 %v15126_v59 }
0x1181   : > { %5688 = vadd.xlane.f32.xlu1 %v15206_v26 }
0x1182   : > { %10589 = vmatpush3.bf16.xpose.msra.mxu0 %v6716_v50  ;;  %v15240_v50 = vsel %vm16869_vm10, %v15149_v13, -1e+30 }
0x1183   : > { %10459 = vmatpush3.bf16.msra.mxu1 %v15126_v59  ;;  %10818 = vmatprep.subr.msk.bf16.mxu0 %vm16923_vm12, %v6670_v32  ;;  %v16928_v59 = vld [vmem:[#allocation56_spill] sm:$0xff]  ;;  %vm16929_vm12 = vmmov %vm16917_vm4 }
0x1184   : > { %10460 = vmatprep.subr.bf16.mxu1 %v15129_v40  ;;  %v6707_v58 = vsel %vm16929_vm12, %v6666_v11, 0  ;;  %vm16935_vm12 = vmmov %vm16931_vm2 }
0x1187   : > { %10461 = vmatpush3.bf16.msra.mxu1 %v15129_v40  ;;  %v6664_v40 = vpop.permute.xlu1 %6663 }
0x1188   : > { %v6704_v55 = vsel %vm16931_vm2, %v6664_v40, 0 }
0x118a   : > { %10591 = vmatpush3.bf16.xpose.msra.mxu0 %v6713_v36 }
0x118b   : > { %10819 = vmatprep.subr.msk.bf16.mxu0 %vm16917_vm4, %v6668_v18  ;;  %v6650_v44 = vpop.permute.xlu1 %6649  ;;  %vm16933_vm4 = vmmov %vm16931_vm2 }
0x1192   : > { %6653 = vrot.lane.b32.xlu1 %v16926_v31, %s12031_s16  ;;  %10593 = vmatpush3.bf16.xpose.msra.mxu0 %v6710_v52 }
0x1193   : > { %10820 = vmatprep.subr.msk.bf16.mxu0 %vm16927_vm11, %v6666_v11  ;;  %vm16934_vm11 = vmmov %vm16931_vm2 }
0x1195   : > { %6657 = vrot.lane.b32.xlu0 %v16928_v59, %s12031_s16 }
0x119a   : > { %10595 = vmatpush3.bf16.xpose.msra.mxu0 %v6707_v58 }
0x119b   : > { %10821 = vmatprep.subr.msk.bf16.mxu0 %vm16930_vm9, %v6664_v40  ;;  %vm16937_vm9 = vmmov %vm16931_vm2 }
0x11a2   : > { %10597 = vmatpush3.bf16.xpose.msra.mxu0 %v6704_v55  ;;  %v16938_v55 = vld [vmem:[#allocation57_spill] sm:$0xff] }
0x11a3   : > { %v10384_v19 = vpop.f32.mrf.mxu1 }
0x11a5   : > { %v5156_v30 = vpop.f32.mrf.mxu1 }
0x11a7   : > { %v10385_v46 = vpop.f32.mrf.mxu1 }
0x11a8   : > { %v5206_v61 = vpack.c.bf16 %v10385_v46, %v10384_v19 }
0x11a9   : > { %v5159_v32 = vpop.f32.mrf.mxu1  ;;  %10599 = vmatmul.mubr.msk.bf16.vlgmr.msra.gmra.mxu0 %vm16932_vm8, %v6650_v44  ;;  %vm16939_vm8 = vmmov %vm16931_vm2 }
0x11aa   : > { %v5205_v20 = vpack.c.bf16 %v5159_v32, %v5156_v30  ;;  %10602 = vmatprep.mubr.msk.bf16.mxu0 %vm16933_vm4, %v6652_v56  ;;  %vm16940_vm4 = vmmov %vm16931_vm2 }
0x11ac   : > { %10402 = vmatprep.mubr.msk.bf16.mxu1 %vm16934_vm11, %v5205_v20  ;;  %v15229_v11 = vpop.f32.mrf.mxu0 }
0x11ad   : > { %10403 = vmatmul.mubr.msk.bf16.gmra.mxu1 %vm16935_vm12, %v5206_v61 }
0x11ae   : > { %v6166_v15 = vpop.f32.mrf.mxu0 }
0x11b0   : > { %v10525_v7 = vpop.f32.mrf.mxu0 }
0x11b1   : > { %v15245_v18 = vsel %vm16902_vm5, %v10525_v7, -1e+30 }
0x11b3   : > { %v10388_v62 = vpop.f32.mrf.mxu1 }
0x11b4   : > { %6227 = vmax.xlane.f32.xlu0 %v15234_v41 }
0x11b5   : > { %v5172_v36 = vpop.f32.mrf.mxu1 }
0x11b6   : > { %6215 = vmax.xlane.f32.xlu1 %v15240_v50 }
0x11b7   : > { %v10389_v52 = vpop.f32.mrf.mxu1 }
0x11b8   : > { %6235 = vmax.xlane.f32.xlu0 %v15245_v18  ;;  %v5208_v59 = vpack.c.bf16 %v10389_v52, %v10388_v62 }
0x11b9   : > { %v5175_v27 = vpop.f32.mrf.mxu1 }
0x11ba   : > { %v5207_v31 = vpack.c.bf16 %v5175_v27, %v5172_v36  ;;  %v6169_v27 = vpop.f32.mrf.mxu0 }
0x11bc   : > { %10406 = vmatprep.mubr.msk.bf16.mxu1 %vm16931_vm2, %v5207_v31 }
0x11bd   : > { %10407 = vmatmul.mubr.msk.bf16.gmra.mxu1 %vm16937_vm9, %v5208_v59 }
0x11c3   : > { %v10392_v58 = vpop.f32.mrf.mxu1 }
0x11c4   : > { %v5663_v13 = vpop.xlane.xlu0 %5662 }
0x11c5   : > { %v5188_v40 = vpop.f32.mrf.mxu1 }
0x11c7   : > { %6655 = vrot.lane.b32.xlu1 %v16938_v55, %s12031_s16  ;;  %v10393_v19 = vpop.f32.mrf.mxu1 }
0x11c8   : > { %v5659_v30 = vpop.xlane.xlu0 %5658  ;;  %v5210_v56 = vpack.c.bf16 %v10393_v19, %v10392_v58 }
0x11c9   : > { %v5191_v46 = vpop.f32.mrf.mxu1 }
0x11ca   : > { %v5209_v44 = vpack.c.bf16 %v5191_v46, %v5188_v40 }
0x11cc   : > { %10410 = vmatprep.mubr.msk.bf16.mxu1 %vm16939_vm8, %v5209_v44  ;;  %v5665_v32 = vpop.xlane.xlu0 %5664  ;;  %v15275_v44 = vsel %vm16905_vm0, %v15162_v54, -1e+30 }
0x11cd   : > { %10411 = vmatmul.mubr.msk.bf16.gmra.mxu1 %vm16940_vm4, %v5210_v56  ;;  %11541 = vrcp.f32 %v5665_v32  ;;  %vm16953_vm4 = vmmov %vm16931_vm2 }
0x11ce   : > { %11543 = vrcp.f32 %v5659_v30 }
0x11cf   : > { %11545 = vrcp.f32 %v5663_v13 }
0x11d0   : > { %v5661_v20 = vpop.xlane.xlu0 %5660 }
0x11d1   : > { %11547 = vrcp.f32 %v5661_v20 }
0x11da   : > { %v11542_v61 = vpop.eup %11541 }
0x11db   : > { %v11544_v62 = vpop.eup %11543  ;;  %v5709_v52 = vmul.f32 %v11542_v61, %v15092_v37  ;;  %v5669_v37 = vpop.xlane.xlu0 %5668  ;;  %v15280_v61 = vsel %vm16877_vm14, %v6166_v15, -1e+30 }
0x11dc   : > { %v11546_v7 = vpop.eup %11545  ;;  %v5706_v31 = vmul.f32 %v11544_v62, %v15088_v23  ;;  %11549 = vrcp.f32 %v5669_v37  ;;  %v16947_v37 = vld [vmem:[#allocation59_spill] sm:$0xff] }
0x11dd   : > { %v5708_v58 = vmul.f32 %v11546_v7, %v15085_v6 }
0x11de   : > { %v11548_v36 = vpop.eup %11547 }
0x11df   : > { %v5707_v59 = vmul.f32 %v11548_v36, %v15095_v47  ;;  %v5723_v19 = vpack.c.bf16 %v5709_v52, %v5708_v58  ;;  %v5677_v56 = vpop.xlane.xlu0 %5676  ;;  %v16943_v36 = vld [vmem:[#allocation41_spill] sm:$0xff] }
0x11e0   : > { %vm16944_vm11 = vnez %v16943_v36 }
0x11e1   : > { %v15258_v40 = vpop.f32.mrf.mxu0  ;;  %v5722_v55 = vpack.c.bf16 %v5707_v59, %v5706_v31  ;;  %v15285_v52 = vsel %vm16944_vm11, %v6169_v27, -1e+30  ;;  %v16945_v59 = vld [vmem:[#allocation39_spill] sm:$0xff] }
0x11e2   : > { %vm16946_vm12 = vnez %v16945_v59 }
0x11e3   : > { %10462 = vmatprep.mubr.bf16.mxu1 %v5722_v55  ;;  %v6182_v13 = vpop.f32.mrf.mxu0  ;;  %v15293_v15 = vsel %vm16946_vm12, %v15229_v11, -1e+30 }
0x11e4   : > { %v15262_v30 = vsel %vm16903_vm15, %v6182_v13, -1e+30  ;;  %10463 = vmatmul.mubr.bf16.vlgmr.msra.gmra.mxu1 %v5723_v19 }
0x11e5   : > { %v15264_v46 = vpop.f32.mrf.mxu0  ;;  %6237 = vmax.xlane.f32.xlu0 %v15262_v30 }
0x11e7   : > { %v6185_v23 = vpop.f32.mrf.mxu0 }
0x11e8   : > { %v15269_v6 = vsel %vm16904_vm3, %v6185_v23, -1e+30 }
0x11e9   : > { %6239 = vmax.xlane.f32.xlu0 %v15269_v6  ;;  %v11550_v19 = vpop.eup %11549 }
0x11eb   : > { %6225 = vmax.xlane.f32.xlu1 %v15275_v44 }
0x11ed   : > { %v5671_v32 = vpop.xlane.xlu1 %5670 }
0x11ef   : > { %6229 = vmax.xlane.f32.xlu1 %v15280_v61 }
0x11f0   : > { %v5687_v62 = vpop.xlane.xlu0 %5686 }
0x11f1   : > { %v5667_v7 = vpop.xlane.xlu1 %5666 }
0x11f2   : > { %11551 = vrcp.f32 %v5667_v7  ;;  %v5711_v7 = vmul.f32 %v11550_v19, %v15098_v28 }
0x11f3   : > { %6231 = vmax.xlane.f32.xlu1 %v15285_v52  ;;  %11553 = vrcp.f32 %v5671_v32 }
0x11f4   : > { %v15288_v54 = vpop.xlane.xlu0 %6213 }
0x11f5   : > { %v5673_v31 = vpop.xlane.xlu1 %5672 }
0x11f6   : > { %11555 = vrcp.f32 %v5673_v31 }
0x11f7   : > { %6233 = vmax.xlane.f32.xlu1 %v15293_v15  ;;  %11557 = vrcp.f32 %v5677_v56 }
0x11f8   : > { %v15296_v58 = vpop.xlane.xlu0 %6217 }
0x11f9   : > { %v5679_v55 = vpop.xlane.xlu1 %5678 }
0x11fc   : > { %v15298_v27 = vpop.xlane.xlu0 %6219 }
0x11fe   : > { %v5675_v13 = vpop.xlane.xlu1 %5674 }
0x11ff   : > { %v11552_v23 = vpop.eup %11551  ;;  %11559 = vrcp.f32 %v5675_v13  ;;  %6661 = vrot.lane.b32.xlu0 %v16947_v37, %s12031_s16 }
0x1200   : > { %v15302_v32 = vpop.xlane.xlu0 %6221  ;;  %v5710_v11 = vmul.f32 %v11552_v23, %v15133_v43  ;;  %v11554_v31 = vpop.eup %11553  ;;  %11561 = vrcp.f32 %v5679_v55  ;;  %v16948_v43 = vld [vmem:[#allocation58_spill] sm:$0xff] }
0x1201   : > { %v5712_v56 = vmul.f32 %v11554_v31, %v15122_v51 }
0x1202   : > { %v5681_v45 = vpop.xlane.xlu1 %5680  ;;  %v5724_v49 = vpack.c.bf16 %v5711_v7, %v5710_v11 }
0x1203   : > { %v11556_v33 = vpop.eup %11555  ;;  %11563 = vrcp.f32 %v5681_v45 }
0x1204   : > { %v5685_v59 = vpop.xlane.xlu0 %5684  ;;  %10466 = vmatprep.mubr.bf16.mxu1 %v5724_v49  ;;  %v5713_v13 = vmul.f32 %v11556_v33, %v15147_v4  ;;  %v11558_v28 = vpop.eup %11557 }
0x1205   : > { %11565 = vrcp.f32 %v5685_v59  ;;  %v5715_v49 = vmul.f32 %v11558_v28, %v15103_v34 }
0x1206   : > { %v5683_v37 = vpop.xlane.xlu1 %5682  ;;  %v5725_v36 = vpack.c.bf16 %v5713_v13, %v5712_v56 }
0x1207   : > { %11567 = vrcp.f32 %v5683_v37 }
0x1208   : > { %6659 = vrot.lane.b32.xlu1 %v16948_v43, %s12031_s16  ;;  %10467 = vmatmul.mubr.bf16.gmra.mxu1 %v5725_v36  ;;  %11569 = vrcp.f32 %v5687_v62 }
0x120a   : > { %v5689_v55 = vpop.xlane.xlu1 %5688 }
0x120b   : > { %11571 = vrcp.f32 %v5689_v55  ;;  %v16951_v55 = vld [vmem:[#allocation42_spill] sm:$0xff] }
0x120c   : > { %v11560_v19 = vpop.eup %11559  ;;  %vm16952_vm8 = vnez %v16951_v55 }
0x120d   : > { %v5714_v45 = vmul.f32 %v11560_v19, %v15174_v57  ;;  %v11562_v51 = vpop.eup %11561  ;;  %v15328_v19 = vsel %vm16952_vm8, %v15258_v40, -1e+30 }
0x120e   : > { %v6654_v23 = vpop.permute.xlu1 %6653  ;;  %v5716_v59 = vmul.f32 %v11562_v51, %v15160_v38  ;;  %v16949_v38 = vld [vmem:[#allocation44_spill] sm:$0xff]  ;;  %v6248_v51 = vsub.f32 %v15170_v35, %v15298_v27 }
0x120f   : > { %10603 = vmatmul.mubr.msk.bf16.gmra.mxu0 %vm16931_vm2, %v6654_v23  ;;  %v5726_v33 = vpack.c.bf16 %v5715_v49, %v5714_v45  ;;  %vm16950_vm9 = vnez %v16949_v38  ;;  %v6245_v45 = vsub.f32 %v15144_v60, %v15288_v54 }
0x1210   : > { %v11564_v4 = vpop.eup %11563  ;;  %v6267_v23 = vmul.f32 1.442695, %v6248_v51 }
0x1211   : > { %10470 = vmatprep.mubr.bf16.mxu1 %v5726_v33  ;;  %v5717_v36 = vmul.f32 %v11564_v4, %v15186_v3  ;;  %v15322_v3 = vsel %vm16950_vm9, %v15264_v46, -1e+30  ;;  %v6261_v49 = vmul.f32 1.442695, %v6245_v45  ;;  %v6247_v4 = vsub.f32 %v15158_v22, %v15296_v58 }
0x1212   : > { %v11566_v62 = vpop.eup %11565 }
0x1213   : > { %v5727_v11 = vpack.c.bf16 %v5717_v36, %v5716_v59  ;;  %v5719_v31 = vmul.f32 %v11566_v62, %v15191_v1  ;;  %v11043_v1 = vld [vmem:[#allocation5 + $0x58] sm:$0xff]   ;;  %11573 = vpow2.f32 %v6261_v49  ;;  %v6249_v59 = vsub.f32 %v15181_v53, %v15302_v32 }
0x1214   : > { %v11568_v7 = vpop.eup %11567  ;;  %10478 = vmatprep.subr.bf16.mxu1 %v11043_v1  ;;  %11575 = vpow2.f32 %v6267_v23  ;;  %v6265_v62 = vmul.f32 1.442695, %v6247_v4 }
0x1215   : > { %10471 = vmatmul.mubr.bf16.gmra.mxu1 %v5727_v11  ;;  %v5718_v57 = vmul.f32 %v11568_v7, %v15195_v29  ;;  %v11570_v34 = vpop.eup %11569  ;;  %v11044_v29 = vld [vmem:[#allocation5 + $0x50] sm:$0xff]   ;;  %v6269_v11 = vmul.f32 1.442695, %v6249_v59 }
0x1216   : > { %v5720_v37 = vmul.f32 %v11570_v34, %v15131_v5  ;;  %10479 = vmatpush3.bf16.msra.mxu1 %v11043_v1  ;;  %v6224_v5 = vpop.xlane.xlu0 %6223 }
0x1217   : > { %v5728_v56 = vpack.c.bf16 %v5719_v31, %v5718_v57  ;;  %10480 = vmatprep.subr.bf16.mxu1 %v11044_v29 }
0x1218   : > { %v11572_v13 = vpop.eup %11571 }
0x1219   : > { %10474 = vmatprep.mubr.bf16.mxu1 %v5728_v56  ;;  %v5721_v43 = vmul.f32 %v11572_v13, %v15206_v26 }
0x121a   : > { %10481 = vmatpush3.bf16.msra.mxu1 %v11044_v29  ;;  %v6658_v46 = vpop.permute.xlu0 %6657 }
0x121b   : > { %v5729_v28 = vpack.c.bf16 %v5721_v43, %v5720_v37  ;;  %v6250_v37 = vsub.f32 %v15202_v8, %v6224_v5 }
0x121d   : > { %10475 = vmatmul.mubr.bf16.gmra.mxu1 %v5729_v28 }
0x121e   : > { %6243 = vmax.xlane.f32.xlu0 %v15322_v3 }
0x1220   : > { %v15356_v60 = vpop.eup %11573 }
0x1221   : > { %v15359_v35 = vpop.eup %11575 }
0x122a   : > { %v15371_v58 = vpop.f32.mrf.mxu1 }
0x122c   : > { %6241 = vmax.xlane.f32.xlu1 %v15328_v19  ;;  %v15373_v32 = vpop.f32.mrf.mxu1 }
0x122e   : > { %v15377_v31 = vpop.f32.mrf.mxu1 }
0x1230   : > { %v15382_v43 = vpop.f32.mrf.mxu1 }
0x1231   : > { %16954 = vst [vmem:[#allocation36_spill] sm:$0xff] %v15382_v43 }
0x1234   : > { %6377 = vrot.lane.b32.xlu0 %v14586_v14, %s12030_s25 }
0x1238   : > { %6375 = vrot.lane.b32.xlu0 %v14605_v21, %s12030_s25 }
0x123c   : > { %6371 = vrot.lane.b32.xlu0 %v14637_v12, %s12030_s25 }
0x123d   : > { %6379 = vrot.lane.b32.xlu1 %v14577_v42, %s12030_s25  ;;  %v6228_v53 = vpop.xlane.xlu0 %6227 }
0x123e   : > { %v6252_v34 = vsub.f32 %v15234_v41, %v6228_v53 }
0x123f   : > { %v6216_v26 = vpop.xlane.xlu1 %6215 }
0x1240   : > { %6367 = vrot.lane.b32.xlu0 %v14671_v25, %s12030_s25  ;;  %v6246_v33 = vsub.f32 %v15240_v50, %v6216_v26  ;;  %v6275_v1 = vmul.f32 1.442695, %v6252_v34 }
0x1241   : > { %6373 = vrot.lane.b32.xlu1 %v14625_v39, %s12030_s25  ;;  %v6236_v27 = vpop.xlane.xlu0 %6235 }
0x1242   : > { %v6263_v36 = vmul.f32 1.442695, %v6246_v33  ;;  %v6256_v59 = vsub.f32 %v15245_v18, %v6236_v27 }
0x1243   : > { %v6656_v40 = vpop.permute.xlu1 %6655 }
0x1244   : > { %10606 = vmatprep.mubr.msk.bf16.mxu0 %vm16953_vm4, %v6656_v40  ;;  %11577 = vpow2.f32 %v6263_v36  ;;  %v6271_v40 = vmul.f32 1.442695, %v6250_v37  ;;  %vm16955_vm4 = vmmov %vm16931_vm2  ;;  %v6283_v53 = vmul.f32 1.442695, %v6256_v59 }
0x1245   : > { %6369 = vrot.lane.b32.xlu1 %v14655_v63, %s12030_s25  ;;  %10607 = vmatmul.mubr.msk.bf16.gmra.mxu0 %vm16931_vm2, %v6658_v46  ;;  %11579 = vpow2.f32 %v6265_v62 }
0x1246   : > { %11581 = vpow2.f32 %v6269_v11 }
0x1251   : > { %v15362_v50 = vpop.eup %11577 }
0x1252   : > { %v15365_v22 = vpop.eup %11579 }
0x1253   : > { %v15368_v54 = vpop.eup %11581 }
0x125f   : > { %6293 = vadd.xlane.f32.xlu0 %v15356_v60 }
0x1263   : > { %6299 = vadd.xlane.f32.xlu0 %v15359_v35 }
0x1267   : > { %6295 = vadd.xlane.f32.xlu0 %v15362_v50 }
0x1269   : > { %6297 = vadd.xlane.f32.xlu1 %v15365_v22 }
0x126b   : > { %6301 = vadd.xlane.f32.xlu0 %v15368_v54 }
0x126d   : > { %v15384_v26 = vpop.f32.mrf.mxu1 }
0x126e   : > { %v15375_v7 = vpop.xlane.xlu0 %6237 }
0x126f   : > { %v15388_v49 = vpop.f32.mrf.mxu1 }
0x1271   : > { %v15392_v33 = vpop.f32.mrf.mxu1 }
0x1272   : > { %v6240_v29 = vpop.xlane.xlu0 %6239 }
0x1273   : > { %v6258_v46 = vsub.f32 %v15269_v6, %v6240_v29  ;;  %v15398_v11 = vpop.f32.mrf.mxu1 }
0x1274   : > { %v6226_v57 = vpop.xlane.xlu1 %6225  ;;  %16956 = vst [vmem:[#allocation38_spill] sm:$0xff] %v15398_v11 }
0x1275   : > { %v6251_v56 = vsub.f32 %v15275_v44, %v6226_v57  ;;  %v6287_v8 = vmul.f32 1.442695, %v6258_v46 }
0x1276   : > { %v6662_v36 = vpop.permute.xlu0 %6661 }
0x1277   : > { %v6273_v13 = vmul.f32 1.442695, %v6251_v56 }
0x1278   : > { %v6230_v28 = vpop.xlane.xlu1 %6229 }
0x1279   : > { %11583 = vpow2.f32 %v6273_v13  ;;  %v6253_v51 = vsub.f32 %v15280_v61, %v6230_v28  ;;  %v16957_v61 = vmov 0  }
0x127a   : > { %11585 = vpow2.f32 %v6275_v1 }
0x127b   : > { %11587 = vpow2.f32 %v6271_v40 }
0x127c   : > { %v6232_v45 = vpop.xlane.xlu1 %6231 }
0x127d   : > { %v6254_v41 = vsub.f32 %v15285_v52, %v6232_v45  ;;  %v6277_v52 = vmul.f32 1.442695, %v6253_v51 }
0x127f   : > { %v6279_v44 = vmul.f32 1.442695, %v6254_v41 }
0x1280   : > { %v6234_v5 = vpop.xlane.xlu1 %6233 }
0x1281   : > { %11589 = vpow2.f32 %v6279_v44  ;;  %v6255_v23 = vsub.f32 %v15293_v15, %v6234_v5  ;;  %v15403_v15 = vpop.f32.mrf.mxu1 }
0x1282   : > { %11591 = vpow2.f32 %v6287_v8 }
0x1283   : > { %v6281_v4 = vmul.f32 1.442695, %v6255_v23  ;;  %v15408_v27 = vpop.f32.mrf.mxu1 }
0x1284   : > { %v6660_v6 = vpop.permute.xlu1 %6659 }
0x1285   : > { %11593 = vpow2.f32 %v6281_v4  ;;  %10610 = vmatprep.mubr.msk.bf16.mxu0 %vm16955_vm4, %v6660_v6  ;;  %v15416_v56 = vpop.f32.mrf.mxu1  ;;  %vm16960_vm4 = vmmov %vm16931_vm2 }
0x1286   : > { %v15396_v62 = vpop.eup %11583  ;;  %10611 = vmatmul.mubr.msk.bf16.gmra.mxu0 %vm16931_vm2, %v6662_v36  ;;  %11595 = vpow2.f32 %v6277_v52  ;;  %v6257_v36 = vsub.f32 %v15262_v30, %v15375_v7 }
0x1287   : > { %6305 = vadd.xlane.f32.xlu1 %v15396_v62  ;;  %7658 = vmatprep.mubr.bf16.mxu0 %v16957_v61  ;;  %v15405_v18 = vpop.eup %11585  ;;  %11597 = vpow2.f32 %v6283_v53  ;;  %v15424_v28 = vpop.f32.mrf.mxu1 }
0x1288   : > { %v15410_v57 = vpop.eup %11587  ;;  %16958 = vst [vmem:[#allocation19_spill] sm:$0xff] %v15424_v28  ;;  %v6285_v43 = vmul.f32 1.442695, %v6257_v36 }
0x128b   : > { %6307 = vadd.xlane.f32.xlu1 %v15405_v18 }
0x128d   : > { %v15428_v29 = vpop.f32.mrf.mxu1 }
0x128e   : > { %v15412_v34 = vpop.eup %11589 }
0x128f   : > { %6303 = vadd.xlane.f32.xlu1 %v15410_v57  ;;  %6311 = vadd.xlane.f32.xlu0 %v15412_v34  ;;  %v15418_v13 = vpop.eup %11591  ;;  %v15433_v46 = vpop.f32.mrf.mxu1 }
0x1291   : > { %v15436_v45 = vpop.f32.mrf.mxu1 }
0x1292   : > { %v15420_v37 = vpop.eup %11593 }
0x1293   : > { %6319 = vadd.xlane.f32.xlu0 %v15418_v13  ;;  %6313 = vadd.xlane.f32.xlu1 %v15420_v37  ;;  %v15426_v1 = vpop.eup %11595  ;;  %v15438_v41 = vpop.f32.mrf.mxu1 }
0x1294   : > { %v15431_v40 = vpop.eup %11597  ;;  %16959 = vst [vmem:[#allocation52_spill] sm:$0xff] %v15438_v41 }
0x1297   : > { %6309 = vadd.xlane.f32.xlu1 %v15426_v1 }
0x129b   : > { %6315 = vadd.xlane.f32.xlu1 %v15431_v40 }
0x12a4   : > { %v10464_v44 = vpop.f32.mrf.mxu1 }
0x12a6   : > { %v5796_v8 = vpop.f32.mrf.mxu1 }
0x12a7   : > { %v6244_v6 = vpop.xlane.xlu0 %6243 }
0x12a8   : > { %v10465_v5 = vpop.f32.mrf.mxu1  ;;  %v6260_v41 = vsub.f32 %v15322_v3, %v6244_v6 }
0x12a9   : > { %6365 = vrot.lane.b32.xlu0 %v14689_v10, %s12030_s25  ;;  %v5860_v4 = vpack.c.bf16 %v10465_v5, %v10464_v44  ;;  %v10600_v5 = vpop.f32.mrf.mxu0  ;;  %s9387_s25 = sshll.u32 %s12106_s15, 9  ;;  %s12032_s15 = smov [#allocation13]  }
0x12aa   : > { %v5799_v51 = vpop.f32.mrf.mxu1  ;;  %v6291_v44 = vmul.f32 1.442695, %v6260_v41  ;;  %s16421_s19 = scalar_lea.hbm %s16473_s9, %s9387_s25  ;;  %s11944_s23 = sshll.u32 %s12032_s15, 4  ;;  %s11945_s23 = int_to_ptr.vmem [resolvable:$false] %s11944_s23 }
0x12ab   : > { %v5859_v23 = vpack.c.bf16 %v5799_v51, %v5796_v8  ;;  %v6378_v61 = vpop.permute.xlu0 %6377  ;;  %s11946_s4 = scalar_lea.vmem %s11945_s23, 1024  ;;  %p11947_p12 = scmp.lt.s32.totalorder %s16416_s28, %s11945_s23 }
0x12ac   : > { %p11948_p3 = scmp.lt.s32.totalorder %s11946_s4, %s11940_s2 }
0x12ad   : > { %10482 = vmatprep.mubr.msk.bf16.mxu1 %vm16960_vm4, %v5859_v23  ;;  %vm16961_vm4 = vmmov %vm16931_vm2 }
0x12ae   : > { %10483 = vmatmul.mubr.msk.bf16.vlgmr.msra.gmra.mxu1 %vm16931_vm2, %v5860_v4  ;;  %p11949_p1 = por %p11948_p3, %p11947_p12 }
0x12af   : > { %v6376_v8 = vpop.permute.xlu0 %6375 }
0x12b0   : > { %p11950_p5 = pnand %p11949_p1, %p11943_p9 }
0x12b3   : > { %v6372_v51 = vpop.permute.xlu0 %6371 }
0x12b5   : > { %v6242_v59 = vpop.xlane.xlu1 %6241 }
0x12b6   : > { %v6259_v52 = vsub.f32 %v15328_v19, %v6242_v59  ;;  %v6761_v19 = vpop.f32.mrf.mxu0 }
0x12b7   : > { %v6368_v36 = vpop.permute.xlu0 %6367 }
0x12b8   : > { %v6289_v53 = vmul.f32 1.442695, %v6259_v52 }
0x12b9   : > { %v6380_v11 = vpop.permute.xlu1 %6379 }
0x12ba   : > { %11599 = vpow2.f32 %v6289_v53  ;;  %10530 = vmatprep.subr.bf16.mxu1 %v6380_v11 }
0x12bb   : > { %10531 = vmatpush3.bf16.msra.mxu1 %v6380_v11  ;;  %11601 = vpow2.f32 %v6285_v43  ;;  %v10601_v11 = vpop.f32.mrf.mxu0 }
0x12bc   : > { %10532 = vmatprep.subr.bf16.mxu1 %v6378_v61  ;;  %11603 = vpow2.f32 %v6291_v44 }
0x12bd   : > { %v6374_v30 = vpop.permute.xlu1 %6373  ;;  %v6764_v4 = vpop.f32.mrf.mxu0 }
0x12bf   : > { %10533 = vmatpush3.bf16.msra.mxu1 %v6378_v61 }
0x12c0   : > { %10534 = vmatprep.subr.bf16.mxu1 %v6376_v8 }
0x12c1   : > { %v6370_v61 = vpop.permute.xlu1 %6369 }
0x12c3   : > { %10535 = vmatpush3.bf16.msra.mxu1 %v6376_v8 }
0x12c4   : > { %10536 = vmatprep.subr.bf16.mxu1 %v6374_v30 }
0x12c7   : > { %v15448_v7 = vpop.eup %11599  ;;  %10537 = vmatpush3.bf16.msra.mxu1 %v6374_v30  ;;  %v15461_v30 = vsel %vm16769_vm6, %v6761_v19, -1e+30  ;;  %v15476_v19 = vsel %vm12636_vm1, %v10600_v5, -1e+30  ;;  %vm16962_vm6 = vmmov %vm16931_vm2  ;;  %vm16965_vm1 = vnez %v16872_v24 }
0x12c8   : > { %6321 = vadd.xlane.f32.xlu1 %v15448_v7  ;;  %10538 = vmatprep.subr.bf16.mxu1 %v6372_v51  ;;  %v10468_v3 = vpop.f32.mrf.mxu1  ;;  %v15451_v41 = vpop.eup %11601 }
0x12c9   : > { %v15454_v59 = vpop.eup %11603 }
0x12ca   : > { %v5812_v43 = vpop.f32.mrf.mxu1 }
0x12cb   : > { %10539 = vmatpush3.bf16.msra.mxu1 %v6372_v51 }
0x12cc   : > { %6317 = vadd.xlane.f32.xlu1 %v15451_v41  ;;  %10540 = vmatprep.subr.bf16.mxu1 %v6370_v61  ;;  %v10469_v23 = vpop.f32.mrf.mxu1 }
0x12cd   : > { %v5862_v44 = vpack.c.bf16 %v10469_v23, %v10468_v3  ;;  %v15470_v23 = vsel %vm16869_vm10, %v6764_v4, -1e+30  ;;  %vm16963_vm10 = vnez %v16659_v17 }
0x12ce   : > { %v5815_v6 = vpop.f32.mrf.mxu1  ;;  %v15482_v9 = vsel %vm16963_vm10, %v10601_v11, -1e+30 }
0x12cf   : > { %v5861_v52 = vpack.c.bf16 %v5815_v6, %v5812_v43  ;;  %10541 = vmatpush3.bf16.msra.mxu1 %v6370_v61  ;;  %v10604_v53 = vpop.f32.mrf.mxu0 }
0x12d0   : > { %6323 = vadd.xlane.f32.xlu1 %v15454_v59  ;;  %10542 = vmatprep.subr.bf16.mxu1 %v6368_v36  ;;  %v15494_v17 = vsel %vm16905_vm0, %v10604_v53, -1e+30  ;;  %vm16977_vm0 = vmmov %vm16931_vm2 }
0x12d1   : > { %v6777_v8 = vpop.f32.mrf.mxu0  ;;  %10486 = vmatprep.mubr.msk.bf16.mxu1 %vm16961_vm4, %v5861_v52  ;;  %vm16966_vm4 = vmmov %vm16931_vm2 }
0x12d2   : > { %10487 = vmatmul.mubr.msk.bf16.gmra.mxu1 %vm16931_vm2, %v5862_v44  ;;  %v15488_v5 = vsel %vm16965_vm1, %v6777_v8, -1e+30  ;;  %vm16985_vm10 = vmmov %vm16977_vm0 }
0x12d3   : > { %10543 = vmatpush3.bf16.msra.mxu1 %v6368_v36  ;;  %v10605_v51 = vpop.f32.mrf.mxu0  ;;  %vm16987_vm1 = vmmov %vm16977_vm0 }
0x12d4   : > { %6840 = vmax.xlane.f32.xlu1 %v15461_v30  ;;  %v15500_v24 = vsel %vm16704_vm7, %v10605_v51, -1e+30  ;;  %vm16972_vm7 = vmmov %vm16931_vm2 }
0x12d5   : > { %v10472_v43 = vpop.f32.mrf.mxu1  ;;  %v6780_v61 = vpop.f32.mrf.mxu0 }
0x12d6   : > { %v15466_v3 = vsel %vm16874_vm13, %v6780_v61, -1e+30  ;;  %vm16964_vm13 = vmmov %vm16931_vm2 }
0x12d7   : > { %v5828_v6 = vpop.f32.mrf.mxu1  ;;  %6850 = vmax.xlane.f32.xlu0 %v15466_v3 }
0x12d8   : > { %6842 = vmax.xlane.f32.xlu1 %v15470_v23 }
0x12d9   : > { %v10473_v0 = vpop.f32.mrf.mxu1 }
0x12da   : > { %v5864_v48 = vpack.c.bf16 %v10473_v0, %v10472_v43 }
0x12db   : > { %v5831_v36 = vpop.f32.mrf.mxu1 }
0x12dc   : > { %v5863_v52 = vpack.c.bf16 %v5831_v36, %v5828_v6  ;;  %6844 = vmax.xlane.f32.xlu1 %v15476_v19 }
0x12dd   : > { %v10476_v44 = vpop.f32.mrf.mxu1 }
0x12de   : > { %10490 = vmatprep.mubr.msk.bf16.mxu1 %vm16962_vm6, %v5863_v52  ;;  %vm16984_vm6 = vmmov %vm16977_vm0 }
0x12df   : > { %v5844_v4 = vpop.f32.mrf.mxu1  ;;  %10491 = vmatmul.mubr.msk.bf16.gmra.mxu1 %vm16964_vm13, %v5864_v48  ;;  %vm16986_vm13 = vmmov %vm16977_vm0 }
0x12e0   : > { %6846 = vmax.xlane.f32.xlu1 %v15482_v9 }
0x12e1   : > { %v10477_v16 = vpop.f32.mrf.mxu1 }
0x12e2   : > { %v5866_v43 = vpack.c.bf16 %v10477_v16, %v10476_v44 }
0x12e3   : > { %v5847_v61 = vpop.f32.mrf.mxu1 }
0x12e4   : > { %v5865_v6 = vpack.c.bf16 %v5847_v61, %v5844_v4  ;;  %6848 = vmax.xlane.f32.xlu1 %v15488_v5 }
0x12e6   : > { %10494 = vmatprep.mubr.msk.bf16.mxu1 %vm16966_vm4, %v5865_v6  ;;  %vm16988_vm4 = vmmov %vm16977_vm0 }
0x12e7   : > { %10495 = vmatmul.mubr.msk.bf16.gmra.mxu1 %vm16931_vm2, %v5866_v43 }
0x12e8   : > { %6852 = vmax.xlane.f32.xlu1 %v15494_v17  ;;  %v6294_v11 = vpop.xlane.xlu0 %6293 }
0x12e9   : > { %11605 = vrcp.f32 %v6294_v11 }
0x12ec   : > { %6854 = vmax.xlane.f32.xlu1 %v15500_v24  ;;  %v6300_v8 = vpop.xlane.xlu0 %6299 }
0x12f0   : > { %v6296_v0 = vpop.xlane.xlu0 %6295 }
0x12f1   : > { %11607 = vrcp.f32 %v6296_v0 }
0x12f2   : > { %v6298_v61 = vpop.xlane.xlu1 %6297 }
0x12f3   : > { %11609 = vrcp.f32 %v6298_v61 }
0x12f4   : > { %11611 = vrcp.f32 %v6300_v8  ;;  %v6302_v20 = vpop.xlane.xlu0 %6301 }
0x12f6   : > { %v11606_v36 = vpop.eup %11605 }
0x12f7   : > { %v6341_v47 = vmul.f32 %v11606_v36, %v15356_v60 }
0x12fe   : > { %v11608_v52 = vpop.eup %11607 }
0x12ff   : > { %v6342_v53 = vmul.f32 %v11608_v52, %v15362_v50 }
0x1301   : > { %v6357_v48 = vpack.c.bf16 %v6342_v53, %v6341_v47 }
0x1303   : > { %10546 = vmatprep.mubr.bf16.mxu1 %v6357_v48  ;;  %v11610_v48 = vpop.eup %11609 }
0x1304   : > { %v11612_v8 = vpop.eup %11611 }
0x1305   : > { %v10608_v44 = vpop.f32.mrf.mxu0 }
0x1306   : > { %v15517_v50 = vsel %vm16946_vm12, %v10608_v44, -1e+30  ;;  %vm16979_vm12 = vmmov %vm16977_vm0 }
0x1307   : > { %v6793_v4 = vpop.f32.mrf.mxu0 }
0x1308   : > { %v15507_v2 = vsel %vm16877_vm14, %v6793_v4, -1e+30  ;;  %vm16973_vm14 = vmmov %vm16931_vm2 }
0x1309   : > { %v10609_v51 = vpop.f32.mrf.mxu0  ;;  %6856 = vmax.xlane.f32.xlu1 %v15507_v2 }
0x130a   : > { %v15522_v36 = vsel %vm16902_vm5, %v10609_v51, -1e+30  ;;  %v6344_v51 = vmul.f32 %v11612_v8, %v15359_v35  ;;  %vm16974_vm5 = vmmov %vm16931_vm2 }
0x130b   : > { %v6796_v16 = vpop.f32.mrf.mxu0 }
0x130c   : > { %v15512_v43 = vsel %vm16944_vm11, %v6796_v16, -1e+30  ;;  %v6343_v16 = vmul.f32 %v11610_v48, %v15365_v22  ;;  %vm16978_vm11 = vmmov %vm16977_vm0 }
0x130d   : > { %6858 = vmax.xlane.f32.xlu1 %v15512_v43 }
0x130e   : > { %v6358_v60 = vpack.c.bf16 %v6344_v51, %v6343_v16 }
0x1310   : > { %v6306_v11 = vpop.xlane.xlu1 %6305 }
0x1311   : > { %6860 = vmax.xlane.f32.xlu1 %v15517_v50 }
0x1314   : > { %v6308_v52 = vpop.xlane.xlu1 %6307 }
0x1315   : > { %6862 = vmax.xlane.f32.xlu1 %v15522_v36  ;;  %11613 = vrcp.f32 %v6308_v52 }
0x1316   : > { %11615 = vrcp.f32 %v6302_v20 }
0x1317   : > { %11617 = vrcp.f32 %v6306_v11 }
0x1318   : > { %v6312_v47 = vpop.xlane.xlu0 %6311  ;;  %v6304_v53 = vpop.xlane.xlu1 %6303 }
0x1319   : > { %11619 = vrcp.f32 %v6304_v53 }
0x131a   : > { %11621 = vrcp.f32 %v6312_v47 }
0x131c   : > { %v6320_v44 = vpop.xlane.xlu0 %6319  ;;  %v6314_v4 = vpop.xlane.xlu1 %6313 }
0x1320   : > { %v6366_v61 = vpop.permute.xlu0 %6365  ;;  %v6310_v6 = vpop.xlane.xlu1 %6309 }
0x1321   : > { %11623 = vrcp.f32 %v6310_v6  ;;  %10544 = vmatprep.subr.bf16.mxu1 %v6366_v61 }
0x1322   : > { %10545 = vmatpush3.bf16.msra.mxu1 %v6366_v61  ;;  %11625 = vrcp.f32 %v6314_v4  ;;  %v11614_v20 = vpop.eup %11613 }
0x1323   : > { %v11616_v11 = vpop.eup %11615  ;;  %v6348_v28 = vmul.f32 %v11614_v20, %v15405_v18 }
0x1324   : > { %v6316_v0 = vpop.xlane.xlu1 %6315  ;;  %v11618_v52 = vpop.eup %11617  ;;  %v6345_v22 = vmul.f32 %v11616_v11, %v15368_v54 }
0x1325   : > { %11627 = vrcp.f32 %v6316_v0  ;;  %10547 = vmatmul.mubr.bf16.vlgmr.msra.gmra.mxu1 %v6358_v60  ;;  %v6347_v35 = vmul.f32 %v11618_v52, %v15396_v62 }
0x1326   : > { %v11620_v53 = vpop.eup %11619  ;;  %11629 = vrcp.f32 %v6320_v44 }
0x1327   : > { %v6346_v47 = vmul.f32 %v11620_v53, %v15410_v57  ;;  %v6360_v8 = vpack.c.bf16 %v6348_v28, %v6347_v35  ;;  %v11622_v61 = vpop.eup %11621 }
0x1328   : > { %v6350_v6 = vmul.f32 %v11622_v61, %v15412_v34 }
0x1329   : > { %v6359_v48 = vpack.c.bf16 %v6346_v47, %v6345_v22  ;;  %v11046_v47 = vld [vmem:[#allocation5 + $0x60] sm:$0xff]  }
0x132b   : > { %10550 = vmatprep.mubr.bf16.mxu1 %v6359_v48 }
0x132d   : > { %10551 = vmatmul.mubr.bf16.gmra.mxu1 %v6360_v8 }
0x132e   : > { %v11624_v4 = vpop.eup %11623 }
0x132f   : > { %v6349_v16 = vmul.f32 %v11624_v4, %v15426_v1  ;;  %v11626_v51 = vpop.eup %11625 }
0x1330   : > { %v6351_v54 = vmul.f32 %v11626_v51, %v15420_v37  ;;  %v11045_v37 = vld [vmem:[#allocation5 + $0x68] sm:$0xff]  }
0x1331   : > { %v6361_v60 = vpack.c.bf16 %v6350_v6, %v6349_v16  ;;  %10562 = vmatprep.subr.bf16.mxu1 %v11045_v37 }
0x1332   : > { %v11628_v0 = vpop.eup %11627  ;;  %10563 = vmatpush3.bf16.msra.mxu1 %v11045_v37 }
0x1333   : > { %10554 = vmatprep.mubr.bf16.mxu1 %v6361_v60  ;;  %v6352_v18 = vmul.f32 %v11628_v0, %v15431_v40  ;;  %10564 = vmatprep.subr.bf16.mxu1 %v11046_v47  ;;  %v11630_v61 = vpop.eup %11629 }
0x1334   : > { %v6354_v16 = vmul.f32 %v11630_v61, %v15418_v13 }
0x1335   : > { %v6362_v57 = vpack.c.bf16 %v6352_v18, %v6351_v54  ;;  %v15569_v54 = vld [vmem:[#allocation10 + $0x7] ss:$0 sm:$0xff] }
0x1336   : > { %10565 = vmatpush3.bf16.msra.mxu1 %v11046_v47 }
0x1337   : > { %10555 = vmatmul.mubr.bf16.gmra.mxu1 %v6362_v57 }
0x1346   : > { %v10612_v62 = vpop.f32.mrf.mxu0 }
0x1347   : > { %v15537_v28 = vsel %vm16952_vm8, %v10612_v62, -1e+30  ;;  %vm16983_vm8 = vmmov %vm16977_vm0 }
0x1348   : > { %6868 = vmax.xlane.f32.xlu0 %v15537_v28  ;;  %v6809_v1 = vpop.f32.mrf.mxu0 }
0x1349   : > { %v15542_v34 = vsel %vm16903_vm15, %v6809_v1, -1e+30  ;;  %vm16975_vm15 = vmmov %vm16931_vm2 }
0x134a   : > { %v10613_v11 = vpop.f32.mrf.mxu0  ;;  %6864 = vmax.xlane.f32.xlu1 %v15542_v34 }
0x134b   : > { %v15552_v55 = vsel %vm16950_vm9, %v10613_v11, -1e+30  ;;  %vm16982_vm9 = vmmov %vm16977_vm0 }
0x134c   : > { %v6812_v52 = vpop.f32.mrf.mxu0 }
0x134d   : > { %v15547_v53 = vsel %vm16904_vm3, %v6812_v52, -1e+30  ;;  %vm16976_vm3 = vmmov %vm16931_vm2 }
0x134e   : > { %6866 = vmax.xlane.f32.xlu1 %v15547_v53  ;;  %vm16989_vm2 = vmmov %vm16977_vm0 }
0x1351   : > { %v6322_v22 = vpop.xlane.xlu1 %6321 }
0x1352   : > { %6870 = vmax.xlane.f32.xlu1 %v15552_v55 }
0x1355   : > { %v6318_v35 = vpop.xlane.xlu1 %6317 }
0x1356   : > { %11631 = vrcp.f32 %v6318_v35 }
0x1357   : > { %11633 = vrcp.f32 %v6322_v22 }
0x1359   : > { %v6324_v48 = vpop.xlane.xlu1 %6323 }
0x135a   : > { %11635 = vrcp.f32 %v6324_v48 }
0x135d   : > { %v6841_v8 = vpop.xlane.xlu1 %6840 }
0x135e   : > { %7006 = vrot.lane.b32.xlu0 %v14577_v42, %s12031_s16  ;;  %v6872_v40 = vsub.f32 %v15461_v30, %v6841_v8 }
0x1360   : > { %v6888_v35 = vmul.f32 1.442695, %v6872_v40 }
0x1361   : > { %v6843_v38 = vpop.xlane.xlu1 %6842 }
0x1362   : > { %7002 = vrot.lane.b32.xlu0 %v14605_v21, %s12031_s16 }
0x1363   : > { %v11632_v4 = vpop.eup %11631  ;;  %7004 = vrot.lane.b32.xlu1 %v14586_v14, %s12031_s16 }
0x1364   : > { %v6353_v44 = vmul.f32 %v11632_v4, %v15451_v41  ;;  %v11634_v6 = vpop.eup %11633 }
0x1365   : > { %v6845_v51 = vpop.xlane.xlu1 %6844  ;;  %v6355_v21 = vmul.f32 %v11634_v6, %v15448_v7 }
0x1366   : > { %7000 = vrot.lane.b32.xlu0 %v14625_v39, %s12031_s16  ;;  %v6363_v60 = vpack.c.bf16 %v6354_v16, %v6353_v44  ;;  %v5355_v39 = vadd.f32 %v15371_v58, %v15569_v54  ;;  %v6874_v58 = vsub.f32 %v15476_v19, %v6845_v51  ;;  %v6873_v19 = vsub.f32 %v15470_v23, %v6843_v38 }
0x1367   : > { %v11636_v42 = vpop.eup %11635  ;;  %6996 = vrot.lane.b32.xlu1 %v14655_v63, %s12031_s16  ;;  %v5353_v63 = vadd.f32 %v15569_v54, %v15373_v32  ;;  %v5359_v16 = vadd.f32 %v15384_v26, %v15569_v54 }
0x1368   : > { %10558 = vmatprep.mubr.bf16.mxu1 %v6363_v60  ;;  %v6356_v0 = vmul.f32 %v11636_v42, %v15454_v59  ;;  %v5356_v59 = vadd.f32 %v15377_v31, %v15569_v54  ;;  %v6892_v22 = vmul.f32 1.442695, %v6874_v58  ;;  %v6890_v30 = vmul.f32 1.442695, %v6873_v19 }
0x1369   : > { %v6847_v14 = vpop.xlane.xlu1 %6846  ;;  %v5357_v60 = vadd.f32 %v15569_v54, %v15388_v49 }
0x136a   : > { %6998 = vrot.lane.b32.xlu0 %v14637_v12, %s12031_s16  ;;  %v6364_v13 = vpack.c.bf16 %v6356_v0, %v6355_v21  ;;  %v6875_v48 = vsub.f32 %v15482_v9, %v6847_v14  ;;  %v5360_v0 = vadd.f32 %v15392_v33, %v15569_v54  ;;  %v5361_v33 = vadd.f32 %v15569_v54, %v15408_v27 }
0x136b   : > { %v5365_v27 = vadd.f32 %v15569_v54, %v15433_v46 }
0x136c   : > { %10559 = vmatmul.mubr.bf16.gmra.mxu1 %v6364_v13  ;;  %v6894_v61 = vmul.f32 1.442695, %v6875_v48 }
0x136d   : > { %v6849_v41 = vpop.xlane.xlu1 %6848 }
0x136e   : > { %v10484_v18 = vpop.f32.mrf.mxu1  ;;  %v6876_v37 = vsub.f32 %v15488_v5, %v6849_v41  ;;  %v6851_v5 = vpop.xlane.xlu0 %6850 }
0x136f   : > { %v15577_v57 = vadd.f32 %v10484_v18, %v5355_v39  ;;  %v6877_v4 = vsub.f32 %v15466_v3, %v6851_v5  ;;  %v5363_v18 = vadd.f32 %v15403_v15, %v15569_v54  ;;  %v5367_v15 = vadd.f32 %v15428_v29, %v15569_v54 }
0x1370   : > { %v5941_v7 = vpop.f32.mrf.mxu1  ;;  %v6896_v47 = vmul.f32 1.442695, %v6876_v37 }
0x1371   : > { %v15581_v62 = vadd.f32 %v5941_v7, %v5353_v63  ;;  %v6853_v1 = vpop.xlane.xlu1 %6852  ;;  %v6898_v44 = vmul.f32 1.442695, %v6877_v4 }
0x1372   : > { %v10485_v12 = vpop.f32.mrf.mxu1  ;;  %v6878_v20 = vsub.f32 %v15494_v17, %v6853_v1  ;;  %v5364_v1 = vadd.f32 %v15416_v56, %v15569_v54 }
0x1373   : > { %v15584_v11 = vadd.f32 %v10485_v12, %v5356_v59 }
0x1374   : > { %v6900_v52 = vmul.f32 1.442695, %v6878_v20  ;;  %v15607_v38 = vpop.f32.mrf.mxu1 }
0x1375   : > { %v6855_v32 = vpop.xlane.xlu1 %6854 }
0x1376   : > { %11637 = vpow2.f32 %v6900_v52  ;;  %v6879_v31 = vsub.f32 %v15500_v24, %v6855_v32 }
0x1377   : > { %11639 = vpow2.f32 %v6892_v22  ;;  %v5368_v22 = vadd.f32 %v15436_v45, %v15569_v54 }
0x1378   : > { %11641 = vpow2.f32 %v6896_v47  ;;  %v6902_v17 = vmul.f32 1.442695, %v6879_v31 }
0x1379   : > { %11643 = vpow2.f32 %v6888_v35 }
0x137a   : > { %11645 = vpow2.f32 %v6902_v17 }
0x137b   : > { %11647 = vpow2.f32 %v6894_v61 }
0x137c   : > { %11649 = vpow2.f32 %v6890_v30 }
0x137d   : > { %11651 = vpow2.f32 %v6898_v44 }
0x1383   : > { %v15593_v8 = vpop.eup %11637 }
0x1384   : > { %v15596_v24 = vpop.eup %11639 }
0x1385   : > { %v15599_v9 = vpop.eup %11641 }
0x1386   : > { %v15602_v23 = vpop.eup %11643 }
0x1387   : > { %v15605_v3 = vpop.eup %11645 }
0x1388   : > { %v15612_v6 = vpop.eup %11647 }
0x1389   : > { %6932 = vadd.xlane.f32.xlu0 %v15593_v8  ;;  %v15623_v13 = vpop.eup %11649 }
0x138a   : > { %v15628_v41 = vpop.eup %11651 }
0x138b   : > { %6924 = vadd.xlane.f32.xlu1 %v15596_v24 }
0x138d   : > { %6928 = vadd.xlane.f32.xlu0 %v15599_v9 }
0x138f   : > { %6920 = vadd.xlane.f32.xlu1 %v15602_v23 }
0x1391   : > { %6934 = vadd.xlane.f32.xlu0 %v15605_v3 }
0x1392   : > { %v10488_v51 = vpop.f32.mrf.mxu1  ;;  %v6857_v37 = vpop.xlane.xlu1 %6856 }
0x1393   : > { %v15616_v42 = vadd.f32 %v10488_v51, %v5359_v16  ;;  %6926 = vadd.xlane.f32.xlu1 %v15612_v6  ;;  %v6880_v61 = vsub.f32 %v15507_v2, %v6857_v37 }
0x1394   : > { %v5957_v21 = vpop.f32.mrf.mxu1 }
0x1395   : > { %v15621_v14 = vadd.f32 %v5957_v21, %v5357_v60  ;;  %v6904_v5 = vmul.f32 1.442695, %v6880_v61 }
0x1396   : > { %v10489_v26 = vpop.f32.mrf.mxu1  ;;  %v6859_v31 = vpop.xlane.xlu1 %6858 }
0x1397   : > { %v15625_v39 = vadd.f32 %v10489_v26, %v5360_v0  ;;  %6922 = vadd.xlane.f32.xlu1 %v15623_v13 }
0x1398   : > { %v15631_v49 = vpop.f32.mrf.mxu1 }
0x139a   : > { %v6861_v29 = vpop.xlane.xlu1 %6860 }
0x139b   : > { %6930 = vadd.xlane.f32.xlu1 %v15628_v41  ;;  %v6882_v46 = vsub.f32 %v15517_v50, %v6861_v29 }
0x139d   : > { %v6908_v19 = vmul.f32 1.442695, %v6882_v46 }
0x139e   : > { %v6863_v45 = vpop.xlane.xlu1 %6862 }
0x139f   : > { %v10492_v63 = vpop.f32.mrf.mxu1  ;;  %v6883_v4 = vsub.f32 %v15522_v36, %v6863_v45 }
0x13a0   : > { %v15637_v7 = vadd.f32 %v10492_v63, %v5363_v18 }
0x13a1   : > { %v5973_v59 = vpop.f32.mrf.mxu1  ;;  %v6910_v30 = vmul.f32 1.442695, %v6883_v4 }
0x13a2   : > { %v15641_v12 = vadd.f32 %v5973_v59, %v5361_v33 }
0x13a3   : > { %v10493_v20 = vpop.f32.mrf.mxu1 }
0x13a4   : > { %v15643_v58 = vadd.f32 %v10493_v20, %v5364_v1 }
0x13a5   : > { %v15645_v52 = vpop.f32.mrf.mxu1 }
0x13a7   : > { %v10496_v32 = vpop.f32.mrf.mxu1  ;;  %6994 = vrot.lane.b32.xlu0 %v14671_v25, %s12031_s16  ;;  %v6881_v25 = vsub.f32 %v15512_v43, %v6859_v31 }
0x13a8   : > { %v15653_v40 = vadd.f32 %v10496_v32, %v5367_v15 }
0x13a9   : > { %v5989_v56 = vpop.f32.mrf.mxu1  ;;  %v6906_v17 = vmul.f32 1.442695, %v6881_v25 }
0x13aa   : > { %v15657_v47 = vadd.f32 %v5989_v56, %v5365_v27 }
0x13ab   : > { %v10497_v35 = vpop.f32.mrf.mxu1  ;;  %11653 = vpow2.f32 %v6906_v17 }
0x13ac   : > { %v15659_v48 = vadd.f32 %v10497_v35, %v5368_v22  ;;  %6992 = vrot.lane.b32.xlu1 %v14689_v10, %s12031_s16  ;;  %11655 = vpow2.f32 %v6908_v19 }
0x13ad   : > { %11657 = vpow2.f32 %v6904_v5  ;;  %v15683_v1 = vpop.f32.mrf.mxu1 }
0x13ae   : > { %11659 = vpow2.f32 %v6910_v30 }
0x13b8   : > { %v15667_v44 = vpop.eup %11653 }
0x13b9   : > { %v15670_v10 = vpop.eup %11655 }
0x13ba   : > { %v15673_v43 = vpop.eup %11657 }
0x13bb   : > { %v15676_v50 = vpop.eup %11659 }
0x13c6   : > { %6938 = vadd.xlane.f32.xlu0 %v15667_v44 }
0x13ca   : > { %6940 = vadd.xlane.f32.xlu0 %v15670_v10 }
0x13d0   : > { %6936 = vadd.xlane.f32.xlu1 %v15673_v43 }
0x13d1   : > { %v6869_v2 = vpop.xlane.xlu0 %6868 }
0x13d2   : > { %v6886_v36 = vsub.f32 %v15537_v28, %v6869_v2 }
0x13d3   : > { %v6865_v16 = vpop.xlane.xlu1 %6864 }
0x13d4   : > { %v6884_v51 = vsub.f32 %v15542_v34, %v6865_v16  ;;  %6942 = vadd.xlane.f32.xlu1 %v15676_v50  ;;  %v6916_v0 = vmul.f32 1.442695, %v6886_v36 }
0x13d5   : > { %v7007_v60 = vpop.permute.xlu0 %7006 }
0x13d6   : > { %v6912_v21 = vmul.f32 1.442695, %v6884_v51  ;;  %10614 = vmatprep.subr.bf16.mxu1 %v7007_v60 }
0x13d7   : > { %v6867_v26 = vpop.xlane.xlu1 %6866 }
0x13d8   : > { %11661 = vpow2.f32 %v6912_v21  ;;  %v6885_v18 = vsub.f32 %v15547_v53, %v6867_v26 }
0x13d9   : > { %11663 = vpow2.f32 %v6916_v0  ;;  %v7003_v25 = vpop.permute.xlu0 %7002 }
0x13da   : > { %v6914_v63 = vmul.f32 1.442695, %v6885_v18 }
0x13db   : > { %v6871_v33 = vpop.xlane.xlu1 %6870 }
0x13dc   : > { %11665 = vpow2.f32 %v6914_v63  ;;  %v6887_v59 = vsub.f32 %v15552_v55, %v6871_v33 }
0x13dd   : > { %v7001_v45 = vpop.permute.xlu0 %7000 }
0x13de   : > { %v6918_v28 = vmul.f32 1.442695, %v6887_v59 }
0x13df   : > { %v7005_v29 = vpop.permute.xlu1 %7004 }
0x13e0   : > { %11667 = vpow2.f32 %v6918_v28 }
0x13e1   : > { %v6999_v2 = vpop.permute.xlu0 %6998 }
0x13e5   : > { %v15685_v34 = vpop.eup %11661  ;;  %v10548_v20 = vpop.f32.mrf.mxu1 }
0x13e6   : > { %6944 = vadd.xlane.f32.xlu0 %v15685_v34  ;;  %v15688_v15 = vpop.eup %11663 }
0x13e7   : > { %v6423_v37 = vpop.f32.mrf.mxu1 }
0x13e9   : > { %v15690_v32 = vpop.eup %11665  ;;  %v10549_v53 = vpop.f32.mrf.mxu1 }
0x13ea   : > { %6948 = vadd.xlane.f32.xlu0 %v15688_v15  ;;  %6946 = vadd.xlane.f32.xlu1 %v15690_v32  ;;  %v6487_v22 = vpack.c.bf16 %v10549_v53, %v10548_v20 }
0x13eb   : > { %v6426_v55 = vpop.f32.mrf.mxu1 }
0x13ec   : > { %v6486_v27 = vpack.c.bf16 %v6426_v55, %v6423_v37 }
0x13ed   : > { %v15694_v56 = vpop.eup %11667  ;;  %v10552_v31 = vpop.f32.mrf.mxu1 }
0x13ee   : > { %10566 = vmatprep.mubr.msk.bf16.mxu1 %vm16972_vm7, %v6486_v27  ;;  %6950 = vadd.xlane.f32.xlu1 %v15694_v56  ;;  %vm8779_vm7 = vcmask 523264  }
0x13ef   : > { %v6439_v35 = vpop.f32.mrf.mxu1  ;;  %10567 = vmatmul.mubr.msk.bf16.vlgmr.msra.gmra.mxu1 %vm16973_vm14, %v6487_v22 }
0x13f0   : > { %10615 = vmatpush3.bf16.msra.mxu1 %v7007_v60  ;;  %v6997_v60 = vpop.permute.xlu1 %6996 }
0x13f1   : > { %10616 = vmatprep.subr.bf16.mxu1 %v7005_v29  ;;  %v10553_v17 = vpop.f32.mrf.mxu1 }
0x13f2   : > { %v6489_v61 = vpack.c.bf16 %v10553_v17, %v10552_v31 }
0x13f3   : > { %v6442_v46 = vpop.f32.mrf.mxu1 }
0x13f4   : > { %v6488_v19 = vpack.c.bf16 %v6442_v46, %v6439_v35  ;;  %10617 = vmatpush3.bf16.msra.mxu1 %v7005_v29 }
0x13f5   : > { %10618 = vmatprep.subr.bf16.mxu1 %v7003_v25 }
0x13f6   : > { %10570 = vmatprep.mubr.msk.bf16.mxu1 %vm16974_vm5, %v6488_v19 }
0x13f7   : > { %v10556_v5 = vpop.f32.mrf.mxu1  ;;  %10571 = vmatmul.mubr.msk.bf16.gmra.mxu1 %vm16975_vm15, %v6489_v61 }
0x13f8   : > { %10619 = vmatpush3.bf16.msra.mxu1 %v7003_v25 }
0x13f9   : > { %10620 = vmatprep.subr.bf16.mxu1 %v7001_v45  ;;  %v6455_v4 = vpop.f32.mrf.mxu1 }
0x13fb   : > { %v10557_v30 = vpop.f32.mrf.mxu1 }
0x13fc   : > { %10621 = vmatpush3.bf16.msra.mxu1 %v7001_v45  ;;  %v6491_v51 = vpack.c.bf16 %v10557_v30, %v10556_v5 }
0x13fd   : > { %10622 = vmatprep.subr.bf16.mxu1 %v6999_v2  ;;  %v6458_v36 = vpop.f32.mrf.mxu1 }
0x13fe   : > { %v6490_v16 = vpack.c.bf16 %v6458_v36, %v6455_v4 }
0x1400   : > { %10623 = vmatpush3.bf16.msra.mxu1 %v6999_v2  ;;  %10574 = vmatprep.mubr.msk.bf16.mxu1 %vm16976_vm3, %v6490_v16 }
0x1401   : > { %10624 = vmatprep.subr.bf16.mxu1 %v6997_v60  ;;  %10575 = vmatmul.mubr.msk.bf16.gmra.mxu1 %vm16977_vm0, %v6491_v51 }
0x1404   : > { %10625 = vmatpush3.bf16.msra.mxu1 %v6997_v60 }
0x1412   : > { %v6933_v21 = vpop.xlane.xlu0 %6932 }
0x1414   : > { %v6925_v0 = vpop.xlane.xlu1 %6924 }
0x1416   : > { %v6929_v26 = vpop.xlane.xlu0 %6928 }
0x1418   : > { %v6921_v18 = vpop.xlane.xlu1 %6920 }
0x141a   : > { %v6935_v63 = vpop.xlane.xlu0 %6934 }
0x141c   : > { %v6927_v33 = vpop.xlane.xlu1 %6926 }
0x141e   : > { %v6995_v59 = vpop.permute.xlu0 %6994 }
0x141f   : > { %10626 = vmatprep.subr.bf16.mxu1 %v6995_v59 }
0x1420   : > { %10627 = vmatpush3.bf16.msra.mxu1 %v6995_v59  ;;  %v6923_v28 = vpop.xlane.xlu1 %6922 }
0x1421   : > { %11669 = vrcp.f32 %v6923_v28 }
0x1422   : > { %11671 = vrcp.f32 %v6921_v18 }
0x1423   : > { %11673 = vrcp.f32 %v6927_v33 }
0x1424   : > { %v6931_v20 = vpop.xlane.xlu1 %6930 }
0x1425   : > { %11675 = vrcp.f32 %v6931_v20 }
0x1426   : > { %11677 = vrcp.f32 %v6925_v0 }
0x1427   : > { %11679 = vrcp.f32 %v6929_v26 }
0x1428   : > { %v6993_v37 = vpop.permute.xlu1 %6992  ;;  %11681 = vrcp.f32 %v6935_v63 }
0x1429   : > { %10628 = vmatprep.subr.bf16.mxu1 %v6993_v37  ;;  %11683 = vrcp.f32 %v6933_v21 }
0x142a   : > { %10629 = vmatpush3.bf16.msra.mxu1 %v6993_v37 }
0x142c   : > { %v10560_v53 = vpop.f32.mrf.mxu1 }
0x142e   : > { %v11670_v55 = vpop.eup %11669  ;;  %v6471_v27 = vpop.f32.mrf.mxu1 }
0x142f   : > { %v11672_v22 = vpop.eup %11671  ;;  %v6969_v35 = vmul.f32 %v11670_v55, %v15623_v13 }
0x1430   : > { %v10561_v31 = vpop.f32.mrf.mxu1  ;;  %v6968_v17 = vmul.f32 %v11672_v22, %v15602_v23  ;;  %v11674_v19 = vpop.eup %11673 }
0x1431   : > { %v6493_v46 = vpack.c.bf16 %v10561_v31, %v10560_v53  ;;  %v6971_v30 = vmul.f32 %v11674_v19, %v15612_v6 }
0x1432   : > { %v6474_v25 = vpop.f32.mrf.mxu1  ;;  %v6984_v61 = vpack.c.bf16 %v6969_v35, %v6968_v17  ;;  %v11676_v45 = vpop.eup %11675 }
0x1433   : > { %v6492_v29 = vpack.c.bf16 %v6474_v25, %v6471_v27  ;;  %v11678_v5 = vpop.eup %11677  ;;  %v6973_v13 = vmul.f32 %v11676_v45, %v15628_v41 }
0x1434   : > { %v11680_v4 = vpop.eup %11679  ;;  %v6970_v2 = vmul.f32 %v11678_v5, %v15596_v24 }
0x1435   : > { %10578 = vmatprep.mubr.msk.bf16.mxu1 %vm16978_vm11, %v6492_v29  ;;  %v6972_v36 = vmul.f32 %v11680_v4, %v15599_v9  ;;  %v11682_v16 = vpop.eup %11681  ;;  %v11048_v29 = vld [vmem:[#allocation5 + $0x70] sm:$0xff]  }
0x1436   : > { %10579 = vmatmul.mubr.msk.bf16.gmra.mxu1 %vm16979_vm12, %v6493_v46  ;;  %v6985_v23 = vpack.c.bf16 %v6971_v30, %v6970_v2  ;;  %v11684_v60 = vpop.eup %11683  ;;  %v6975_v21 = vmul.f32 %v11682_v16, %v15605_v3 }
0x1437   : > { %10630 = vmatprep.mubr.bf16.mxu1 %v6984_v61  ;;  %v6986_v51 = vpack.c.bf16 %v6973_v13, %v6972_v36  ;;  %v6974_v0 = vmul.f32 %v11684_v60, %v15593_v8 }
0x1439   : > { %v6987_v26 = vpack.c.bf16 %v6975_v21, %v6974_v0  ;;  %v16980_v21 = vld [vmem:[#allocation19_spill] sm:$0xff] }
0x143a   : > { %v5362_v0 = vadd.f32 %v15569_v54, %v16980_v21  ;;  %v16991_v21 = vld [vmem:[#allocation26_spill] sm:$0xff] }
0x143e   : > { %10631 = vmatmul.mubr.bf16.vlgmr.msra.gmra.mxu1 %v6985_v23 }
0x143f   : > { %10634 = vmatprep.mubr.bf16.mxu1 %v6986_v51 }
0x1446   : > { %10635 = vmatmul.mubr.bf16.gmra.mxu1 %v6987_v26 }
0x144f   : > { %v6939_v18 = vpop.xlane.xlu0 %6938 }
0x1450   : > { %11685 = vrcp.f32 %v6939_v18 }
0x1453   : > { %v6941_v6 = vpop.xlane.xlu0 %6940 }
0x1459   : > { %v6937_v41 = vpop.xlane.xlu1 %6936 }
0x145a   : > { %11687 = vrcp.f32 %v6937_v41 }
0x145b   : > { %11689 = vrcp.f32 %v6941_v6 }
0x145d   : > { %v6943_v24 = vpop.xlane.xlu1 %6942  ;;  %v11686_v9 = vpop.eup %11685 }
0x145e   : > { %11691 = vrcp.f32 %v6943_v24  ;;  %v6977_v59 = vmul.f32 %v11686_v9, %v15667_v44  ;;  %v16981_v9 = vld [vmem:[#allocation52_spill] sm:$0xff] }
0x1467   : > { %v11688_v63 = vpop.eup %11687 }
0x1468   : > { %v6976_v33 = vmul.f32 %v11688_v63, %v15673_v43  ;;  %v11690_v28 = vpop.eup %11689  ;;  %v11047_v43 = vld [vmem:[#allocation5 + $0x78] sm:$0xff]   ;;  %v5366_v63 = vadd.f32 %v15569_v54, %v16981_v9  ;;  %v16993_v9 = vld [vmem:[#allocation30_spill] sm:$0xff] }
0x1469   : > { %v6978_v8 = vmul.f32 %v11690_v28, %v15670_v10  ;;  %10646 = vmatprep.subr.bf16.mxu1 %v11047_v43 }
0x146a   : > { %v6988_v3 = vpack.c.bf16 %v6977_v59, %v6976_v33  ;;  %10647 = vmatpush3.bf16.msra.mxu1 %v11047_v43 }
0x146b   : > { %v11692_v20 = vpop.eup %11691  ;;  %10648 = vmatprep.subr.bf16.mxu1 %v11048_v29 }
0x146c   : > { %10638 = vmatprep.mubr.bf16.mxu1 %v6988_v3  ;;  %v6979_v37 = vmul.f32 %v11692_v20, %v15676_v50 }
0x146e   : > { %v6989_v53 = vpack.c.bf16 %v6979_v37, %v6978_v8  ;;  %10649 = vmatpush3.bf16.msra.mxu1 %v11048_v29 }
0x146f   : > { %v6945_v55 = vpop.xlane.xlu0 %6944 }
0x1470   : > { %10639 = vmatmul.mubr.bf16.gmra.mxu1 %v6989_v53  ;;  %11693 = vrcp.f32 %v6945_v55 }
0x1473   : > { %v6949_v27 = vpop.xlane.xlu0 %6948  ;;  %v6947_v22 = vpop.xlane.xlu1 %6946 }
0x1474   : > { %11695 = vrcp.f32 %v6947_v22 }
0x1475   : > { %11697 = vrcp.f32 %v6949_v27 }
0x1477   : > { %v6951_v31 = vpop.xlane.xlu1 %6950 }
0x1478   : > { %11699 = vrcp.f32 %v6951_v31 }
0x147d   : > { %v11694_v44 = vpop.eup %11693 }
0x147e   : > { %v6980_v10 = vmul.f32 %v11694_v44, %v15685_v34 }
0x1481   : > { %v11696_v35 = vpop.eup %11695 }
0x1482   : > { %v11698_v25 = vpop.eup %11697  ;;  %v6981_v50 = vmul.f32 %v11696_v35, %v15690_v32 }
0x1483   : > { %v6982_v19 = vmul.f32 %v11698_v25, %v15688_v15 }
0x1484   : > { %v6990_v46 = vpack.c.bf16 %v6981_v50, %v6980_v10 }
0x1485   : > { %v11700_v17 = vpop.eup %11699 }
0x1486   : > { %v6983_v61 = vmul.f32 %v11700_v17, %v15694_v56  ;;  %10642 = vmatprep.mubr.bf16.mxu1 %v6990_v46 }
0x1488   : > { %v6991_v45 = vpack.c.bf16 %v6983_v61, %v6982_v19 }
0x148a   : > { %10643 = vmatmul.mubr.bf16.gmra.mxu1 %v6991_v45 }
0x14af   : > { %v10568_v5 = vpop.f32.mrf.mxu1 }
0x14b0   : > { %v15722_v4 = vadd.f32 %v10568_v5, %v15577_v57  ;;  %v16990_v5 = vld [vmem:[#allocation36_spill] sm:$0xff] }
0x14b1   : > { %v6568_v30 = vpop.f32.mrf.mxu1 }
0x14b2   : > { %v15725_v34 = vadd.f32 %v6568_v30, %v15581_v62  ;;  %v5354_v30 = vadd.f32 %v15569_v54, %v16990_v5 }
0x14b3   : > { %v10569_v32 = vpop.f32.mrf.mxu1 }
0x14b4   : > { %v15728_v13 = vadd.f32 %v10569_v32, %v15584_v11 }
0x14b5   : > { %v15730_v2 = vpop.f32.mrf.mxu1 }
0x14b7   : > { %v10572_v15 = vpop.f32.mrf.mxu1 }
0x14b8   : > { %v15733_v56 = vadd.f32 %v10572_v15, %v15616_v42  ;;  %v6005_v15 = vadd.f32 %v15607_v38, %v5354_v30 }
0x14b9   : > { %v6584_v36 = vpop.f32.mrf.mxu1 }
0x14ba   : > { %v15736_v23 = vadd.f32 %v6584_v36, %v15621_v14  ;;  %v6013_v14 = vadd.f32 %v15645_v52, %v5362_v0  ;;  %v6017_v52 = vadd.f32 %v15683_v1, %v5366_v63  ;;  %v16994_v63 = vld [vmem:[#allocation31_spill] sm:$0xff] }
0x14bb   : > { %v10573_v57 = vpop.f32.mrf.mxu1 }
0x14bc   : > { %v15739_v16 = vadd.f32 %v10573_v57, %v15625_v39 }
0x14bd   : > { %v15741_v62 = vpop.f32.mrf.mxu1 }
0x14c1   : > { %v10576_v51 = vpop.f32.mrf.mxu1 }
0x14c2   : > { %v15744_v11 = vadd.f32 %v10576_v51, %v15637_v7  ;;  %v6632_v51 = vadd.f32 %v15730_v2, %v6005_v15 }
0x14c3   : > { %v6600_v60 = vpop.f32.mrf.mxu1 }
0x14c4   : > { %v15749_v42 = vadd.f32 %v6600_v60, %v15641_v12 }
0x14c5   : > { %v10577_v26 = vpop.f32.mrf.mxu1 }
0x14c6   : > { %v15753_v18 = vadd.f32 %v10577_v26, %v15643_v58 }
0x14c7   : > { %v6603_v39 = vpop.f32.mrf.mxu1 }
0x14c8   : > { %v15755_v6 = vadd.f32 %v6603_v39, %v6013_v14 }
0x14f6   : > { %v10580_v41 = vpop.f32.mrf.mxu1 }
0x14f7   : > { %v15758_v7 = vadd.f32 %v10580_v41, %v15653_v40  ;;  %v16992_v41 = vld [vmem:[#allocation38_spill] sm:$0xff] }
0x14f8   : > { %v6616_v24 = vpop.f32.mrf.mxu1 }
0x14f9   : > { %v15763_v12 = vadd.f32 %v6616_v24, %v15657_v47  ;;  %v5358_v24 = vadd.f32 %v15569_v54, %v16992_v41 }
0x14fa   : > { %v10581_v33 = vpop.f32.mrf.mxu1 }
0x14fb   : > { %v15767_v58 = vadd.f32 %v10581_v33, %v15659_v48  ;;  %v6009_v33 = vadd.f32 %v15631_v49, %v5358_v24  ;;  %v16997_v49 = vld [vmem:[#allocation49_spill] sm:$0xff] }
0x14fc   : > { %v6619_v59 = vpop.f32.mrf.mxu1 }
0x14fd   : > { %v15769_v28 = vadd.f32 %v6619_v59, %v6017_v52  ;;  %v6636_v54 = vadd.f32 %v15741_v62, %v6009_v33  ;;  %v16998_v62 = vld [vmem:[#allocation23_spill] sm:$0xff] }
0x14fe   : > { %v10632_v3 = vpop.f32.mrf.mxu1 }
0x1500   : > { %v7050_v20 = vpop.f32.mrf.mxu1 }
0x1502   : > { %v10633_v40 = vpop.f32.mrf.mxu1 }
0x1503   : > { %v7114_v53 = vpack.c.bf16 %v10633_v40, %v10632_v3  ;;  %v16995_v3 = vld [vmem:[#allocation24_spill] sm:$0xff]  ;;  %v16996_v40 = vld [vmem:[#allocation47_spill] sm:$0xff] }
0x1504   : > { %v7053_v8 = vpop.f32.mrf.mxu1 }
0x1505   : > { %v7113_v37 = vpack.c.bf16 %v7053_v8, %v7050_v20 }
0x1506   : > { %v10636_v55 = vpop.f32.mrf.mxu1 }
0x1507   : > { %10650 = vmatprep.mubr.msk.bf16.mxu1 %vm16982_vm9, %v7113_v37 }
0x1508   : > { %v7066_v47 = vpop.f32.mrf.mxu1  ;;  %10651 = vmatmul.mubr.msk.bf16.vlgmr.msra.gmra.mxu1 %vm16983_vm8, %v7114_v53 }
0x150a   : > { %v10637_v27 = vpop.f32.mrf.mxu1 }
0x150b   : > { %v7116_v48 = vpack.c.bf16 %v10637_v27, %v10636_v55 }
0x150c   : > { %v7069_v1 = vpop.f32.mrf.mxu1 }
0x150d   : > { %v7115_v22 = vpack.c.bf16 %v7069_v1, %v7066_v47 }
0x150f   : > { %10654 = vmatprep.mubr.msk.bf16.mxu1 %vm16984_vm6, %v7115_v22 }
0x1510   : > { %10655 = vmatmul.mubr.msk.bf16.gmra.mxu1 %vm16985_vm10, %v7116_v48 }
0x1530   : > { %v10640_v31 = vpop.f32.mrf.mxu1 }
0x1532   : > { %v7082_v43 = vpop.f32.mrf.mxu1 }
0x1534   : > { %v10641_v44 = vpop.f32.mrf.mxu1 }
0x1535   : > { %v7118_v10 = vpack.c.bf16 %v10641_v44, %v10640_v31 }
0x1536   : > { %v7085_v35 = vpop.f32.mrf.mxu1 }
0x1537   : > { %v7117_v25 = vpack.c.bf16 %v7085_v35, %v7082_v43 }
0x1539   : > { %10658 = vmatprep.mubr.msk.bf16.mxu1 %vm16986_vm13, %v7117_v25 }
0x153a   : > { %10659 = vmatmul.mubr.msk.bf16.gmra.mxu1 %vm16987_vm1, %v7118_v10  ;;  %v17001_v10 = vld [vmem:[#allocation29_spill] sm:$0xff] }
0x154a   : > { %v10644_v50 = vpop.f32.mrf.mxu1 }
0x154c   : > { %v7098_v29 = vpop.f32.mrf.mxu1 }
0x154e   : > { %v10645_v17 = vpop.f32.mrf.mxu1 }
0x154f   : > { %v7120_v61 = vpack.c.bf16 %v10645_v17, %v10644_v50  ;;  %v17002_v17 = vld [vmem:[#allocation48_spill] sm:$0xff] }
0x1550   : > { %v7101_v46 = vpop.f32.mrf.mxu1 }
0x1551   : > { %v7119_v19 = vpack.c.bf16 %v7101_v46, %v7098_v29 }
0x1553   : > { %10662 = vmatprep.mubr.msk.bf16.mxu1 %vm16988_vm4, %v7119_v19 }
0x1554   : > { %10663 = vmatmul.mubr.msk.bf16.gmra.mxu1 %vm16989_vm2, %v7120_v61 }
0x15c8   : > { %v10652_v45 = vpop.f32.mrf.mxu1 }
0x15c9   : > { %v7260_v60 = vadd.f32 %v10652_v45, %v15722_v4 }
0x15ca   : > { %v7195_v32 = vpop.f32.mrf.mxu1 }
0x15cb   : > { %v7258_v36 = vadd.f32 %v7195_v32, %v15725_v34  ;;  %v15792_v38 = vadd.f32 %v7260_v60, %v16993_v9  ;;  %v17006_v60 = vld [vmem:[#allocation32_spill] sm:$0xff] }
0x15cc   : > { %v10653_v57 = vpop.f32.mrf.mxu1 }
0x15cd   : > { %v15786_v0 = vadd.f32 %v7258_v36, %v16991_v21  ;;  %v7261_v34 = vadd.f32 %v10653_v57, %v15728_v13  ;;  %v17005_v36 = vld [vmem:[#allocation50_spill] sm:$0xff] }
0x15ce   : > { %v7198_v26 = vpop.f32.mrf.mxu1 }
0x15cf   : > { %v7259_v14 = vadd.f32 %v7198_v26, %v6632_v51  ;;  %7292 = vadd.xlane.f32.xlu0 %v15786_v0  ;;  %v15804_v20 = vadd.f32 %v7261_v34, %v16995_v3  ;;  %v11051_v26 = vld [vmem:[#allocation7 + $0xf4] ss:$8 sps:$4 sm:$0xff]  }
0x15d0   : > { %v10656_v39 = vpop.f32.mrf.mxu1  ;;  %7626 = vmatprep.subr.bf16.mxu0 %v11051_v26 }
0x15d1   : > { %v15796_v2 = vadd.f32 %v7259_v14, %v16994_v63  ;;  %v7264_v13 = vadd.f32 %v10656_v39, %v15733_v56  ;;  %v16999_v56 = vld [vmem:[#allocation28_spill] sm:$0xff] }
0x15d2   : > { %v7211_v4 = vpop.f32.mrf.mxu1 }
0x15d3   : > { %v7262_v52 = vadd.f32 %v7211_v4, %v15736_v23  ;;  %7296 = vadd.xlane.f32.xlu0 %v15792_v38  ;;  %7294 = vadd.xlane.f32.xlu1 %v15796_v2  ;;  %v15813_v23 = vadd.f32 %v7264_v13, %v16997_v49 }
0x15d4   : > { %v10657_v59 = vpop.f32.mrf.mxu1 }
0x15d5   : > { %v15808_v8 = vadd.f32 %v7262_v52, %v16996_v40  ;;  %v7265_v55 = vadd.f32 %v10657_v59, %v15739_v16  ;;  %v17000_v16 = vld [vmem:[#allocation25_spill] sm:$0xff] }
0x15d6   : > { %v7214_v37 = vpop.f32.mrf.mxu1 }
0x15d7   : > { %v7263_v53 = vadd.f32 %v7214_v37, %v6636_v54  ;;  %7298 = vadd.xlane.f32.xlu1 %v15804_v20  ;;  %7300 = vadd.xlane.f32.xlu0 %v15808_v8  ;;  %v15822_v27 = vadd.f32 %v7265_v55, %v16999_v56 }
0x15d9   : > { %v15817_v47 = vadd.f32 %v7263_v53, %v16998_v62 }
0x15db   : > { %7304 = vadd.xlane.f32.xlu0 %v15813_v23  ;;  %7302 = vadd.xlane.f32.xlu1 %v15817_v47 }
0x15df   : > { %7306 = vadd.xlane.f32.xlu1 %v15822_v27 }
0x15fa   : > { %v10660_v1 = vpop.f32.mrf.mxu1 }
0x15fb   : > { %v7268_v43 = vadd.f32 %v10660_v1, %v15744_v11  ;;  %v17003_v11 = vld [vmem:[#allocation27_spill] sm:$0xff] }
0x15fc   : > { %v7227_v22 = vpop.f32.mrf.mxu1 }
0x15fd   : > { %v7266_v48 = vadd.f32 %v7227_v22, %v15749_v42  ;;  %v15833_v50 = vadd.f32 %v7268_v43, %v17001_v10  ;;  %v11058_v10 = vld [vmem:[#allocation7 + $0xc0] ss:$8 sps:$4 sm:$0xff]  }
0x15fe   : > { %v10661_v31 = vpop.f32.mrf.mxu1 }
0x15ff   : > { %v15828_v44 = vadd.f32 %v7266_v48, %v17000_v16  ;;  %v7269_v29 = vadd.f32 %v10661_v31, %v15753_v18  ;;  %v17004_v18 = vld [vmem:[#allocation22_spill] sm:$0xff] }
0x1600   : > { %v7230_v35 = vpop.f32.mrf.mxu1  ;;  %v11054_v31 = vld [vmem:[#allocation7 + $0xe4] ss:$8 sps:$4 sm:$0xff]   ;;  %v11057_v16 = vld [vmem:[#allocation7 + $0xd4] ss:$8 sps:$4 sm:$0xff]  }
0x1601   : > { %v7267_v25 = vadd.f32 %v7230_v35, %v15755_v6  ;;  %7308 = vadd.xlane.f32.xlu0 %v15828_v44  ;;  %v15842_v42 = vadd.f32 %v7269_v29, %v17003_v11  ;;  %v11055_v35 = vld [vmem:[#allocation7 + $0xd0] ss:$8 sps:$4 sm:$0xff]   ;;  %v11063_v29 = vld [vmem:[#allocation7 + $0xb4] ss:$8 sps:$4 sm:$0xff]   ;;  %v11064_v11 = vld [vmem:[#allocation7 + $0xa0] ss:$8 sps:$4 sm:$0xff]  }
0x1603   : > { %v15837_v46 = vadd.f32 %v7267_v25, %v17002_v17  ;;  %v11060_v25 = vld [vmem:[#allocation7 + $0xc4] ss:$8 sps:$4 sm:$0xff]  }
0x1604   : > { %v11066_v17 = vld [vmem:[#allocation7 + $0xa4] ss:$8 sps:$4 sm:$0xff]  }
0x1605   : > { %7312 = vadd.xlane.f32.xlu0 %v15833_v50  ;;  %7310 = vadd.xlane.f32.xlu1 %v15837_v46 }
0x1609   : > { %7314 = vadd.xlane.f32.xlu1 %v15842_v42 }
0x1614   : > { %v10664_v6 = vpop.f32.mrf.mxu1 }
0x1615   : > { %v7272_v5 = vadd.f32 %v10664_v6, %v15758_v7  ;;  %v17007_v7 = vld [vmem:[#allocation51_spill] sm:$0xff] }
0x1616   : > { %v7243_v19 = vpop.f32.mrf.mxu1  ;;  %v11069_v6 = vld [vmem:[#allocation7 + $0x94] ss:$8 sps:$4 sm:$0xff]  }
0x1617   : > { %v7270_v61 = vadd.f32 %v7243_v19, %v15763_v12  ;;  %v15853_v57 = vadd.f32 %v7272_v5, %v17005_v36  ;;  %v11067_v19 = vld [vmem:[#allocation7 + $0x90] ss:$8 sps:$4 sm:$0xff]  }
0x1618   : > { %v10665_v45 = vpop.f32.mrf.mxu1 }
0x1619   : > { %v15848_v30 = vadd.f32 %v7270_v61, %v17004_v18  ;;  %v7273_v51 = vadd.f32 %v10665_v45, %v15767_v58  ;;  %v11070_v61 = vld [vmem:[#allocation7 + $0x80] ss:$8 sps:$4 sm:$0xff]   ;;  %v11072_v45 = vld [vmem:[#allocation7 + $0x84] ss:$8 sps:$4 sm:$0xff]  }
0x161a   : > { %v7246_v32 = vpop.f32.mrf.mxu1 }
0x161b   : > { %v7271_v15 = vadd.f32 %v7246_v32, %v15769_v28  ;;  %7316 = vadd.xlane.f32.xlu0 %v15848_v30  ;;  %v15862_v12 = vadd.f32 %v7273_v51, %v17007_v7  ;;  %v11049_v28 = vld [vmem:[#allocation7 + $0xf0] ss:$8 sps:$4 sm:$0xff]  }
0x161c   : > { %7627 = vmatpush1.bf16.msra.mxu0 %v11049_v28 }
0x161d   : > { %v15857_v21 = vadd.f32 %v7271_v15, %v17006_v60  ;;  %7628 = vmatprep.subr.bf16.mxu0 %v11054_v31  ;;  %v11081_v31 = vld [vmem:[#allocation8 + $0xd8] sm:$0xff]  }
0x161f   : > { %7320 = vadd.xlane.f32.xlu0 %v15853_v57  ;;  %7318 = vadd.xlane.f32.xlu1 %v15857_v21 }
0x1623   : > { %7322 = vadd.xlane.f32.xlu1 %v15862_v12 }
0x1658   : > { %v7293_v14 = vpop.xlane.xlu0 %7292 }
0x1659   : > { %v7324_v39 = vmul.f32 0.0078125, %v7293_v14 }
0x165b   : > { %v15866_v58 = vsub.f32 %v15786_v0, %v7324_v39 }
0x165c   : > { %v7297_v41 = vpop.xlane.xlu0 %7296  ;;  %v7295_v24 = vpop.xlane.xlu1 %7294 }
0x165d   : > { %v7326_v9 = vmul.f32 0.0078125, %v7297_v41  ;;  %v7325_v34 = vmul.f32 0.0078125, %v7295_v24  ;;  %v7356_v63 = vmul.f32 %v15866_v58, %v15866_v58 }
0x165f   : > { %v15871_v4 = vsub.f32 %v15792_v38, %v7326_v9  ;;  %v15874_v33 = vsub.f32 %v15796_v2, %v7325_v34  ;;  %7372 = vadd.xlane.f32.xlu0 %v7356_v63 }
0x1660   : > { %v7299_v52 = vpop.xlane.xlu1 %7298  ;;  %v7301_v59 = vpop.xlane.xlu0 %7300 }
0x1661   : > { %v7327_v54 = vmul.f32 0.0078125, %v7299_v52  ;;  %v7328_v3 = vmul.f32 0.0078125, %v7301_v59  ;;  %v7358_v0 = vmul.f32 %v15871_v4, %v15871_v4  ;;  %v7357_v13 = vmul.f32 %v15874_v33, %v15874_v33 }
0x1663   : > { %v15881_v40 = vsub.f32 %v15804_v20, %v7327_v54  ;;  %v15884_v38 = vsub.f32 %v15808_v8, %v7328_v3  ;;  %7376 = vadd.xlane.f32.xlu0 %v7358_v0  ;;  %7374 = vadd.xlane.f32.xlu1 %v7357_v13 }
0x1664   : > { %v7305_v2 = vpop.xlane.xlu0 %7304  ;;  %v7303_v37 = vpop.xlane.xlu1 %7302 }
0x1665   : > { %v7330_v53 = vmul.f32 0.0078125, %v7305_v2  ;;  %v7329_v49 = vmul.f32 0.0078125, %v7303_v37  ;;  %v7360_v55 = vmul.f32 %v15884_v38, %v15884_v38  ;;  %v7359_v62 = vmul.f32 %v15881_v40, %v15881_v40 }
0x1667   : > { %v15891_v56 = vsub.f32 %v15813_v23, %v7330_v53  ;;  %v15894_v20 = vsub.f32 %v15817_v47, %v7329_v49  ;;  %7380 = vadd.xlane.f32.xlu0 %v7360_v55  ;;  %7378 = vadd.xlane.f32.xlu1 %v7359_v62  ;;  %v11052_v23 = vld [vmem:[#allocation7 + $0xe0] ss:$8 sps:$4 sm:$0xff]   ;;  %v11074_v49 = vld [vmem:[#allocation8 + $0xb8] sm:$0xff]   ;;  %v11075_v55 = vld [vmem:[#allocation8 + $0xf0] sm:$0xff]  }
0x1668   : > { %v7307_v8 = vpop.xlane.xlu1 %7306  ;;  %7629 = vmatpush1.bf16.msra.mxu0 %v11052_v23  ;;  %v11076_v62 = vld [vmem:[#allocation8 + $0xb0] sm:$0xff]  }
0x1669   : > { %v7331_v1 = vmul.f32 0.0078125, %v7307_v8  ;;  %v7362_v22 = vmul.f32 %v15891_v56, %v15891_v56  ;;  %v7361_v48 = vmul.f32 %v15894_v20, %v15894_v20  ;;  %7630 = vmatprep.subr.bf16.mxu0 %v11057_v16  ;;  %v11077_v8 = vld [vmem:[#allocation8 + $0xe8] sm:$0xff]   ;;  %v11082_v16 = vld [vmem:[#allocation8 + $0x98] sm:$0xff]  }
0x166b   : > { %v15901_v43 = vsub.f32 %v15822_v27, %v7331_v1  ;;  %7384 = vadd.xlane.f32.xlu0 %v7362_v22  ;;  %7382 = vadd.xlane.f32.xlu1 %v7361_v48  ;;  %v11061_v27 = vld [vmem:[#allocation7 + $0xb0] ss:$8 sps:$4 sm:$0xff]   ;;  %v11078_v1 = vld [vmem:[#allocation8 + $0xa8] sm:$0xff]   ;;  %v11079_v22 = vld [vmem:[#allocation8 + $0xe0] sm:$0xff]  }
0x166c   : > { %7631 = vmatpush1.bf16.msra.mxu0 %v11055_v35 }
0x166d   : > { %v7363_v47 = vmul.f32 %v15901_v43, %v15901_v43  ;;  %7632 = vmatprep.subr.bf16.mxu0 %v11060_v25 }
0x166f   : > { %7386 = vadd.xlane.f32.xlu1 %v7363_v47 }
0x1670   : > { %7633 = vmatpush1.bf16.msra.mxu0 %v11058_v10 }
0x1671   : > { %7634 = vmatprep.subr.bf16.mxu0 %v11063_v29 }
0x1674   : > { %7635 = vmatpush1.bf16.msra.mxu0 %v11061_v27 }
0x1675   : > { %7636 = vmatprep.subr.bf16.mxu0 %v11066_v17 }
0x1678   : > { %7637 = vmatpush1.bf16.msra.mxu0 %v11064_v11 }
0x1679   : > { %7638 = vmatprep.subr.bf16.mxu0 %v11069_v6 }
0x167c   : > { %7639 = vmatpush1.bf16.msra.mxu0 %v11067_v19 }
0x167d   : > { %7640 = vmatprep.subr.bf16.mxu0 %v11072_v45 }
0x1680   : > { %7641 = vmatpush1.bf16.msra.mxu0 %v11070_v61 }
0x168a   : > { %v7309_v5 = vpop.xlane.xlu0 %7308 }
0x168b   : > { %v7332_v18 = vmul.f32 0.0078125, %v7309_v5 }
0x168d   : > { %v15906_v32 = vsub.f32 %v15828_v44, %v7332_v18 }
0x168e   : > { %v7313_v15 = vpop.xlane.xlu0 %7312  ;;  %v7311_v36 = vpop.xlane.xlu1 %7310 }
0x168f   : > { %v7334_v51 = vmul.f32 0.0078125, %v7313_v15  ;;  %v7333_v60 = vmul.f32 0.0078125, %v7311_v36  ;;  %v7364_v7 = vmul.f32 %v15906_v32, %v15906_v32 }
0x1691   : > { %v15911_v28 = vsub.f32 %v15833_v50, %v7334_v51  ;;  %v15914_v26 = vsub.f32 %v15837_v46, %v7333_v60  ;;  %7388 = vadd.xlane.f32.xlu0 %v7364_v7 }
0x1692   : > { %v7315_v14 = vpop.xlane.xlu1 %7314 }
0x1693   : > { %v7335_v39 = vmul.f32 0.0078125, %v7315_v14  ;;  %v7366_v44 = vmul.f32 %v15911_v28, %v15911_v28  ;;  %v7365_v41 = vmul.f32 %v15914_v26, %v15914_v26 }
0x1695   : > { %v15921_v24 = vsub.f32 %v15842_v42, %v7335_v39  ;;  %7392 = vadd.xlane.f32.xlu0 %v7366_v44  ;;  %7390 = vadd.xlane.f32.xlu1 %v7365_v41  ;;  %v15946_v41 = vld [vmem:[#allocation10 + $0x9] ss:$0 sm:$0xff] }
0x1697   : > { %v7367_v50 = vmul.f32 %v15921_v24, %v15921_v24 }
0x1699   : > { %7394 = vadd.xlane.f32.xlu1 %v7367_v50 }
0x16a4   : > { %v7317_v46 = vpop.xlane.xlu0 %7316 }
0x16a5   : > { %v7336_v9 = vmul.f32 0.0078125, %v7317_v46 }
0x16a7   : > { %v15926_v34 = vsub.f32 %v15848_v30, %v7336_v9 }
0x16a8   : > { %v7321_v63 = vpop.xlane.xlu0 %7320  ;;  %v7319_v52 = vpop.xlane.xlu1 %7318 }
0x16a9   : > { %v7338_v59 = vmul.f32 0.0078125, %v7321_v63  ;;  %v7337_v54 = vmul.f32 0.0078125, %v7319_v52  ;;  %v7368_v3 = vmul.f32 %v15926_v34, %v15926_v34 }
0x16ab   : > { %v15931_v42 = vsub.f32 %v15853_v57, %v7338_v59  ;;  %v15934_v0 = vsub.f32 %v15857_v21, %v7337_v54  ;;  %7396 = vadd.xlane.f32.xlu0 %v7368_v3  ;;  %v11073_v21 = vld [vmem:[#allocation8 + $0xf8] sm:$0xff]   ;;  %v15950_v54 = vld [vmem:[#allocation10 + $0xb] ss:$0 sm:$0xff] }
0x16ac   : > { %v7323_v13 = vpop.xlane.xlu1 %7322  ;;  %9820 = vmatprep.subr.bf16.mxu1 %v11073_v21 }
0x16ad   : > { %v7339_v2 = vmul.f32 0.0078125, %v7323_v13  ;;  %v7370_v30 = vmul.f32 %v15931_v42, %v15931_v42  ;;  %v7369_v37 = vmul.f32 %v15934_v0, %v15934_v0  ;;  %9821 = vmatpush3.bf16.msra.mxu1 %v11074_v49 }
0x16ae   : > { %9822 = vmatprep.subr.bf16.mxu1 %v11075_v55 }
0x16af   : > { %v15941_v53 = vsub.f32 %v15862_v12, %v7339_v2  ;;  %7400 = vadd.xlane.f32.xlu0 %v7370_v30  ;;  %7398 = vadd.xlane.f32.xlu1 %v7369_v37  ;;  %v11080_v12 = vld [vmem:[#allocation8 + $0xa0] sm:$0xff]  }
0x16b1   : > { %v7371_v57 = vmul.f32 %v15941_v53, %v15941_v53  ;;  %9823 = vmatpush3.bf16.msra.mxu1 %v11076_v62  ;;  %v17008_v62 = vmov 0  }
0x16b2   : > { %9824 = vmatprep.subr.bf16.mxu1 %v11077_v8 }
0x16b3   : > { %7402 = vadd.xlane.f32.xlu1 %v7371_v57 }
0x16b5   : > { %9825 = vmatpush3.bf16.msra.mxu1 %v11078_v1 }
0x16b6   : > { %9826 = vmatprep.subr.bf16.mxu1 %v11079_v22 }
0x16b9   : > { %9827 = vmatpush3.bf16.msra.mxu1 %v11080_v12 }
0x16ba   : > { %9828 = vmatprep.subr.bf16.mxu1 %v11081_v31 }
0x16bd   : > { %9829 = vmatpush3.bf16.msra.mxu1 %v11082_v16 }
0x16e8   : > { %v7373_v48 = vpop.xlane.xlu0 %7372 }
0x16e9   : > { %v7404_v23 = vmul.f32 0.0078125, %v7373_v48 }
0x16eb   : > { %v7420_v47 = vadd.f32 1e-05, %v7404_v23 }
0x16ec   : > { %v7377_v35 = vpop.xlane.xlu0 %7376  ;;  %v7375_v25 = vpop.xlane.xlu1 %7374 }
0x16ed   : > { %11701 = vrsqrt.f32 %v7420_v47  ;;  %v7406_v10 = vmul.f32 0.0078125, %v7377_v35  ;;  %v7405_v29 = vmul.f32 0.0078125, %v7375_v25 }
0x16ef   : > { %v7421_v27 = vadd.f32 1e-05, %v7405_v29  ;;  %v7422_v17 = vadd.f32 1e-05, %v7406_v10 }
0x16f0   : > { %v7379_v11 = vpop.xlane.xlu1 %7378  ;;  %v7381_v6 = vpop.xlane.xlu0 %7380 }
0x16f1   : > { %v7407_v19 = vmul.f32 0.0078125, %v7379_v11  ;;  %11703 = vrsqrt.f32 %v7421_v27  ;;  %v7408_v45 = vmul.f32 0.0078125, %v7381_v6 }
0x16f2   : > { %11705 = vrsqrt.f32 %v7422_v17 }
0x16f3   : > { %v7423_v61 = vadd.f32 1e-05, %v7407_v19  ;;  %v7424_v36 = vadd.f32 1e-05, %v7408_v45 }
0x16f4   : > { %v7383_v5 = vpop.xlane.xlu1 %7382  ;;  %v7385_v51 = vpop.xlane.xlu0 %7384 }
0x16f5   : > { %v7409_v18 = vmul.f32 0.0078125, %v7383_v5  ;;  %11707 = vrsqrt.f32 %v7423_v61  ;;  %v7410_v39 = vmul.f32 0.0078125, %v7385_v51 }
0x16f7   : > { %v7425_v15 = vadd.f32 1e-05, %v7409_v18  ;;  %v7426_v9 = vadd.f32 1e-05, %v7410_v39 }
0x16f8   : > { %v7387_v60 = vpop.xlane.xlu1 %7386 }
0x16f9   : > { %11709 = vrsqrt.f32 %v7425_v15  ;;  %v7411_v14 = vmul.f32 0.0078125, %v7387_v60 }
0x16fa   : > { %v11702_v7 = vpop.eup %11701  ;;  %11711 = vrsqrt.f32 %v7424_v36 }
0x16fb   : > { %v7452_v44 = vmul.f32 %v11702_v7, %v15866_v58  ;;  %v7427_v50 = vadd.f32 1e-05, %v7411_v14 }
0x16fd   : > { %v7472_v63 = vmul.f32 %v15946_v41, %v7452_v44  ;;  %11713 = vrsqrt.f32 %v7427_v50 }
0x16fe   : > { %v11704_v46 = vpop.eup %11703  ;;  %11715 = vrsqrt.f32 %v7426_v9 }
0x16ff   : > { %v7453_v52 = vmul.f32 %v11704_v46, %v15874_v33  ;;  %v11706_v59 = vpop.eup %11705  ;;  %v15954_v58 = vadd.f32 %v15950_v54, %v7472_v63 }
0x1700   : > { %v7454_v30 = vmul.f32 %v11706_v59, %v15871_v4 }
0x1701   : > { %v7473_v3 = vmul.f32 %v15946_v41, %v7453_v52 }
0x1702   : > { %v11708_v13 = vpop.eup %11707  ;;  %v7474_v49 = vmul.f32 %v15946_v41, %v7454_v30 }
0x1703   : > { %v15957_v2 = vadd.f32 %v15950_v54, %v7473_v3  ;;  %v7455_v37 = vmul.f32 %v11708_v13, %v15881_v40 }
0x1704   : > { %v15971_v4 = vadd.f32 %v15950_v54, %v7474_v49 }
0x1705   : > { %v7508_v33 = vpack.c.bf16 %v15957_v2, %v15954_v58  ;;  %v7475_v57 = vmul.f32 %v15946_v41, %v7455_v37 }
0x1706   : > { %v11710_v21 = vpop.eup %11709 }
0x1707   : > { %7659 = vmatmul.mubr.bf16.vlgmr.msra.gmra.mxu0 %v7508_v33  ;;  %v11712_v55 = vpop.eup %11711  ;;  %v15967_v8 = vadd.f32 %v15950_v54, %v7475_v57  ;;  %v7457_v1 = vmul.f32 %v11710_v21, %v15894_v20 }
0x1708   : > { %7668 = vmatprep.mubr.bf16.mxu0 %v17008_v62  ;;  %v7456_v40 = vmul.f32 %v11712_v55, %v15884_v38 }
0x1709   : > { %v7509_v22 = vpack.c.bf16 %v15967_v8, %v15971_v4  ;;  %v7477_v12 = vmul.f32 %v15946_v41, %v7457_v1 }
0x170a   : > { %v11714_v48 = vpop.eup %11713  ;;  %v7476_v23 = vmul.f32 %v15946_v41, %v7456_v40 }
0x170b   : > { %v11716_v31 = vpop.eup %11715  ;;  %v15980_v47 = vadd.f32 %v15950_v54, %v7477_v12  ;;  %v7459_v20 = vmul.f32 %v11714_v48, %v15901_v43 }
0x170c   : > { %v15984_v16 = vadd.f32 %v15950_v54, %v7476_v23  ;;  %v7458_v38 = vmul.f32 %v11716_v31, %v15891_v56 }
0x170d   : > { %v7479_v25 = vmul.f32 %v15946_v41, %v7459_v20 }
0x170e   : > { %v7510_v35 = vpack.c.bf16 %v15980_v47, %v15984_v16  ;;  %v7478_v10 = vmul.f32 %v15946_v41, %v7458_v38  ;;  %v11083_v38 = vld [vmem:[#allocation8 + $0xd0] sm:$0xff]  }
0x170f   : > { %7669 = vmatmul.mubr.bf16.gmra.mxu0 %v7509_v22  ;;  %v15993_v27 = vadd.f32 %v15950_v54, %v7479_v25  ;;  %9830 = vmatprep.subr.bf16.mxu1 %v11083_v38 }
0x1710   : > { %7678 = vmatprep.mubr.bf16.mxu0 %v17008_v62  ;;  %v15996_v17 = vadd.f32 %v15950_v54, %v7478_v10 }
0x1712   : > { %v7511_v19 = vpack.c.bf16 %v15993_v27, %v15996_v17 }
0x1717   : > { %7679 = vmatmul.mubr.bf16.gmra.mxu0 %v7510_v35  ;;  %v11084_v35 = vld [vmem:[#allocation8 + $0x90] sm:$0xff]  }
0x1718   : > { %7688 = vmatprep.mubr.bf16.mxu0 %v17008_v62  ;;  %9831 = vmatpush3.bf16.msra.mxu1 %v11084_v35 }
0x171a   : > { %v7389_v29 = vpop.xlane.xlu0 %7388 }
0x171b   : > { %v7412_v43 = vmul.f32 0.0078125, %v7389_v29 }
0x171d   : > { %v7428_v11 = vadd.f32 1e-05, %v7412_v43  ;;  %v11085_v43 = vld [vmem:[#allocation8 + $0xc8] sm:$0xff]  }
0x171e   : > { %v7393_v56 = vpop.xlane.xlu0 %7392  ;;  %v7391_v6 = vpop.xlane.xlu1 %7390  ;;  %9832 = vmatprep.subr.bf16.mxu1 %v11085_v43 }
0x171f   : > { %11717 = vrsqrt.f32 %v7428_v11  ;;  %v7414_v61 = vmul.f32 0.0078125, %v7393_v56  ;;  %v7413_v45 = vmul.f32 0.0078125, %v7391_v6  ;;  %7689 = vmatmul.mubr.bf16.gmra.mxu0 %v7511_v19  ;;  %v11086_v56 = vld [vmem:[#allocation8 + $0x88] sm:$0xff]  }
0x1720   : > { %7698 = vmatprep.mubr.bf16.mxu0 %v17008_v62  ;;  %9833 = vmatpush3.bf16.msra.mxu1 %v11086_v56 }
0x1721   : > { %v7429_v5 = vadd.f32 1e-05, %v7413_v45  ;;  %v7430_v18 = vadd.f32 1e-05, %v7414_v61 }
0x1722   : > { %v7395_v15 = vpop.xlane.xlu1 %7394 }
0x1723   : > { %v7415_v36 = vmul.f32 0.0078125, %v7395_v15  ;;  %11719 = vrsqrt.f32 %v7429_v5  ;;  %v11087_v5 = vld [vmem:[#allocation8 + $0xc0] sm:$0xff]  }
0x1724   : > { %11721 = vrsqrt.f32 %v7430_v18  ;;  %v11088_v18 = vld [vmem:[#allocation8 + $0x80] sm:$0xff]   ;;  %9834 = vmatprep.subr.bf16.mxu1 %v11087_v5 }
0x1725   : > { %v7431_v51 = vadd.f32 1e-05, %v7415_v36  ;;  %9835 = vmatpush3.bf16.msra.mxu1 %v11088_v18 }
0x1727   : > { %11723 = vrsqrt.f32 %v7431_v51 }
0x172c   : > { %v11718_v60 = vpop.eup %11717 }
0x172d   : > { %v7460_v7 = vmul.f32 %v11718_v60, %v15906_v32 }
0x172f   : > { %v7480_v44 = vmul.f32 %v15946_v41, %v7460_v7  ;;  %v7534_v7 = vld [vmem:[#allocation10 + $0xd] ss:$2 sm:$0x3] }
0x1730   : > { %v11720_v14 = vpop.eup %11719 }
0x1731   : > { %v7461_v39 = vmul.f32 %v11720_v14, %v15914_v26  ;;  %v11722_v50 = vpop.eup %11721  ;;  %v16007_v3 = vadd.f32 %v15950_v54, %v7480_v44 }
0x1732   : > { %v7462_v32 = vmul.f32 %v11722_v50, %v15911_v28  ;;  %v17010_v50 = vld [vmem:[#allocation20_spill] sm:$0xff] }
0x1733   : > { %v7481_v63 = vmul.f32 %v15946_v41, %v7461_v39  ;;  %v17009_v39 = vld [vmem:[#allocation21_spill] sm:$0xff] }
0x1734   : > { %v11724_v46 = vpop.eup %11723  ;;  %v7397_v9 = vpop.xlane.xlu0 %7396  ;;  %v16053_v44 = vrot.slane %v7534_v7, %v17009_v39 }
0x1735   : > { %v7416_v52 = vmul.f32 0.0078125, %v7397_v9  ;;  %v7463_v59 = vmul.f32 %v11724_v46, %v15921_v24  ;;  %v16010_v13 = vadd.f32 %v15950_v54, %v7481_v63  ;;  %v7482_v24 = vmul.f32 %v15946_v41, %v7462_v32 }
0x1736   : > { %v16056_v46 = vrot.slane %v7534_v7, %v17010_v50 }
0x1737   : > { %v7432_v30 = vadd.f32 1e-05, %v7416_v52  ;;  %v7512_v33 = vpack.c.bf16 %v16010_v13, %v16007_v3  ;;  %v7483_v57 = vmul.f32 %v15946_v41, %v7463_v59  ;;  %v16022_v12 = vadd.f32 %v15950_v54, %v7482_v24 }
0x1738   : > { %v7401_v26 = vpop.xlane.xlu0 %7400  ;;  %v7399_v37 = vpop.xlane.xlu1 %7398 }
0x1739   : > { %11725 = vrsqrt.f32 %v7432_v30  ;;  %v7418_v21 = vmul.f32 0.0078125, %v7401_v26  ;;  %v7417_v49 = vmul.f32 0.0078125, %v7399_v37  ;;  %7699 = vmatmul.mubr.bf16.gmra.mxu0 %v7512_v33  ;;  %v16019_v28 = vadd.f32 %v15950_v54, %v7483_v57 }
0x173a   : > { %7708 = vmatprep.mubr.bf16.mxu0 %v17008_v62 }
0x173b   : > { %v7433_v55 = vadd.f32 1e-05, %v7417_v49  ;;  %v7434_v1 = vadd.f32 1e-05, %v7418_v21  ;;  %v7513_v31 = vpack.c.bf16 %v16019_v28, %v16022_v12 }
0x173c   : > { %v7403_v40 = vpop.xlane.xlu1 %7402 }
0x173d   : > { %v7419_v22 = vmul.f32 0.0078125, %v7403_v40  ;;  %11727 = vrsqrt.f32 %v7433_v55 }
0x173e   : > { %11729 = vrsqrt.f32 %v7434_v1 }
0x173f   : > { %v7435_v48 = vadd.f32 1e-05, %v7419_v22 }
0x1741   : > { %11731 = vrsqrt.f32 %v7435_v48  ;;  %7709 = vmatmul.mubr.bf16.gmra.mxu0 %v7513_v31 }
0x1742   : > { %7718 = vmatprep.mubr.bf16.mxu0 %v17008_v62 }
0x1746   : > { %v11726_v23 = vpop.eup %11725 }
0x1747   : > { %v7464_v20 = vmul.f32 %v11726_v23, %v15926_v34 }
0x1749   : > { %v7484_v29 = vmul.f32 %v15946_v41, %v7464_v20 }
0x174a   : > { %v11728_v25 = vpop.eup %11727 }
0x174b   : > { %v7465_v10 = vmul.f32 %v11728_v25, %v15934_v0  ;;  %v11730_v11 = vpop.eup %11729  ;;  %v16033_v34 = vadd.f32 %v15950_v54, %v7484_v29 }
0x174c   : > { %v7466_v0 = vmul.f32 %v11730_v11, %v15931_v42 }
0x174d   : > { %v7485_v19 = vmul.f32 %v15946_v41, %v7465_v10 }
0x174e   : > { %v11732_v6 = vpop.eup %11731 }
0x174f   : > { %v7467_v61 = vmul.f32 %v11732_v6, %v15941_v53  ;;  %v16036_v45 = vadd.f32 %v15950_v54, %v7485_v19  ;;  %v7486_v53 = vmul.f32 %v15946_v41, %v7466_v0 }
0x1751   : > { %v7514_v15 = vpack.c.bf16 %v16036_v45, %v16033_v34  ;;  %v7487_v36 = vmul.f32 %v15946_v41, %v7467_v61  ;;  %v16048_v60 = vadd.f32 %v15950_v54, %v7486_v53 }
0x1753   : > { %7719 = vmatmul.mubr.bf16.gmra.mxu0 %v7514_v15  ;;  %v16045_v51 = vadd.f32 %v15950_v54, %v7487_v36 }
0x1754   : > { %7728 = vmatprep.mubr.bf16.mxu0 %v17008_v62 }
0x1755   : > { %v7515_v42 = vpack.c.bf16 %v16045_v51, %v16048_v60 }
0x175b   : > { %7729 = vmatmul.mubr.bf16.gmra.mxu0 %v7515_v42 }
0x17c7   : > { %v7660_v14 = vpop.f32.mrf.mxu0 }
0x17c8   : > { %v7661_v54 = vadd.f32 %v7660_v14, %v16056_v46 }
0x17c9   : > { %v7662_v41 = vpop.f32.mrf.mxu0 }
0x17ca   : > { %v7663_v9 = vadd.f32 %v7662_v41, %v16053_v44  ;;  %v7739_v33 = vmax.f32 %v7661_v54, 0.0 }
0x17cb   : > { %v7664_v62 = vpop.f32.mrf.mxu0 }
0x17cc   : > { %v7665_v63 = vadd.f32 %v7664_v62, %v16056_v46  ;;  %v7740_v26 = vmax.f32 %v7663_v9, 0.0 }
0x17cd   : > { %v7666_v52 = vpop.f32.mrf.mxu0 }
0x17ce   : > { %v7667_v59 = vadd.f32 %v7666_v52, %v16053_v44  ;;  %v7741_v32 = vmax.f32 %v7665_v63, 0.0 }
0x17cf   : > { %v7670_v30 = vpop.f32.mrf.mxu0 }
0x17d0   : > { %v7742_v37 = vmax.f32 %v7667_v59, 0.0  ;;  %v7771_v49 = vpack.c.bf16 %v7741_v32, %v7739_v33  ;;  %v7671_v40 = vadd.f32 %v7670_v30, %v16056_v46 }
0x17d1   : > { %v7672_v57 = vpop.f32.mrf.mxu0 }
0x17d2   : > { %v7772_v21 = vpack.c.bf16 %v7742_v37, %v7740_v26  ;;  %v7673_v55 = vadd.f32 %v7672_v57, %v16053_v44  ;;  %v7743_v35 = vmax.f32 %v7671_v40, 0.0 }
0x17d3   : > { %v7674_v24 = vpop.f32.mrf.mxu0 }
0x17d4   : > { %v7675_v1 = vadd.f32 %v7674_v24, %v16056_v46  ;;  %7953 = vmatprep.mubr.bf16.mxu1 %v7772_v21  ;;  %v7744_v20 = vmax.f32 %v7673_v55, 0.0 }
0x17d5   : > { %v7676_v22 = vpop.f32.mrf.mxu0  ;;  %7954 = vmatmul.mubr.bf16.vlgmr.msra.gmra.mxu1 %v7771_v49 }
0x17d6   : > { %v7677_v48 = vadd.f32 %v7676_v22, %v16053_v44  ;;  %v7745_v31 = vmax.f32 %v7675_v1, 0.0 }
0x17d7   : > { %v7680_v23 = vpop.f32.mrf.mxu0 }
0x17d8   : > { %v7746_v38 = vmax.f32 %v7677_v48, 0.0  ;;  %v7773_v29 = vpack.c.bf16 %v7745_v31, %v7743_v35  ;;  %v7681_v6 = vadd.f32 %v7680_v23, %v16056_v46 }
0x17d9   : > { %v7682_v25 = vpop.f32.mrf.mxu0 }
0x17da   : > { %v7774_v10 = vpack.c.bf16 %v7746_v38, %v7744_v20  ;;  %v7683_v11 = vadd.f32 %v7682_v25, %v16053_v44  ;;  %v7747_v36 = vmax.f32 %v7681_v6, 0.0 }
0x17db   : > { %v7684_v43 = vpop.f32.mrf.mxu0 }
0x17dc   : > { %v7685_v56 = vadd.f32 %v7684_v43, %v16056_v46  ;;  %7961 = vmatprep.mubr.bf16.mxu1 %v7774_v10  ;;  %v7748_v18 = vmax.f32 %v7683_v11, 0.0 }
0x17dd   : > { %v7686_v19 = vpop.f32.mrf.mxu0  ;;  %7962 = vmatmul.mubr.bf16.gmra.mxu1 %v7773_v29 }
0x17de   : > { %v7687_v61 = vadd.f32 %v7686_v19, %v16053_v44  ;;  %v7749_v0 = vmax.f32 %v7685_v56, 0.0 }
0x17df   : > { %v7690_v5 = vpop.f32.mrf.mxu0 }
0x17e0   : > { %v7750_v15 = vmax.f32 %v7687_v61, 0.0  ;;  %v7775_v7 = vpack.c.bf16 %v7749_v0, %v7747_v36  ;;  %v7691_v41 = vadd.f32 %v7690_v5, %v16056_v46 }
0x17e1   : > { %v7692_v53 = vpop.f32.mrf.mxu0 }
0x17e2   : > { %v7776_v42 = vpack.c.bf16 %v7750_v15, %v7748_v18  ;;  %v7693_v39 = vadd.f32 %v7692_v53, %v16053_v44  ;;  %v7751_v59 = vmax.f32 %v7691_v41, 0.0 }
0x17e3   : > { %v7694_v14 = vpop.f32.mrf.mxu0 }
0x17e4   : > { %v7695_v50 = vadd.f32 %v7694_v14, %v16056_v46  ;;  %7969 = vmatprep.mubr.bf16.mxu1 %v7776_v42  ;;  %v7752_v54 = vmax.f32 %v7693_v39, 0.0 }
0x17e5   : > { %v7696_v62 = vpop.f32.mrf.mxu0  ;;  %7970 = vmatmul.mubr.bf16.gmra.mxu1 %v7775_v7 }
0x17e6   : > { %v7697_v9 = vadd.f32 %v7696_v62, %v16053_v44  ;;  %v7753_v63 = vmax.f32 %v7695_v50, 0.0 }
0x17e8   : > { %v7754_v52 = vmax.f32 %v7697_v9, 0.0  ;;  %v7777_v30 = vpack.c.bf16 %v7753_v63, %v7751_v59 }
0x17ea   : > { %v7778_v32 = vpack.c.bf16 %v7754_v52, %v7752_v54 }
0x17ec   : > { %7977 = vmatprep.mubr.bf16.mxu1 %v7778_v32 }
0x17ed   : > { %7978 = vmatmul.mubr.bf16.gmra.mxu1 %v7777_v30 }
0x17f9   : > { %v7700_v26 = vpop.f32.mrf.mxu0 }
0x17fa   : > { %v7701_v49 = vadd.f32 %v7700_v26, %v16056_v46 }
0x17fb   : > { %v7702_v37 = vpop.f32.mrf.mxu0 }
0x17fc   : > { %v7703_v57 = vadd.f32 %v7702_v37, %v16053_v44  ;;  %v7755_v31 = vmax.f32 %v7701_v49, 0.0 }
0x17fd   : > { %v7704_v33 = vpop.f32.mrf.mxu0 }
0x17fe   : > { %v7705_v21 = vadd.f32 %v7704_v33, %v16056_v46  ;;  %v7756_v22 = vmax.f32 %v7703_v57, 0.0 }
0x17ff   : > { %v7706_v24 = vpop.f32.mrf.mxu0 }
0x1800   : > { %v7707_v55 = vadd.f32 %v7706_v24, %v16053_v44  ;;  %v7757_v1 = vmax.f32 %v7705_v21, 0.0 }
0x1801   : > { %v7710_v40 = vpop.f32.mrf.mxu0 }
0x1802   : > { %v7758_v48 = vmax.f32 %v7707_v55, 0.0  ;;  %v7779_v38 = vpack.c.bf16 %v7757_v1, %v7755_v31  ;;  %v7711_v29 = vadd.f32 %v7710_v40, %v16056_v46 }
0x1803   : > { %v7712_v23 = vpop.f32.mrf.mxu0 }
0x1804   : > { %v7780_v20 = vpack.c.bf16 %v7758_v48, %v7756_v22  ;;  %v7713_v25 = vadd.f32 %v7712_v23, %v16053_v44  ;;  %v7759_v61 = vmax.f32 %v7711_v29, 0.0  ;;  %v16090_v48 = vld [vmem:[#allocation10 + $0x11] ss:$0 sm:$0xff] }
0x1805   : > { %v7714_v35 = vpop.f32.mrf.mxu0 }
0x1806   : > { %v7715_v10 = vadd.f32 %v7714_v35, %v16056_v46  ;;  %7985 = vmatprep.mubr.bf16.mxu1 %v7780_v20  ;;  %v7760_v6 = vmax.f32 %v7713_v25, 0.0 }
0x1807   : > { %v7716_v43 = vpop.f32.mrf.mxu0  ;;  %7986 = vmatmul.mubr.bf16.gmra.mxu1 %v7779_v38 }
0x1808   : > { %v7717_v11 = vadd.f32 %v7716_v43, %v16053_v44  ;;  %v7761_v56 = vmax.f32 %v7715_v10, 0.0 }
0x180a   : > { %v7762_v19 = vmax.f32 %v7717_v11, 0.0  ;;  %v7781_v5 = vpack.c.bf16 %v7761_v56, %v7759_v61 }
0x180c   : > { %v7782_v0 = vpack.c.bf16 %v7762_v19, %v7760_v6 }
0x180e   : > { %7993 = vmatprep.mubr.bf16.mxu1 %v7782_v0 }
0x180f   : > { %7994 = vmatmul.mubr.bf16.gmra.mxu1 %v7781_v5 }
0x1813   : > { %v7720_v18 = vpop.f32.mrf.mxu0 }
0x1814   : > { %v7721_v7 = vadd.f32 %v7720_v18, %v16056_v46 }
0x1815   : > { %v7722_v15 = vpop.f32.mrf.mxu0 }
0x1816   : > { %v7723_v53 = vadd.f32 %v7722_v15, %v16053_v44  ;;  %v7763_v63 = vmax.f32 %v7721_v7, 0.0 }
0x1817   : > { %v7724_v36 = vpop.f32.mrf.mxu0 }
0x1818   : > { %v7725_v42 = vadd.f32 %v7724_v36, %v16056_v46  ;;  %v7764_v62 = vmax.f32 %v7723_v53, 0.0 }
0x1819   : > { %v7726_v14 = vpop.f32.mrf.mxu0 }
0x181a   : > { %v7727_v39 = vadd.f32 %v7726_v14, %v16053_v44  ;;  %v7765_v50 = vmax.f32 %v7725_v42, 0.0 }
0x181b   : > { %v7730_v41 = vpop.f32.mrf.mxu0 }
0x181c   : > { %v7766_v9 = vmax.f32 %v7727_v39, 0.0  ;;  %v7783_v59 = vpack.c.bf16 %v7765_v50, %v7763_v63  ;;  %v7731_v37 = vadd.f32 %v7730_v41, %v16056_v46 }
0x181d   : > { %v7732_v54 = vpop.f32.mrf.mxu0 }
0x181e   : > { %v7784_v52 = vpack.c.bf16 %v7766_v9, %v7764_v62  ;;  %v7733_v30 = vadd.f32 %v7732_v54, %v16053_v44  ;;  %v7767_v55 = vmax.f32 %v7731_v37, 0.0 }
0x181f   : > { %v7734_v32 = vpop.f32.mrf.mxu0 }
0x1820   : > { %v7735_v26 = vadd.f32 %v7734_v32, %v16056_v46  ;;  %8001 = vmatprep.mubr.bf16.mxu1 %v7784_v52  ;;  %v7768_v49 = vmax.f32 %v7733_v30, 0.0 }
0x1821   : > { %v7736_v33 = vpop.f32.mrf.mxu0  ;;  %8002 = vmatmul.mubr.bf16.gmra.mxu1 %v7783_v59 }
0x1822   : > { %v7737_v57 = vadd.f32 %v7736_v33, %v16053_v44  ;;  %v7769_v21 = vmax.f32 %v7735_v26, 0.0 }
0x1824   : > { %v7770_v24 = vmax.f32 %v7737_v57, 0.0  ;;  %v7785_v40 = vpack.c.bf16 %v7769_v21, %v7767_v55 }
0x1826   : > { %v7786_v1 = vpack.c.bf16 %v7770_v24, %v7768_v49 }
0x1828   : > { %8009 = vmatprep.mubr.bf16.mxu1 %v7786_v1 }
0x1829   : > { %8010 = vmatmul.mubr.bf16.gmra.mxu1 %v7785_v40 }
0x1895   : > { %v9836_v22 = vpop.f32.mrf.mxu1 }
0x1897   : > { %v9837_v31 = vpop.f32.mrf.mxu1 }
0x1898   : > { %v9838_v23 = vadd.f32 %v9837_v31, %v9836_v22 }
0x1899   : > { %v9839_v20 = vpop.f32.mrf.mxu1 }
0x189a   : > { %v7956_v46 = vadd.f32 %v9838_v23, %v16090_v48 }
0x189b   : > { %v9840_v38 = vpop.f32.mrf.mxu1 }
0x189c   : > { %v9841_v35 = vadd.f32 %v9840_v38, %v9839_v20  ;;  %v16094_v44 = vadd.f32 %v7956_v46, %v15954_v58 }
0x189d   : > { %v9842_v25 = vpop.f32.mrf.mxu1 }
0x189e   : > { %v7959_v10 = vadd.f32 %v9841_v35, %v16090_v48  ;;  %8036 = vadd.xlane.f32.xlu0 %v16094_v44 }
0x189f   : > { %v9843_v29 = vpop.f32.mrf.mxu1 }
0x18a0   : > { %v9844_v43 = vadd.f32 %v9843_v29, %v9842_v25  ;;  %v16099_v11 = vadd.f32 %v7959_v10, %v15957_v2 }
0x18a1   : > { %v9845_v56 = vpop.f32.mrf.mxu1 }
0x18a2   : > { %v7964_v6 = vadd.f32 %v9844_v43, %v16090_v48  ;;  %8038 = vadd.xlane.f32.xlu1 %v16099_v11 }
0x18a3   : > { %v9846_v19 = vpop.f32.mrf.mxu1 }
0x18a4   : > { %v9847_v61 = vadd.f32 %v9846_v19, %v9845_v56  ;;  %v16104_v58 = vadd.f32 %v7964_v6, %v15971_v4 }
0x18a5   : > { %v9848_v0 = vpop.f32.mrf.mxu1 }
0x18a6   : > { %v7967_v5 = vadd.f32 %v9847_v61, %v16090_v48  ;;  %8040 = vadd.xlane.f32.xlu0 %v16104_v58 }
0x18a7   : > { %v9849_v18 = vpop.f32.mrf.mxu1 }
0x18a8   : > { %v9850_v15 = vadd.f32 %v9849_v18, %v9848_v0  ;;  %v16109_v2 = vadd.f32 %v7967_v5, %v15967_v8 }
0x18a9   : > { %v9851_v36 = vpop.f32.mrf.mxu1 }
0x18aa   : > { %v7972_v53 = vadd.f32 %v9850_v15, %v16090_v48  ;;  %8042 = vadd.xlane.f32.xlu1 %v16109_v2 }
0x18ab   : > { %v9852_v42 = vpop.f32.mrf.mxu1 }
0x18ac   : > { %v9853_v7 = vadd.f32 %v9852_v42, %v9851_v36  ;;  %v16114_v4 = vadd.f32 %v7972_v53, %v15984_v16 }
0x18ad   : > { %v9854_v14 = vpop.f32.mrf.mxu1 }
0x18ae   : > { %v7975_v39 = vadd.f32 %v9853_v7, %v16090_v48  ;;  %8044 = vadd.xlane.f32.xlu0 %v16114_v4 }
0x18af   : > { %v9855_v50 = vpop.f32.mrf.mxu1 }
0x18b0   : > { %v9856_v41 = vadd.f32 %v9855_v50, %v9854_v14  ;;  %v16119_v8 = vadd.f32 %v7975_v39, %v15980_v47 }
0x18b1   : > { %v9857_v62 = vpop.f32.mrf.mxu1 }
0x18b2   : > { %v7980_v9 = vadd.f32 %v9856_v41, %v16090_v48  ;;  %8046 = vadd.xlane.f32.xlu1 %v16119_v8 }
0x18b3   : > { %v9858_v63 = vpop.f32.mrf.mxu1 }
0x18b4   : > { %v9859_v54 = vadd.f32 %v9858_v63, %v9857_v62  ;;  %v16124_v16 = vadd.f32 %v7980_v9, %v15996_v17 }
0x18b6   : > { %v7983_v52 = vadd.f32 %v9859_v54, %v16090_v48  ;;  %8048 = vadd.xlane.f32.xlu0 %v16124_v16 }
0x18b8   : > { %v16129_v59 = vadd.f32 %v7983_v52, %v15993_v27 }
0x18ba   : > { %8050 = vadd.xlane.f32.xlu1 %v16129_v59 }
0x18c7   : > { %v9860_v47 = vpop.f32.mrf.mxu1 }
0x18c9   : > { %v9861_v32 = vpop.f32.mrf.mxu1 }
0x18ca   : > { %v9862_v30 = vadd.f32 %v9861_v32, %v9860_v47 }
0x18cb   : > { %v9863_v26 = vpop.f32.mrf.mxu1 }
0x18cc   : > { %v7988_v37 = vadd.f32 %v9862_v30, %v16090_v48 }
0x18cd   : > { %v9864_v33 = vpop.f32.mrf.mxu1 }
0x18ce   : > { %v9865_v57 = vadd.f32 %v9864_v33, %v9863_v26  ;;  %v16134_v17 = vadd.f32 %v7988_v37, %v16007_v3 }
0x18cf   : > { %v9866_v21 = vpop.f32.mrf.mxu1 }
0x18d0   : > { %v7991_v49 = vadd.f32 %v9865_v57, %v16090_v48  ;;  %8052 = vadd.xlane.f32.xlu0 %v16134_v17  ;;  %v11090_v57 = vld [vmem:[%s16470_s6 + $0x30] sm:$0xff]  }
0x18d1   : > { %v9867_v27 = vpop.f32.mrf.mxu1 }
0x18d2   : > { %v9868_v24 = vadd.f32 %v9867_v27, %v9866_v21  ;;  %v16139_v55 = vadd.f32 %v7991_v49, %v16010_v13 }
0x18d3   : > { %v9869_v1 = vpop.f32.mrf.mxu1 }
0x18d4   : > { %v7996_v40 = vadd.f32 %v9868_v24, %v16090_v48  ;;  %8054 = vadd.xlane.f32.xlu1 %v16139_v55  ;;  %v11091_v24 = vld [vmem:[%s16470_s6 + $0x28] sm:$0xff]  }
0x18d5   : > { %v9870_v22 = vpop.f32.mrf.mxu1 }
0x18d6   : > { %v9871_v31 = vadd.f32 %v9870_v22, %v9869_v1  ;;  %v16144_v3 = vadd.f32 %v7996_v40, %v16022_v12  ;;  %v11092_v40 = vld [vmem:[%s16470_s6 + $0x20] sm:$0xff]   ;;  %v11093_v22 = vld [vmem:[%s16470_s6 + $0x78] sm:$0xff]  }
0x18d7   : > { %10686 = vmatprep.subr.bf16.mxu1 %v11093_v22 }
0x18d8   : > { %v7999_v23 = vadd.f32 %v9871_v31, %v16090_v48  ;;  %8056 = vadd.xlane.f32.xlu0 %v16144_v3  ;;  %10687 = vmatpush3.bf16.msra.mxu1 %v11093_v22  ;;  %v11095_v31 = vld [vmem:[%s16470_s6 + $0x10] sm:$0xff]  }
0x18da   : > { %v16149_v20 = vadd.f32 %v7999_v23, %v16019_v28  ;;  %v11096_v23 = vld [vmem:[%s16470_s6 + $0x70] sm:$0xff]  }
0x18db   : > { %10688 = vmatprep.subr.bf16.mxu1 %v11096_v23 }
0x18dc   : > { %8058 = vadd.xlane.f32.xlu1 %v16149_v20  ;;  %10689 = vmatpush3.bf16.msra.mxu1 %v11096_v23 }
0x18e1   : > { %v9872_v13 = vpop.f32.mrf.mxu1 }
0x18e3   : > { %v9873_v46 = vpop.f32.mrf.mxu1 }
0x18e4   : > { %v9874_v38 = vadd.f32 %v9873_v46, %v9872_v13  ;;  %v11097_v13 = vld [vmem:[%s16470_s6 + $0x8] sm:$0xff]  }
0x18e5   : > { %v9875_v35 = vpop.f32.mrf.mxu1  ;;  %v11098_v46 = vld [vmem:[%s16470_s6 + $0x68] sm:$0xff]  }
0x18e6   : > { %v8004_v25 = vadd.f32 %v9874_v38, %v16090_v48  ;;  %10690 = vmatprep.subr.bf16.mxu1 %v11098_v46  ;;  %v11099_v38 = vld [vmem:[%s16470_s6] sm:$0xff]  }
0x18e7   : > { %v9876_v10 = vpop.f32.mrf.mxu1  ;;  %10691 = vmatpush3.bf16.msra.mxu1 %v11098_v46 }
0x18e8   : > { %v9877_v29 = vadd.f32 %v9876_v10, %v9875_v35  ;;  %v16154_v12 = vadd.f32 %v8004_v25, %v16033_v34  ;;  %v11100_v35 = vld [vmem:[%s16470_s6 + $0x60] sm:$0xff]  }
0x18e9   : > { %v9878_v43 = vpop.f32.mrf.mxu1  ;;  %10692 = vmatprep.subr.bf16.mxu1 %v11100_v35 }
0x18ea   : > { %v8007_v56 = vadd.f32 %v9877_v29, %v16090_v48  ;;  %8060 = vadd.xlane.f32.xlu0 %v16154_v12 }
0x18eb   : > { %v9879_v28 = vpop.f32.mrf.mxu1  ;;  %10693 = vmatpush3.bf16.msra.mxu1 %v11100_v35  ;;  %v16313_v35 = vld [vmem:[#allocation10 + $0x13] ss:$0 sm:$0xff] }
0x18ec   : > { %v9880_v6 = vadd.f32 %v9879_v28, %v9878_v43  ;;  %v16159_v19 = vadd.f32 %v8007_v56, %v16036_v45  ;;  %v11101_v43 = vld [vmem:[%s16470_s6 + $0x58] sm:$0xff]  }
0x18ed   : > { %v9881_v61 = vpop.f32.mrf.mxu1  ;;  %10694 = vmatprep.subr.bf16.mxu1 %v11101_v43 }
0x18ee   : > { %v8012_v0 = vadd.f32 %v9880_v6, %v16090_v48  ;;  %8062 = vadd.xlane.f32.xlu1 %v16159_v19 }
0x18ef   : > { %v9882_v5 = vpop.f32.mrf.mxu1  ;;  %10695 = vmatpush3.bf16.msra.mxu1 %v11101_v43 }
0x18f0   : > { %v9883_v18 = vadd.f32 %v9882_v5, %v9881_v61  ;;  %v16164_v34 = vadd.f32 %v8012_v0, %v16048_v60 }
0x18f2   : > { %v8015_v15 = vadd.f32 %v9883_v18, %v16090_v48  ;;  %8064 = vadd.xlane.f32.xlu0 %v16164_v34 }
0x18f4   : > { %v16169_v36 = vadd.f32 %v8015_v15, %v16045_v51 }
0x18f6   : > { %8066 = vadd.xlane.f32.xlu1 %v16169_v36 }
0x1927   : > { %v8037_v45 = vpop.xlane.xlu0 %8036 }
0x1928   : > { %v8068_v53 = vmul.f32 0.0078125, %v8037_v45 }
0x192a   : > { %v16173_v42 = vsub.f32 %v16094_v44, %v8068_v53 }
0x192b   : > { %v8039_v7 = vpop.xlane.xlu1 %8038 }
0x192c   : > { %v8069_v14 = vmul.f32 0.0078125, %v8039_v7  ;;  %v8100_v60 = vmul.f32 %v16173_v42, %v16173_v42 }
0x192e   : > { %v16178_v39 = vsub.f32 %v16099_v11, %v8069_v14  ;;  %8116 = vadd.xlane.f32.xlu0 %v8100_v60 }
0x192f   : > { %v8041_v48 = vpop.xlane.xlu0 %8040 }
0x1930   : > { %v8070_v50 = vmul.f32 0.0078125, %v8041_v48  ;;  %v8101_v51 = vmul.f32 %v16178_v39, %v16178_v39  ;;  %v16283_v48 = vld [vmem:[%s16470_s6 + $0xb8] sm:$0xff]  }
0x1932   : > { %v16183_v41 = vsub.f32 %v16104_v58, %v8070_v50  ;;  %8118 = vadd.xlane.f32.xlu1 %v8101_v51 }
0x1933   : > { %v8043_v44 = vpop.xlane.xlu1 %8042 }
0x1934   : > { %v8071_v62 = vmul.f32 0.0078125, %v8043_v44  ;;  %v8102_v9 = vmul.f32 %v16183_v41, %v16183_v41 }
0x1936   : > { %v16188_v63 = vsub.f32 %v16109_v2, %v8071_v62  ;;  %8120 = vadd.xlane.f32.xlu0 %v8102_v9  ;;  %v11089_v2 = vld [vmem:[%s16470_s6 + $0x38] sm:$0xff]  }
0x1937   : > { %v8045_v11 = vpop.xlane.xlu0 %8044  ;;  %10666 = vmatprep.subr.bf16.mxu0 %v11089_v2 }
0x1938   : > { %v8072_v54 = vmul.f32 0.0078125, %v8045_v11  ;;  %v8103_v52 = vmul.f32 %v16188_v63, %v16188_v63  ;;  %10667 = vmatpush3.bf16.msra.mxu0 %v11089_v2 }
0x1939   : > { %10668 = vmatprep.subr.bf16.mxu0 %v11090_v57 }
0x193a   : > { %v16193_v47 = vsub.f32 %v16114_v4, %v8072_v54  ;;  %8122 = vadd.xlane.f32.xlu1 %v8103_v52 }
0x193b   : > { %v8047_v58 = vpop.xlane.xlu1 %8046 }
0x193c   : > { %v8073_v32 = vmul.f32 0.0078125, %v8047_v58  ;;  %v8104_v30 = vmul.f32 %v16193_v47, %v16193_v47  ;;  %10669 = vmatpush3.bf16.msra.mxu0 %v11090_v57 }
0x193d   : > { %10670 = vmatprep.subr.bf16.mxu0 %v11091_v24 }
0x193e   : > { %v16201_v26 = vsub.f32 %v16119_v8, %v8073_v32  ;;  %8124 = vadd.xlane.f32.xlu0 %v8104_v30 }
0x193f   : > { %v8049_v37 = vpop.xlane.xlu0 %8048 }
0x1940   : > { %v8074_v33 = vmul.f32 0.0078125, %v8049_v37  ;;  %v8105_v4 = vmul.f32 %v16201_v26, %v16201_v26  ;;  %10671 = vmatpush3.bf16.msra.mxu0 %v11091_v24 }
0x1941   : > { %10672 = vmatprep.subr.bf16.mxu0 %v11092_v40 }
0x1942   : > { %v16209_v21 = vsub.f32 %v16124_v16, %v8074_v33  ;;  %8126 = vadd.xlane.f32.xlu1 %v8105_v4  ;;  %v16309_v33 = vld [vmem:[%s16470_s6 + $0xf8] sm:$0xff]  }
0x1943   : > { %v8051_v49 = vpop.xlane.xlu1 %8050 }
0x1944   : > { %v8075_v8 = vmul.f32 0.0078125, %v8051_v49  ;;  %v8106_v27 = vmul.f32 %v16209_v21, %v16209_v21  ;;  %10673 = vmatpush3.bf16.msra.mxu0 %v11092_v40 }
0x1946   : > { %v16217_v1 = vsub.f32 %v16129_v59, %v8075_v8  ;;  %8128 = vadd.xlane.f32.xlu0 %v8106_v27  ;;  %v11094_v59 = vld [vmem:[%s16470_s6 + $0x18] sm:$0xff]  }
0x1947   : > { %10674 = vmatprep.subr.bf16.mxu0 %v11094_v59 }
0x1948   : > { %v8107_v16 = vmul.f32 %v16217_v1, %v16217_v1  ;;  %10675 = vmatpush3.bf16.msra.mxu0 %v11094_v59 }
0x1949   : > { %10676 = vmatprep.subr.bf16.mxu0 %v11095_v31 }
0x194a   : > { %8130 = vadd.xlane.f32.xlu1 %v8107_v16 }
0x194c   : > { %10677 = vmatpush3.bf16.msra.mxu0 %v11095_v31 }
0x194d   : > { %10678 = vmatprep.subr.bf16.mxu0 %v11097_v13 }
0x1950   : > { %10679 = vmatpush3.bf16.msra.mxu0 %v11097_v13 }
0x1951   : > { %10680 = vmatprep.subr.bf16.mxu0 %v11099_v38 }
0x1954   : > { %10681 = vmatpush3.bf16.msra.mxu0 %v11099_v38 }
0x1955   : > { %10706 = vmatprep.subr.bf16.mxu0 %v16283_v48 }
0x1959   : > { %v8053_v25 = vpop.xlane.xlu0 %8052 }
0x195a   : > { %v8076_v10 = vmul.f32 0.0078125, %v8053_v25 }
0x195c   : > { %v16249_v29 = vsub.f32 %v16134_v17, %v8076_v10  ;;  %v11102_v17 = vld [vmem:[%s16470_s6 + $0x50] sm:$0xff]  }
0x195d   : > { %v8055_v56 = vpop.xlane.xlu1 %8054  ;;  %10696 = vmatprep.subr.bf16.mxu1 %v11102_v17 }
0x195e   : > { %v8077_v28 = vmul.f32 0.0078125, %v8055_v56  ;;  %v8108_v6 = vmul.f32 %v16249_v29, %v16249_v29  ;;  %10697 = vmatpush3.bf16.msra.mxu1 %v11102_v17 }
0x1960   : > { %v16257_v61 = vsub.f32 %v16139_v55, %v8077_v28  ;;  %8132 = vadd.xlane.f32.xlu0 %v8108_v6  ;;  %v11103_v55 = vld [vmem:[%s16470_s6 + $0x48] sm:$0xff]  }
0x1961   : > { %v8057_v0 = vpop.xlane.xlu0 %8056  ;;  %10698 = vmatprep.subr.bf16.mxu1 %v11103_v55 }
0x1962   : > { %v8078_v5 = vmul.f32 0.0078125, %v8057_v0  ;;  %v8109_v18 = vmul.f32 %v16257_v61, %v16257_v61  ;;  %10699 = vmatpush3.bf16.msra.mxu1 %v11103_v55  ;;  %v16317_v0 = vld [vmem:[#allocation10 + $0x15] ss:$0 sm:$0xff] }
0x1964   : > { %v16265_v15 = vsub.f32 %v16144_v3, %v8078_v5  ;;  %8134 = vadd.xlane.f32.xlu1 %v8109_v18  ;;  %v11104_v3 = vld [vmem:[%s16470_s6 + $0x40] sm:$0xff]  }
0x1965   : > { %v8059_v45 = vpop.xlane.xlu1 %8058  ;;  %10700 = vmatprep.subr.bf16.mxu1 %v11104_v3 }
0x1966   : > { %v8079_v53 = vmul.f32 0.0078125, %v8059_v45  ;;  %v8110_v7 = vmul.f32 %v16265_v15, %v16265_v15  ;;  %10701 = vmatpush3.bf16.msra.mxu1 %v11104_v3 }
0x1967   : > { %10726 = vmatprep.subr.bf16.mxu1 %v16309_v33 }
0x1968   : > { %v16273_v14 = vsub.f32 %v16149_v20, %v8079_v53  ;;  %8136 = vadd.xlane.f32.xlu0 %v8110_v7 }
0x196a   : > { %v8111_v60 = vmul.f32 %v16273_v14, %v16273_v14 }
0x196c   : > { %8138 = vadd.xlane.f32.xlu1 %v8111_v60 }
0x1973   : > { %v8061_v20 = vpop.xlane.xlu0 %8060 }
0x1974   : > { %v8080_v50 = vmul.f32 0.0078125, %v8061_v20 }
0x1976   : > { %v16287_v51 = vsub.f32 %v16154_v12, %v8080_v50 }
0x1977   : > { %v8063_v44 = vpop.xlane.xlu1 %8062 }
0x1978   : > { %v8081_v62 = vmul.f32 0.0078125, %v8063_v44  ;;  %v8112_v9 = vmul.f32 %v16287_v51, %v16287_v51 }
0x197a   : > { %v16292_v11 = vsub.f32 %v16159_v19, %v8081_v62  ;;  %8140 = vadd.xlane.f32.xlu0 %v8112_v9 }
0x197b   : > { %v8065_v54 = vpop.xlane.xlu0 %8064 }
0x197c   : > { %v8082_v52 = vmul.f32 0.0078125, %v8065_v54  ;;  %v8113_v58 = vmul.f32 %v16292_v11, %v16292_v11 }
0x197e   : > { %v16297_v32 = vsub.f32 %v16164_v34, %v8082_v52  ;;  %8142 = vadd.xlane.f32.xlu1 %v8113_v58 }
0x197f   : > { %v8067_v12 = vpop.xlane.xlu1 %8066 }
0x1980   : > { %v8083_v30 = vmul.f32 0.0078125, %v8067_v12  ;;  %v8114_v2 = vmul.f32 %v16297_v32, %v16297_v32 }
0x1982   : > { %v16302_v37 = vsub.f32 %v16169_v36, %v8083_v30  ;;  %8144 = vadd.xlane.f32.xlu0 %v8114_v2  ;;  %v11106_v30 = vld [vmem:[%s16470_s6 + $0xb0] sm:$0xff]  }
0x1984   : > { %v8115_v19 = vmul.f32 %v16302_v37, %v16302_v37 }
0x1986   : > { %8146 = vadd.xlane.f32.xlu1 %v8115_v19 }
0x19b7   : > { %v8117_v34 = vpop.xlane.xlu0 %8116 }
0x19b8   : > { %v8148_v4 = vmul.f32 0.0078125, %v8117_v34 }
0x19ba   : > { %v8164_v57 = vadd.f32 1e-05, %v8148_v4 }
0x19bb   : > { %v8119_v49 = vpop.xlane.xlu1 %8118 }
0x19bc   : > { %11733 = vrsqrt.f32 %v8164_v57  ;;  %v8149_v8 = vmul.f32 0.0078125, %v8119_v49 }
0x19be   : > { %v8165_v36 = vadd.f32 1e-05, %v8149_v8 }
0x19bf   : > { %v8121_v27 = vpop.xlane.xlu0 %8120 }
0x19c0   : > { %11735 = vrsqrt.f32 %v8165_v36  ;;  %v8150_v24 = vmul.f32 0.0078125, %v8121_v27 }
0x19c2   : > { %v8166_v16 = vadd.f32 1e-05, %v8150_v24 }
0x19c3   : > { %v8123_v40 = vpop.xlane.xlu1 %8122 }
0x19c4   : > { %11737 = vrsqrt.f32 %v8166_v16  ;;  %v8151_v22 = vmul.f32 0.0078125, %v8123_v40  ;;  %v11109_v16 = vld [vmem:[%s16470_s6 + $0x98] sm:$0xff]  }
0x19c6   : > { %v8167_v59 = vadd.f32 1e-05, %v8151_v22 }
0x19c7   : > { %v8125_v31 = vpop.xlane.xlu0 %8124 }
0x19c8   : > { %11739 = vrsqrt.f32 %v8167_v59  ;;  %v8152_v23 = vmul.f32 0.0078125, %v8125_v31 }
0x19c9   : > { %v11734_v13 = vpop.eup %11733 }
0x19ca   : > { %v8168_v46 = vadd.f32 1e-05, %v8152_v23  ;;  %v8196_v38 = vmul.f32 %v11734_v13, %v16173_v42 }
0x19cb   : > { %v8127_v25 = vpop.xlane.xlu1 %8126 }
0x19cc   : > { %11741 = vrsqrt.f32 %v8168_v46  ;;  %v8153_v10 = vmul.f32 0.0078125, %v8127_v25  ;;  %v8216_v6 = vmul.f32 %v16313_v35, %v8196_v38  ;;  %v11114_v46 = vld [vmem:[%s16470_s6 + $0xf0] sm:$0xff]  }
0x19cd   : > { %v11736_v43 = vpop.eup %11735 }
0x19ce   : > { %v8169_v56 = vadd.f32 1e-05, %v8153_v10  ;;  %v8197_v28 = vmul.f32 %v11736_v43, %v16178_v39  ;;  %v8236_v53 = vadd.f32 %v16317_v0, %v8216_v6  ;;  %v11111_v43 = vld [vmem:[%s16470_s6 + $0x88] sm:$0xff]  }
0x19cf   : > { %v8129_v17 = vpop.xlane.xlu0 %8128 }
0x19d0   : > { %11743 = vrsqrt.f32 %v8169_v56  ;;  %v8154_v5 = vmul.f32 0.0078125, %v8129_v17  ;;  %v8217_v18 = vmul.f32 %v16313_v35, %v8197_v28  ;;  %v11115_v56 = vld [vmem:[%s16470_s6 + $0xe8] sm:$0xff]  }
0x19d1   : > { %v11738_v55 = vpop.eup %11737 }
0x19d2   : > { %v8198_v42 = vmul.f32 %v11738_v55, %v16183_v41  ;;  %v8170_v45 = vadd.f32 1e-05, %v8154_v5  ;;  %v8237_v7 = vadd.f32 %v16317_v0, %v8217_v18  ;;  %v11116_v5 = vld [vmem:[%s16470_s6 + $0xe0] sm:$0xff]  }
0x19d3   : > { %v8131_v3 = vpop.xlane.xlu1 %8130 }
0x19d4   : > { %11745 = vrsqrt.f32 %v8170_v45  ;;  %v8155_v39 = vmul.f32 0.0078125, %v8131_v3  ;;  %v8253_v60 = vpack.c.bf16 %v8237_v7, %v8236_v53  ;;  %v8218_v50 = vmul.f32 %v16313_v35, %v8198_v42  ;;  %v11117_v45 = vld [vmem:[%s16470_s6 + $0xd8] sm:$0xff]   ;;  %v11118_v3 = vld [vmem:[%s16470_s6 + $0xd0] sm:$0xff]  }
0x19d5   : > { %v11740_v20 = vpop.eup %11739 }
0x19d6   : > { %v8199_v44 = vmul.f32 %v11740_v20, %v16188_v63  ;;  %v8171_v62 = vadd.f32 1e-05, %v8155_v39  ;;  %10682 = vmatprep.mubr.bf16.mxu0 %v8253_v60  ;;  %v8238_v54 = vadd.f32 %v16317_v0, %v8218_v50  ;;  %v11119_v50 = vld [vmem:[%s16470_s6 + $0xc8] sm:$0xff]  }
0x19d8   : > { %v8219_v9 = vmul.f32 %v16313_v35, %v8199_v44  ;;  %11747 = vrsqrt.f32 %v8171_v62 }
0x19d9   : > { %v11742_v41 = vpop.eup %11741 }
0x19da   : > { %v8239_v52 = vadd.f32 %v16317_v0, %v8219_v9  ;;  %v8200_v58 = vmul.f32 %v11742_v41, %v16193_v47  ;;  %v11107_v47 = vld [vmem:[%s16470_s6 + $0xa8] sm:$0xff]  }
0x19dc   : > { %v8254_v12 = vpack.c.bf16 %v8239_v52, %v8238_v54  ;;  %v8220_v19 = vmul.f32 %v16313_v35, %v8200_v58 }
0x19dd   : > { %v11744_v2 = vpop.eup %11743 }
0x19de   : > { %10683 = vmatmul.mubr.bf16.vlgmr.msra.gmra.mxu0 %v8254_v12  ;;  %v8201_v63 = vmul.f32 %v11744_v2, %v16201_v26  ;;  %v8240_v49 = vadd.f32 %v16317_v0, %v8220_v19 }
0x19df   : > { %10707 = vmatpush3.bf16.msra.mxu0 %v16283_v48  ;;  %v11108_v48 = vld [vmem:[%s16470_s6 + $0xa0] sm:$0xff]  }
0x19e0   : > { %v8221_v34 = vmul.f32 %v16313_v35, %v8201_v63  ;;  %10708 = vmatprep.subr.bf16.mxu0 %v11106_v30 }
0x19e1   : > { %v11746_v4 = vpop.eup %11745 }
0x19e2   : > { %v8202_v57 = vmul.f32 %v11746_v4, %v16209_v21  ;;  %v8241_v8 = vadd.f32 %v16317_v0, %v8221_v34 }
0x19e3   : > { %10709 = vmatpush3.bf16.msra.mxu0 %v11106_v30 }
0x19e4   : > { %v8376_v26 = vpack.c.bf16 %v8241_v8, %v8240_v49  ;;  %10710 = vmatprep.subr.bf16.mxu0 %v11107_v47  ;;  %v8222_v27 = vmul.f32 %v16313_v35, %v8202_v57 }
0x19e5   : > { %v11748_v36 = vpop.eup %11747 }
0x19e6   : > { %v8203_v24 = vmul.f32 %v11748_v36, %v16217_v1  ;;  %10702 = vmatprep.mubr.bf16.mxu1 %v8376_v26  ;;  %v8242_v59 = vadd.f32 %v16317_v0, %v8222_v27  ;;  %v11110_v1 = vld [vmem:[%s16470_s6 + $0x90] sm:$0xff]  }
0x19e7   : > { %10711 = vmatpush3.bf16.msra.mxu0 %v11107_v47 }
0x19e8   : > { %v8223_v21 = vmul.f32 %v16313_v35, %v8203_v24  ;;  %10712 = vmatprep.subr.bf16.mxu0 %v11108_v48 }
0x19e9   : > { %v8133_v40 = vpop.xlane.xlu0 %8132 }
0x19ea   : > { %v8156_v22 = vmul.f32 0.0078125, %v8133_v40  ;;  %v8243_v31 = vadd.f32 %v16317_v0, %v8223_v21 }
0x19eb   : > { %10713 = vmatpush3.bf16.msra.mxu0 %v11108_v48 }
0x19ec   : > { %v8172_v23 = vadd.f32 1e-05, %v8156_v22  ;;  %v8377_v13 = vpack.c.bf16 %v8243_v31, %v8242_v59  ;;  %10714 = vmatprep.subr.bf16.mxu0 %v11109_v16 }
0x19ed   : > { %v8135_v38 = vpop.xlane.xlu1 %8134 }
0x19ee   : > { %11749 = vrsqrt.f32 %v8172_v23  ;;  %v8157_v25 = vmul.f32 0.0078125, %v8135_v38  ;;  %10703 = vmatmul.mubr.bf16.vlgmr.msra.gmra.mxu1 %v8377_v13 }
0x19ef   : > { %10715 = vmatpush3.bf16.msra.mxu0 %v11109_v16  ;;  %10727 = vmatpush3.bf16.msra.mxu1 %v16309_v33  ;;  %v11113_v33 = vld [vmem:[%s16470_s6 + $0x80] sm:$0xff]  }
0x19f0   : > { %v8173_v10 = vadd.f32 1e-05, %v8157_v25  ;;  %10716 = vmatprep.subr.bf16.mxu0 %v11110_v1  ;;  %10728 = vmatprep.subr.bf16.mxu1 %v11114_v46 }
0x19f1   : > { %v8137_v28 = vpop.xlane.xlu0 %8136 }
0x19f2   : > { %11751 = vrsqrt.f32 %v8173_v10  ;;  %v8158_v6 = vmul.f32 0.0078125, %v8137_v28  ;;  %v11122_v28 = vld [vmem:[#allocation11 + $0x10] sm:$0xff]  }
0x19f3   : > { %10717 = vmatpush3.bf16.msra.mxu0 %v11110_v1  ;;  %10729 = vmatpush3.bf16.msra.mxu1 %v11114_v46 }
0x19f4   : > { %v8174_v17 = vadd.f32 1e-05, %v8158_v6  ;;  %10718 = vmatprep.subr.bf16.mxu0 %v11111_v43  ;;  %10730 = vmatprep.subr.bf16.mxu1 %v11115_v56  ;;  %v11123_v6 = vld [vmem:[#allocation11 + $0x8] sm:$0xff]  }
0x19f5   : > { %v8139_v18 = vpop.xlane.xlu1 %8138 }
0x19f6   : > { %11753 = vrsqrt.f32 %v8174_v17  ;;  %v8159_v55 = vmul.f32 0.0078125, %v8139_v18 }
0x19f7   : > { %10719 = vmatpush3.bf16.msra.mxu0 %v11111_v43  ;;  %10731 = vmatpush3.bf16.msra.mxu1 %v11115_v56 }
0x19f8   : > { %v8175_v42 = vadd.f32 1e-05, %v8159_v55  ;;  %10720 = vmatprep.subr.bf16.mxu0 %v11113_v33  ;;  %10732 = vmatprep.subr.bf16.mxu1 %v11116_v5 }
0x19fa   : > { %11755 = vrsqrt.f32 %v8175_v42 }
0x19fb   : > { %v11750_v53 = vpop.eup %11749  ;;  %10721 = vmatpush3.bf16.msra.mxu0 %v11113_v33  ;;  %10733 = vmatpush3.bf16.msra.mxu1 %v11116_v5 }
0x19fc   : > { %v8204_v7 = vmul.f32 %v11750_v53, %v16249_v29  ;;  %10734 = vmatprep.subr.bf16.mxu1 %v11117_v45  ;;  %v9301_v53 = vld [vmem:[%s16472_s8] ss:$0 sm:$0xff] }
0x19fe   : > { %v8224_v20 = vmul.f32 %v16313_v35, %v8204_v7 }
0x19ff   : > { %v11752_v39 = vpop.eup %11751  ;;  %10735 = vmatpush3.bf16.msra.mxu1 %v11117_v45 }
0x1a00   : > { %v8205_v60 = vmul.f32 %v11752_v39, %v16257_v61  ;;  %10736 = vmatprep.subr.bf16.mxu1 %v11118_v3  ;;  %v8244_v54 = vadd.f32 %v16317_v0, %v8224_v20  ;;  %v11120_v61 = vld [vmem:[%s16470_s6 + $0xc0] sm:$0xff]  }
0x1a02   : > { %v8225_v44 = vmul.f32 %v16313_v35, %v8205_v60 }
0x1a03   : > { %v11754_v62 = vpop.eup %11753  ;;  %v8141_v29 = vpop.xlane.xlu0 %8140  ;;  %10737 = vmatpush3.bf16.msra.mxu1 %v11118_v3 }
0x1a04   : > { %v8206_v9 = vmul.f32 %v11754_v62, %v16265_v15  ;;  %v8160_v41 = vmul.f32 0.0078125, %v8141_v29  ;;  %v8245_v52 = vadd.f32 %v16317_v0, %v8225_v44  ;;  %10738 = vmatprep.subr.bf16.mxu1 %v11119_v50 }
0x1a06   : > { %v8176_v58 = vadd.f32 1e-05, %v8160_v41  ;;  %v8496_v12 = vpack.c.bf16 %v8245_v52, %v8244_v54  ;;  %v8226_v15 = vmul.f32 %v16313_v35, %v8206_v9 }
0x1a07   : > { %v11756_v30 = vpop.eup %11755  ;;  %v8143_v2 = vpop.xlane.xlu1 %8142  ;;  %10739 = vmatpush3.bf16.msra.mxu1 %v11119_v50 }
0x1a08   : > { %v8207_v63 = vmul.f32 %v11756_v30, %v16273_v14  ;;  %11757 = vrsqrt.f32 %v8176_v58  ;;  %v8161_v19 = vmul.f32 0.0078125, %v8143_v2  ;;  %10722 = vmatprep.mubr.bf16.mxu0 %v8496_v12  ;;  %10740 = vmatprep.subr.bf16.mxu1 %v11120_v61  ;;  %v8246_v49 = vadd.f32 %v16317_v0, %v8226_v15 }
0x1a0a   : > { %v8177_v34 = vadd.f32 1e-05, %v8161_v19  ;;  %v8227_v47 = vmul.f32 %v16313_v35, %v8207_v63 }
0x1a0b   : > { %v8145_v4 = vpop.xlane.xlu0 %8144  ;;  %10741 = vmatpush3.bf16.msra.mxu1 %v11120_v61 }
0x1a0c   : > { %11759 = vrsqrt.f32 %v8177_v34  ;;  %v8162_v57 = vmul.f32 0.0078125, %v8145_v4  ;;  %v8247_v8 = vadd.f32 %v16317_v0, %v8227_v47 }
0x1a0e   : > { %v8178_v26 = vadd.f32 1e-05, %v8162_v57  ;;  %v8497_v48 = vpack.c.bf16 %v8247_v8, %v8246_v49 }
0x1a0f   : > { %v8147_v14 = vpop.xlane.xlu1 %8146 }
0x1a10   : > { %11761 = vrsqrt.f32 %v8178_v26  ;;  %v8163_v36 = vmul.f32 0.0078125, %v8147_v14  ;;  %10723 = vmatmul.mubr.bf16.vlgmr.msra.gmra.mxu0 %v8497_v48  ;;  %v9374_v14 = vld [vmem:[%s16472_s8 + $0x1] ss:$0 sm:$0xff] }
0x1a12   : > { %v8179_v27 = vadd.f32 1e-05, %v8163_v36 }
0x1a14   : > { %11763 = vrsqrt.f32 %v8179_v27 }
0x1a15   : > { %v11758_v24 = vpop.eup %11757 }
0x1a16   : > { %v8208_v21 = vmul.f32 %v11758_v24, %v16287_v51 }
0x1a18   : > { %v8228_v22 = vmul.f32 %v16313_v35, %v8208_v21 }
0x1a19   : > { %v11760_v16 = vpop.eup %11759 }
0x1a1a   : > { %v8209_v40 = vmul.f32 %v11760_v16, %v16292_v11  ;;  %v8248_v13 = vadd.f32 %v16317_v0, %v8228_v22 }
0x1a1c   : > { %v8229_v59 = vmul.f32 %v16313_v35, %v8209_v40 }
0x1a1d   : > { %v11762_v31 = vpop.eup %11761 }
0x1a1e   : > { %v8210_v23 = vmul.f32 %v11762_v31, %v16297_v32  ;;  %v8249_v1 = vadd.f32 %v16317_v0, %v8229_v59  ;;  %v11121_v32 = vld [vmem:[#allocation11 + $0x18] sm:$0xff]  }
0x1a1f   : > { %10746 = vmatprep.subr.bf16.mxu0 %v11121_v32 }
0x1a20   : > { %v8616_v46 = vpack.c.bf16 %v8249_v1, %v8248_v13  ;;  %v8230_v51 = vmul.f32 %v16313_v35, %v8210_v23  ;;  %10747 = vmatpush3.bf16.msra.mxu0 %v11121_v32 }
0x1a21   : > { %v11764_v38 = vpop.eup %11763  ;;  %10748 = vmatprep.subr.bf16.mxu0 %v11122_v28 }
0x1a22   : > { %v8211_v25 = vmul.f32 %v11764_v38, %v16302_v37  ;;  %10742 = vmatprep.mubr.bf16.mxu1 %v8616_v46  ;;  %v8250_v10 = vadd.f32 %v16317_v0, %v8230_v51  ;;  %v11124_v37 = vld [vmem:[#allocation11] sm:$0xff]  }
0x1a24   : > { %v8231_v11 = vmul.f32 %v16313_v35, %v8211_v25  ;;  %10749 = vmatpush3.bf16.msra.mxu0 %v11122_v28 }
0x1a25   : > { %10750 = vmatprep.subr.bf16.mxu0 %v11123_v6 }
0x1a26   : > { %v8251_v43 = vadd.f32 %v16317_v0, %v8231_v11 }
0x1a28   : > { %v8617_v56 = vpack.c.bf16 %v8251_v43, %v8250_v10  ;;  %10751 = vmatpush3.bf16.msra.mxu0 %v11123_v6 }
0x1a29   : > { %10752 = vmatprep.subr.bf16.mxu0 %v11124_v37 }
0x1a2a   : > { %10743 = vmatmul.mubr.bf16.vlgmr.msra.gmra.mxu1 %v8617_v56 }
0x1a2c   : > { %10753 = vmatpush3.bf16.msra.mxu0 %v11124_v37 }
0x1a9e   : > { %v10684_v17 = vpop.f32.mrf.mxu0 }
0x1a9f   : > { %v8374_v20 = vadd.f32 %v10684_v17, %v9301_v53 }
0x1aa0   : > { %v8353_v35 = vpop.f32.mrf.mxu0 }
0x1aa1   : > { %v8372_v39 = vadd.f32 %v9301_v53, %v8353_v35 }
0x1aa2   : > { %v10685_v33 = vpop.f32.mrf.mxu0 }
0x1aa3   : > { %v8375_v60 = vadd.f32 %v10685_v33, %v9301_v53 }
0x1aa4   : > { %v8356_v18 = vpop.f32.mrf.mxu0 }
0x1aa5   : > { %v8373_v44 = vadd.f32 %v9301_v53, %v8356_v18 }
0x1aae   : > { %v10704_v5 = vpop.f32.mrf.mxu1 }
0x1aaf   : > { %v8494_v9 = vadd.f32 %v10704_v5, %v8374_v20 }
0x1ab0   : > { %v8477_v0 = vpop.f32.mrf.mxu1 }
0x1ab1   : > { %v8492_v62 = vadd.f32 %v8477_v0, %v8372_v39 }
0x1ab2   : > { %v10705_v42 = vpop.f32.mrf.mxu1 }
0x1ab3   : > { %v8495_v29 = vadd.f32 %v10705_v42, %v8375_v60 }
0x1ab4   : > { %v8480_v7 = vpop.f32.mrf.mxu1 }
0x1ab5   : > { %v8493_v52 = vadd.f32 %v8480_v7, %v8373_v44 }
0x1ad0   : > { %v10724_v55 = vpop.f32.mrf.mxu0 }
0x1ad1   : > { %v8614_v12 = vadd.f32 %v10724_v55, %v8494_v9 }
0x1ad2   : > { %v8597_v45 = vpop.f32.mrf.mxu0 }
0x1ad3   : > { %v8612_v61 = vadd.f32 %v8597_v45, %v8492_v62 }
0x1ad4   : > { %v10725_v3 = vpop.f32.mrf.mxu0 }
0x1ad5   : > { %v8615_v58 = vadd.f32 %v10725_v3, %v8495_v29 }
0x1ad6   : > { %v8600_v41 = vpop.f32.mrf.mxu0 }
0x1ad7   : > { %v8613_v2 = vadd.f32 %v8600_v41, %v8493_v52 }
0x1aea   : > { %v10744_v50 = vpop.f32.mrf.mxu1 }
0x1aeb   : > { %v8734_v15 = vadd.f32 %v10744_v50, %v8614_v12 }
0x1aec   : > { %v8717_v54 = vpop.f32.mrf.mxu1 }
0x1aed   : > { %v8732_v63 = vadd.f32 %v8717_v54, %v8612_v61  ;;  %v8738_v8 = vmax.f32 %v8734_v15, 0.0 }
0x1aee   : > { %v10745_v30 = vpop.f32.mrf.mxu1 }
0x1aef   : > { %v8735_v19 = vadd.f32 %v10745_v30, %v8615_v58  ;;  %v8736_v57 = vmax.f32 %v8732_v63, 0.0 }
0x1af0   : > { %v8720_v34 = vpop.f32.mrf.mxu1 }
0x1af1   : > { %v8733_v47 = vadd.f32 %v8720_v34, %v8613_v2  ;;  %v8739_v4 = vmax.f32 %v8735_v19, 0.0 }
0x1af3   : > { %v8737_v49 = vmax.f32 %v8733_v47, 0.0  ;;  %v8741_v48 = vpack.c.bf16 %v8739_v4, %v8738_v8 }
0x1af5   : > { %v8740_v26 = vpack.c.bf16 %v8737_v49, %v8736_v57 }
0x1af7   : > { %10754 = vmatprep.mubr.msk.bf16.mxu0 %vm8779_vm7, %v8740_v26 }
0x1af8   : > { %10755 = vmatmul.mubr.msk.bf16.vlgmr.msra.gmra.mxu0 %vm8779_vm7, %v8741_v48 }
0x1bb8   : > { %v10756_v36 = vpop.f32.mrf.mxu0 }
0x1bb9   : > { %v8829_v27 = vadd.f32 %v10756_v36, %v9374_v14 }
0x1bba   : > { %v8820_v24 = vpop.f32.mrf.mxu0 }
0x1bbb   : > { %8837 = vst [vmem:[%s421_s14 + $0x10] sm:$0xff] %v8829_v27  ;;  %v8821_v21 = vadd.f32 %v9374_v14, %v8820_v24 }
0x1bbc   : > { %v10757_v16 = vpop.f32.mrf.mxu0 }
0x1bbd   : > { %8835 = vst [vmem:[%s421_s14] sm:$0xff] %v8821_v21  ;;  %v8832_v40 = vadd.f32 %v10757_v16, %v9374_v14 }
0x1bbe   : > { %v8823_v22 = vpop.f32.mrf.mxu0 }
0x1bbf   : > { %8838 = vst [vmem:[%s421_s14 + $0x18] sm:$0xff] %v8832_v40  ;;  %v8824_v59 = vadd.f32 %v9374_v14, %v8823_v22 }
0x1bc1   : > { %8836 = vst [vmem:[%s421_s14 + $0x8] sm:$0xff] %v8824_v59 }
0x1bc2   : > { %11953 = shalt.err (!%p11950_p5)
}
0x1bc3   : > { %s11954_s18 = scalar_lea.hbm %s16421_s19, 512  ;;  %s11958_s20 = scalar_lea.hbm %s16473_s9, 1024 }
0x1bc4   : > { %p11955_p6 = scmp.ne.s32.totalorder %s16421_s19, %s11954_s18  ;;  %p11959_p4 = scmp.lt.s32.totalorder %s16421_s19, %s16473_s9 }
0x1bc5   : > { %p11960_p7 = scmp.lt.s32.totalorder %s11958_s20, %s11954_s18 }
0x1bc6   : > { %p11956_p10 = pnand %p11955_p6, %p17011_p2 }
0x1bc7   : > { %p11961_p13 = por %p11960_p7, %p11959_p4 }
0x1bc8   : > { %p11957_p11 = pneg %p11956_p10 }
0x1bca   : > { %p11962_p0 = pnand %p11961_p13, %p11957_p11 }
0x1bcc   : > { %11965 = shalt.err (!%p11962_p0)
}
0x1bcd   : > { %s12033_s16 = smov 128   ;;  %s12034_s27 = smov 8  }
0x1bce   : > { %10844 = dma.vmem_to_hbm [thread:$0]  (%p17011_p2), %s16416_s28, 512, %s16421_s19, %s8840_s21, %s12033_s16, %s12033_s16, %s12034_s27  }
0x1bcf PF: > { %s8868_s2 = sand.u32 1, %s12004_s30   ;;  %p17012_p8 = scmp.ne.s32.totalorder %s16624_s29, 0 }
0x1bd0   : > { %p17013_p9 = scmp.ge.s32.totalorder %s12016_s12, 2  ;;  %s8869_s15 = scalar_lea.sflag [#allocation4], %s8868_s2 }
0x1bd2   : > { %p10867_p12 = pnand %p17013_p9, %p17012_p8 }
0x1bd4   : > { %p10868_p3 = pneg %p10867_p12 }
0x1bd6   : > { %11999 = dma.done.wait (%p10868_p3), %s8869_s15, 512  }
0x1bd7   : > { %12001 = vsyncadd (%p10868_p3), %s8869_s15, 4294966784  ;;  %p25_p1 = scmp.ge.s32.totalorder %s12193_s22, 4   ;;  %s17014_s30 = smov %s12008_s10 }
0x1bd8   : > { %s17015_s10 = smov %s12012_s11  ;;  %s17016_s11 = smov %s12205_s13 }
0x1bd9   : > { %s17017_s12 = smov %s12193_s22  ;;  %27 = sbr.rel (!%p25_p1) target bundleno = 12 (0xc), region = 131 }
0x1bde   :  { %8874 = vsyncpa [#allocation3], 1 }
0x1bdf   :  { %8876 = vsyncpa [#allocation3 + $0x1], 1 }
0x1be0   :  { %8877 = vsyncpa [#allocation6], 1 }
0x1be1   :  { %8878 = vsyncpa [#allocation9], 1 }
0x1be2   :  { %8879 = vsyncpa [#allocation12], 1 }
0x1be3   :  { %8880 = vsyncpa [#allocation4], 1 }
0x1be4   :  { %8882 = vsyncpa [#allocation4 + $0x1], 1 }

</bundles_post_ra>
